<compile_context>
chip_gen: v7x
topology: tpu7x:2x2x1
jax: 0.10.0
libtpu: 0.0.40
codegen_flags: <defaults>
</compile_context>

<pallas_src>
import functools
import numpy as np
import jax
import jax.numpy as jnp
from jax.experimental import pallas as pl
from jax.experimental.pallas import tpu as pltpu

# ----------------------------- static shape constants -----------------------------
H_IN = W_IN = 16
C_IN, C1, C2 = 3, 32, 64
C_IN_PAD = 8                                   # pad input channels 3 -> 8 (tile-aligned)
K = 3
SEG = H_IN * W_IN                              # 256 flat positions per image
HID, OUT = 64, 3
NPOOL2 = 4
FLAT = C2 * NPOOL2                             # 256 (stands in for 8198656)

TB = 128                                       # images per grid step (multiple of 128)

# conv1 output region actually consumed downstream: 12x12 (y1, x1 in 0..11), stored
# densely with column-group index m = y1*12 + x1.
N1_W = 12
N1 = N1_W * N1_W                               # 144 conv1 positions kept
# pool1 (2x2 stride 2) done "in place" over the 12-wide grid: elementwise max of 4
# offset slices; valid outputs live at m = 2i*12 + 2j for i, j in 0..5.
PL1_OFF = (0, 1, N1_W, N1_W + 1)
# conv2 tap offsets in 12-wide pool1 coordinates (one pool1 step = 2 conv1 positions)
OFF2_12 = tuple(2 * N1_W * ky + 2 * kx for ky in range(K) for kx in range(K))


def _q12(t, p):
    """12-wide coord of the conv2 output needed by pool2 output p, pool2 tap t."""
    ti, tj = divmod(t, 2)
    pi, pj = divmod(p, 2)
    return (2 * (2 * pi + ti)) * N1_W + 2 * (2 * pj + tj)


# conv2 base positions gathered for cols2; column-group order g = t*4 + p
Q12 = tuple(_q12(t, p) for t in range(4) for p in range(4))

# pool1 slab width needed by the compacted conv2 gather
P1 = max(q + o for q in Q12 for o in OFF2_12) + 1          # 131

# static bound checks (re-derived for the compacted layout)
assert P1 - 1 + max(PL1_OFF) < N1                           # pool1 reads inside acc1
assert (N1_W - 1 + K - 1) * W_IN + (K - 1) + (N1_W - 1) < SEG  # conv1 reads inside image


# ----------------------------------- kernel ---------------------------------------
def cnn_kernel(x_ref, w1_ref, w2_ref, g1_ref, fb1_ref, w3_ref, fb3_ref, out_ref,
               *, pool_bf16):
    x = x_ref[0]                                             # (8, 256*TB) f32

    # ---- conv1: trimmed fused im2col (9 taps x 12 rows of aligned slices), 1 matmul
    tap_blocks = []
    for ky in range(K):
        for kx in range(K):
            rows = [x[:, ((y1 + ky) * W_IN + kx) * TB:
                         ((y1 + ky) * W_IN + kx + N1_W) * TB]
                    for y1 in range(N1_W)]
            tap_blocks.append(jnp.concatenate(rows, axis=1))        # (8, 144*TB)
    cols1 = jnp.concatenate(tap_blocks, axis=0).astype(jnp.bfloat16)  # (72, 144*TB)
    acc1 = jnp.dot(w1_ref[...], cols1,
                   preferred_element_type=jnp.float32)       # (32, 144*TB), no bias

    # ---- pool1: 2x2 max = elementwise max of 4 TB-aligned slices (bias folded away)
    if pool_bf16:                                            # v6e / v7x: bf16 VALU
        acc1 = acc1.astype(jnp.bfloat16)
    t1 = jnp.maximum(
        jnp.maximum(acc1[:, PL1_OFF[0] * TB:(PL1_OFF[0] + P1) * TB],
                    acc1[:, PL1_OFF[1] * TB:(PL1_OFF[1] + P1) * TB]),
        jnp.maximum(acc1[:, PL1_OFF[2] * TB:(PL1_OFF[2] + P1) * TB],
                    acc1[:, PL1_OFF[3] * TB:(PL1_OFF[3] + P1) * TB]))
    if not pool_bf16:                                        # v5e and older: pool in f32
        t1 = t1.astype(jnp.bfloat16)                         # (32, 131*TB)

    # ---- conv2: COMPACTED fused im2col (only the 16 positions pool2 consumes)
    #      column groups ordered g = pool2_tap*4 + pool2_output
    cols2 = jnp.concatenate(
        [jnp.concatenate([t1[:, (q + o) * TB:(q + o + 1) * TB] for q in Q12], axis=1)
         for o in OFF2_12], axis=0)                          # (288, 16*TB)
    acc2 = jnp.dot(w2_ref[...], cols2,
                   preferred_element_type=jnp.float32)       # (64, 16*TB), no bias

    # ---- pool2: max over the 4 contiguous tap groups -> (64, 4*TB)
    if pool_bf16:
        acc2 = acc2.astype(jnp.bfloat16)
    t2 = jnp.maximum(
        jnp.maximum(acc2[:, 0 * 4 * TB:1 * 4 * TB], acc2[:, 1 * 4 * TB:2 * 4 * TB]),
        jnp.maximum(acc2[:, 2 * 4 * TB:3 * 4 * TB], acc2[:, 3 * 4 * TB:4 * 4 * TB]))
    if not pool_bf16:
        t2 = t2.astype(jnp.bfloat16)                         # (64, 4*TB)

    # ---- fc1 (+ folded conv biases) + relu
    p2 = jnp.concatenate([t2[:, p * TB:(p + 1) * TB] for p in range(NPOOL2)], axis=0)
    hidden = jnp.dot(g1_ref[...], p2,
                     preferred_element_type=jnp.float32) + fb1_ref[...]   # (64, TB)
    hidden = jnp.maximum(hidden, 0.0).astype(jnp.bfloat16)

    # ---- fc3, lane-dense store of the whole (3, TB) block
    out_ref[...] = jnp.dot(w3_ref[...], hidden,
                           preferred_element_type=jnp.float32) + fb3_ref[...]


# ---------------------------------- wrapper ----------------------------------------
def cnn_forward(x, params):
    """x: (N, 3, 16, 16) float32 NCHW; params in PyTorch shapes. Returns (N, 3)."""
    w1, b1, w2, b2, fw1, fb1, fw3, fb3 = params
    n = x.shape[0]
    nb = pl.cdiv(n, TB)
    n_pad = nb * TB

    # glue: batch-block + position-major layout (column index = pos*TB + b)
    x_flat = x.reshape(n, C_IN, SEG)
    x_flat = jnp.pad(x_flat, ((0, n_pad - n), (0, C_IN_PAD - C_IN), (0, 0)))
    x_blk = (x_flat.reshape(nb, TB, C_IN_PAD, SEG)
             .transpose(0, 2, 3, 1)
             .reshape(nb, C_IN_PAD, SEG * TB))

    # fused conv weights: cols1 row = tap*8 + cin (padded channels are zero),
    #                     cols2 row = tap*32 + cin
    w1p = jnp.pad(w1, ((0, 0), (0, C_IN_PAD - C_IN), (0, 0), (0, 0)))
    w1f = jnp.transpose(w1p, (0, 2, 3, 1)).reshape(C1, K * K * C_IN_PAD).astype(jnp.bfloat16)
    w2f = jnp.transpose(w2, (0, 2, 3, 1)).reshape(C2, K * K * C1).astype(jnp.bfloat16)
    # fc1 weight reordered to match p2 rows = s*C2 + c (torch flatten index = c*4 + s)
    w1g = (fw1.reshape(HID, C2, NPOOL2).transpose(0, 2, 1)
           .reshape(HID, NPOOL2 * C2).astype(jnp.bfloat16))
    w3b = fw3.astype(jnp.bfloat16)

    # bias folding (exact per-channel rewrites: max(x)+c == max(x+c), conv/fc linear):
    #   b1 -> adjusted b2; adjusted b2 -> fc1 bias.  Kernel applies no conv biases.
    b2_adj = b2 + jnp.sum(w2, axis=(2, 3)) @ b1                        # (64,)
    fb1_adj = fb1 + fw1.reshape(HID, C2, NPOOL2).sum(-1) @ b2_adj      # (64,)
    fb1c = fb1_adj.reshape(HID, 1)
    fb3c = fb3.reshape(OUT, 1)

    # bf16 pooling only on generations with bf16 VALUs (v6e/v7x+); f32 on v5e/older.
    kind = jax.devices()[0].device_kind.lower()
    pool_bf16 = not any(v in kind for v in ("v2", "v3", "v4", "v5"))
    kern = functools.partial(cnn_kernel, pool_bf16=pool_bf16)

    out = pl.pallas_call(
        kern,
        out_shape=jax.ShapeDtypeStruct((OUT, n_pad), jnp.float32),
        grid=(nb,),
        in_specs=[
            pl.BlockSpec((1, C_IN_PAD, SEG * TB), lambda i: (i, 0, 0)),
            pl.BlockSpec((C1, K * K * C_IN_PAD), lambda i: (0, 0)),
            pl.BlockSpec((C2, K * K * C1), lambda i: (0, 0)),
            pl.BlockSpec((HID, NPOOL2 * C2), lambda i: (0, 0)),
            pl.BlockSpec((HID, 1), lambda i: (0, 0)),
            pl.BlockSpec((OUT, HID), lambda i: (0, 0)),
            pl.BlockSpec((OUT, 1), lambda i: (0, 0)),
        ],
        out_specs=pl.BlockSpec((OUT, TB), lambda i: (0, i)),
        compiler_params=pltpu.CompilerParams(
            dimension_semantics=("parallel",),
            vmem_limit_bytes=32 * 1024 * 1024),
    )(x_blk, w1f, w2f, w1g, fb1c, w3b, fb3c)
    return out[:, :n].T


# ------------------------------ reference & params ---------------------------------
def ref_forward(x, params):
    w1, b1, w2, b2, fw1, fb1, fw3, fb3 = params
    dn = ("NCHW", "OIHW", "NCHW")
    prec = jax.lax.Precision.HIGHEST
    y = jax.lax.conv_general_dilated(x, w1, (1, 1), "VALID",
                                     dimension_numbers=dn, precision=prec)
    y = y + b1.reshape(1, C1, 1, 1)
    y = jax.lax.reduce_window(y, -jnp.inf, jax.lax.max, (1, 1, 2, 2), (1, 1, 2, 2), "VALID")
    y = jax.lax.conv_general_dilated(y, w2, (1, 1), "VALID",
                                     dimension_numbers=dn, precision=prec)
    y = y + b2.reshape(1, C2, 1, 1)
    y = jax.lax.reduce_window(y, -jnp.inf, jax.lax.max, (1, 1, 2, 2), (1, 1, 2, 2), "VALID")
    y = y.reshape(x.shape[0], -1)
    y = jnp.maximum(jnp.dot(y, fw1.T, precision=prec) + fb1, 0.0)
    return jnp.dot(y, fw3.T, precision=prec) + fb3


def init_params(key):
    ks = jax.random.split(key, 8)

    def init(k, shape, fan_in):
        bound = 1.0 / np.sqrt(fan_in)
        return jax.random.uniform(k, shape, jnp.float32, -bound, bound)

    w1 = init(ks[0], (C1, C_IN, K, K), C_IN * K * K)
    b1 = init(ks[1], (C1,), C_IN * K * K)
    w2 = init(ks[2], (C2, C1, K, K), C1 * K * K)
    b2 = init(ks[3], (C2,), C1 * K * K)
    fw1 = init(ks[4], (HID, FLAT), FLAT)       # fc1.weight  (64, 256)
    fb1 = init(ks[5], (HID,), FLAT)
    fw3 = init(ks[6], (OUT, HID), HID)         # fc3.weight  (3, 64)
    fb3 = init(ks[7], (OUT,), HID)
    return (w1, b1, w2, b2, fw1, fb1, fw3, fb3)


if __name__ == "__main__":
    key = jax.random.PRNGKey(0)
    kx, kp = jax.random.split(key)
    x = jax.random.normal(kx, (2, C_IN, H_IN, W_IN), jnp.float32)
    params = init_params(kp)

    out = jax.jit(cnn_forward)(x, params)
    jax.block_until_ready(out)

    ref = ref_forward(x, params)
    assert out.shape == (2, OUT)
    err = float(jnp.max(jnp.abs(out - ref)))
    assert err < 5e-2, f"mismatch vs reference: max abs err = {err}"
    print("KERNEL_OK")
</pallas_src>

<mosaic_0001>
module attributes {stable_mosaic.version = 11 : i64} {
  func.func @cnn_kernel(%arg0: i32, %arg1: memref<1x8x32768xf32, #tpu.memory_space<vmem>>, %arg2: memref<32x72xbf16, #tpu.memory_space<vmem>>, %arg3: memref<64x288xbf16, #tpu.memory_space<vmem>>, %arg4: memref<64x256xbf16, #tpu.memory_space<vmem>>, %arg5: memref<64x1xf32, #tpu.memory_space<vmem>>, %arg6: memref<3x64xbf16, #tpu.memory_space<vmem>>, %arg7: memref<3x1xf32, #tpu.memory_space<vmem>>, %arg8: memref<3x128xf32, #tpu.memory_space<vmem>>) attributes {dimension_semantics = [#tpu.dimension_semantics<parallel>], iteration_bounds = array<i64: 1>, scalar_prefetch = 0 : i64, scratch_operands = 0 : i64, tpu.core_type = #tpu.core_type<tc>, window_params = [{transform_indices = @transform_0, window_bounds = array<i64: 1, 8, 32768>}, {pipeline_mode = #tpu.pipeline_mode<synchronous>, transform_indices = @transform_1, window_bounds = array<i64: 32, 72>}, {pipeline_mode = #tpu.pipeline_mode<synchronous>, transform_indices = @transform_2, window_bounds = array<i64: 64, 288>}, {pipeline_mode = #tpu.pipeline_mode<synchronous>, transform_indices = @transform_3, window_bounds = array<i64: 64, 256>}, {pipeline_mode = #tpu.pipeline_mode<synchronous>, transform_indices = @transform_4, window_bounds = array<i64: 64, 1>}, {pipeline_mode = #tpu.pipeline_mode<synchronous>, transform_indices = @transform_5, window_bounds = array<i64: 3, 64>}, {pipeline_mode = #tpu.pipeline_mode<synchronous>, transform_indices = @transform_6, window_bounds = array<i64: 3, 1>}, {transform_indices = @transform_7, window_bounds = array<i64: 3, 128>}]} {
    %c0 = arith.constant 0 : index
    %c0_0 = arith.constant 0 : index
    %c0_1 = arith.constant 0 : index
    %0 = vector.load %arg1[%c0, %c0_0, %c0_1] : memref<1x8x32768xf32, #tpu.memory_space<vmem>>, vector<1x8x32768xf32>
    %1 = vector.shape_cast %0 : vector<1x8x32768xf32> to vector<8x32768xf32>
    %2 = vector.extract_strided_slice %1 {offsets = [0, 0], sizes = [8, 1536], strides = [1, 1]} : vector<8x32768xf32> to vector<8x1536xf32>
    %3 = vector.extract_strided_slice %1 {offsets = [0, 2048], sizes = [8, 1536], strides = [1, 1]} : vector<8x32768xf32> to vector<8x1536xf32>
    %4 = vector.extract_strided_slice %1 {offsets = [0, 4096], sizes = [8, 1536], strides = [1, 1]} : vector<8x32768xf32> to vector<8x1536xf32>
    %5 = vector.extract_strided_slice %1 {offsets = [0, 6144], sizes = [8, 1536], strides = [1, 1]} : vector<8x32768xf32> to vector<8x1536xf32>
    %6 = vector.extract_strided_slice %1 {offsets = [0, 8192], sizes = [8, 1536], strides = [1, 1]} : vector<8x32768xf32> to vector<8x1536xf32>
    %7 = vector.extract_strided_slice %1 {offsets = [0, 10240], sizes = [8, 1536], strides = [1, 1]} : vector<8x32768xf32> to vector<8x1536xf32>
    %8 = vector.extract_strided_slice %1 {offsets = [0, 12288], sizes = [8, 1536], strides = [1, 1]} : vector<8x32768xf32> to vector<8x1536xf32>
    %9 = vector.extract_strided_slice %1 {offsets = [0, 14336], sizes = [8, 1536], strides = [1, 1]} : vector<8x32768xf32> to vector<8x1536xf32>
    %10 = vector.extract_strided_slice %1 {offsets = [0, 16384], sizes = [8, 1536], strides = [1, 1]} : vector<8x32768xf32> to vector<8x1536xf32>
    %11 = vector.extract_strided_slice %1 {offsets = [0, 18432], sizes = [8, 1536], strides = [1, 1]} : vector<8x32768xf32> to vector<8x1536xf32>
    %12 = vector.extract_strided_slice %1 {offsets = [0, 20480], sizes = [8, 1536], strides = [1, 1]} : vector<8x32768xf32> to vector<8x1536xf32>
    %13 = vector.extract_strided_slice %1 {offsets = [0, 22528], sizes = [8, 1536], strides = [1, 1]} : vector<8x32768xf32> to vector<8x1536xf32>
    %14 = tpu.concatenate %2, %3, %4, %5, %6, %7, %8, %9, %10, %11, %12, %13 in 1 : vector<8x1536xf32>, vector<8x1536xf32>, vector<8x1536xf32>, vector<8x1536xf32>, vector<8x1536xf32>, vector<8x1536xf32>, vector<8x1536xf32>, vector<8x1536xf32>, vector<8x1536xf32>, vector<8x1536xf32>, vector<8x1536xf32>, vector<8x1536xf32> -> vector<8x18432xf32>
    %15 = vector.extract_strided_slice %1 {offsets = [0, 128], sizes = [8, 1536], strides = [1, 1]} : vector<8x32768xf32> to vector<8x1536xf32>
    %16 = vector.extract_strided_slice %1 {offsets = [0, 2176], sizes = [8, 1536], strides = [1, 1]} : vector<8x32768xf32> to vector<8x1536xf32>
    %17 = vector.extract_strided_slice %1 {offsets = [0, 4224], sizes = [8, 1536], strides = [1, 1]} : vector<8x32768xf32> to vector<8x1536xf32>
    %18 = vector.extract_strided_slice %1 {offsets = [0, 6272], sizes = [8, 1536], strides = [1, 1]} : vector<8x32768xf32> to vector<8x1536xf32>
    %19 = vector.extract_strided_slice %1 {offsets = [0, 8320], sizes = [8, 1536], strides = [1, 1]} : vector<8x32768xf32> to vector<8x1536xf32>
    %20 = vector.extract_strided_slice %1 {offsets = [0, 10368], sizes = [8, 1536], strides = [1, 1]} : vector<8x32768xf32> to vector<8x1536xf32>
    %21 = vector.extract_strided_slice %1 {offsets = [0, 12416], sizes = [8, 1536], strides = [1, 1]} : vector<8x32768xf32> to vector<8x1536xf32>
    %22 = vector.extract_strided_slice %1 {offsets = [0, 14464], sizes = [8, 1536], strides = [1, 1]} : vector<8x32768xf32> to vector<8x1536xf32>
    %23 = vector.extract_strided_slice %1 {offsets = [0, 16512], sizes = [8, 1536], strides = [1, 1]} : vector<8x32768xf32> to vector<8x1536xf32>
    %24 = vector.extract_strided_slice %1 {offsets = [0, 18560], sizes = [8, 1536], strides = [1, 1]} : vector<8x32768xf32> to vector<8x1536xf32>
    %25 = vector.extract_strided_slice %1 {offsets = [0, 20608], sizes = [8, 1536], strides = [1, 1]} : vector<8x32768xf32> to vector<8x1536xf32>
    %26 = vector.extract_strided_slice %1 {offsets = [0, 22656], sizes = [8, 1536], strides = [1, 1]} : vector<8x32768xf32> to vector<8x1536xf32>
    %27 = tpu.concatenate %15, %16, %17, %18, %19, %20, %21, %22, %23, %24, %25, %26 in 1 : vector<8x1536xf32>, vector<8x1536xf32>, vector<8x1536xf32>, vector<8x1536xf32>, vector<8x1536xf32>, vector<8x1536xf32>, vector<8x1536xf32>, vector<8x1536xf32>, vector<8x1536xf32>, vector<8x1536xf32>, vector<8x1536xf32>, vector<8x1536xf32> -> vector<8x18432xf32>
    %28 = vector.extract_strided_slice %1 {offsets = [0, 256], sizes = [8, 1536], strides = [1, 1]} : vector<8x32768xf32> to vector<8x1536xf32>
    %29 = vector.extract_strided_slice %1 {offsets = [0, 2304], sizes = [8, 1536], strides = [1, 1]} : vector<8x32768xf32> to vector<8x1536xf32>
    %30 = vector.extract_strided_slice %1 {offsets = [0, 4352], sizes = [8, 1536], strides = [1, 1]} : vector<8x32768xf32> to vector<8x1536xf32>
    %31 = vector.extract_strided_slice %1 {offsets = [0, 6400], sizes = [8, 1536], strides = [1, 1]} : vector<8x32768xf32> to vector<8x1536xf32>
    %32 = vector.extract_strided_slice %1 {offsets = [0, 8448], sizes = [8, 1536], strides = [1, 1]} : vector<8x32768xf32> to vector<8x1536xf32>
    %33 = vector.extract_strided_slice %1 {offsets = [0, 10496], sizes = [8, 1536], strides = [1, 1]} : vector<8x32768xf32> to vector<8x1536xf32>
    %34 = vector.extract_strided_slice %1 {offsets = [0, 12544], sizes = [8, 1536], strides = [1, 1]} : vector<8x32768xf32> to vector<8x1536xf32>
    %35 = vector.extract_strided_slice %1 {offsets = [0, 14592], sizes = [8, 1536], strides = [1, 1]} : vector<8x32768xf32> to vector<8x1536xf32>
    %36 = vector.extract_strided_slice %1 {offsets = [0, 16640], sizes = [8, 1536], strides = [1, 1]} : vector<8x32768xf32> to vector<8x1536xf32>
    %37 = vector.extract_strided_slice %1 {offsets = [0, 18688], sizes = [8, 1536], strides = [1, 1]} : vector<8x32768xf32> to vector<8x1536xf32>
    %38 = vector.extract_strided_slice %1 {offsets = [0, 20736], sizes = [8, 1536], strides = [1, 1]} : vector<8x32768xf32> to vector<8x1536xf32>
    %39 = vector.extract_strided_slice %1 {offsets = [0, 22784], sizes = [8, 1536], strides = [1, 1]} : vector<8x32768xf32> to vector<8x1536xf32>
    %40 = tpu.concatenate %28, %29, %30, %31, %32, %33, %34, %35, %36, %37, %38, %39 in 1 : vector<8x1536xf32>, vector<8x1536xf32>, vector<8x1536xf32>, vector<8x1536xf32>, vector<8x1536xf32>, vector<8x1536xf32>, vector<8x1536xf32>, vector<8x1536xf32>, vector<8x1536xf32>, vector<8x1536xf32>, vector<8x1536xf32>, vector<8x1536xf32> -> vector<8x18432xf32>
    %41 = vector.extract_strided_slice %1 {offsets = [0, 2048], sizes = [8, 1536], strides = [1, 1]} : vector<8x32768xf32> to vector<8x1536xf32>
    %42 = vector.extract_strided_slice %1 {offsets = [0, 4096], sizes = [8, 1536], strides = [1, 1]} : vector<8x32768xf32> to vector<8x1536xf32>
    %43 = vector.extract_strided_slice %1 {offsets = [0, 6144], sizes = [8, 1536], strides = [1, 1]} : vector<8x32768xf32> to vector<8x1536xf32>
    %44 = vector.extract_strided_slice %1 {offsets = [0, 8192], sizes = [8, 1536], strides = [1, 1]} : vector<8x32768xf32> to vector<8x1536xf32>
    %45 = vector.extract_strided_slice %1 {offsets = [0, 10240], sizes = [8, 1536], strides = [1, 1]} : vector<8x32768xf32> to vector<8x1536xf32>
    %46 = vector.extract_strided_slice %1 {offsets = [0, 12288], sizes = [8, 1536], strides = [1, 1]} : vector<8x32768xf32> to vector<8x1536xf32>
    %47 = vector.extract_strided_slice %1 {offsets = [0, 14336], sizes = [8, 1536], strides = [1, 1]} : vector<8x32768xf32> to vector<8x1536xf32>
    %48 = vector.extract_strided_slice %1 {offsets = [0, 16384], sizes = [8, 1536], strides = [1, 1]} : vector<8x32768xf32> to vector<8x1536xf32>
    %49 = vector.extract_strided_slice %1 {offsets = [0, 18432], sizes = [8, 1536], strides = [1, 1]} : vector<8x32768xf32> to vector<8x1536xf32>
    %50 = vector.extract_strided_slice %1 {offsets = [0, 20480], sizes = [8, 1536], strides = [1, 1]} : vector<8x32768xf32> to vector<8x1536xf32>
    %51 = vector.extract_strided_slice %1 {offsets = [0, 22528], sizes = [8, 1536], strides = [1, 1]} : vector<8x32768xf32> to vector<8x1536xf32>
    %52 = vector.extract_strided_slice %1 {offsets = [0, 24576], sizes = [8, 1536], strides = [1, 1]} : vector<8x32768xf32> to vector<8x1536xf32>
    %53 = tpu.concatenate %41, %42, %43, %44, %45, %46, %47, %48, %49, %50, %51, %52 in 1 : vector<8x1536xf32>, vector<8x1536xf32>, vector<8x1536xf32>, vector<8x1536xf32>, vector<8x1536xf32>, vector<8x1536xf32>, vector<8x1536xf32>, vector<8x1536xf32>, vector<8x1536xf32>, vector<8x1536xf32>, vector<8x1536xf32>, vector<8x1536xf32> -> vector<8x18432xf32>
    %54 = vector.extract_strided_slice %1 {offsets = [0, 2176], sizes = [8, 1536], strides = [1, 1]} : vector<8x32768xf32> to vector<8x1536xf32>
    %55 = vector.extract_strided_slice %1 {offsets = [0, 4224], sizes = [8, 1536], strides = [1, 1]} : vector<8x32768xf32> to vector<8x1536xf32>
    %56 = vector.extract_strided_slice %1 {offsets = [0, 6272], sizes = [8, 1536], strides = [1, 1]} : vector<8x32768xf32> to vector<8x1536xf32>
    %57 = vector.extract_strided_slice %1 {offsets = [0, 8320], sizes = [8, 1536], strides = [1, 1]} : vector<8x32768xf32> to vector<8x1536xf32>
    %58 = vector.extract_strided_slice %1 {offsets = [0, 10368], sizes = [8, 1536], strides = [1, 1]} : vector<8x32768xf32> to vector<8x1536xf32>
    %59 = vector.extract_strided_slice %1 {offsets = [0, 12416], sizes = [8, 1536], strides = [1, 1]} : vector<8x32768xf32> to vector<8x1536xf32>
    %60 = vector.extract_strided_slice %1 {offsets = [0, 14464], sizes = [8, 1536], strides = [1, 1]} : vector<8x32768xf32> to vector<8x1536xf32>
    %61 = vector.extract_strided_slice %1 {offsets = [0, 16512], sizes = [8, 1536], strides = [1, 1]} : vector<8x32768xf32> to vector<8x1536xf32>
    %62 = vector.extract_strided_slice %1 {offsets = [0, 18560], sizes = [8, 1536], strides = [1, 1]} : vector<8x32768xf32> to vector<8x1536xf32>
    %63 = vector.extract_strided_slice %1 {offsets = [0, 20608], sizes = [8, 1536], strides = [1, 1]} : vector<8x32768xf32> to vector<8x1536xf32>
    %64 = vector.extract_strided_slice %1 {offsets = [0, 22656], sizes = [8, 1536], strides = [1, 1]} : vector<8x32768xf32> to vector<8x1536xf32>
    %65 = vector.extract_strided_slice %1 {offsets = [0, 24704], sizes = [8, 1536], strides = [1, 1]} : vector<8x32768xf32> to vector<8x1536xf32>
    %66 = tpu.concatenate %54, %55, %56, %57, %58, %59, %60, %61, %62, %63, %64, %65 in 1 : vector<8x1536xf32>, vector<8x1536xf32>, vector<8x1536xf32>, vector<8x1536xf32>, vector<8x1536xf32>, vector<8x1536xf32>, vector<8x1536xf32>, vector<8x1536xf32>, vector<8x1536xf32>, vector<8x1536xf32>, vector<8x1536xf32>, vector<8x1536xf32> -> vector<8x18432xf32>
    %67 = vector.extract_strided_slice %1 {offsets = [0, 2304], sizes = [8, 1536], strides = [1, 1]} : vector<8x32768xf32> to vector<8x1536xf32>
    %68 = vector.extract_strided_slice %1 {offsets = [0, 4352], sizes = [8, 1536], strides = [1, 1]} : vector<8x32768xf32> to vector<8x1536xf32>
    %69 = vector.extract_strided_slice %1 {offsets = [0, 6400], sizes = [8, 1536], strides = [1, 1]} : vector<8x32768xf32> to vector<8x1536xf32>
    %70 = vector.extract_strided_slice %1 {offsets = [0, 8448], sizes = [8, 1536], strides = [1, 1]} : vector<8x32768xf32> to vector<8x1536xf32>
    %71 = vector.extract_strided_slice %1 {offsets = [0, 10496], sizes = [8, 1536], strides = [1, 1]} : vector<8x32768xf32> to vector<8x1536xf32>
    %72 = vector.extract_strided_slice %1 {offsets = [0, 12544], sizes = [8, 1536], strides = [1, 1]} : vector<8x32768xf32> to vector<8x1536xf32>
    %73 = vector.extract_strided_slice %1 {offsets = [0, 14592], sizes = [8, 1536], strides = [1, 1]} : vector<8x32768xf32> to vector<8x1536xf32>
    %74 = vector.extract_strided_slice %1 {offsets = [0, 16640], sizes = [8, 1536], strides = [1, 1]} : vector<8x32768xf32> to vector<8x1536xf32>
    %75 = vector.extract_strided_slice %1 {offsets = [0, 18688], sizes = [8, 1536], strides = [1, 1]} : vector<8x32768xf32> to vector<8x1536xf32>
    %76 = vector.extract_strided_slice %1 {offsets = [0, 20736], sizes = [8, 1536], strides = [1, 1]} : vector<8x32768xf32> to vector<8x1536xf32>
    %77 = vector.extract_strided_slice %1 {offsets = [0, 22784], sizes = [8, 1536], strides = [1, 1]} : vector<8x32768xf32> to vector<8x1536xf32>
    %78 = vector.extract_strided_slice %1 {offsets = [0, 24832], sizes = [8, 1536], strides = [1, 1]} : vector<8x32768xf32> to vector<8x1536xf32>
    %79 = tpu.concatenate %67, %68, %69, %70, %71, %72, %73, %74, %75, %76, %77, %78 in 1 : vector<8x1536xf32>, vector<8x1536xf32>, vector<8x1536xf32>, vector<8x1536xf32>, vector<8x1536xf32>, vector<8x1536xf32>, vector<8x1536xf32>, vector<8x1536xf32>, vector<8x1536xf32>, vector<8x1536xf32>, vector<8x1536xf32>, vector<8x1536xf32> -> vector<8x18432xf32>
    %80 = vector.extract_strided_slice %1 {offsets = [0, 4096], sizes = [8, 1536], strides = [1, 1]} : vector<8x32768xf32> to vector<8x1536xf32>
    %81 = vector.extract_strided_slice %1 {offsets = [0, 6144], sizes = [8, 1536], strides = [1, 1]} : vector<8x32768xf32> to vector<8x1536xf32>
    %82 = vector.extract_strided_slice %1 {offsets = [0, 8192], sizes = [8, 1536], strides = [1, 1]} : vector<8x32768xf32> to vector<8x1536xf32>
    %83 = vector.extract_strided_slice %1 {offsets = [0, 10240], sizes = [8, 1536], strides = [1, 1]} : vector<8x32768xf32> to vector<8x1536xf32>
    %84 = vector.extract_strided_slice %1 {offsets = [0, 12288], sizes = [8, 1536], strides = [1, 1]} : vector<8x32768xf32> to vector<8x1536xf32>
    %85 = vector.extract_strided_slice %1 {offsets = [0, 14336], sizes = [8, 1536], strides = [1, 1]} : vector<8x32768xf32> to vector<8x1536xf32>
    %86 = vector.extract_strided_slice %1 {offsets = [0, 16384], sizes = [8, 1536], strides = [1, 1]} : vector<8x32768xf32> to vector<8x1536xf32>
    %87 = vector.extract_strided_slice %1 {offsets = [0, 18432], sizes = [8, 1536], strides = [1, 1]} : vector<8x32768xf32> to vector<8x1536xf32>
    %88 = vector.extract_strided_slice %1 {offsets = [0, 20480], sizes = [8, 1536], strides = [1, 1]} : vector<8x32768xf32> to vector<8x1536xf32>
    %89 = vector.extract_strided_slice %1 {offsets = [0, 22528], sizes = [8, 1536], strides = [1, 1]} : vector<8x32768xf32> to vector<8x1536xf32>
    %90 = vector.extract_strided_slice %1 {offsets = [0, 24576], sizes = [8, 1536], strides = [1, 1]} : vector<8x32768xf32> to vector<8x1536xf32>
    %91 = vector.extract_strided_slice %1 {offsets = [0, 26624], sizes = [8, 1536], strides = [1, 1]} : vector<8x32768xf32> to vector<8x1536xf32>
    %92 = tpu.concatenate %80, %81, %82, %83, %84, %85, %86, %87, %88, %89, %90, %91 in 1 : vector<8x1536xf32>, vector<8x1536xf32>, vector<8x1536xf32>, vector<8x1536xf32>, vector<8x1536xf32>, vector<8x1536xf32>, vector<8x1536xf32>, vector<8x1536xf32>, vector<8x1536xf32>, vector<8x1536xf32>, vector<8x1536xf32>, vector<8x1536xf32> -> vector<8x18432xf32>
    %93 = vector.extract_strided_slice %1 {offsets = [0, 4224], sizes = [8, 1536], strides = [1, 1]} : vector<8x32768xf32> to vector<8x1536xf32>
    %94 = vector.extract_strided_slice %1 {offsets = [0, 6272], sizes = [8, 1536], strides = [1, 1]} : vector<8x32768xf32> to vector<8x1536xf32>
    %95 = vector.extract_strided_slice %1 {offsets = [0, 8320], sizes = [8, 1536], strides = [1, 1]} : vector<8x32768xf32> to vector<8x1536xf32>
    %96 = vector.extract_strided_slice %1 {offsets = [0, 10368], sizes = [8, 1536], strides = [1, 1]} : vector<8x32768xf32> to vector<8x1536xf32>
    %97 = vector.extract_strided_slice %1 {offsets = [0, 12416], sizes = [8, 1536], strides = [1, 1]} : vector<8x32768xf32> to vector<8x1536xf32>
    %98 = vector.extract_strided_slice %1 {offsets = [0, 14464], sizes = [8, 1536], strides = [1, 1]} : vector<8x32768xf32> to vector<8x1536xf32>
    %99 = vector.extract_strided_slice %1 {offsets = [0, 16512], sizes = [8, 1536], strides = [1, 1]} : vector<8x32768xf32> to vector<8x1536xf32>
    %100 = vector.extract_strided_slice %1 {offsets = [0, 18560], sizes = [8, 1536], strides = [1, 1]} : vector<8x32768xf32> to vector<8x1536xf32>
    %101 = vector.extract_strided_slice %1 {offsets = [0, 20608], sizes = [8, 1536], strides = [1, 1]} : vector<8x32768xf32> to vector<8x1536xf32>
    %102 = vector.extract_strided_slice %1 {offsets = [0, 22656], sizes = [8, 1536], strides = [1, 1]} : vector<8x32768xf32> to vector<8x1536xf32>
    %103 = vector.extract_strided_slice %1 {offsets = [0, 24704], sizes = [8, 1536], strides = [1, 1]} : vector<8x32768xf32> to vector<8x1536xf32>
    %104 = vector.extract_strided_slice %1 {offsets = [0, 26752], sizes = [8, 1536], strides = [1, 1]} : vector<8x32768xf32> to vector<8x1536xf32>
    %105 = tpu.concatenate %93, %94, %95, %96, %97, %98, %99, %100, %101, %102, %103, %104 in 1 : vector<8x1536xf32>, vector<8x1536xf32>, vector<8x1536xf32>, vector<8x1536xf32>, vector<8x1536xf32>, vector<8x1536xf32>, vector<8x1536xf32>, vector<8x1536xf32>, vector<8x1536xf32>, vector<8x1536xf32>, vector<8x1536xf32>, vector<8x1536xf32> -> vector<8x18432xf32>
    %106 = vector.extract_strided_slice %1 {offsets = [0, 4352], sizes = [8, 1536], strides = [1, 1]} : vector<8x32768xf32> to vector<8x1536xf32>
    %107 = vector.extract_strided_slice %1 {offsets = [0, 6400], sizes = [8, 1536], strides = [1, 1]} : vector<8x32768xf32> to vector<8x1536xf32>
    %108 = vector.extract_strided_slice %1 {offsets = [0, 8448], sizes = [8, 1536], strides = [1, 1]} : vector<8x32768xf32> to vector<8x1536xf32>
    %109 = vector.extract_strided_slice %1 {offsets = [0, 10496], sizes = [8, 1536], strides = [1, 1]} : vector<8x32768xf32> to vector<8x1536xf32>
    %110 = vector.extract_strided_slice %1 {offsets = [0, 12544], sizes = [8, 1536], strides = [1, 1]} : vector<8x32768xf32> to vector<8x1536xf32>
    %111 = vector.extract_strided_slice %1 {offsets = [0, 14592], sizes = [8, 1536], strides = [1, 1]} : vector<8x32768xf32> to vector<8x1536xf32>
    %112 = vector.extract_strided_slice %1 {offsets = [0, 16640], sizes = [8, 1536], strides = [1, 1]} : vector<8x32768xf32> to vector<8x1536xf32>
    %113 = vector.extract_strided_slice %1 {offsets = [0, 18688], sizes = [8, 1536], strides = [1, 1]} : vector<8x32768xf32> to vector<8x1536xf32>
    %114 = vector.extract_strided_slice %1 {offsets = [0, 20736], sizes = [8, 1536], strides = [1, 1]} : vector<8x32768xf32> to vector<8x1536xf32>
    %115 = vector.extract_strided_slice %1 {offsets = [0, 22784], sizes = [8, 1536], strides = [1, 1]} : vector<8x32768xf32> to vector<8x1536xf32>
    %116 = vector.extract_strided_slice %1 {offsets = [0, 24832], sizes = [8, 1536], strides = [1, 1]} : vector<8x32768xf32> to vector<8x1536xf32>
    %117 = vector.extract_strided_slice %1 {offsets = [0, 26880], sizes = [8, 1536], strides = [1, 1]} : vector<8x32768xf32> to vector<8x1536xf32>
    %118 = tpu.concatenate %106, %107, %108, %109, %110, %111, %112, %113, %114, %115, %116, %117 in 1 : vector<8x1536xf32>, vector<8x1536xf32>, vector<8x1536xf32>, vector<8x1536xf32>, vector<8x1536xf32>, vector<8x1536xf32>, vector<8x1536xf32>, vector<8x1536xf32>, vector<8x1536xf32>, vector<8x1536xf32>, vector<8x1536xf32>, vector<8x1536xf32> -> vector<8x18432xf32>
    %119 = tpu.concatenate %14, %27, %40, %53, %66, %79, %92, %105, %118 in 0 : vector<8x18432xf32>, vector<8x18432xf32>, vector<8x18432xf32>, vector<8x18432xf32>, vector<8x18432xf32>, vector<8x18432xf32>, vector<8x18432xf32>, vector<8x18432xf32>, vector<8x18432xf32> -> vector<72x18432xf32>
    %120 = arith.truncf %119 : vector<72x18432xf32> to vector<72x18432xbf16>
    %c0_2 = arith.constant 0 : index
    %c0_3 = arith.constant 0 : index
    %121 = vector.load %arg2[%c0_2, %c0_3] : memref<32x72xbf16, #tpu.memory_space<vmem>>, vector<32x72xbf16>
    %cst = arith.constant dense<0.000000e+00> : vector<32x18432xf32>
    %122 = tpu.matmul %121, %120, %cst {dimension_numbers = #tpu.dot_dimension_numbers<[1], [0], [0], [1], [0, 0, 1, 1], [], []>} : vector<32x72xbf16>, vector<72x18432xbf16>, vector<32x18432xf32> -> vector<32x18432xf32>
    %123 = arith.truncf %122 : vector<32x18432xf32> to vector<32x18432xbf16>
    %124 = vector.extract_strided_slice %123 {offsets = [0, 0], sizes = [32, 16768], strides = [1, 1]} : vector<32x18432xbf16> to vector<32x16768xbf16>
    %125 = vector.extract_strided_slice %123 {offsets = [0, 128], sizes = [32, 16768], strides = [1, 1]} : vector<32x18432xbf16> to vector<32x16768xbf16>
    %126 = arith.maximumf %124, %125 : vector<32x16768xbf16>
    %127 = vector.extract_strided_slice %123 {offsets = [0, 1536], sizes = [32, 16768], strides = [1, 1]} : vector<32x18432xbf16> to vector<32x16768xbf16>
    %128 = vector.extract_strided_slice %123 {offsets = [0, 1664], sizes = [32, 16768], strides = [1, 1]} : vector<32x18432xbf16> to vector<32x16768xbf16>
    %129 = arith.maximumf %127, %128 : vector<32x16768xbf16>
    %130 = arith.maximumf %126, %129 : vector<32x16768xbf16>
    %131 = vector.extract_strided_slice %130 {offsets = [0, 0], sizes = [32, 128], strides = [1, 1]} : vector<32x16768xbf16> to vector<32x128xbf16>
    %132 = vector.extract_strided_slice %130 {offsets = [0, 512], sizes = [32, 128], strides = [1, 1]} : vector<32x16768xbf16> to vector<32x128xbf16>
    %133 = vector.extract_strided_slice %130 {offsets = [0, 6144], sizes = [32, 128], strides = [1, 1]} : vector<32x16768xbf16> to vector<32x128xbf16>
    %134 = vector.extract_strided_slice %130 {offsets = [0, 6656], sizes = [32, 128], strides = [1, 1]} : vector<32x16768xbf16> to vector<32x128xbf16>
    %135 = vector.extract_strided_slice %130 {offsets = [0, 256], sizes = [32, 128], strides = [1, 1]} : vector<32x16768xbf16> to vector<32x128xbf16>
    %136 = vector.extract_strided_slice %130 {offsets = [0, 768], sizes = [32, 128], strides = [1, 1]} : vector<32x16768xbf16> to vector<32x128xbf16>
    %137 = vector.extract_strided_slice %130 {offsets = [0, 6400], sizes = [32, 128], strides = [1, 1]} : vector<32x16768xbf16> to vector<32x128xbf16>
    %138 = vector.extract_strided_slice %130 {offsets = [0, 6912], sizes = [32, 128], strides = [1, 1]} : vector<32x16768xbf16> to vector<32x128xbf16>
    %139 = vector.extract_strided_slice %130 {offsets = [0, 3072], sizes = [32, 128], strides = [1, 1]} : vector<32x16768xbf16> to vector<32x128xbf16>
    %140 = vector.extract_strided_slice %130 {offsets = [0, 3584], sizes = [32, 128], strides = [1, 1]} : vector<32x16768xbf16> to vector<32x128xbf16>
    %141 = vector.extract_strided_slice %130 {offsets = [0, 9216], sizes = [32, 128], strides = [1, 1]} : vector<32x16768xbf16> to vector<32x128xbf16>
    %142 = vector.extract_strided_slice %130 {offsets = [0, 9728], sizes = [32, 128], strides = [1, 1]} : vector<32x16768xbf16> to vector<32x128xbf16>
    %143 = vector.extract_strided_slice %130 {offsets = [0, 3328], sizes = [32, 128], strides = [1, 1]} : vector<32x16768xbf16> to vector<32x128xbf16>
    %144 = vector.extract_strided_slice %130 {offsets = [0, 3840], sizes = [32, 128], strides = [1, 1]} : vector<32x16768xbf16> to vector<32x128xbf16>
    %145 = vector.extract_strided_slice %130 {offsets = [0, 9472], sizes = [32, 128], strides = [1, 1]} : vector<32x16768xbf16> to vector<32x128xbf16>
    %146 = vector.extract_strided_slice %130 {offsets = [0, 9984], sizes = [32, 128], strides = [1, 1]} : vector<32x16768xbf16> to vector<32x128xbf16>
    %147 = tpu.concatenate %131, %132, %133, %134, %135, %136, %137, %138, %139, %140, %141, %142, %143, %144, %145, %146 in 1 : vector<32x128xbf16>, vector<32x128xbf16>, vector<32x128xbf16>, vector<32x128xbf16>, vector<32x128xbf16>, vector<32x128xbf16>, vector<32x128xbf16>, vector<32x128xbf16>, vector<32x128xbf16>, vector<32x128xbf16>, vector<32x128xbf16>, vector<32x128xbf16>, vector<32x128xbf16>, vector<32x128xbf16>, vector<32x128xbf16>, vector<32x128xbf16> -> vector<32x2048xbf16>
    %148 = vector.extract_strided_slice %130 {offsets = [0, 256], sizes = [32, 128], strides = [1, 1]} : vector<32x16768xbf16> to vector<32x128xbf16>
    %149 = vector.extract_strided_slice %130 {offsets = [0, 768], sizes = [32, 128], strides = [1, 1]} : vector<32x16768xbf16> to vector<32x128xbf16>
    %150 = vector.extract_strided_slice %130 {offsets = [0, 6400], sizes = [32, 128], strides = [1, 1]} : vector<32x16768xbf16> to vector<32x128xbf16>
    %151 = vector.extract_strided_slice %130 {offsets = [0, 6912], sizes = [32, 128], strides = [1, 1]} : vector<32x16768xbf16> to vector<32x128xbf16>
    %152 = vector.extract_strided_slice %130 {offsets = [0, 512], sizes = [32, 128], strides = [1, 1]} : vector<32x16768xbf16> to vector<32x128xbf16>
    %153 = vector.extract_strided_slice %130 {offsets = [0, 1024], sizes = [32, 128], strides = [1, 1]} : vector<32x16768xbf16> to vector<32x128xbf16>
    %154 = vector.extract_strided_slice %130 {offsets = [0, 6656], sizes = [32, 128], strides = [1, 1]} : vector<32x16768xbf16> to vector<32x128xbf16>
    %155 = vector.extract_strided_slice %130 {offsets = [0, 7168], sizes = [32, 128], strides = [1, 1]} : vector<32x16768xbf16> to vector<32x128xbf16>
    %156 = vector.extract_strided_slice %130 {offsets = [0, 3328], sizes = [32, 128], strides = [1, 1]} : vector<32x16768xbf16> to vector<32x128xbf16>
    %157 = vector.extract_strided_slice %130 {offsets = [0, 3840], sizes = [32, 128], strides = [1, 1]} : vector<32x16768xbf16> to vector<32x128xbf16>
    %158 = vector.extract_strided_slice %130 {offsets = [0, 9472], sizes = [32, 128], strides = [1, 1]} : vector<32x16768xbf16> to vector<32x128xbf16>
    %159 = vector.extract_strided_slice %130 {offsets = [0, 9984], sizes = [32, 128], strides = [1, 1]} : vector<32x16768xbf16> to vector<32x128xbf16>
    %160 = vector.extract_strided_slice %130 {offsets = [0, 3584], sizes = [32, 128], strides = [1, 1]} : vector<32x16768xbf16> to vector<32x128xbf16>
    %161 = vector.extract_strided_slice %130 {offsets = [0, 4096], sizes = [32, 128], strides = [1, 1]} : vector<32x16768xbf16> to vector<32x128xbf16>
    %162 = vector.extract_strided_slice %130 {offsets = [0, 9728], sizes = [32, 128], strides = [1, 1]} : vector<32x16768xbf16> to vector<32x128xbf16>
    %163 = vector.extract_strided_slice %130 {offsets = [0, 10240], sizes = [32, 128], strides = [1, 1]} : vector<32x16768xbf16> to vector<32x128xbf16>
    %164 = tpu.concatenate %148, %149, %150, %151, %152, %153, %154, %155, %156, %157, %158, %159, %160, %161, %162, %163 in 1 : vector<32x128xbf16>, vector<32x128xbf16>, vector<32x128xbf16>, vector<32x128xbf16>, vector<32x128xbf16>, vector<32x128xbf16>, vector<32x128xbf16>, vector<32x128xbf16>, vector<32x128xbf16>, vector<32x128xbf16>, vector<32x128xbf16>, vector<32x128xbf16>, vector<32x128xbf16>, vector<32x128xbf16>, vector<32x128xbf16>, vector<32x128xbf16> -> vector<32x2048xbf16>
    %165 = vector.extract_strided_slice %130 {offsets = [0, 512], sizes = [32, 128], strides = [1, 1]} : vector<32x16768xbf16> to vector<32x128xbf16>
    %166 = vector.extract_strided_slice %130 {offsets = [0, 1024], sizes = [32, 128], strides = [1, 1]} : vector<32x16768xbf16> to vector<32x128xbf16>
    %167 = vector.extract_strided_slice %130 {offsets = [0, 6656], sizes = [32, 128], strides = [1, 1]} : vector<32x16768xbf16> to vector<32x128xbf16>
    %168 = vector.extract_strided_slice %130 {offsets = [0, 7168], sizes = [32, 128], strides = [1, 1]} : vector<32x16768xbf16> to vector<32x128xbf16>
    %169 = vector.extract_strided_slice %130 {offsets = [0, 768], sizes = [32, 128], strides = [1, 1]} : vector<32x16768xbf16> to vector<32x128xbf16>
    %170 = vector.extract_strided_slice %130 {offsets = [0, 1280], sizes = [32, 128], strides = [1, 1]} : vector<32x16768xbf16> to vector<32x128xbf16>
    %171 = vector.extract_strided_slice %130 {offsets = [0, 6912], sizes = [32, 128], strides = [1, 1]} : vector<32x16768xbf16> to vector<32x128xbf16>
    %172 = vector.extract_strided_slice %130 {offsets = [0, 7424], sizes = [32, 128], strides = [1, 1]} : vector<32x16768xbf16> to vector<32x128xbf16>
    %173 = vector.extract_strided_slice %130 {offsets = [0, 3584], sizes = [32, 128], strides = [1, 1]} : vector<32x16768xbf16> to vector<32x128xbf16>
    %174 = vector.extract_strided_slice %130 {offsets = [0, 4096], sizes = [32, 128], strides = [1, 1]} : vector<32x16768xbf16> to vector<32x128xbf16>
    %175 = vector.extract_strided_slice %130 {offsets = [0, 9728], sizes = [32, 128], strides = [1, 1]} : vector<32x16768xbf16> to vector<32x128xbf16>
    %176 = vector.extract_strided_slice %130 {offsets = [0, 10240], sizes = [32, 128], strides = [1, 1]} : vector<32x16768xbf16> to vector<32x128xbf16>
    %177 = vector.extract_strided_slice %130 {offsets = [0, 3840], sizes = [32, 128], strides = [1, 1]} : vector<32x16768xbf16> to vector<32x128xbf16>
    %178 = vector.extract_strided_slice %130 {offsets = [0, 4352], sizes = [32, 128], strides = [1, 1]} : vector<32x16768xbf16> to vector<32x128xbf16>
    %179 = vector.extract_strided_slice %130 {offsets = [0, 9984], sizes = [32, 128], strides = [1, 1]} : vector<32x16768xbf16> to vector<32x128xbf16>
    %180 = vector.extract_strided_slice %130 {offsets = [0, 10496], sizes = [32, 128], strides = [1, 1]} : vector<32x16768xbf16> to vector<32x128xbf16>
    %181 = tpu.concatenate %165, %166, %167, %168, %169, %170, %171, %172, %173, %174, %175, %176, %177, %178, %179, %180 in 1 : vector<32x128xbf16>, vector<32x128xbf16>, vector<32x128xbf16>, vector<32x128xbf16>, vector<32x128xbf16>, vector<32x128xbf16>, vector<32x128xbf16>, vector<32x128xbf16>, vector<32x128xbf16>, vector<32x128xbf16>, vector<32x128xbf16>, vector<32x128xbf16>, vector<32x128xbf16>, vector<32x128xbf16>, vector<32x128xbf16>, vector<32x128xbf16> -> vector<32x2048xbf16>
    %182 = vector.extract_strided_slice %130 {offsets = [0, 3072], sizes = [32, 128], strides = [1, 1]} : vector<32x16768xbf16> to vector<32x128xbf16>
    %183 = vector.extract_strided_slice %130 {offsets = [0, 3584], sizes = [32, 128], strides = [1, 1]} : vector<32x16768xbf16> to vector<32x128xbf16>
    %184 = vector.extract_strided_slice %130 {offsets = [0, 9216], sizes = [32, 128], strides = [1, 1]} : vector<32x16768xbf16> to vector<32x128xbf16>
    %185 = vector.extract_strided_slice %130 {offsets = [0, 9728], sizes = [32, 128], strides = [1, 1]} : vector<32x16768xbf16> to vector<32x128xbf16>
    %186 = vector.extract_strided_slice %130 {offsets = [0, 3328], sizes = [32, 128], strides = [1, 1]} : vector<32x16768xbf16> to vector<32x128xbf16>
    %187 = vector.extract_strided_slice %130 {offsets = [0, 3840], sizes = [32, 128], strides = [1, 1]} : vector<32x16768xbf16> to vector<32x128xbf16>
    %188 = vector.extract_strided_slice %130 {offsets = [0, 9472], sizes = [32, 128], strides = [1, 1]} : vector<32x16768xbf16> to vector<32x128xbf16>
    %189 = vector.extract_strided_slice %130 {offsets = [0, 9984], sizes = [32, 128], strides = [1, 1]} : vector<32x16768xbf16> to vector<32x128xbf16>
    %190 = vector.extract_strided_slice %130 {offsets = [0, 6144], sizes = [32, 128], strides = [1, 1]} : vector<32x16768xbf16> to vector<32x128xbf16>
    %191 = vector.extract_strided_slice %130 {offsets = [0, 6656], sizes = [32, 128], strides = [1, 1]} : vector<32x16768xbf16> to vector<32x128xbf16>
    %192 = vector.extract_strided_slice %130 {offsets = [0, 12288], sizes = [32, 128], strides = [1, 1]} : vector<32x16768xbf16> to vector<32x128xbf16>
    %193 = vector.extract_strided_slice %130 {offsets = [0, 12800], sizes = [32, 128], strides = [1, 1]} : vector<32x16768xbf16> to vector<32x128xbf16>
    %194 = vector.extract_strided_slice %130 {offsets = [0, 6400], sizes = [32, 128], strides = [1, 1]} : vector<32x16768xbf16> to vector<32x128xbf16>
    %195 = vector.extract_strided_slice %130 {offsets = [0, 6912], sizes = [32, 128], strides = [1, 1]} : vector<32x16768xbf16> to vector<32x128xbf16>
    %196 = vector.extract_strided_slice %130 {offsets = [0, 12544], sizes = [32, 128], strides = [1, 1]} : vector<32x16768xbf16> to vector<32x128xbf16>
    %197 = vector.extract_strided_slice %130 {offsets = [0, 13056], sizes = [32, 128], strides = [1, 1]} : vector<32x16768xbf16> to vector<32x128xbf16>
    %198 = tpu.concatenate %182, %183, %184, %185, %186, %187, %188, %189, %190, %191, %192, %193, %194, %195, %196, %197 in 1 : vector<32x128xbf16>, vector<32x128xbf16>, vector<32x128xbf16>, vector<32x128xbf16>, vector<32x128xbf16>, vector<32x128xbf16>, vector<32x128xbf16>, vector<32x128xbf16>, vector<32x128xbf16>, vector<32x128xbf16>, vector<32x128xbf16>, vector<32x128xbf16>, vector<32x128xbf16>, vector<32x128xbf16>, vector<32x128xbf16>, vector<32x128xbf16> -> vector<32x2048xbf16>
    %199 = vector.extract_strided_slice %130 {offsets = [0, 3328], sizes = [32, 128], strides = [1, 1]} : vector<32x16768xbf16> to vector<32x128xbf16>
    %200 = vector.extract_strided_slice %130 {offsets = [0, 3840], sizes = [32, 128], strides = [1, 1]} : vector<32x16768xbf16> to vector<32x128xbf16>
    %201 = vector.extract_strided_slice %130 {offsets = [0, 9472], sizes = [32, 128], strides = [1, 1]} : vector<32x16768xbf16> to vector<32x128xbf16>
    %202 = vector.extract_strided_slice %130 {offsets = [0, 9984], sizes = [32, 128], strides = [1, 1]} : vector<32x16768xbf16> to vector<32x128xbf16>
    %203 = vector.extract_strided_slice %130 {offsets = [0, 3584], sizes = [32, 128], strides = [1, 1]} : vector<32x16768xbf16> to vector<32x128xbf16>
    %204 = vector.extract_strided_slice %130 {offsets = [0, 4096], sizes = [32, 128], strides = [1, 1]} : vector<32x16768xbf16> to vector<32x128xbf16>
    %205 = vector.extract_strided_slice %130 {offsets = [0, 9728], sizes = [32, 128], strides = [1, 1]} : vector<32x16768xbf16> to vector<32x128xbf16>
    %206 = vector.extract_strided_slice %130 {offsets = [0, 10240], sizes = [32, 128], strides = [1, 1]} : vector<32x16768xbf16> to vector<32x128xbf16>
    %207 = vector.extract_strided_slice %130 {offsets = [0, 6400], sizes = [32, 128], strides = [1, 1]} : vector<32x16768xbf16> to vector<32x128xbf16>
    %208 = vector.extract_strided_slice %130 {offsets = [0, 6912], sizes = [32, 128], strides = [1, 1]} : vector<32x16768xbf16> to vector<32x128xbf16>
    %209 = vector.extract_strided_slice %130 {offsets = [0, 12544], sizes = [32, 128], strides = [1, 1]} : vector<32x16768xbf16> to vector<32x128xbf16>
    %210 = vector.extract_strided_slice %130 {offsets = [0, 13056], sizes = [32, 128], strides = [1, 1]} : vector<32x16768xbf16> to vector<32x128xbf16>
    %211 = vector.extract_strided_slice %130 {offsets = [0, 6656], sizes = [32, 128], strides = [1, 1]} : vector<32x16768xbf16> to vector<32x128xbf16>
    %212 = vector.extract_strided_slice %130 {offsets = [0, 7168], sizes = [32, 128], strides = [1, 1]} : vector<32x16768xbf16> to vector<32x128xbf16>
    %213 = vector.extract_strided_slice %130 {offsets = [0, 12800], sizes = [32, 128], strides = [1, 1]} : vector<32x16768xbf16> to vector<32x128xbf16>
    %214 = vector.extract_strided_slice %130 {offsets = [0, 13312], sizes = [32, 128], strides = [1, 1]} : vector<32x16768xbf16> to vector<32x128xbf16>
    %215 = tpu.concatenate %199, %200, %201, %202, %203, %204, %205, %206, %207, %208, %209, %210, %211, %212, %213, %214 in 1 : vector<32x128xbf16>, vector<32x128xbf16>, vector<32x128xbf16>, vector<32x128xbf16>, vector<32x128xbf16>, vector<32x128xbf16>, vector<32x128xbf16>, vector<32x128xbf16>, vector<32x128xbf16>, vector<32x128xbf16>, vector<32x128xbf16>, vector<32x128xbf16>, vector<32x128xbf16>, vector<32x128xbf16>, vector<32x128xbf16>, vector<32x128xbf16> -> vector<32x2048xbf16>
    %216 = vector.extract_strided_slice %130 {offsets = [0, 3584], sizes = [32, 128], strides = [1, 1]} : vector<32x16768xbf16> to vector<32x128xbf16>
    %217 = vector.extract_strided_slice %130 {offsets = [0, 4096], sizes = [32, 128], strides = [1, 1]} : vector<32x16768xbf16> to vector<32x128xbf16>
    %218 = vector.extract_strided_slice %130 {offsets = [0, 9728], sizes = [32, 128], strides = [1, 1]} : vector<32x16768xbf16> to vector<32x128xbf16>
    %219 = vector.extract_strided_slice %130 {offsets = [0, 10240], sizes = [32, 128], strides = [1, 1]} : vector<32x16768xbf16> to vector<32x128xbf16>
    %220 = vector.extract_strided_slice %130 {offsets = [0, 3840], sizes = [32, 128], strides = [1, 1]} : vector<32x16768xbf16> to vector<32x128xbf16>
    %221 = vector.extract_strided_slice %130 {offsets = [0, 4352], sizes = [32, 128], strides = [1, 1]} : vector<32x16768xbf16> to vector<32x128xbf16>
    %222 = vector.extract_strided_slice %130 {offsets = [0, 9984], sizes = [32, 128], strides = [1, 1]} : vector<32x16768xbf16> to vector<32x128xbf16>
    %223 = vector.extract_strided_slice %130 {offsets = [0, 10496], sizes = [32, 128], strides = [1, 1]} : vector<32x16768xbf16> to vector<32x128xbf16>
    %224 = vector.extract_strided_slice %130 {offsets = [0, 6656], sizes = [32, 128], strides = [1, 1]} : vector<32x16768xbf16> to vector<32x128xbf16>
    %225 = vector.extract_strided_slice %130 {offsets = [0, 7168], sizes = [32, 128], strides = [1, 1]} : vector<32x16768xbf16> to vector<32x128xbf16>
    %226 = vector.extract_strided_slice %130 {offsets = [0, 12800], sizes = [32, 128], strides = [1, 1]} : vector<32x16768xbf16> to vector<32x128xbf16>
    %227 = vector.extract_strided_slice %130 {offsets = [0, 13312], sizes = [32, 128], strides = [1, 1]} : vector<32x16768xbf16> to vector<32x128xbf16>
    %228 = vector.extract_strided_slice %130 {offsets = [0, 6912], sizes = [32, 128], strides = [1, 1]} : vector<32x16768xbf16> to vector<32x128xbf16>
    %229 = vector.extract_strided_slice %130 {offsets = [0, 7424], sizes = [32, 128], strides = [1, 1]} : vector<32x16768xbf16> to vector<32x128xbf16>
    %230 = vector.extract_strided_slice %130 {offsets = [0, 13056], sizes = [32, 128], strides = [1, 1]} : vector<32x16768xbf16> to vector<32x128xbf16>
    %231 = vector.extract_strided_slice %130 {offsets = [0, 13568], sizes = [32, 128], strides = [1, 1]} : vector<32x16768xbf16> to vector<32x128xbf16>
    %232 = tpu.concatenate %216, %217, %218, %219, %220, %221, %222, %223, %224, %225, %226, %227, %228, %229, %230, %231 in 1 : vector<32x128xbf16>, vector<32x128xbf16>, vector<32x128xbf16>, vector<32x128xbf16>, vector<32x128xbf16>, vector<32x128xbf16>, vector<32x128xbf16>, vector<32x128xbf16>, vector<32x128xbf16>, vector<32x128xbf16>, vector<32x128xbf16>, vector<32x128xbf16>, vector<32x128xbf16>, vector<32x128xbf16>, vector<32x128xbf16>, vector<32x128xbf16> -> vector<32x2048xbf16>
    %233 = vector.extract_strided_slice %130 {offsets = [0, 6144], sizes = [32, 128], strides = [1, 1]} : vector<32x16768xbf16> to vector<32x128xbf16>
    %234 = vector.extract_strided_slice %130 {offsets = [0, 6656], sizes = [32, 128], strides = [1, 1]} : vector<32x16768xbf16> to vector<32x128xbf16>
    %235 = vector.extract_strided_slice %130 {offsets = [0, 12288], sizes = [32, 128], strides = [1, 1]} : vector<32x16768xbf16> to vector<32x128xbf16>
    %236 = vector.extract_strided_slice %130 {offsets = [0, 12800], sizes = [32, 128], strides = [1, 1]} : vector<32x16768xbf16> to vector<32x128xbf16>
    %237 = vector.extract_strided_slice %130 {offsets = [0, 6400], sizes = [32, 128], strides = [1, 1]} : vector<32x16768xbf16> to vector<32x128xbf16>
    %238 = vector.extract_strided_slice %130 {offsets = [0, 6912], sizes = [32, 128], strides = [1, 1]} : vector<32x16768xbf16> to vector<32x128xbf16>
    %239 = vector.extract_strided_slice %130 {offsets = [0, 12544], sizes = [32, 128], strides = [1, 1]} : vector<32x16768xbf16> to vector<32x128xbf16>
    %240 = vector.extract_strided_slice %130 {offsets = [0, 13056], sizes = [32, 128], strides = [1, 1]} : vector<32x16768xbf16> to vector<32x128xbf16>
    %241 = vector.extract_strided_slice %130 {offsets = [0, 9216], sizes = [32, 128], strides = [1, 1]} : vector<32x16768xbf16> to vector<32x128xbf16>
    %242 = vector.extract_strided_slice %130 {offsets = [0, 9728], sizes = [32, 128], strides = [1, 1]} : vector<32x16768xbf16> to vector<32x128xbf16>
    %243 = vector.extract_strided_slice %130 {offsets = [0, 15360], sizes = [32, 128], strides = [1, 1]} : vector<32x16768xbf16> to vector<32x128xbf16>
    %244 = vector.extract_strided_slice %130 {offsets = [0, 15872], sizes = [32, 128], strides = [1, 1]} : vector<32x16768xbf16> to vector<32x128xbf16>
    %245 = vector.extract_strided_slice %130 {offsets = [0, 9472], sizes = [32, 128], strides = [1, 1]} : vector<32x16768xbf16> to vector<32x128xbf16>
    %246 = vector.extract_strided_slice %130 {offsets = [0, 9984], sizes = [32, 128], strides = [1, 1]} : vector<32x16768xbf16> to vector<32x128xbf16>
    %247 = vector.extract_strided_slice %130 {offsets = [0, 15616], sizes = [32, 128], strides = [1, 1]} : vector<32x16768xbf16> to vector<32x128xbf16>
    %248 = vector.extract_strided_slice %130 {offsets = [0, 16128], sizes = [32, 128], strides = [1, 1]} : vector<32x16768xbf16> to vector<32x128xbf16>
    %249 = tpu.concatenate %233, %234, %235, %236, %237, %238, %239, %240, %241, %242, %243, %244, %245, %246, %247, %248 in 1 : vector<32x128xbf16>, vector<32x128xbf16>, vector<32x128xbf16>, vector<32x128xbf16>, vector<32x128xbf16>, vector<32x128xbf16>, vector<32x128xbf16>, vector<32x128xbf16>, vector<32x128xbf16>, vector<32x128xbf16>, vector<32x128xbf16>, vector<32x128xbf16>, vector<32x128xbf16>, vector<32x128xbf16>, vector<32x128xbf16>, vector<32x128xbf16> -> vector<32x2048xbf16>
    %250 = vector.extract_strided_slice %130 {offsets = [0, 6400], sizes = [32, 128], strides = [1, 1]} : vector<32x16768xbf16> to vector<32x128xbf16>
    %251 = vector.extract_strided_slice %130 {offsets = [0, 6912], sizes = [32, 128], strides = [1, 1]} : vector<32x16768xbf16> to vector<32x128xbf16>
    %252 = vector.extract_strided_slice %130 {offsets = [0, 12544], sizes = [32, 128], strides = [1, 1]} : vector<32x16768xbf16> to vector<32x128xbf16>
    %253 = vector.extract_strided_slice %130 {offsets = [0, 13056], sizes = [32, 128], strides = [1, 1]} : vector<32x16768xbf16> to vector<32x128xbf16>
    %254 = vector.extract_strided_slice %130 {offsets = [0, 6656], sizes = [32, 128], strides = [1, 1]} : vector<32x16768xbf16> to vector<32x128xbf16>
    %255 = vector.extract_strided_slice %130 {offsets = [0, 7168], sizes = [32, 128], strides = [1, 1]} : vector<32x16768xbf16> to vector<32x128xbf16>
    %256 = vector.extract_strided_slice %130 {offsets = [0, 12800], sizes = [32, 128], strides = [1, 1]} : vector<32x16768xbf16> to vector<32x128xbf16>
    %257 = vector.extract_strided_slice %130 {offsets = [0, 13312], sizes = [32, 128], strides = [1, 1]} : vector<32x16768xbf16> to vector<32x128xbf16>
    %258 = vector.extract_strided_slice %130 {offsets = [0, 9472], sizes = [32, 128], strides = [1, 1]} : vector<32x16768xbf16> to vector<32x128xbf16>
    %259 = vector.extract_strided_slice %130 {offsets = [0, 9984], sizes = [32, 128], strides = [1, 1]} : vector<32x16768xbf16> to vector<32x128xbf16>
    %260 = vector.extract_strided_slice %130 {offsets = [0, 15616], sizes = [32, 128], strides = [1, 1]} : vector<32x16768xbf16> to vector<32x128xbf16>
    %261 = vector.extract_strided_slice %130 {offsets = [0, 16128], sizes = [32, 128], strides = [1, 1]} : vector<32x16768xbf16> to vector<32x128xbf16>
    %262 = vector.extract_strided_slice %130 {offsets = [0, 9728], sizes = [32, 128], strides = [1, 1]} : vector<32x16768xbf16> to vector<32x128xbf16>
    %263 = vector.extract_strided_slice %130 {offsets = [0, 10240], sizes = [32, 128], strides = [1, 1]} : vector<32x16768xbf16> to vector<32x128xbf16>
    %264 = vector.extract_strided_slice %130 {offsets = [0, 15872], sizes = [32, 128], strides = [1, 1]} : vector<32x16768xbf16> to vector<32x128xbf16>
    %265 = vector.extract_strided_slice %130 {offsets = [0, 16384], sizes = [32, 128], strides = [1, 1]} : vector<32x16768xbf16> to vector<32x128xbf16>
    %266 = tpu.concatenate %250, %251, %252, %253, %254, %255, %256, %257, %258, %259, %260, %261, %262, %263, %264, %265 in 1 : vector<32x128xbf16>, vector<32x128xbf16>, vector<32x128xbf16>, vector<32x128xbf16>, vector<32x128xbf16>, vector<32x128xbf16>, vector<32x128xbf16>, vector<32x128xbf16>, vector<32x128xbf16>, vector<32x128xbf16>, vector<32x128xbf16>, vector<32x128xbf16>, vector<32x128xbf16>, vector<32x128xbf16>, vector<32x128xbf16>, vector<32x128xbf16> -> vector<32x2048xbf16>
    %267 = vector.extract_strided_slice %130 {offsets = [0, 6656], sizes = [32, 128], strides = [1, 1]} : vector<32x16768xbf16> to vector<32x128xbf16>
    %268 = vector.extract_strided_slice %130 {offsets = [0, 7168], sizes = [32, 128], strides = [1, 1]} : vector<32x16768xbf16> to vector<32x128xbf16>
    %269 = vector.extract_strided_slice %130 {offsets = [0, 12800], sizes = [32, 128], strides = [1, 1]} : vector<32x16768xbf16> to vector<32x128xbf16>
    %270 = vector.extract_strided_slice %130 {offsets = [0, 13312], sizes = [32, 128], strides = [1, 1]} : vector<32x16768xbf16> to vector<32x128xbf16>
    %271 = vector.extract_strided_slice %130 {offsets = [0, 6912], sizes = [32, 128], strides = [1, 1]} : vector<32x16768xbf16> to vector<32x128xbf16>
    %272 = vector.extract_strided_slice %130 {offsets = [0, 7424], sizes = [32, 128], strides = [1, 1]} : vector<32x16768xbf16> to vector<32x128xbf16>
    %273 = vector.extract_strided_slice %130 {offsets = [0, 13056], sizes = [32, 128], strides = [1, 1]} : vector<32x16768xbf16> to vector<32x128xbf16>
    %274 = vector.extract_strided_slice %130 {offsets = [0, 13568], sizes = [32, 128], strides = [1, 1]} : vector<32x16768xbf16> to vector<32x128xbf16>
    %275 = vector.extract_strided_slice %130 {offsets = [0, 9728], sizes = [32, 128], strides = [1, 1]} : vector<32x16768xbf16> to vector<32x128xbf16>
    %276 = vector.extract_strided_slice %130 {offsets = [0, 10240], sizes = [32, 128], strides = [1, 1]} : vector<32x16768xbf16> to vector<32x128xbf16>
    %277 = vector.extract_strided_slice %130 {offsets = [0, 15872], sizes = [32, 128], strides = [1, 1]} : vector<32x16768xbf16> to vector<32x128xbf16>
    %278 = vector.extract_strided_slice %130 {offsets = [0, 16384], sizes = [32, 128], strides = [1, 1]} : vector<32x16768xbf16> to vector<32x128xbf16>
    %279 = vector.extract_strided_slice %130 {offsets = [0, 9984], sizes = [32, 128], strides = [1, 1]} : vector<32x16768xbf16> to vector<32x128xbf16>
    %280 = vector.extract_strided_slice %130 {offsets = [0, 10496], sizes = [32, 128], strides = [1, 1]} : vector<32x16768xbf16> to vector<32x128xbf16>
    %281 = vector.extract_strided_slice %130 {offsets = [0, 16128], sizes = [32, 128], strides = [1, 1]} : vector<32x16768xbf16> to vector<32x128xbf16>
    %282 = vector.extract_strided_slice %130 {offsets = [0, 16640], sizes = [32, 128], strides = [1, 1]} : vector<32x16768xbf16> to vector<32x128xbf16>
    %283 = tpu.concatenate %267, %268, %269, %270, %271, %272, %273, %274, %275, %276, %277, %278, %279, %280, %281, %282 in 1 : vector<32x128xbf16>, vector<32x128xbf16>, vector<32x128xbf16>, vector<32x128xbf16>, vector<32x128xbf16>, vector<32x128xbf16>, vector<32x128xbf16>, vector<32x128xbf16>, vector<32x128xbf16>, vector<32x128xbf16>, vector<32x128xbf16>, vector<32x128xbf16>, vector<32x128xbf16>, vector<32x128xbf16>, vector<32x128xbf16>, vector<32x128xbf16> -> vector<32x2048xbf16>
    %284 = tpu.concatenate %147, %164, %181, %198, %215, %232, %249, %266, %283 in 0 : vector<32x2048xbf16>, vector<32x2048xbf16>, vector<32x2048xbf16>, vector<32x2048xbf16>, vector<32x2048xbf16>, vector<32x2048xbf16>, vector<32x2048xbf16>, vector<32x2048xbf16>, vector<32x2048xbf16> -> vector<288x2048xbf16>
    %c0_4 = arith.constant 0 : index
    %c0_5 = arith.constant 0 : index
    %285 = vector.load %arg3[%c0_4, %c0_5] : memref<64x288xbf16, #tpu.memory_space<vmem>>, vector<64x288xbf16>
    %cst_6 = arith.constant dense<0.000000e+00> : vector<64x2048xf32>
    %286 = tpu.matmul %285, %284, %cst_6 {dimension_numbers = #tpu.dot_dimension_numbers<[1], [0], [0], [1], [0, 0, 1, 1], [], []>} : vector<64x288xbf16>, vector<288x2048xbf16>, vector<64x2048xf32> -> vector<64x2048xf32>
    %287 = arith.truncf %286 : vector<64x2048xf32> to vector<64x2048xbf16>
    %288 = vector.extract_strided_slice %287 {offsets = [0, 0], sizes = [64, 512], strides = [1, 1]} : vector<64x2048xbf16> to vector<64x512xbf16>
    %289 = vector.extract_strided_slice %287 {offsets = [0, 512], sizes = [64, 512], strides = [1, 1]} : vector<64x2048xbf16> to vector<64x512xbf16>
    %290 = arith.maximumf %288, %289 : vector<64x512xbf16>
    %291 = vector.extract_strided_slice %287 {offsets = [0, 1024], sizes = [64, 512], strides = [1, 1]} : vector<64x2048xbf16> to vector<64x512xbf16>
    %292 = vector.extract_strided_slice %287 {offsets = [0, 1536], sizes = [64, 512], strides = [1, 1]} : vector<64x2048xbf16> to vector<64x512xbf16>
    %293 = arith.maximumf %291, %292 : vector<64x512xbf16>
    %294 = arith.maximumf %290, %293 : vector<64x512xbf16>
    %295 = vector.extract_strided_slice %294 {offsets = [0, 0], sizes = [64, 128], strides = [1, 1]} : vector<64x512xbf16> to vector<64x128xbf16>
    %296 = vector.extract_strided_slice %294 {offsets = [0, 128], sizes = [64, 128], strides = [1, 1]} : vector<64x512xbf16> to vector<64x128xbf16>
    %297 = vector.extract_strided_slice %294 {offsets = [0, 256], sizes = [64, 128], strides = [1, 1]} : vector<64x512xbf16> to vector<64x128xbf16>
    %298 = vector.extract_strided_slice %294 {offsets = [0, 384], sizes = [64, 128], strides = [1, 1]} : vector<64x512xbf16> to vector<64x128xbf16>
    %299 = tpu.concatenate %295, %296, %297, %298 in 0 : vector<64x128xbf16>, vector<64x128xbf16>, vector<64x128xbf16>, vector<64x128xbf16> -> vector<256x128xbf16>
    %c0_7 = arith.constant 0 : index
    %c0_8 = arith.constant 0 : index
    %300 = vector.load %arg4[%c0_7, %c0_8] : memref<64x256xbf16, #tpu.memory_space<vmem>>, vector<64x256xbf16>
    %cst_9 = arith.constant dense<0.000000e+00> : vector<64x128xf32>
    %301 = tpu.matmul %300, %299, %cst_9 {dimension_numbers = #tpu.dot_dimension_numbers<[1], [0], [0], [1], [0, 0, 1, 1], [], []>} : vector<64x256xbf16>, vector<256x128xbf16>, vector<64x128xf32> -> vector<64x128xf32>
    %c0_10 = arith.constant 0 : index
    %c0_11 = arith.constant 0 : index
    %302 = vector.load %arg5[%c0_10, %c0_11] : memref<64x1xf32, #tpu.memory_space<vmem>>, vector<64x1xf32>
    %303 = vector.broadcast %302 : vector<64x1xf32> to vector<64x128xf32>
    %304 = arith.addf %301, %303 : vector<64x128xf32>
    %cst_12 = arith.constant 0.000000e+00 : f32
    %305 = vector.broadcast %cst_12 : f32 to vector<64x128xf32>
    %306 = arith.maximumf %304, %305 : vector<64x128xf32>
    %307 = arith.truncf %306 : vector<64x128xf32> to vector<64x128xbf16>
    %c0_13 = arith.constant 0 : index
    %c0_14 = arith.constant 0 : index
    %308 = vector.load %arg6[%c0_13, %c0_14] : memref<3x64xbf16, #tpu.memory_space<vmem>>, vector<3x64xbf16>
    %cst_15 = arith.constant dense<0.000000e+00> : vector<3x128xf32>
    %309 = tpu.matmul %308, %307, %cst_15 {dimension_numbers = #tpu.dot_dimension_numbers<[1], [0], [0], [1], [0, 0, 1, 1], [], []>} : vector<3x64xbf16>, vector<64x128xbf16>, vector<3x128xf32> -> vector<3x128xf32>
    %c0_16 = arith.constant 0 : index
    %c0_17 = arith.constant 0 : index
    %310 = vector.load %arg7[%c0_16, %c0_17] : memref<3x1xf32, #tpu.memory_space<vmem>>, vector<3x1xf32>
    %311 = vector.broadcast %310 : vector<3x1xf32> to vector<3x128xf32>
    %312 = arith.addf %309, %311 : vector<3x128xf32>
    %c0_18 = arith.constant 0 : index
    %c0_19 = arith.constant 0 : index
    %313 = vector.load %arg8[%c0_18, %c0_19] : memref<3x128xf32, #tpu.memory_space<vmem>>, vector<3x128xf32>
    tpu.vector_store %arg8[%c0_18, %c0_19], %312 {strides = array<i32>} : memref<3x128xf32, #tpu.memory_space<vmem>>, vector<3x128xf32>,
    return
  }
  func.func @transform_0(%arg0: i32) -> (i32, i32, i32) {
    %c0_i32 = arith.constant 0 : i32
    %c0_i32_0 = arith.constant 0 : i32
    %c0_i32_1 = arith.constant 0 : i32
    return %arg0, %c0_i32, %c0_i32_0 : i32, i32, i32
  }
  func.func @transform_1(%arg0: i32) -> (i32, i32) {
    %c0_i32 = arith.constant 0 : i32
    %c0_i32_0 = arith.constant 0 : i32
    %c0_i32_1 = arith.constant 0 : i32
    return %c0_i32, %c0_i32_0 : i32, i32
  }
  func.func @transform_2(%arg0: i32) -> (i32, i32) {
    %c0_i32 = arith.constant 0 : i32
    %c0_i32_0 = arith.constant 0 : i32
    %c0_i32_1 = arith.constant 0 : i32
    return %c0_i32, %c0_i32_0 : i32, i32
  }
  func.func @transform_3(%arg0: i32) -> (i32, i32) {
    %c0_i32 = arith.constant 0 : i32
    %c0_i32_0 = arith.constant 0 : i32
    %c0_i32_1 = arith.constant 0 : i32
    return %c0_i32, %c0_i32_0 : i32, i32
  }
  func.func @transform_4(%arg0: i32) -> (i32, i32) {
    %c0_i32 = arith.constant 0 : i32
    %c0_i32_0 = arith.constant 0 : i32
    %c0_i32_1 = arith.constant 0 : i32
    return %c0_i32, %c0_i32_0 : i32, i32
  }
  func.func @transform_5(%arg0: i32) -> (i32, i32) {
    %c0_i32 = arith.constant 0 : i32
    %c0_i32_0 = arith.constant 0 : i32
    %c0_i32_1 = arith.constant 0 : i32
    return %c0_i32, %c0_i32_0 : i32, i32
  }
  func.func @transform_6(%arg0: i32) -> (i32, i32) {
    %c0_i32 = arith.constant 0 : i32
    %c0_i32_0 = arith.constant 0 : i32
    %c0_i32_1 = arith.constant 0 : i32
    return %c0_i32, %c0_i32_0 : i32, i32
  }
  func.func @transform_7(%arg0: i32) -> (i32, i32) {
    %c0_i32 = arith.constant 0 : i32
    %c0_i32_0 = arith.constant 0 : i32
    return %c0_i32, %arg0 : i32, i32
  }
}

</mosaic_0001>

<bundles_post_ra>
// kernel: cnn_forward.1
= control target key start
LH: loop header
LB: loop body
LE: loop exit
PB: predicated region body
PF: predicated region fallthrough
CT: control target
= control target key end

     0   :  { %v12157_v3 = vmov 0   ;;  %vm712_vm0 = vcmask 1043456   ;;  %vm705_vm1 = vcmask 588800   ;;  %vm5541_vm2 = vcmask 261120   ;;  %s12148_s0 = inlined_call_operand.vmem [shape: f32[1,8,32768], index: 0, kind: input, shape index: {}]   ;;  %s12149_s1 = inlined_call_operand.vmem [shape: bf16[32,72], index: 1, kind: input, shape index: {}]   ;;  %s12150_s2 = inlined_call_operand.vmem [shape: bf16[64,288], index: 2, kind: input, shape index: {}]   ;;  %s12151_s3 = inlined_call_operand.vmem [shape: bf16[64,256], index: 3, kind: input, shape index: {}]   ;;  %s12152_s4 = inlined_call_operand.vmem [shape: f32[64,1], index: 4, kind: input, shape index: {}]   ;;  %s12153_s6 = inlined_call_operand.vmem [shape: f32[3,1], index: 6, kind: input, shape index: {}]   ;;  %s12154_s5 = inlined_call_operand.vmem [shape: bf16[3,64], index: 5, kind: input, shape index: {}]   ;;  %s12155_s7 = inlined_call_operand.vmem [shape: f32[3,128], index: 7, kind: output, shape index: {}]  }
   0x1   :  { %v28_v0 = vld [vmem:[%s12148_s0 + $0x8] sm:$0xff]  ;;  %v29_v1 = vld [vmem:[%s12148_s0 + $0x10] sm:$0xff]  ;;  %v30_v2 = vld [vmem:[%s12148_s0 + $0x18] sm:$0xff]  ;;  %1177 = vmatprep.mubr.bf16.mxu0 %v12157_v3  ;;  %1230 = vmatprep.mubr.bf16.mxu1 %v12157_v3  ;;  %vm7576_vm3 = vmmov 0   ;;  %vm7014_vm4 = vcmask 523264  }
   0x2   :  { %v224_v4 = vpack.c.bf16 %v29_v1, %v28_v0  ;;  %v7631_v5 = vld [vmem:[%s12148_s0 + $0x20] sm:$0xff]  ;;  %v7636_v6 = vld [vmem:[%s12148_s0 + $0x28] sm:$0xff]  ;;  %v225_v8 = vpack.c.bf16 %v30_v2, %v29_v1  ;;  %7522 = vset.pattern.permute.xlu0 %v12157_v3  ;;  %7523 = vset.pattern.permute.xlu1 %v12157_v3  ;;  %v7652_v12 = vld [vmem:[%s12148_s0 + $0x98] sm:$0xff] }
   0x3   :  { %v27_v7 = vld [vmem:[%s12148_s0] sm:$0xff]  ;;  %v226_v9 = vpack.c.bf16 %v7631_v5, %v30_v2  ;;  %v7647_v11 = vld [vmem:[%s12148_s0 + $0x88] sm:$0xff]  ;;  %v370_v15 = vpack.c.bf16 %v7652_v12, %v7636_v6  ;;  %v7665_v16 = vld [vmem:[%s12148_s0 + $0x90] sm:$0xff]  ;;  %v227_v49 = vpack.c.bf16 %v7636_v6, %v7631_v5 }
   0x4   :  { %v223_v10 = vpack.c.bf16 %v28_v0, %v27_v7  ;;  %v7657_v13 = vld [vmem:[%s12148_s0 + $0x80] sm:$0xff]  ;;  %1145 = vmatprep.subr.bf16.mxu0 %v224_v4  ;;  %v368_v14 = vpack.c.bf16 %v7647_v11, %v30_v2  ;;  %v7675_v18 = vld [vmem:[%s12148_s0 + $0xa8] sm:$0xff]  ;;  %v369_v20 = vpack.c.bf16 %v7665_v16, %v7631_v5  ;;  %v7682_v21 = vpack.c.bf16 %v7652_v12, %v7665_v16  ;;  %v7696_v24 = vld [vmem:[%s12148_s0 + $0x110] sm:$0xff] }
   0x5   :  { %v7670_v17 = vld [vmem:[%s12148_s0 + $0xa0] sm:$0xff]  ;;  %1198 = vmatprep.subr.bf16.mxu1 %v226_v9  ;;  %v367_v19 = vpack.c.bf16 %v7657_v13, %v29_v1  ;;  %v7687_v22 = vld [vmem:[%s12148_s0 + $0x108] sm:$0xff]  ;;  %v7701_v25 = vld [vmem:[%s12148_s0 + $0x118] sm:$0xff]  ;;  %v7710_v27 = vpack.c.bf16 %v7665_v16, %v7647_v11  ;;  %v547_v36 = vpack.c.bf16 %v7696_v24, %v7696_v24 }
   0x6   :  { %1146 = vmatpush1.bf16.msra.mxu0 %v223_v10  ;;  %1199 = vmatpush1.bf16.msra.mxu1 %v225_v8  ;;  %v7691_v23 = vpack.c.bf16 %v7675_v18, %v7670_v17  ;;  %v7706_v26 = vld [vmem:[%s12148_s0 + $0x120] sm:$0xff]  ;;  %v7715_v28 = vpack.c.bf16 %v7670_v17, %v7652_v12  ;;  %v7719_v29 = vpack.c.bf16 %v7696_v24, %v7687_v22  ;;  %v7734_v32 = vld [vmem:[%s12148_s0 + $0x128] sm:$0xff]  ;;  %v33_v39 = vld [vmem:[%s12148_s0 + $0x30] sm:$0xff] }
   0x7   :  { %1147 = vmatprep.subr.bf16.mxu0 %v368_v14  ;;  %1200 = vmatprep.subr.bf16.mxu1 %v370_v15  ;;  %v7724_v30 = vld [vmem:[%s12148_s0 + $0x100] sm:$0xff]  ;;  %v7729_v31 = vpack.c.bf16 %v7706_v26, %v7701_v25  ;;  %v7745_v34 = vpack.c.bf16 %v7701_v25, %v7696_v24  ;;  %v548_v35 = vpack.c.bf16 %v7701_v25, %v7701_v25  ;;  %v34_v40 = vld [vmem:[%s12148_s0 + $0x38] sm:$0xff]  ;;  %v714_v42 = vsel %vm712_vm0, %v547_v36, 0  ;;  %v7783_v47 = vld [vmem:[%s12148_s0 + $0x48] sm:$0xff] }
   0x8   :  { %v7739_v33 = vpack.c.bf16 %v7687_v22, %v7724_v30  ;;  %v550_v37 = vpack.c.bf16 %v7734_v32, %v7734_v32  ;;  %v549_v38 = vpack.c.bf16 %v7706_v26, %v7706_v26  ;;  %v7765_v41 = vld [vmem:[%s12148_s0 + $0x40] sm:$0xff]  ;;  %v228_v43 = vpack.c.bf16 %v33_v39, %v7636_v6  ;;  %v7788_v48 = vld [vmem:[%s12148_s0 + $0xb8] sm:$0xff]  ;;  %v7798_v53 = vld [vmem:[%s12148_s0 + $0xb0] sm:$0xff] }
   0x9   :  { %v230_v45 = vpack.c.bf16 %v7765_v41, %v34_v40  ;;  %v7778_v46 = vld [vmem:[%s12149_s1] sm:$0xff]   ;;  %v229_v50 = vpack.c.bf16 %v34_v40, %v33_v39  ;;  %v372_v51 = vpack.c.bf16 %v7675_v18, %v34_v40  ;;  %v374_v52 = vpack.c.bf16 %v7788_v48, %v7783_v47  ;;  %v7810_v55 = vld [vmem:[%s12148_s0 + $0xc8] sm:$0xff]  ;;  %v7829_v60 = vld [vmem:[%s12148_s0 + $0x130] sm:$0xff] }
   0xa   :  { %1148 = vmatpush1.bf16.msra.mxu0 %v367_v19  ;;  %1201 = vmatpush1.bf16.msra.mxu1 %v369_v20  ;;  %12365 = vst [vmem:[#allocation2_spill] sm:$0xff] %v7739_v33  ;;  %v720_v44 = vsel %vm712_vm0, %v549_v38, 0  ;;  %v7805_v54 = vld [vmem:[%s12148_s0 + $0xc0] sm:$0xff]  ;;  %v371_v56 = vpack.c.bf16 %v7670_v17, %v33_v39  ;;  %v373_v57 = vpack.c.bf16 %v7798_v53, %v7765_v41  ;;  %v7834_v61 = vld [vmem:[%s12149_s1 + $0x8] sm:$0xff]   ;;  %v7840_v62 = vld [vmem:[%s12148_s0 + $0x138] sm:$0xff] }
   0xb   :  { %1149 = vmatprep.subr.bf16.mxu0 %v7682_v21  ;;  %1202 = vmatprep.subr.bf16.mxu1 %v7691_v23  ;;  %v7819_v58 = vpack.c.bf16 %v7788_v48, %v7798_v53  ;;  %v7823_v59 = vpack.c.bf16 %v7810_v55, %v7805_v54  ;;  %v7845_v63 = vld [vmem:[%s12148_s0 + $0x140] sm:$0xff]  ;;  %v7849_v0 = vpack.c.bf16 %v7798_v53, %v7675_v18  ;;  %v7870_v5 = vld [vmem:[%s12148_s0 + $0x148] sm:$0xff]  ;;  %v37_v19 = vld [vmem:[%s12148_s0 + $0x50] sm:$0xff] }
   0xc   :  { %v7854_v1 = vpack.c.bf16 %v7805_v54, %v7788_v48  ;;  %v7858_v2 = vpack.c.bf16 %v7829_v60, %v7734_v32  ;;  %v7863_v4 = vpack.c.bf16 %v7845_v63, %v7840_v62  ;;  %v7877_v6 = vpack.c.bf16 %v7734_v32, %v7706_v26  ;;  %v7892_v10 = vld [vmem:[%s12148_s0 + $0x1a8] sm:$0xff]  ;;  %v7906_v20 = vld [vmem:[%s12148_s0 + $0x1a0] sm:$0xff]  ;;  %v38_v36 = vld [vmem:[%s12148_s0 + $0x58] sm:$0xff] }
   0xd   :  { %v7883_v7 = vpack.c.bf16 %v7840_v62, %v7829_v60  ;;  %v552_v8 = vpack.c.bf16 %v7840_v62, %v7840_v62  ;;  %v551_v9 = vpack.c.bf16 %v7829_v60, %v7829_v60  ;;  %v554_v14 = vpack.c.bf16 %v7870_v5, %v7870_v5  ;;  %v7923_v39 = vld [vmem:[%s12148_s0 + $0x150] sm:$0xff] }
   0xe   :  { %1150 = vmatpush1.bf16.msra.mxu0 %v7710_v27  ;;  %1203 = vmatpush1.bf16.msra.mxu1 %v7715_v28  ;;  %v553_v15 = vpack.c.bf16 %v7845_v63, %v7845_v63 }
   0xf   :  { %1151 = vmatprep.subr.bf16.mxu0 %v7719_v29  ;;  %1204 = vmatprep.subr.bf16.mxu1 %v7729_v31  ;;  %v726_v40 = vsel %vm712_vm0, %v551_v9, 0  ;;  %v233_v9 = vpack.c.bf16 %v38_v36, %v37_v19 }
  0x12   :  { %1152 = vmatpush1.bf16.msra.mxu0 %v7739_v33  ;;  %1205 = vmatpush1.bf16.msra.mxu1 %v7745_v34  ;;  %v235_v33 = vpack.c.bf16 %v7647_v11, %v7657_v13  ;;  %v381_v11 = vpack.c.bf16 %v7696_v24, %v7670_v17  ;;  %v8071_v13 = vld [vmem:[%s12148_s0 + $0x188] sm:$0xff] }
  0x13   :  { %7065 = vmatprep.subr.msk.bf16.mxu0 %vm712_vm0, %v548_v35  ;;  %7068 = vmatprep.subr.msk.bf16.mxu1 %vm712_vm0, %v550_v37  ;;  %v39_v37 = vld [vmem:[%s12148_s0 + $0x60] sm:$0xff] }
  0x16   :  { %1154 = vmatpush1.bf16.msra.mxu0 %v714_v42  ;;  %1207 = vmatpush1.bf16.msra.mxu1 %v720_v44  ;;  %v232_v42 = vpack.c.bf16 %v37_v19, %v7783_v47  ;;  %v7937_v44 = vld [vmem:[%s12148_s0 + $0x1c0] sm:$0xff] }
  0x17   :  { %1251 = vmatprep.subr.bf16.mxu0 %v228_v43  ;;  %1304 = vmatprep.subr.bf16.mxu1 %v230_v45  ;;  %v7932_v43 = vld [vmem:[%s12148_s0 + $0x158] sm:$0xff]  ;;  %v7942_v45 = vld [vmem:[%s12148_s0 + $0x1c8] sm:$0xff] }
  0x19   :  { %7066 = vmatmul.mubr.msk.bf16.vlgmr.msra.gmra.mrb[0].mxu0 %vm705_vm1, %v7778_v46  ;;  %7069 = vmatmul.mubr.msk.bf16.vlgmr.msra.gmra.mrb[0].mxu1 %vm705_vm1, %v7778_v46 }
  0x1a   :  { %1252 = vmatpush1.bf16.msra.mxu0 %v227_v49  ;;  %1305 = vmatpush1.bf16.msra.mxu1 %v229_v50  ;;  %v732_v49 = vsel %vm712_vm0, %v553_v15, 0  ;;  %v234_v50 = vpack.c.bf16 %v39_v37, %v38_v36  ;;  %v7964_v15 = vld [vmem:[%s12148_s0 + $0xd0] sm:$0xff] }
  0x1b   :  { %1253 = vmatprep.subr.bf16.mxu0 %v372_v51  ;;  %1306 = vmatprep.subr.bf16.mxu1 %v374_v52 }
  0x1c   :  { %1187 = vmatprep.mubr.bf16.mxu0 %v12157_v3  ;;  %1240 = vmatprep.mubr.bf16.mxu1 %v12157_v3 }
  0x1e   :  { %1254 = vmatpush1.bf16.msra.mxu0 %v371_v56  ;;  %1307 = vmatpush1.bf16.msra.mxu1 %v373_v57  ;;  %v40_v56 = vld [vmem:[%s12148_s0 + $0x68] sm:$0xff]  ;;  %v7956_v57 = vld [vmem:[%s12148_s0 + $0xd8] sm:$0xff] }
  0x1f   :  { %1255 = vmatprep.subr.bf16.mxu0 %v7819_v58  ;;  %1308 = vmatprep.subr.bf16.mxu1 %v7823_v59  ;;  %v378_v52 = vpack.c.bf16 %v7956_v57, %v40_v56 }
  0x21   :  { %7067 = vmatmul.mubr.msk.bf16.gmra.mrb[4].mxu0 %vm705_vm1, %v7834_v61  ;;  %7070 = vmatmul.mubr.msk.bf16.gmra.mrb[4].mxu1 %vm705_vm1, %v7834_v61 }
  0x22   :  { %1256 = vmatpush1.bf16.msra.mxu0 %v7849_v0  ;;  %1309 = vmatpush1.bf16.msra.mxu1 %v7854_v1 }
  0x23   :  { %1257 = vmatprep.subr.bf16.mxu0 %v7858_v2  ;;  %1310 = vmatprep.subr.bf16.mxu1 %v7863_v4 }
  0x24   :  { %1283 = vmatprep.mubr.bf16.mxu0 %v12157_v3  ;;  %1336 = vmatprep.mubr.bf16.mxu1 %v12157_v3 }
  0x26   :  { %1258 = vmatpush1.bf16.msra.mxu0 %v7877_v6  ;;  %1311 = vmatpush1.bf16.msra.mxu1 %v7883_v7 }
  0x27   :  { %7071 = vmatprep.subr.msk.bf16.mxu0 %vm712_vm0, %v552_v8  ;;  %7074 = vmatprep.subr.msk.bf16.mxu1 %vm712_vm0, %v554_v14  ;;  %v231_v8 = vpack.c.bf16 %v7783_v47, %v7765_v41  ;;  %v376_v14 = vpack.c.bf16 %v7810_v55, %v38_v36  ;;  %v7972_v41 = vld [vmem:[%s12148_s0 + $0xe0] sm:$0xff]  ;;  %v7977_v47 = vld [vmem:[%s12148_s0 + $0xe8] sm:$0xff]  ;;  %v375_v36 = vpack.c.bf16 %v7805_v54, %v37_v19 }
  0x28   :  { %v7994_v19 = vld [vmem:[%s12148_s0 + $0x160] sm:$0xff] }
  0x29   :  { %v8011_v56 = vpack.c.bf16 %v7994_v19, %v7932_v43  ;;  %v557_v51 = vpack.c.bf16 %v7994_v19, %v7994_v19 }
  0x2a   :  { %1260 = vmatpush1.bf16.msra.mxu0 %v726_v40  ;;  %1313 = vmatpush1.bf16.msra.mxu1 %v732_v49  ;;  %v377_v40 = vpack.c.bf16 %v7964_v15, %v39_v37  ;;  %v511_v49 = vpack.c.bf16 %v7977_v47, %v7972_v41  ;;  %v7998_v37 = vpack.c.bf16 %v7964_v15, %v7810_v55 }
  0x2b   :  { %1357 = vmatprep.subr.bf16.mxu0 %v232_v42  ;;  %1410 = vmatprep.subr.bf16.mxu1 %v234_v50  ;;  %v7985_v42 = vpack.c.bf16 %v7956_v57, %v7964_v15  ;;  %v8003_v50 = vpack.c.bf16 %v7972_v41, %v7956_v57  ;;  %v744_v35 = vsel %vm712_vm0, %v557_v51, 0  ;;  %v379_v51 = vpack.c.bf16 %v7724_v30, %v7665_v16  ;;  %v8076_v16 = vld [vmem:[%s12148_s0 + $0x190] sm:$0xff] }
  0x2c   :  { %v8087_v17 = vpack.c.bf16 %v8076_v16, %v8071_v13  ;;  %v559_v30 = vpack.c.bf16 %v8076_v16, %v8076_v16 }
  0x2d   :  { %7072 = vmatmul.mubr.msk.bf16.vlgmr.msra.gmra.mrb[8].mxu0 %vm705_vm1, %v7778_v46  ;;  %7075 = vmatmul.mubr.msk.bf16.vlgmr.msra.gmra.mrb[8].mxu1 %vm705_vm1, %v7778_v46 }
  0x2e   :  { %1358 = vmatpush1.bf16.msra.mxu0 %v231_v8  ;;  %1411 = vmatpush1.bf16.msra.mxu1 %v233_v9  ;;  %v8018_v8 = vld [vmem:[%s12148_s0 + $0x168] sm:$0xff]  ;;  %v8025_v9 = vpack.c.bf16 %v7870_v5, %v7845_v63 }
  0x2f   :  { %1359 = vmatprep.subr.bf16.mxu0 %v376_v14  ;;  %1412 = vmatprep.subr.bf16.mxu1 %v378_v52  ;;  %v8007_v52 = vpack.c.bf16 %v7923_v39, %v7870_v5  ;;  %v8031_v14 = vpack.c.bf16 %v7932_v43, %v7923_v39 }
  0x30   :  { %1293 = vmatprep.mubr.bf16.mxu0 %v12157_v3  ;;  %1346 = vmatprep.mubr.bf16.mxu1 %v12157_v3 }
  0x32   :  { %1360 = vmatpush1.bf16.msra.mxu0 %v375_v36  ;;  %1413 = vmatpush1.bf16.msra.mxu1 %v377_v40  ;;  %v556_v36 = vpack.c.bf16 %v7932_v43, %v7932_v43  ;;  %v555_v40 = vpack.c.bf16 %v7923_v39, %v7923_v39 }
  0x33   :  { %1361 = vmatprep.subr.bf16.mxu0 %v7985_v42  ;;  %1414 = vmatprep.subr.bf16.mxu1 %v511_v49  ;;  %v558_v49 = vpack.c.bf16 %v8018_v8, %v8018_v8 }
  0x34   :  { %v738_v38 = vsel %vm712_vm0, %v555_v40, 0 }
  0x35   :  { %7073 = vmatmul.mubr.msk.bf16.gmra.mrb[12].mxu0 %vm705_vm1, %v7834_v61  ;;  %7076 = vmatmul.mubr.msk.bf16.gmra.mrb[12].mxu1 %vm705_vm1, %v7834_v61 }
  0x36   :  { %1362 = vmatpush1.bf16.msra.mxu0 %v7998_v37  ;;  %1415 = vmatpush1.bf16.msra.mxu1 %v8003_v50 }
  0x37   :  { %1363 = vmatprep.subr.bf16.mxu0 %v8007_v52  ;;  %1416 = vmatprep.subr.bf16.mxu1 %v8011_v56 }
  0x38   :  { %1389 = vmatprep.mubr.bf16.mxu0 %v12157_v3  ;;  %1442 = vmatprep.mubr.bf16.mxu1 %v12157_v3  ;;  %v380_v3 = vpack.c.bf16 %v7687_v22, %v7652_v12  ;;  %v12366_v12 = vmov 0  }
  0x3a   :  { %1364 = vmatpush1.bf16.msra.mxu0 %v8025_v9  ;;  %1417 = vmatpush1.bf16.msra.mxu1 %v8031_v14 }
  0x3b   :  { %7077 = vmatprep.subr.msk.bf16.mxu0 %vm712_vm0, %v556_v36  ;;  %7080 = vmatprep.subr.msk.bf16.mxu1 %vm712_vm0, %v558_v49  ;;  %v382_v36 = vpack.c.bf16 %v7701_v25, %v7675_v18  ;;  %v8092_v18 = vld [vmem:[%s12148_s0 + $0x180] sm:$0xff]  ;;  %v384_v49 = vpack.c.bf16 %v7734_v32, %v7788_v48  ;;  %v385_v48 = vpack.c.bf16 %v7829_v60, %v7805_v54 }
  0x3c   :  { %v8106_v22 = vpack.c.bf16 %v8071_v13, %v8092_v18 }
  0x3e   :  { %1366 = vmatpush1.bf16.msra.mxu0 %v738_v38  ;;  %1419 = vmatpush1.bf16.msra.mxu1 %v744_v35  ;;  %v561_v35 = vpack.c.bf16 %v7906_v20, %v7906_v20  ;;  %v750_v38 = vsel %vm712_vm0, %v559_v30, 0  ;;  %v565_v30 = vpack.c.bf16 %v7937_v44, %v7937_v44 }
  0x3f   :  { %1463 = vmatprep.subr.bf16.mxu0 %v7710_v27  ;;  %1516 = vmatprep.subr.bf16.mxu1 %v7715_v28 }
  0x40   :  { %v756_v40 = vsel %vm712_vm0, %v561_v35, 0  ;;  %v768_v35 = vsel %vm712_vm0, %v565_v30, 0 }
  0x41   :  { %7078 = vmatmul.mubr.msk.bf16.vlgmr.msra.gmra.mrb[16].mxu0 %vm705_vm1, %v7778_v46  ;;  %7081 = vmatmul.mubr.msk.bf16.vlgmr.msra.gmra.mrb[16].mxu1 %vm705_vm1, %v7778_v46 }
  0x42   :  { %1464 = vmatpush1.bf16.msra.mxu0 %v235_v33  ;;  %1517 = vmatpush1.bf16.msra.mxu1 %v7682_v21  ;;  %v562_v33 = vpack.c.bf16 %v7892_v10, %v7892_v10 }
  0x43   :  { %1465 = vmatprep.subr.bf16.mxu0 %v380_v3  ;;  %1518 = vmatprep.subr.bf16.mxu1 %v382_v36  ;;  %v8082_v3 = vld [vmem:[%s12148_s0 + $0x198] sm:$0xff]  ;;  %v386_v36 = vpack.c.bf16 %v7840_v62, %v7810_v55  ;;  %v8151_v55 = vld [vmem:[%s12148_s0 + $0x1b0] sm:$0xff] }
  0x44   :  { %1399 = vmatprep.mubr.bf16.mxu0 %v12366_v12  ;;  %1452 = vmatprep.mubr.bf16.mxu1 %v12366_v12  ;;  %v8097_v21 = vpack.c.bf16 %v7906_v20, %v8082_v3  ;;  %v8112_v27 = vpack.c.bf16 %v8082_v3, %v8076_v16  ;;  %v560_v28 = vpack.c.bf16 %v8082_v3, %v8082_v3 }
  0x46   :  { %1466 = vmatpush1.bf16.msra.mxu0 %v379_v51  ;;  %1519 = vmatpush1.bf16.msra.mxu1 %v381_v11  ;;  %v383_v51 = vpack.c.bf16 %v7706_v26, %v7798_v53  ;;  %v8162_v53 = vpack.c.bf16 %v8151_v55, %v7892_v10  ;;  %v563_v11 = vpack.c.bf16 %v8151_v55, %v8151_v55 }
  0x47   :  { %1467 = vmatprep.subr.bf16.mxu0 %v7745_v34  ;;  %1520 = vmatprep.subr.bf16.mxu1 %v7877_v6 }
  0x49   :  { %7079 = vmatmul.mubr.msk.bf16.gmra.mrb[20].mxu0 %vm705_vm1, %v7834_v61  ;;  %7082 = vmatmul.mubr.msk.bf16.gmra.mrb[20].mxu1 %vm705_vm1, %v7834_v61 }
  0x4a   :  { %1468 = vmatpush1.bf16.msra.mxu0 %v7719_v29  ;;  %1521 = vmatpush1.bf16.msra.mxu1 %v7729_v31 }
  0x4b   :  { %1469 = vmatprep.subr.bf16.mxu0 %v8087_v17  ;;  %1522 = vmatprep.subr.bf16.mxu1 %v8097_v21 }
  0x4c   :  { %1495 = vmatprep.mubr.bf16.mxu0 %v12366_v12  ;;  %1548 = vmatprep.mubr.bf16.mxu1 %v12366_v12 }
  0x4e   :  { %1470 = vmatpush1.bf16.msra.mxu0 %v8106_v22  ;;  %1523 = vmatpush1.bf16.msra.mxu1 %v8112_v27 }
  0x4f   :  { %7083 = vmatprep.subr.msk.bf16.mxu0 %vm712_vm0, %v560_v28  ;;  %7086 = vmatprep.subr.msk.bf16.mxu1 %vm712_vm0, %v562_v33  ;;  %v566_v28 = vpack.c.bf16 %v7942_v45, %v7942_v45  ;;  %v762_v33 = vsel %vm712_vm0, %v563_v11, 0 }
  0x52   :  { %1472 = vmatpush1.bf16.msra.mxu0 %v750_v38  ;;  %1525 = vmatpush1.bf16.msra.mxu1 %v756_v40  ;;  %v388_v38 = vpack.c.bf16 %v7870_v5, %v7956_v57  ;;  %v390_v40 = vpack.c.bf16 %v7932_v43, %v7977_v47  ;;  %v389_v57 = vpack.c.bf16 %v7923_v39, %v7972_v41 }
  0x53   :  { %1569 = vmatprep.subr.bf16.mxu0 %v7849_v0  ;;  %1622 = vmatprep.subr.bf16.mxu1 %v7854_v1  ;;  %v512_v47 = vpack.c.bf16 %v8018_v8, %v7994_v19 }
  0x55   :  { %7084 = vmatmul.mubr.msk.bf16.vlgmr.msra.gmra.mrb[24].mxu0 %vm705_vm1, %v7778_v46  ;;  %7087 = vmatmul.mubr.msk.bf16.vlgmr.msra.gmra.mrb[24].mxu1 %vm705_vm1, %v7778_v46 }
  0x56   :  { %1570 = vmatpush1.bf16.msra.mxu0 %v7691_v23  ;;  %1623 = vmatpush1.bf16.msra.mxu1 %v7819_v58  ;;  %v8157_v23 = vld [vmem:[%s12148_s0 + $0x1b8] sm:$0xff]  ;;  %v8176_v58 = vpack.c.bf16 %v7892_v10, %v7906_v20 }
  0x57   :  { %1571 = vmatprep.subr.bf16.mxu0 %v384_v49  ;;  %1624 = vmatprep.subr.bf16.mxu1 %v386_v36  ;;  %v8167_v54 = vpack.c.bf16 %v7937_v44, %v8157_v23  ;;  %v8182_v0 = vpack.c.bf16 %v8157_v23, %v8151_v55  ;;  %v564_v1 = vpack.c.bf16 %v8157_v23, %v8157_v23 }
  0x58   :  { %1505 = vmatprep.mubr.bf16.mxu0 %v12366_v12  ;;  %1558 = vmatprep.mubr.bf16.mxu1 %v12366_v12  ;;  %v387_v49 = vpack.c.bf16 %v7845_v63, %v7964_v15  ;;  %v8234_v15 = vld [vmem:[%s12148_s0 + $0x1e0] sm:$0xff]  ;;  %v8257_v36 = vpack.c.bf16 %v7942_v45, %v7937_v44 }
  0x5a   :  { %1572 = vmatpush1.bf16.msra.mxu0 %v383_v51  ;;  %1625 = vmatpush1.bf16.msra.mxu1 %v385_v48 }
  0x5b   :  { %1573 = vmatprep.subr.bf16.mxu0 %v7883_v7  ;;  %1626 = vmatprep.subr.bf16.mxu1 %v8025_v9 }
  0x5d   :  { %7085 = vmatmul.mubr.msk.bf16.gmra.mrb[28].mxu0 %vm705_vm1, %v7834_v61  ;;  %7088 = vmatmul.mubr.msk.bf16.gmra.mrb[28].mxu1 %vm705_vm1, %v7834_v61 }
  0x5e   :  { %1574 = vmatpush1.bf16.msra.mxu0 %v7858_v2  ;;  %1627 = vmatpush1.bf16.msra.mxu1 %v7863_v4 }
  0x5f   :  { %1575 = vmatprep.subr.bf16.mxu0 %v8162_v53  ;;  %1628 = vmatprep.subr.bf16.mxu1 %v8167_v54 }
  0x60   :  { %1601 = vmatprep.mubr.bf16.mxu0 %v12366_v12  ;;  %1654 = vmatprep.mubr.bf16.mxu1 %v12366_v12 }
  0x62   :  { %1576 = vmatpush1.bf16.msra.mxu0 %v8176_v58  ;;  %1629 = vmatpush1.bf16.msra.mxu1 %v8182_v0 }
  0x63   :  { %7089 = vmatprep.subr.msk.bf16.mxu0 %vm712_vm0, %v564_v1  ;;  %7092 = vmatprep.subr.msk.bf16.mxu1 %vm712_vm0, %v566_v28  ;;  %v569_v28 = vpack.c.bf16 %v8234_v15, %v8234_v15 }
  0x66   :  { %1578 = vmatpush1.bf16.msra.mxu0 %v762_v33  ;;  %1631 = vmatpush1.bf16.msra.mxu1 %v768_v35  ;;  %v780_v33 = vsel %vm712_vm0, %v569_v28, 0  ;;  %v392_v35 = vpack.c.bf16 %v8071_v13, %v7701_v25  ;;  %v393_v25 = vpack.c.bf16 %v8076_v16, %v7706_v26  ;;  %v8318_v26 = vld [vmem:[%s12148_s0 + $0x220] sm:$0xff] }
  0x67   :  { %1675 = vmatprep.subr.bf16.mxu0 %v7998_v37  ;;  %1728 = vmatprep.subr.bf16.mxu1 %v8003_v50  ;;  %v8223_v37 = vld [vmem:[%s12148_s0 + $0x1d0] sm:$0xff]  ;;  %v8250_v50 = vld [vmem:[%s12148_s0 + $0x1e8] sm:$0xff]  ;;  %v573_v28 = vpack.c.bf16 %v8318_v26, %v8318_v26 }
  0x68   :  { %v8239_v41 = vpack.c.bf16 %v8223_v37, %v7942_v45  ;;  %v567_v1 = vpack.c.bf16 %v8223_v37, %v8223_v37  ;;  %v570_v11 = vpack.c.bf16 %v8250_v50, %v8250_v50 }
  0x69   :  { %7090 = vmatmul.mubr.msk.bf16.vlgmr.msra.gmra.mrb[32].mxu0 %vm705_vm1, %v7778_v46  ;;  %7093 = vmatmul.mubr.msk.bf16.vlgmr.msra.gmra.mrb[32].mxu1 %vm705_vm1, %v7778_v46 }
  0x6a   :  { %1676 = vmatpush1.bf16.msra.mxu0 %v7823_v59  ;;  %1729 = vmatpush1.bf16.msra.mxu1 %v7985_v42  ;;  %v8229_v59 = vld [vmem:[%s12148_s0 + $0x1d8] sm:$0xff]  ;;  %v774_v30 = vsel %vm712_vm0, %v567_v1, 0 }
  0x6b   :  { %1677 = vmatprep.subr.bf16.mxu0 %v388_v38  ;;  %1730 = vmatprep.subr.bf16.mxu1 %v390_v40  ;;  %v8243_v42 = vpack.c.bf16 %v8234_v15, %v8229_v59  ;;  %v8263_v51 = vpack.c.bf16 %v8229_v59, %v8223_v37  ;;  %v568_v48 = vpack.c.bf16 %v8229_v59, %v8229_v59  ;;  %v12367_v40 = vld [vmem:[#allocation2_spill] sm:$0xff] }
  0x6c   :  { %1611 = vmatprep.mubr.bf16.mxu0 %v12366_v12  ;;  %1664 = vmatprep.mubr.bf16.mxu1 %v12366_v12  ;;  %v394_v38 = vpack.c.bf16 %v8082_v3, %v7734_v32 }
  0x6e   :  { %1678 = vmatpush1.bf16.msra.mxu0 %v387_v49  ;;  %1731 = vmatpush1.bf16.msra.mxu1 %v389_v57  ;;  %v391_v49 = vpack.c.bf16 %v8092_v18, %v7696_v24  ;;  %v8313_v24 = vld [vmem:[%s12148_s0 + $0x218] sm:$0xff]  ;;  %v8340_v18 = vld [vmem:[%s12148_s0 + $0x228] sm:$0xff] }
  0x6f   :  { %1679 = vmatprep.subr.bf16.mxu0 %v8031_v14  ;;  %1732 = vmatprep.subr.bf16.mxu1 %v512_v47  ;;  %v8333_v13 = vpack.c.bf16 %v8318_v26, %v8313_v24 }
  0x71   :  { %7091 = vmatmul.mubr.msk.bf16.gmra.mrb[36].mxu0 %vm705_vm1, %v7834_v61  ;;  %7094 = vmatmul.mubr.msk.bf16.gmra.mrb[36].mxu1 %vm705_vm1, %v7834_v61 }
  0x72   :  { %1680 = vmatpush1.bf16.msra.mxu0 %v8007_v52  ;;  %1733 = vmatpush1.bf16.msra.mxu1 %v8011_v56 }
  0x73   :  { %1681 = vmatprep.subr.bf16.mxu0 %v8239_v41  ;;  %1734 = vmatprep.subr.bf16.mxu1 %v8243_v42 }
  0x74   :  { %1707 = vmatprep.mubr.bf16.mxu0 %v12366_v12  ;;  %1760 = vmatprep.mubr.bf16.mxu1 %v12366_v12 }
  0x76   :  { %1682 = vmatpush1.bf16.msra.mxu0 %v8257_v36  ;;  %1735 = vmatpush1.bf16.msra.mxu1 %v8263_v51 }
  0x77   :  { %7095 = vmatprep.subr.msk.bf16.mxu0 %vm712_vm0, %v568_v48  ;;  %7098 = vmatprep.subr.msk.bf16.mxu1 %vm712_vm0, %v570_v11  ;;  %v572_v48 = vpack.c.bf16 %v8313_v24, %v8313_v24  ;;  %v574_v11 = vpack.c.bf16 %v8340_v18, %v8340_v18 }
  0x7a   :  { %1684 = vmatpush1.bf16.msra.mxu0 %v774_v30  ;;  %1737 = vmatpush1.bf16.msra.mxu1 %v780_v33  ;;  %v792_v33 = vsel %vm712_vm0, %v573_v28, 0 }
  0x7b   :  { %1781 = vmatprep.subr.bf16.mxu0 %v7719_v29  ;;  %1834 = vmatprep.subr.bf16.mxu1 %v7729_v31  ;;  %v8302_v29 = vld [vmem:[%s12148_s0 + $0x208] sm:$0xff]  ;;  %v8307_v31 = vld [vmem:[%s12148_s0 + $0x210] sm:$0xff] }
  0x7c   :  { %v8323_v32 = vpack.c.bf16 %v8307_v31, %v8302_v29  ;;  %v8353_v47 = vpack.c.bf16 %v8313_v24, %v8307_v31  ;;  %v571_v1 = vpack.c.bf16 %v8307_v31, %v8307_v31 }
  0x7d   :  { %7096 = vmatmul.mubr.msk.bf16.vlgmr.msra.gmra.mrb[40].mxu0 %vm705_vm1, %v7778_v46  ;;  %7099 = vmatmul.mubr.msk.bf16.vlgmr.msra.gmra.mrb[40].mxu1 %vm705_vm1, %v7778_v46 }
  0x7e   :  { %1782 = vmatpush1.bf16.msra.mxu0 %v12367_v40  ;;  %1835 = vmatpush1.bf16.msra.mxu1 %v7745_v34  ;;  %v8328_v34 = vld [vmem:[%s12148_s0 + $0x200] sm:$0xff]  ;;  %v786_v30 = vsel %vm712_vm0, %v571_v1, 0  ;;  %v8429_v40 = vpack.c.bf16 %v8340_v18, %v8318_v26 }
  0x7f   :  { %1783 = vmatprep.subr.bf16.mxu0 %v392_v35  ;;  %1836 = vmatprep.subr.bf16.mxu1 %v394_v38  ;;  %v8347_v57 = vpack.c.bf16 %v8302_v29, %v8328_v34  ;;  %v398_v35 = vpack.c.bf16 %v8157_v23, %v7870_v5  ;;  %v12368_v38 = vpack.c.bf16 %v7892_v10, %v7840_v62  ;;  %v8397_v5 = vld [vmem:[%s12148_s0 + $0x238] sm:$0xff]  ;;  %v8402_v62 = vld [vmem:[%s12148_s0 + $0x240] sm:$0xff] }
  0x80   :  { %1717 = vmatprep.mubr.bf16.mxu0 %v12366_v12  ;;  %1770 = vmatprep.mubr.bf16.mxu1 %v12366_v12 }
  0x82   :  { %1784 = vmatpush1.bf16.msra.mxu0 %v391_v49  ;;  %1837 = vmatpush1.bf16.msra.mxu1 %v393_v25  ;;  %v576_v25 = vpack.c.bf16 %v8397_v5, %v8397_v5 }
  0x83   :  { %1785 = vmatprep.subr.bf16.mxu0 %v8112_v27  ;;  %1838 = vmatprep.subr.bf16.mxu1 %v8176_v58 }
  0x85   :  { %7097 = vmatmul.mubr.msk.bf16.gmra.mrb[44].mxu0 %vm705_vm1, %v7834_v61  ;;  %7100 = vmatmul.mubr.msk.bf16.gmra.mrb[44].mxu1 %vm705_vm1, %v7834_v61 }
  0x86   :  { %1786 = vmatpush1.bf16.msra.mxu0 %v8087_v17  ;;  %1839 = vmatpush1.bf16.msra.mxu1 %v8097_v21 }
  0x87   :  { %1787 = vmatprep.subr.bf16.mxu0 %v8323_v32  ;;  %1840 = vmatprep.subr.bf16.mxu1 %v8333_v13 }
  0x88   :  { %1813 = vmatprep.mubr.bf16.mxu0 %v12366_v12  ;;  %1866 = vmatprep.mubr.bf16.mxu1 %v12366_v12 }
  0x8a   :  { %1788 = vmatpush1.bf16.msra.mxu0 %v8347_v57  ;;  %1841 = vmatpush1.bf16.msra.mxu1 %v8353_v47 }
  0x8b   :  { %7101 = vmatprep.subr.msk.bf16.mxu0 %vm712_vm0, %v572_v48  ;;  %7104 = vmatprep.subr.msk.bf16.mxu1 %vm712_vm0, %v574_v11  ;;  %v577_v11 = vpack.c.bf16 %v8402_v62, %v8402_v62 }
  0x8e   :  { %1790 = vmatpush1.bf16.msra.mxu0 %v786_v30  ;;  %1843 = vmatpush1.bf16.msra.mxu1 %v792_v33  ;;  %v804_v30 = vsel %vm712_vm0, %v577_v11, 0  ;;  %v402_v33 = vpack.c.bf16 %v8229_v59, %v8018_v8  ;;  %v8475_v8 = vld [vmem:[%s12148_s0 + $0x250] sm:$0xff] }
  0x8f   :  { %1887 = vmatprep.subr.bf16.mxu0 %v7858_v2  ;;  %1940 = vmatprep.subr.bf16.mxu1 %v7863_v4  ;;  %v397_v2 = vpack.c.bf16 %v8151_v55, %v7845_v63  ;;  %v8391_v4 = vld [vmem:[%s12148_s0 + $0x230] sm:$0xff]  ;;  %v12369_v63 = vpack.c.bf16 %v7906_v20, %v7829_v60  ;;  %v8422_v60 = vld [vmem:[%s12148_s0 + $0x248] sm:$0xff] }
  0x90   :  { %v8435_v49 = vpack.c.bf16 %v8397_v5, %v8391_v4  ;;  %v575_v48 = vpack.c.bf16 %v8391_v4, %v8391_v4  ;;  %v578_v1 = vpack.c.bf16 %v8422_v60, %v8422_v60 }
  0x91   :  { %7102 = vmatmul.mubr.msk.bf16.vlgmr.msra.gmra.mrb[48].mxu0 %vm705_vm1, %v7778_v46  ;;  %7105 = vmatmul.mubr.msk.bf16.vlgmr.msra.gmra.mrb[48].mxu1 %vm705_vm1, %v7778_v46 }
  0x92   :  { %1888 = vmatpush1.bf16.msra.mxu0 %v7877_v6  ;;  %1941 = vmatpush1.bf16.msra.mxu1 %v7883_v7  ;;  %v8410_v6 = vpack.c.bf16 %v8391_v4, %v8340_v18  ;;  %v8415_v7 = vpack.c.bf16 %v8402_v62, %v8397_v5  ;;  %v798_v28 = vsel %vm712_vm0, %v575_v48, 0  ;;  %v579_v48 = vpack.c.bf16 %v8475_v8, %v8475_v8 }
  0x93   :  { %1889 = vmatprep.subr.bf16.mxu0 %v12368_v38  ;;  %1942 = vmatprep.subr.bf16.mxu1 %v398_v35  ;;  %v12370_v35 = vpack.c.bf16 %v7942_v45, %v7932_v43  ;;  %v8481_v43 = vld [vmem:[%s12148_s0 + $0x258] sm:$0xff] }
  0x94   :  { %1823 = vmatprep.mubr.bf16.mxu0 %v12366_v12  ;;  %1876 = vmatprep.mubr.bf16.mxu1 %v12366_v12 }
  0x96   :  { %1890 = vmatpush1.bf16.msra.mxu0 %v12369_v63  ;;  %1943 = vmatpush1.bf16.msra.mxu1 %v397_v2  ;;  %v8512_v2 = vpack.c.bf16 %v8422_v60, %v8402_v62  ;;  %v8518_v63 = vpack.c.bf16 %v8481_v43, %v8475_v8 }
  0x97   :  { %1891 = vmatprep.subr.bf16.mxu0 %v8182_v0  ;;  %1944 = vmatprep.subr.bf16.mxu1 %v8257_v36 }
  0x99   :  { %7103 = vmatmul.mubr.msk.bf16.gmra.mrb[52].mxu0 %vm705_vm1, %v7834_v61  ;;  %7106 = vmatmul.mubr.msk.bf16.gmra.mrb[52].mxu1 %vm705_vm1, %v7834_v61 }
  0x9a   :  { %1892 = vmatpush1.bf16.msra.mxu0 %v8162_v53  ;;  %1945 = vmatpush1.bf16.msra.mxu1 %v8167_v54 }
  0x9b   :  { %1893 = vmatprep.subr.bf16.mxu0 %v8410_v6  ;;  %1946 = vmatprep.subr.bf16.mxu1 %v8415_v7 }
  0x9c   :  { %1919 = vmatprep.mubr.bf16.mxu0 %v12366_v12  ;;  %1972 = vmatprep.mubr.bf16.mxu1 %v12366_v12 }
  0x9e   :  { %1894 = vmatpush1.bf16.msra.mxu0 %v8429_v40  ;;  %1947 = vmatpush1.bf16.msra.mxu1 %v8435_v49 }
  0x9f   :  { %7107 = vmatprep.subr.msk.bf16.mxu0 %vm712_vm0, %v576_v25  ;;  %7110 = vmatprep.subr.msk.bf16.mxu1 %vm712_vm0, %v578_v1  ;;  %v580_v25 = vpack.c.bf16 %v8481_v43, %v8481_v43 }
  0xa2   :  { %1896 = vmatpush1.bf16.msra.mxu0 %v798_v28  ;;  %1949 = vmatpush1.bf16.msra.mxu1 %v804_v30  ;;  %v810_v28 = vsel %vm712_vm0, %v579_v48, 0 }
  0xa3   :  { %1993 = vmatprep.subr.bf16.mxu0 %v8007_v52  ;;  %2046 = vmatprep.subr.bf16.mxu1 %v8011_v56  ;;  %v401_v52 = vpack.c.bf16 %v8223_v37, %v7994_v19  ;;  %v513_v56 = vpack.c.bf16 %v8250_v50, %v8234_v15  ;;  %v8486_v19 = vld [vmem:[%s12148_s0 + $0x260] sm:$0xff] }
  0xa4   :  { %v8498_v38 = vpack.c.bf16 %v8486_v19, %v8481_v43  ;;  %v581_v11 = vpack.c.bf16 %v8486_v19, %v8486_v19 }
  0xa5   :  { %7108 = vmatmul.mubr.msk.bf16.vlgmr.msra.gmra.mrb[56].mxu0 %vm705_vm1, %v7778_v46  ;;  %7111 = vmatmul.mubr.msk.bf16.vlgmr.msra.gmra.mrb[56].mxu1 %vm705_vm1, %v7778_v46 }
  0xa6   :  { %1994 = vmatpush1.bf16.msra.mxu0 %v8025_v9  ;;  %2047 = vmatpush1.bf16.msra.mxu1 %v8031_v14  ;;  %v12371_v9 = vpack.c.bf16 %v7937_v44, %v7923_v39  ;;  %v8494_v14 = vpack.c.bf16 %v8475_v8, %v8422_v60  ;;  %v8505_v39 = vld [vmem:[%s12148_s0 + $0x268] sm:$0xff]  ;;  %v816_v30 = vsel %vm712_vm0, %v581_v11, 0 }
  0xa7   :  { %1995 = vmatprep.subr.bf16.mxu0 %v12370_v35  ;;  %2048 = vmatprep.subr.bf16.mxu1 %v402_v33  ;;  %v582_v1 = vpack.c.bf16 %v8505_v39, %v8505_v39  ;;  %v404_v33 = vpack.c.bf16 %v8302_v29, %v8082_v3  ;;  %v406_v35 = vpack.c.bf16 %v8313_v24, %v7892_v10  ;;  %v8557_v10 = vld [vmem:[%s12148_s0 + $0x288] sm:$0xff] }
  0xa8   :  { %1929 = vmatprep.mubr.bf16.mxu0 %v12366_v12  ;;  %1982 = vmatprep.mubr.bf16.mxu1 %v12366_v12  ;;  %v405_v3 = vpack.c.bf16 %v8307_v31, %v7906_v20  ;;  %v8573_v20 = vld [vmem:[%s12148_s0 + $0x2a0] sm:$0xff]  ;;  %v8595_v29 = vld [vmem:[%s12148_s0 + $0x2a8] sm:$0xff] }
  0xa9   :  { %v586_v48 = vpack.c.bf16 %v8595_v29, %v8595_v29 }
  0xaa   :  { %1996 = vmatpush1.bf16.msra.mxu0 %v12371_v9  ;;  %2049 = vmatpush1.bf16.msra.mxu1 %v401_v52  ;;  %v403_v52 = vpack.c.bf16 %v8328_v34, %v8076_v16  ;;  %v8568_v16 = vld [vmem:[%s12148_s0 + $0x298] sm:$0xff] }
  0xab   :  { %1997 = vmatprep.subr.bf16.mxu0 %v8263_v51  ;;  %2050 = vmatprep.subr.bf16.mxu1 %v513_v56  ;;  %v584_v9 = vpack.c.bf16 %v8568_v16, %v8568_v16 }
  0xad   :  { %7109 = vmatmul.mubr.msk.bf16.gmra.mrb[60].mxu0 %vm705_vm1, %v7834_v61  ;;  %7112 = vmatmul.mubr.msk.bf16.gmra.mrb[60].mxu1 %vm705_vm1, %v7834_v61 }
  0xae   :  { %1998 = vmatpush1.bf16.msra.mxu0 %v8239_v41  ;;  %2051 = vmatpush1.bf16.msra.mxu1 %v8243_v42 }
  0xaf   :  { %1999 = vmatprep.subr.bf16.mxu0 %v8494_v14  ;;  %2052 = vmatprep.subr.bf16.mxu1 %v8498_v38 }
  0xb0   :  { %2025 = vmatprep.mubr.bf16.mxu0 %v12366_v12  ;;  %2078 = vmatprep.mubr.bf16.mxu1 %v12366_v12 }
  0xb2   :  { %2000 = vmatpush1.bf16.msra.mxu0 %v8512_v2  ;;  %2053 = vmatpush1.bf16.msra.mxu1 %v8518_v63 }
  0xb3   :  { %7113 = vmatprep.subr.msk.bf16.mxu0 %vm712_vm0, %v580_v25  ;;  %7116 = vmatprep.subr.msk.bf16.mxu1 %vm712_vm0, %v582_v1  ;;  %v585_v1 = vpack.c.bf16 %v8573_v20, %v8573_v20 }
  0xb6   :  { %2002 = vmatpush1.bf16.msra.mxu0 %v810_v28  ;;  %2055 = vmatpush1.bf16.msra.mxu1 %v816_v30  ;;  %v828_v28 = vsel %vm712_vm0, %v585_v1, 0  ;;  %v408_v30 = vpack.c.bf16 %v8340_v18, %v8157_v23  ;;  %v409_v23 = vpack.c.bf16 %v8391_v4, %v7937_v44 }
  0xb7   :  { %2099 = vmatprep.subr.bf16.mxu0 %v8087_v17  ;;  %2152 = vmatprep.subr.bf16.mxu1 %v8097_v21  ;;  %v8562_v17 = vld [vmem:[%s12148_s0 + $0x290] sm:$0xff] }
  0xb8   :  { %v8578_v21 = vpack.c.bf16 %v8562_v17, %v8557_v10  ;;  %v8608_v56 = vpack.c.bf16 %v8568_v16, %v8562_v17  ;;  %v583_v25 = vpack.c.bf16 %v8562_v17, %v8562_v17 }
  0xb9   :  { %7114 = vmatmul.mubr.msk.bf16.vlgmr.msra.gmra.mrb[64].mxu0 %vm705_vm1, %v7778_v46  ;;  %7117 = vmatmul.mubr.msk.bf16.vlgmr.msra.gmra.mrb[64].mxu1 %vm705_vm1, %v7778_v46 }
  0xba   :  { %2100 = vmatpush1.bf16.msra.mxu0 %v8106_v22  ;;  %2153 = vmatpush1.bf16.msra.mxu1 %v8112_v27  ;;  %v8583_v22 = vld [vmem:[%s12148_s0 + $0x280] sm:$0xff]  ;;  %v8588_v27 = vpack.c.bf16 %v8573_v20, %v8568_v16  ;;  %v822_v11 = vsel %vm712_vm0, %v583_v25, 0 }
  0xbb   :  { %2101 = vmatprep.subr.bf16.mxu0 %v404_v33  ;;  %2154 = vmatprep.subr.bf16.mxu1 %v406_v35  ;;  %v8602_v34 = vpack.c.bf16 %v8557_v10, %v8583_v22  ;;  %v410_v33 = vpack.c.bf16 %v8397_v5, %v7942_v45  ;;  %v407_v35 = vpack.c.bf16 %v8318_v26, %v8151_v55  ;;  %v8647_v45 = vld [vmem:[%s12148_s0 + $0x2b0] sm:$0xff]  ;;  %v8653_v55 = vld [vmem:[%s12148_s0 + $0x2b8] sm:$0xff] }
  0xbc   :  { %2035 = vmatprep.mubr.bf16.mxu0 %v12366_v12  ;;  %2088 = vmatprep.mubr.bf16.mxu1 %v12366_v12  ;;  %v8663_v44 = vpack.c.bf16 %v8647_v45, %v8595_v29 }
  0xbd   :  { %12372 = vst [vmem:[#allocation2_spill] sm:$0xff] %v8602_v34 }
  0xbe   :  { %2102 = vmatpush1.bf16.msra.mxu0 %v403_v52  ;;  %2155 = vmatpush1.bf16.msra.mxu1 %v405_v3  ;;  %v8688_v52 = vpack.c.bf16 %v8653_v55, %v8647_v45  ;;  %v588_v3 = vpack.c.bf16 %v8653_v55, %v8653_v55 }
  0xbf   :  { %2103 = vmatprep.subr.bf16.mxu0 %v8353_v47  ;;  %2156 = vmatprep.subr.bf16.mxu1 %v8429_v40 }
  0xc1   :  { %7115 = vmatmul.mubr.msk.bf16.gmra.mrb[68].mxu0 %vm705_vm1, %v7834_v61  ;;  %7118 = vmatmul.mubr.msk.bf16.gmra.mrb[68].mxu1 %vm705_vm1, %v7834_v61 }
  0xc2   :  { %2104 = vmatpush1.bf16.msra.mxu0 %v8323_v32  ;;  %2157 = vmatpush1.bf16.msra.mxu1 %v8333_v13 }
  0xc3   :  { %2105 = vmatprep.subr.bf16.mxu0 %v8578_v21  ;;  %2158 = vmatprep.subr.bf16.mxu1 %v8588_v27 }
  0xc4   :  { %2131 = vmatprep.mubr.bf16.mxu0 %v12366_v12  ;;  %2184 = vmatprep.mubr.bf16.mxu1 %v12366_v12 }
  0xc6   :  { %2106 = vmatpush1.bf16.msra.mxu0 %v8602_v34  ;;  %2159 = vmatpush1.bf16.msra.mxu1 %v8608_v56 }
  0xc7   :  { %7119 = vmatprep.subr.msk.bf16.mxu0 %vm712_vm0, %v584_v9  ;;  %7122 = vmatprep.subr.msk.bf16.mxu1 %vm712_vm0, %v586_v48  ;;  %v587_v9 = vpack.c.bf16 %v8647_v45, %v8647_v45 }
  0xc9   :  { %v834_v1 = vsel %vm712_vm0, %v587_v9, 0 }
  0xca   :  { %2108 = vmatpush1.bf16.msra.mxu0 %v822_v11  ;;  %2161 = vmatpush1.bf16.msra.mxu1 %v828_v28  ;;  %v412_v28 = vpack.c.bf16 %v8422_v60, %v8229_v59  ;;  %v413_v59 = vpack.c.bf16 %v8475_v8, %v8234_v15  ;;  %v8740_v15 = vld [vmem:[%s12148_s0 + $0x2e0] sm:$0xff] }
  0xcb   :  { %2205 = vmatprep.subr.bf16.mxu0 %v8162_v53  ;;  %2258 = vmatprep.subr.bf16.mxu1 %v8167_v54  ;;  %v8658_v53 = vld [vmem:[%s12148_s0 + $0x2c0] sm:$0xff]  ;;  %12375 = vst [vmem:[#allocation5_spill] sm:$0xff] %v8740_v15 }
  0xcc   :  { %v8668_v54 = vpack.c.bf16 %v8658_v53, %v8653_v55  ;;  %v589_v48 = vpack.c.bf16 %v8658_v53, %v8658_v53 }
  0xcd   :  { %7120 = vmatmul.mubr.msk.bf16.vlgmr.msra.gmra.mrb[72].mxu0 %vm705_vm1, %v7778_v46  ;;  %7123 = vmatmul.mubr.msk.bf16.vlgmr.msra.gmra.mrb[72].mxu1 %vm705_vm1, %v7778_v46 }
  0xce   :  { %2206 = vmatpush1.bf16.msra.mxu0 %v8176_v58  ;;  %2259 = vmatpush1.bf16.msra.mxu1 %v8182_v0  ;;  %v8675_v58 = vld [vmem:[%s12148_s0 + $0x2c8] sm:$0xff]  ;;  %v8682_v0 = vpack.c.bf16 %v8595_v29, %v8573_v20  ;;  %v840_v11 = vsel %vm712_vm0, %v589_v48, 0 }
  0xcf   :  { %2207 = vmatprep.subr.bf16.mxu0 %v408_v30  ;;  %2260 = vmatprep.subr.bf16.mxu1 %v410_v33  ;;  %v590_v25 = vpack.c.bf16 %v8675_v58, %v8675_v58  ;;  %v414_v30 = vpack.c.bf16 %v8481_v43, %v8250_v50  ;;  %v411_v33 = vpack.c.bf16 %v8402_v62, %v8223_v37  ;;  %v8735_v37 = vld [vmem:[%s12148_s0 + $0x2d8] sm:$0xff] }
  0xd0   :  { %2141 = vmatprep.mubr.bf16.mxu0 %v12366_v12  ;;  %2194 = vmatprep.mubr.bf16.mxu1 %v12366_v12  ;;  %12373 = vst [vmem:[#allocation3_spill] sm:$0xff] %v8682_v0  ;;  %v8749_v50 = vpack.c.bf16 %v8740_v15, %v8735_v37 }
  0xd2   :  { %2208 = vmatpush1.bf16.msra.mxu0 %v407_v35  ;;  %2261 = vmatpush1.bf16.msra.mxu1 %v409_v23  ;;  %12377 = vst [vmem:[#allocation7_spill] sm:$0xff] %v8749_v50  ;;  %v592_v23 = vpack.c.bf16 %v8735_v37, %v8735_v37 }
  0xd3   :  { %2209 = vmatprep.subr.bf16.mxu0 %v8435_v49  ;;  %2262 = vmatprep.subr.bf16.mxu1 %v8512_v2 }
  0xd5   :  { %7121 = vmatmul.mubr.msk.bf16.gmra.mrb[76].mxu0 %vm705_vm1, %v7834_v61  ;;  %7124 = vmatmul.mubr.msk.bf16.gmra.mrb[76].mxu1 %vm705_vm1, %v7834_v61 }
  0xd6   :  { %2210 = vmatpush1.bf16.msra.mxu0 %v8410_v6  ;;  %2263 = vmatpush1.bf16.msra.mxu1 %v8415_v7 }
  0xd7   :  { %2211 = vmatprep.subr.bf16.mxu0 %v8663_v44  ;;  %2264 = vmatprep.subr.bf16.mxu1 %v8668_v54 }
  0xd8   :  { %2237 = vmatprep.mubr.bf16.mxu0 %v12366_v12  ;;  %2290 = vmatprep.mubr.bf16.mxu1 %v12366_v12 }
  0xda   :  { %2212 = vmatpush1.bf16.msra.mxu0 %v8682_v0  ;;  %2265 = vmatpush1.bf16.msra.mxu1 %v8688_v52 }
  0xdb   :  { %7125 = vmatprep.subr.msk.bf16.mxu0 %vm712_vm0, %v588_v3  ;;  %7128 = vmatprep.subr.msk.bf16.mxu1 %vm712_vm0, %v590_v25  ;;  %v593_v25 = vpack.c.bf16 %v8740_v15, %v8740_v15 }
  0xde   :  { %2214 = vmatpush1.bf16.msra.mxu0 %v834_v1  ;;  %2267 = vmatpush1.bf16.msra.mxu1 %v840_v11 }
  0xdf   :  { %2311 = vmatprep.subr.bf16.mxu0 %v8239_v41  ;;  %2364 = vmatprep.subr.bf16.mxu1 %v8243_v42  ;;  %v514_v41 = vpack.c.bf16 %v8505_v39, %v8486_v19 }
  0xe1   :  { %7126 = vmatmul.mubr.msk.bf16.vlgmr.msra.gmra.mrb[80].mxu0 %vm705_vm1, %v7778_v46  ;;  %7129 = vmatmul.mubr.msk.bf16.vlgmr.msra.gmra.mrb[80].mxu1 %vm705_vm1, %v7778_v46  ;;  %v8729_v46 = vld [vmem:[%s12148_s0 + $0x2d0] sm:$0xff] }
  0xe2   :  { %2312 = vmatpush1.bf16.msra.mxu0 %v8257_v36  ;;  %2365 = vmatpush1.bf16.msra.mxu1 %v8263_v51  ;;  %12374 = vst [vmem:[#allocation4_spill] sm:$0xff] %v8729_v46  ;;  %v8745_v42 = vpack.c.bf16 %v8729_v46, %v8675_v58  ;;  %v8756_v36 = vld [vmem:[%s12148_s0 + $0x2e8] sm:$0xff]  ;;  %v8763_v51 = vpack.c.bf16 %v8675_v58, %v8658_v53 }
  0xe3   :  { %2313 = vmatprep.subr.bf16.mxu0 %v412_v28  ;;  %2366 = vmatprep.subr.bf16.mxu1 %v414_v30  ;;  %12378 = vst [vmem:[#allocation8_spill] sm:$0xff] %v8756_v36  ;;  %v8769_v35 = vpack.c.bf16 %v8735_v37, %v8729_v46  ;;  %v594_v9 = vpack.c.bf16 %v8756_v36, %v8756_v36 }
  0xe4   :  { %2247 = vmatprep.mubr.bf16.mxu0 %v12366_v12  ;;  %2300 = vmatprep.mubr.bf16.mxu1 %v12366_v12  ;;  %12376 = vst [vmem:[#allocation6_spill] sm:$0xff] %v8745_v42  ;;  %12379 = vst [vmem:[#allocation9_spill] sm:$0xff] %v8763_v51 }
  0xe5   :  { %12380 = vst [vmem:[#allocation10_spill] sm:$0xff] %v8769_v35 }
  0xe6   :  { %2314 = vmatpush1.bf16.msra.mxu0 %v411_v33  ;;  %2367 = vmatpush1.bf16.msra.mxu1 %v413_v59 }
  0xe7   :  { %2315 = vmatprep.subr.bf16.mxu0 %v8518_v63  ;;  %2368 = vmatprep.subr.bf16.mxu1 %v514_v41 }
  0xe9   :  { %7127 = vmatmul.mubr.msk.bf16.gmra.mrb[84].mxu0 %vm705_vm1, %v7834_v61  ;;  %7130 = vmatmul.mubr.msk.bf16.gmra.mrb[84].mxu1 %vm705_vm1, %v7834_v61  ;;  %v591_v61 = vpack.c.bf16 %v8729_v46, %v8729_v46 }
  0xea   :  { %2316 = vmatpush1.bf16.msra.mxu0 %v8494_v14  ;;  %2369 = vmatpush1.bf16.msra.mxu1 %v8498_v38 }
  0xeb   :  { %2317 = vmatprep.subr.bf16.mxu0 %v8745_v42  ;;  %2370 = vmatprep.subr.bf16.mxu1 %v8749_v50  ;;  %v846_v59 = vsel %vm712_vm0, %v591_v61, 0  ;;  %v852_v50 = vsel %vm712_vm0, %v593_v25, 0 }
  0xec   :  { %v1179_v3 = vpop.f32.mrb[0].mxu0  ;;  %2343 = vmatprep.mubr.bf16.mxu0 %v12366_v12  ;;  %v1232_v1 = vpop.f32.mrb[0].mxu1  ;;  %2396 = vmatprep.mubr.bf16.mxu1 %v12366_v12 }
  0xed   :  { %v1181_v48 = vpop.f32.mrb[1].mxu0  ;;  %v1234_v28 = vpop.f32.mrb[1].mxu1 }
  0xee   :  { %v1183_v11 = vpop.f32.mrb[2].mxu0  ;;  %2318 = vmatpush1.bf16.msra.mxu0 %v8763_v51  ;;  %2371 = vmatpush1.bf16.msra.mxu1 %v8769_v35  ;;  %v1236_v41 = vpop.f32.mrb[2].mxu1 }
  0xef   :  { %v4961_v30 = vpack.c.bf16 %v1183_v11, %v1179_v3  ;;  %v1185_v33 = vpop.f32.mrb[3].mxu0  ;;  %7131 = vmatprep.subr.msk.bf16.mxu0 %vm712_vm0, %v592_v23  ;;  %7134 = vmatprep.subr.msk.bf16.mxu1 %vm712_vm0, %v594_v9  ;;  %v4963_v42 = vpack.c.bf16 %v1236_v41, %v1232_v1  ;;  %v1238_v36 = vpop.f32.mrb[3].mxu1  ;;  %v416_v23 = vpack.c.bf16 %v8557_v10, %v8313_v24  ;;  %v8833_v1 = vld [vmem:[%s12148_s0 + $0x320] sm:$0xff]  ;;  %v8857_v41 = vld [vmem:[%s12149_s1 + $0x8] sm:$0xff]  }
  0xf0   :  { %v4962_v34 = vpack.c.bf16 %v1185_v33, %v1181_v48  ;;  %v4964_v15 = vpack.c.bf16 %v1238_v36, %v1234_v28  ;;  %v418_v9 = vpack.c.bf16 %v8568_v16, %v8340_v18  ;;  %v8847_v33 = vld [vmem:[%s12148_s0 + $0x300] sm:$0xff] }
  0xf2   :  { %v8788_v46 = vmax.bf16 %v4962_v34, %v4961_v30  ;;  %2320 = vmatpush1.bf16.msra.mxu0 %v846_v59  ;;  %2373 = vmatpush1.bf16.msra.mxu1 %v852_v50  ;;  %v8790_v3 = vmax.bf16 %v4964_v15, %v4963_v42  ;;  %v8801_v34 = vld [vmem:[%s12149_s1] sm:$0xff]   ;;  %v417_v50 = vpack.c.bf16 %v8562_v17, %v8318_v26 }
  0xf3   :  { %2417 = vmatprep.subr.bf16.mxu0 %v8323_v32  ;;  %2470 = vmatprep.subr.bf16.mxu1 %v8333_v13  ;;  %v415_v32 = vpack.c.bf16 %v8583_v22, %v8307_v31  ;;  %v8817_v31 = vld [vmem:[%s12148_s0 + $0x308] sm:$0xff]  ;;  %v8828_v22 = vld [vmem:[%s12148_s0 + $0x318] sm:$0xff] }
  0xf4   :  { %12381 = vst [vmem:[#allocation11_spill] sm:$0xff] %v8788_v46  ;;  %v1189_v61 = vpop.f32.mrb[4].mxu0  ;;  %v1242_v42 = vpop.f32.mrb[4].mxu1  ;;  %v8852_v59 = vpack.c.bf16 %v8833_v1, %v8828_v22 }
  0xf5   :  { %7132 = vmatmul.mubr.msk.bf16.vlgmr.msra.gmra.mrb[88].mxu0 %vm705_vm1, %v8801_v34  ;;  %v1191_v15 = vpop.f32.mrb[5].mxu0  ;;  %7135 = vmatmul.mubr.msk.bf16.vlgmr.msra.gmra.mrb[88].mxu1 %vm705_vm1, %v8801_v34  ;;  %v1244_v13 = vpop.f32.mrb[5].mxu1 }
  0xf6   :  { %2418 = vmatpush1.bf16.msra.mxu0 %v8347_v57  ;;  %v1193_v24 = vpop.f32.mrb[6].mxu0  ;;  %2471 = vmatpush1.bf16.msra.mxu1 %v8353_v47  ;;  %v1246_v36 = vpop.f32.mrb[6].mxu1  ;;  %v8822_v47 = vld [vmem:[%s12148_s0 + $0x310] sm:$0xff]  ;;  %12386 = vst [vmem:[#allocation16_spill] sm:$0xff] %v8852_v59 }
  0xf7   :  { %v5105_v18 = vpack.c.bf16 %v1193_v24, %v1189_v61  ;;  %v1195_v10 = vpop.f32.mrb[7].mxu0  ;;  %2419 = vmatprep.subr.bf16.mxu0 %v416_v23  ;;  %2472 = vmatprep.subr.bf16.mxu1 %v418_v9  ;;  %v5107_v48 = vpack.c.bf16 %v1246_v36, %v1242_v42  ;;  %v1248_v57 = vpop.f32.mrb[7].mxu1  ;;  %12382 = vst [vmem:[#allocation12_spill] sm:$0xff] %v8822_v47  ;;  %v8864_v23 = vld [vmem:[%s12148_s0 + $0x328] sm:$0xff] }
  0xf8   :  { %v5106_v25 = vpack.c.bf16 %v1195_v10, %v1191_v15  ;;  %2353 = vmatprep.mubr.bf16.mxu0 %v12366_v12  ;;  %2406 = vmatprep.mubr.bf16.mxu1 %v12366_v12  ;;  %v5108_v26 = vpack.c.bf16 %v1248_v57, %v1244_v13  ;;  %v8842_v30 = vpack.c.bf16 %v8822_v47, %v8817_v31 }
  0xf9   :  { %v8871_v61 = vpack.c.bf16 %v8817_v31, %v8847_v33  ;;  %v8877_v9 = vpack.c.bf16 %v8828_v22, %v8822_v47  ;;  %v596_v15 = vpack.c.bf16 %v8828_v22, %v8828_v22  ;;  %v595_v42 = vpack.c.bf16 %v8822_v47, %v8822_v47 }
  0xfa   :  { %v8835_v11 = vmax.bf16 %v5106_v25, %v5105_v18  ;;  %2420 = vmatpush1.bf16.msra.mxu0 %v415_v32  ;;  %2473 = vmatpush1.bf16.msra.mxu1 %v417_v50  ;;  %v8838_v28 = vmax.bf16 %v5108_v26, %v5107_v48  ;;  %12385 = vst [vmem:[#allocation15_spill] sm:$0xff] %v8842_v30 }
  0xfb   :  { %2421 = vmatprep.subr.bf16.mxu0 %v8608_v56  ;;  %2474 = vmatprep.subr.bf16.mxu1 %v8682_v0  ;;  %12387 = vst [vmem:[#allocation17_spill] sm:$0xff] %v8871_v61  ;;  %v598_v32 = vpack.c.bf16 %v8864_v23, %v8864_v23  ;;  %v597_v13 = vpack.c.bf16 %v8833_v1, %v8833_v1  ;;  %v858_v57 = vsel %vm712_vm0, %v595_v42, 0 }
  0xfc   :  { %12383 = vst [vmem:[#allocation13_spill] sm:$0xff] %v8835_v11  ;;  %12384 = vst [vmem:[#allocation14_spill] sm:$0xff] %v8838_v28 }
  0xfd   :  { %7133 = vmatmul.mubr.msk.bf16.gmra.mrb[92].mxu0 %vm705_vm1, %v8857_v41  ;;  %7136 = vmatmul.mubr.msk.bf16.gmra.mrb[92].mxu1 %vm705_vm1, %v8857_v41 }
  0xfe   :  { %2422 = vmatpush1.bf16.msra.mxu0 %v8578_v21  ;;  %2475 = vmatpush1.bf16.msra.mxu1 %v8588_v27 }
  0xff   :  { %2423 = vmatprep.subr.bf16.mxu0 %v8842_v30  ;;  %2476 = vmatprep.subr.bf16.mxu1 %v8852_v59  ;;  %v864_v59 = vsel %vm712_vm0, %v597_v13, 0 }
 0x100   :  { %v1285_v24 = vpop.f32.mrb[8].mxu0  ;;  %2449 = vmatprep.mubr.bf16.mxu0 %v12366_v12  ;;  %v1338_v10 = vpop.f32.mrb[8].mxu1  ;;  %2502 = vmatprep.mubr.bf16.mxu1 %v12366_v12 }
 0x101   :  { %v1287_v18 = vpop.f32.mrb[9].mxu0  ;;  %v1340_v36 = vpop.f32.mrb[9].mxu1 }
 0x102   :  { %v1289_v50 = vpop.f32.mrb[10].mxu0  ;;  %2424 = vmatpush1.bf16.msra.mxu0 %v8871_v61  ;;  %2477 = vmatpush1.bf16.msra.mxu1 %v8877_v9  ;;  %v1342_v26 = vpop.f32.mrb[10].mxu1 }
 0x103   :  { %v4965_v25 = vpack.c.bf16 %v1289_v50, %v1285_v24  ;;  %v1291_v48 = vpop.f32.mrb[11].mxu0  ;;  %7137 = vmatprep.subr.msk.bf16.mxu0 %vm712_vm0, %v596_v15  ;;  %7140 = vmatprep.subr.msk.bf16.mxu1 %vm712_vm0, %v598_v32  ;;  %v4967_v30 = vpack.c.bf16 %v1342_v26, %v1338_v10  ;;  %v1344_v28 = vpop.f32.mrb[11].mxu1  ;;  %v420_v15 = vpack.c.bf16 %v8595_v29, %v8397_v5 }
 0x104   :  { %v4966_v0 = vpack.c.bf16 %v1291_v48, %v1287_v18  ;;  %v4968_v11 = vpack.c.bf16 %v1344_v28, %v1340_v36  ;;  %v422_v32 = vpack.c.bf16 %v8653_v55, %v8422_v60  ;;  %v419_v5 = vpack.c.bf16 %v8573_v20, %v8391_v4  ;;  %v8920_v4 = vld [vmem:[%s12148_s0 + $0x330] sm:$0xff] }
 0x105   :  { %v421_v60 = vpack.c.bf16 %v8647_v45, %v8402_v62  ;;  %v8931_v62 = vld [vmem:[%s12148_s0 + $0x340] sm:$0xff]  ;;  %v8959_v26 = vpack.c.bf16 %v8864_v23, %v8833_v1 }
 0x106   :  { %v8896_v47 = vmax.bf16 %v4966_v0, %v4965_v25  ;;  %2426 = vmatpush1.bf16.msra.mxu0 %v858_v57  ;;  %2479 = vmatpush1.bf16.msra.mxu1 %v864_v59  ;;  %v8898_v24 = vmax.bf16 %v4968_v11, %v4967_v30  ;;  %v8940_v25 = vpack.c.bf16 %v8920_v4, %v8864_v23  ;;  %v8952_v57 = vld [vmem:[%s12148_s0 + $0x348] sm:$0xff] }
 0x107   :  { %2523 = vmatprep.subr.bf16.mxu0 %v8410_v6  ;;  %2576 = vmatprep.subr.bf16.mxu1 %v8415_v7  ;;  %12390 = vst [vmem:[#allocation20_spill] sm:$0xff] %v8959_v26 }
 0x108   :  { %v1295_v42 = vpop.f32.mrb[12].mxu0  ;;  %v1348_v28 = vpop.f32.mrb[12].mxu1  ;;  %12388 = vst [vmem:[#allocation18_spill] sm:$0xff] %v8940_v25 }
 0x109   :  { %7138 = vmatmul.mubr.msk.bf16.vlgmr.msra.gmra.mrb[96].mxu0 %vm705_vm1, %v8801_v34  ;;  %v1297_v0 = vpop.f32.mrb[13].mxu0  ;;  %7141 = vmatmul.mubr.msk.bf16.vlgmr.msra.gmra.mrb[96].mxu1 %vm705_vm1, %v8801_v34  ;;  %v1350_v11 = vpop.f32.mrb[13].mxu1 }
 0x10a   :  { %2524 = vmatpush1.bf16.msra.mxu0 %v8429_v40  ;;  %v1299_v6 = vpop.f32.mrb[14].mxu0  ;;  %2577 = vmatpush1.bf16.msra.mxu1 %v8435_v49  ;;  %v1352_v59 = vpop.f32.mrb[14].mxu1  ;;  %v8926_v49 = vld [vmem:[%s12148_s0 + $0x338] sm:$0xff] }
 0x10b   :  { %v5109_v7 = vpack.c.bf16 %v1299_v6, %v1295_v42  ;;  %v1301_v30 = vpop.f32.mrb[15].mxu0  ;;  %2525 = vmatprep.subr.bf16.mxu0 %v420_v15  ;;  %2578 = vmatprep.subr.bf16.mxu1 %v422_v32  ;;  %v5111_v18 = vpack.c.bf16 %v1352_v59, %v1348_v28  ;;  %v1354_v40 = vpop.f32.mrb[15].mxu1  ;;  %v8945_v48 = vpack.c.bf16 %v8931_v62, %v8926_v49 }
 0x10c   :  { %v5110_v13 = vpack.c.bf16 %v1301_v30, %v1297_v0  ;;  %2459 = vmatprep.mubr.bf16.mxu0 %v12366_v12  ;;  %v5112_v10 = vpack.c.bf16 %v1354_v40, %v1350_v11  ;;  %2512 = vmatprep.mubr.bf16.mxu1 %v12366_v12  ;;  %v8965_v15 = vpack.c.bf16 %v8926_v49, %v8920_v4 }
 0x10d   :  { %12389 = vst [vmem:[#allocation19_spill] sm:$0xff] %v8945_v48  ;;  %v600_v42 = vpack.c.bf16 %v8926_v49, %v8926_v49  ;;  %v599_v32 = vpack.c.bf16 %v8920_v4, %v8920_v4  ;;  %v602_v28 = vpack.c.bf16 %v8952_v57, %v8952_v57  ;;  %v601_v6 = vpack.c.bf16 %v8931_v62, %v8931_v62 }
 0x10e   :  { %v8933_v50 = vmax.bf16 %v5110_v13, %v5109_v7  ;;  %2526 = vmatpush1.bf16.msra.mxu0 %v419_v5  ;;  %2579 = vmatpush1.bf16.msra.mxu1 %v421_v60  ;;  %v8936_v36 = vmax.bf16 %v5112_v10, %v5111_v18 }
 0x10f   :  { %2527 = vmatprep.subr.bf16.mxu0 %v8688_v52  ;;  %2580 = vmatprep.subr.bf16.mxu1 %v8763_v51  ;;  %v870_v13 = vsel %vm712_vm0, %v599_v32, 0  ;;  %v876_v10 = vsel %vm712_vm0, %v601_v6, 0 }
 0x111   :  { %7139 = vmatmul.mubr.msk.bf16.gmra.mrb[100].mxu0 %vm705_vm1, %v8857_v41  ;;  %7142 = vmatmul.mubr.msk.bf16.gmra.mrb[100].mxu1 %vm705_vm1, %v8857_v41 }
 0x112   :  { %2528 = vmatpush1.bf16.msra.mxu0 %v8663_v44  ;;  %2581 = vmatpush1.bf16.msra.mxu1 %v8668_v54 }
 0x113   :  { %2529 = vmatprep.subr.bf16.mxu0 %v8940_v25  ;;  %2582 = vmatprep.subr.bf16.mxu1 %v8945_v48 }
 0x114   :  { %v1391_v0 = vpop.f32.mrb[16].mxu0  ;;  %2555 = vmatprep.mubr.bf16.mxu0 %v12366_v12  ;;  %v1444_v11 = vpop.f32.mrb[16].mxu1  ;;  %2608 = vmatprep.mubr.bf16.mxu1 %v12366_v12 }
 0x115   :  { %v1393_v5 = vpop.f32.mrb[17].mxu0  ;;  %v1446_v30 = vpop.f32.mrb[17].mxu1 }
 0x116   :  { %v1395_v7 = vpop.f32.mrb[18].mxu0  ;;  %2530 = vmatpush1.bf16.msra.mxu0 %v8959_v26  ;;  %2583 = vmatpush1.bf16.msra.mxu1 %v8965_v15  ;;  %v1448_v18 = vpop.f32.mrb[18].mxu1 }
 0x117   :  { %v4969_v60 = vpack.c.bf16 %v1395_v7, %v1391_v0  ;;  %v1397_v59 = vpop.f32.mrb[19].mxu0  ;;  %7143 = vmatprep.subr.msk.bf16.mxu0 %vm712_vm0, %v600_v42  ;;  %7146 = vmatprep.subr.msk.bf16.mxu1 %vm712_vm0, %v602_v28  ;;  %v4971_v61 = vpack.c.bf16 %v1448_v18, %v1444_v11  ;;  %v1450_v51 = vpop.f32.mrb[19].mxu1  ;;  %v424_v42 = vpack.c.bf16 %v8675_v58, %v8481_v43  ;;  %v9021_v18 = vld [vmem:[%s12148_s0 + $0x360] sm:$0xff] }
 0x118   :  { %v4970_v40 = vpack.c.bf16 %v1397_v59, %v1393_v5  ;;  %v4972_v48 = vpack.c.bf16 %v1450_v51, %v1446_v30  ;;  %v426_v28 = vpack.c.bf16 %v8735_v37, %v8505_v39  ;;  %v423_v43 = vpack.c.bf16 %v8658_v53, %v8475_v8  ;;  %v12392_v39 = vld [vmem:[#allocation4_spill] sm:$0xff]  ;;  %v12393_v30 = vld [vmem:[#allocation5_spill] sm:$0xff] }
 0x119   :  { %v425_v5 = vpack.c.bf16 %v12392_v39, %v8486_v19  ;;  %v9010_v8 = vld [vmem:[%s12148_s0 + $0x350] sm:$0xff]  ;;  %v9016_v19 = vld [vmem:[%s12148_s0 + $0x358] sm:$0xff] }
 0x11a   :  { %v8984_v25 = vmax.bf16 %v4970_v40, %v4969_v60  ;;  %2532 = vmatpush1.bf16.msra.mxu0 %v870_v13  ;;  %2585 = vmatpush1.bf16.msra.mxu1 %v876_v10  ;;  %v8986_v0 = vmax.bf16 %v4972_v48, %v4971_v61  ;;  %v12394_v60 = vld [vmem:[#allocation8_spill] sm:$0xff]  ;;  %12395 = vst [vmem:[#allocation4_spill] sm:$0xff] %v9010_v8 }
 0x11b   :  { %2629 = vmatprep.subr.bf16.mxu0 %v8494_v14  ;;  %2682 = vmatprep.subr.bf16.mxu1 %v8498_v38  ;;  %v515_v59 = vpack.c.bf16 %v12394_v60, %v12393_v30  ;;  %12396 = vst [vmem:[#allocation8_spill] sm:$0xff] %v9021_v18 }
 0x11c   :  { %12391 = vst [vmem:[#allocation21_spill] sm:$0xff] %v8986_v0  ;;  %v1401_v32 = vpop.f32.mrb[20].mxu0  ;;  %v1454_v6 = vpop.f32.mrb[20].mxu1 }
 0x11d   :  { %7144 = vmatmul.mubr.msk.bf16.vlgmr.msra.gmra.mrb[104].mxu0 %vm705_vm1, %v8801_v34  ;;  %v1403_v51 = vpop.f32.mrb[21].mxu0  ;;  %7147 = vmatmul.mubr.msk.bf16.vlgmr.msra.gmra.mrb[104].mxu1 %vm705_vm1, %v8801_v34  ;;  %v1456_v61 = vpop.f32.mrb[21].mxu1 }
 0x11e   :  { %2630 = vmatpush1.bf16.msra.mxu0 %v8512_v2  ;;  %v1405_v14 = vpop.f32.mrb[22].mxu0  ;;  %2683 = vmatpush1.bf16.msra.mxu1 %v8518_v63  ;;  %v1458_v11 = vpop.f32.mrb[22].mxu1 }
 0x11f   :  { %v5113_v38 = vpack.c.bf16 %v1405_v14, %v1401_v32  ;;  %v1407_v48 = vpop.f32.mrb[23].mxu0  ;;  %2631 = vmatprep.subr.bf16.mxu0 %v424_v42  ;;  %2684 = vmatprep.subr.bf16.mxu1 %v426_v28  ;;  %v5115_v2 = vpack.c.bf16 %v1458_v11, %v1454_v6  ;;  %v1460_v13 = vpop.f32.mrb[23].mxu1  ;;  %v9030_v42 = vpack.c.bf16 %v9010_v8, %v8952_v57  ;;  %v9041_v28 = vld [vmem:[%s12148_s0 + $0x368] sm:$0xff] }
 0x120   :  { %v5114_v7 = vpack.c.bf16 %v1407_v48, %v1403_v51  ;;  %2565 = vmatprep.mubr.bf16.mxu0 %v12366_v12  ;;  %v5116_v63 = vpack.c.bf16 %v1460_v13, %v1456_v61  ;;  %2618 = vmatprep.mubr.bf16.mxu1 %v12366_v12  ;;  %v9034_v32 = vpack.c.bf16 %v9021_v18, %v9016_v19  ;;  %v12402_v51 = vld [vmem:[#allocation6_spill] sm:$0xff]  ;;  %v12403_v14 = vld [vmem:[#allocation7_spill] sm:$0xff] }
 0x121   :  { %12399 = vst [vmem:[#allocation24_spill] sm:$0xff] %v9030_v42  ;;  %12401 = vst [vmem:[#allocation26_spill] sm:$0xff] %v9041_v28  ;;  %v9048_v6 = vpack.c.bf16 %v8952_v57, %v8931_v62  ;;  %v604_v61 = vpack.c.bf16 %v9016_v19, %v9016_v19  ;;  %v605_v11 = vpack.c.bf16 %v9021_v18, %v9021_v18 }
 0x122   :  { %v9023_v40 = vmax.bf16 %v5114_v7, %v5113_v38  ;;  %2632 = vmatpush1.bf16.msra.mxu0 %v423_v43  ;;  %2685 = vmatpush1.bf16.msra.mxu1 %v425_v5  ;;  %v9026_v10 = vmax.bf16 %v5116_v63, %v5115_v2  ;;  %12400 = vst [vmem:[#allocation25_spill] sm:$0xff] %v9034_v32 }
 0x123   :  { %2633 = vmatprep.subr.bf16.mxu0 %v8769_v35  ;;  %2686 = vmatprep.subr.bf16.mxu1 %v515_v59  ;;  %v9054_v43 = vpack.c.bf16 %v9016_v19, %v9010_v8  ;;  %v603_v38 = vpack.c.bf16 %v9010_v8, %v9010_v8  ;;  %v606_v5 = vpack.c.bf16 %v9041_v28, %v9041_v28  ;;  %v888_v8 = vsel %vm712_vm0, %v605_v11, 0 }
 0x124   :  { %12397 = vst [vmem:[#allocation22_spill] sm:$0xff] %v9023_v40  ;;  %12398 = vst [vmem:[#allocation23_spill] sm:$0xff] %v9026_v10 }
 0x125   :  { %7145 = vmatmul.mubr.msk.bf16.gmra.mrb[108].mxu0 %vm705_vm1, %v8857_v41  ;;  %7148 = vmatmul.mubr.msk.bf16.gmra.mrb[108].mxu1 %vm705_vm1, %v8857_v41  ;;  %v882_v10 = vsel %vm712_vm0, %v603_v38, 0 }
 0x126   :  { %2634 = vmatpush1.bf16.msra.mxu0 %v12402_v51  ;;  %2687 = vmatpush1.bf16.msra.mxu1 %v12403_v14 }
 0x127   :  { %2635 = vmatprep.subr.bf16.mxu0 %v9030_v42  ;;  %2688 = vmatprep.subr.bf16.mxu1 %v9034_v32 }
 0x128   :  { %v1497_v48 = vpop.f32.mrb[24].mxu0  ;;  %2661 = vmatprep.mubr.bf16.mxu0 %v12366_v12  ;;  %v1550_v7 = vpop.f32.mrb[24].mxu1  ;;  %2714 = vmatprep.mubr.bf16.mxu1 %v12366_v12 }
 0x129   :  { %v1499_v59 = vpop.f32.mrb[25].mxu0  ;;  %v1552_v2 = vpop.f32.mrb[25].mxu1 }
 0x12a   :  { %v1501_v13 = vpop.f32.mrb[26].mxu0  ;;  %2636 = vmatpush1.bf16.msra.mxu0 %v9048_v6  ;;  %v1554_v42 = vpop.f32.mrb[26].mxu1  ;;  %2689 = vmatpush1.bf16.msra.mxu1 %v9054_v43 }
 0x12b   :  { %v4973_v63 = vpack.c.bf16 %v1501_v13, %v1497_v48  ;;  %v1503_v32 = vpop.f32.mrb[27].mxu0  ;;  %7149 = vmatprep.subr.msk.bf16.mxu0 %vm712_vm0, %v604_v61  ;;  %v4975_v40 = vpack.c.bf16 %v1554_v42, %v1550_v7  ;;  %v1556_v18 = vpop.f32.mrb[27].mxu1  ;;  %7152 = vmatprep.subr.msk.bf16.mxu1 %vm712_vm0, %v606_v5  ;;  %v428_v61 = vpack.c.bf16 %v8817_v31, %v8568_v16  ;;  %v12406_v16 = vld [vmem:[#allocation2_spill] sm:$0xff]  ;;  %v9100_v7 = vld [vmem:[%s12148_s0 + $0x388] sm:$0xff] }
 0x12c   :  { %v4974_v28 = vpack.c.bf16 %v1503_v32, %v1499_v59  ;;  %v4976_v30 = vpack.c.bf16 %v1556_v18, %v1552_v2  ;;  %v430_v42 = vpack.c.bf16 %v8828_v22, %v8595_v29 }
 0x12e   :  { %v9073_v35 = vmax.bf16 %v4974_v28, %v4973_v63  ;;  %2638 = vmatpush1.bf16.msra.mxu0 %v882_v10  ;;  %v5322_v48 = vmax.bf16 %v4976_v30, %v4975_v40  ;;  %2691 = vmatpush1.bf16.msra.mxu1 %v888_v8  ;;  %v12407_v10 = vld [vmem:[#allocation12_spill] sm:$0xff] }
 0x12f   :  { %2735 = vmatprep.subr.bf16.mxu0 %v8578_v21  ;;  %2788 = vmatprep.subr.bf16.mxu1 %v8588_v27  ;;  %v427_v27 = vpack.c.bf16 %v8847_v33, %v8562_v17  ;;  %v9105_v17 = vld [vmem:[%s12148_s0 + $0x390] sm:$0xff]  ;;  %v9116_v33 = vld [vmem:[%s12148_s0 + $0x3a0] sm:$0xff] }
 0x130   :  { %12404 = vst [vmem:[#allocation6_spill] sm:$0xff] %v9073_v35  ;;  %v1507_v13 = vpop.f32.mrb[28].mxu0  ;;  %v1560_v18 = vpop.f32.mrb[28].mxu1  ;;  %v9086_v30 = vmax.bf16 %v5322_v48, %v8790_v3  ;;  %v429_v3 = vpack.c.bf16 %v12407_v10, %v8573_v20  ;;  %v9111_v20 = vld [vmem:[%s12148_s0 + $0x398] sm:$0xff]  ;;  %v9123_v63 = vpack.c.bf16 %v9105_v17, %v9100_v7  ;;  %v9128_v48 = vld [vmem:[%s12148_s0 + $0x380] sm:$0xff] }
 0x131   :  { %v1509_v28 = vpop.f32.mrb[29].mxu0  ;;  %7150 = vmatmul.mubr.msk.bf16.vlgmr.msra.gmra.mrb[112].mxu0 %vm705_vm1, %v8801_v34  ;;  %v1562_v21 = vpop.f32.mrb[29].mxu1  ;;  %7153 = vmatmul.mubr.msk.bf16.vlgmr.msra.gmra.mrb[112].mxu1 %vm705_vm1, %v8801_v34 }
 0x132   :  { %12405 = vst [vmem:[#allocation7_spill] sm:$0xff] %v9086_v30  ;;  %v1511_v8 = vpop.f32.mrb[30].mxu0  ;;  %2736 = vmatpush1.bf16.msra.mxu0 %v12406_v16  ;;  %v1564_v31 = vpop.f32.mrb[30].mxu1  ;;  %2789 = vmatpush1.bf16.msra.mxu1 %v8608_v56  ;;  %v9152_v16 = vpack.c.bf16 %v9100_v7, %v9128_v48 }
 0x133   :  { %v5117_v29 = vpack.c.bf16 %v1511_v8, %v1507_v13  ;;  %v1513_v40 = vpop.f32.mrb[31].mxu0  ;;  %2737 = vmatprep.subr.bf16.mxu0 %v428_v61  ;;  %v5119_v38 = vpack.c.bf16 %v1564_v31, %v1560_v18  ;;  %v1566_v11 = vpop.f32.mrb[31].mxu1  ;;  %2790 = vmatprep.subr.bf16.mxu1 %v430_v42  ;;  %v9133_v61 = vpack.c.bf16 %v9116_v33, %v9111_v20  ;;  %v9140_v13 = vld [vmem:[%s12148_s0 + $0x3a8] sm:$0xff] }
 0x134   :  { %v5118_v5 = vpack.c.bf16 %v1513_v40, %v1509_v28  ;;  %2671 = vmatprep.mubr.bf16.mxu0 %v12366_v12  ;;  %v5120_v56 = vpack.c.bf16 %v1566_v11, %v1562_v21  ;;  %2724 = vmatprep.mubr.bf16.mxu1 %v12366_v12  ;;  %v12411_v28 = vld [vmem:[#allocation14_spill] sm:$0xff]  ;;  %v12413_v8 = vld [vmem:[#allocation15_spill] sm:$0xff]  ;;  %v608_v31 = vpack.c.bf16 %v9111_v20, %v9111_v20 }
 0x135   :  { %12409 = vst [vmem:[#allocation12_spill] sm:$0xff] %v9133_v61  ;;  %12414 = vst [vmem:[#allocation15_spill] sm:$0xff] %v9152_v16  ;;  %v607_v40 = vpack.c.bf16 %v9105_v17, %v9105_v17 }
 0x136   :  { %v9118_v59 = vmax.bf16 %v5118_v5, %v5117_v29  ;;  %2738 = vmatpush1.bf16.msra.mxu0 %v427_v27  ;;  %v5358_v2 = vmax.bf16 %v5120_v56, %v5119_v38  ;;  %2791 = vmatpush1.bf16.msra.mxu1 %v429_v3  ;;  %v12415_v27 = vld [vmem:[#allocation16_spill] sm:$0xff]  ;;  %v9158_v29 = vpack.c.bf16 %v9111_v20, %v9105_v17 }
 0x137   :  { %2739 = vmatprep.subr.bf16.mxu0 %v8877_v9  ;;  %2792 = vmatprep.subr.bf16.mxu1 %v8959_v26  ;;  %v610_v38 = vpack.c.bf16 %v9140_v13, %v9140_v13  ;;  %v609_v5 = vpack.c.bf16 %v9116_v33, %v9116_v33  ;;  %v894_v30 = vsel %vm712_vm0, %v607_v40, 0 }
 0x138   :  { %12408 = vst [vmem:[#allocation2_spill] sm:$0xff] %v9118_v59  ;;  %v9145_v21 = vmax.bf16 %v5358_v2, %v12411_v28 }
 0x139   :  { %7151 = vmatmul.mubr.msk.bf16.gmra.mrb[116].mxu0 %vm705_vm1, %v8857_v41  ;;  %7154 = vmatmul.mubr.msk.bf16.gmra.mrb[116].mxu1 %vm705_vm1, %v8857_v41  ;;  %v900_v35 = vsel %vm712_vm0, %v609_v5, 0 }
 0x13a   :  { %12412 = vst [vmem:[#allocation14_spill] sm:$0xff] %v9145_v21  ;;  %2740 = vmatpush1.bf16.msra.mxu0 %v12413_v8  ;;  %2793 = vmatpush1.bf16.msra.mxu1 %v12415_v27 }
 0x13b   :  { %2741 = vmatprep.subr.bf16.mxu0 %v9123_v63  ;;  %2794 = vmatprep.subr.bf16.mxu1 %v9133_v61 }
 0x13c   :  { %v1603_v3 = vpop.f32.mrb[32].mxu0  ;;  %2767 = vmatprep.mubr.bf16.mxu0 %v12366_v12  ;;  %v1656_v11 = vpop.f32.mrb[32].mxu1  ;;  %2820 = vmatprep.mubr.bf16.mxu1 %v12366_v12 }
 0x13d   :  { %v1605_v56 = vpop.f32.mrb[33].mxu0  ;;  %v1658_v2 = vpop.f32.mrb[33].mxu1 }
 0x13e   :  { %v1607_v28 = vpop.f32.mrb[34].mxu0  ;;  %2742 = vmatpush1.bf16.msra.mxu0 %v9152_v16  ;;  %v1660_v32 = vpop.f32.mrb[34].mxu1  ;;  %2795 = vmatpush1.bf16.msra.mxu1 %v9158_v29 }
 0x13f   :  { %v4977_v18 = vpack.c.bf16 %v1607_v28, %v1603_v3  ;;  %v1609_v21 = vpop.f32.mrb[35].mxu0  ;;  %7155 = vmatprep.subr.msk.bf16.mxu0 %vm712_vm0, %v608_v31  ;;  %v4979_v42 = vpack.c.bf16 %v1660_v32, %v1656_v11  ;;  %v1662_v46 = vpop.f32.mrb[35].mxu1  ;;  %7158 = vmatprep.subr.msk.bf16.mxu1 %vm712_vm0, %v610_v38  ;;  %v432_v3 = vpack.c.bf16 %v8864_v23, %v8653_v55 }
 0x140   :  { %v4978_v59 = vpack.c.bf16 %v1609_v21, %v1605_v56  ;;  %v4980_v26 = vpack.c.bf16 %v1662_v46, %v1658_v2  ;;  %v434_v32 = vpack.c.bf16 %v8926_v49, %v8675_v58  ;;  %v431_v58 = vpack.c.bf16 %v8833_v1, %v8647_v45  ;;  %v9231_v56 = vld [vmem:[%s12148_s0 + $0x3c8] sm:$0xff] }
 0x142   :  { %v5323_v61 = vmax.bf16 %v4978_v59, %v4977_v18  ;;  %2744 = vmatpush1.bf16.msra.mxu0 %v894_v30  ;;  %v5324_v16 = vmax.bf16 %v4980_v26, %v4979_v42  ;;  %2797 = vmatpush1.bf16.msra.mxu1 %v900_v35  ;;  %v9203_v18 = vld [vmem:[%s12148_s0 + $0x3b0] sm:$0xff] }
 0x143   :  { %2841 = vmatprep.subr.bf16.mxu0 %v8663_v44  ;;  %2894 = vmatprep.subr.bf16.mxu1 %v8668_v54  ;;  %v12418_v54 = vld [vmem:[#allocation3_spill] sm:$0xff]  ;;  %v9219_v5 = vpack.c.bf16 %v9203_v18, %v9140_v13 }
 0x144   :  { %v1613_v31 = vpop.f32.mrb[36].mxu0  ;;  %v9184_v21 = vmax.bf16 %v5323_v61, %v8896_v47  ;;  %v1666_v40 = vpop.f32.mrb[36].mxu1  ;;  %v9189_v35 = vmax.bf16 %v5324_v16, %v8898_v24  ;;  %v433_v24 = vpack.c.bf16 %v8920_v4, %v8658_v53  ;;  %v9214_v53 = vld [vmem:[%s12148_s0 + $0x3c0] sm:$0xff] }
 0x145   :  { %v1615_v46 = vpop.f32.mrb[37].mxu0  ;;  %7156 = vmatmul.mubr.msk.bf16.vlgmr.msra.gmra.mrb[120].mxu0 %vm705_vm1, %v8801_v34  ;;  %v1668_v44 = vpop.f32.mrb[37].mxu1  ;;  %7159 = vmatmul.mubr.msk.bf16.vlgmr.msra.gmra.mrb[120].mxu1 %vm705_vm1, %v8801_v34 }
 0x146   :  { %12416 = vst [vmem:[#allocation16_spill] sm:$0xff] %v9184_v21  ;;  %12417 = vst [vmem:[#allocation27_spill] sm:$0xff] %v9189_v35  ;;  %v1617_v55 = vpop.f32.mrb[38].mxu0  ;;  %2842 = vmatpush1.bf16.msra.mxu0 %v12418_v54  ;;  %v1670_v26 = vpop.f32.mrb[38].mxu1  ;;  %2895 = vmatpush1.bf16.msra.mxu1 %v8688_v52  ;;  %v9209_v52 = vld [vmem:[%s12148_s0 + $0x3b8] sm:$0xff] }
 0x147   :  { %v5121_v47 = vpack.c.bf16 %v1617_v55, %v1613_v31  ;;  %v1619_v30 = vpop.f32.mrb[39].mxu0  ;;  %2843 = vmatprep.subr.bf16.mxu0 %v432_v3  ;;  %v5123_v59 = vpack.c.bf16 %v1670_v26, %v1666_v40  ;;  %v1672_v42 = vpop.f32.mrb[39].mxu1  ;;  %2896 = vmatprep.subr.bf16.mxu1 %v434_v32  ;;  %v9224_v11 = vpack.c.bf16 %v9214_v53, %v9209_v52  ;;  %v12421_v3 = vld [vmem:[#allocation18_spill] sm:$0xff]  ;;  %v12423_v32 = vld [vmem:[#allocation19_spill] sm:$0xff] }
 0x148   :  { %v5122_v61 = vpack.c.bf16 %v1619_v30, %v1615_v46  ;;  %2777 = vmatprep.mubr.bf16.mxu0 %v12366_v12  ;;  %v5124_v45 = vpack.c.bf16 %v1672_v42, %v1668_v44  ;;  %2830 = vmatprep.mubr.bf16.mxu1 %v12366_v12  ;;  %v9244_v31 = vpack.c.bf16 %v9140_v13, %v9116_v33 }
 0x149   :  { %v611_v40 = vpack.c.bf16 %v9203_v18, %v9203_v18  ;;  %v614_v44 = vpack.c.bf16 %v9231_v56, %v9231_v56  ;;  %v613_v55 = vpack.c.bf16 %v9214_v53, %v9214_v53 }
 0x14a   :  { %v5359_v16 = vmax.bf16 %v5122_v61, %v5121_v47  ;;  %2844 = vmatpush1.bf16.msra.mxu0 %v431_v58  ;;  %v5360_v38 = vmax.bf16 %v5124_v45, %v5123_v59  ;;  %2897 = vmatpush1.bf16.msra.mxu1 %v433_v24  ;;  %12422 = vst [vmem:[#allocation18_spill] sm:$0xff] %v9244_v31 }
 0x14b   :  { %2845 = vmatprep.subr.bf16.mxu0 %v8965_v15  ;;  %2898 = vmatprep.subr.bf16.mxu1 %v9048_v6  ;;  %v906_v61 = vsel %vm712_vm0, %v611_v40, 0  ;;  %v438_v40 = vpack.c.bf16 %v9016_v19, %v12394_v60  ;;  %v435_v60 = vpack.c.bf16 %v8931_v62, %v12392_v39  ;;  %v9298_v39 = vld [vmem:[%s12148_s0 + $0x3d0] sm:$0xff] }
 0x14c   :  { %v9234_v2 = vmax.bf16 %v5359_v16, %v8933_v50  ;;  %v9237_v28 = vmax.bf16 %v5360_v38, %v8936_v36  ;;  %v9250_v50 = vpack.c.bf16 %v9209_v52, %v9203_v18  ;;  %v612_v36 = vpack.c.bf16 %v9209_v52, %v9209_v52 }
 0x14d   :  { %7157 = vmatmul.mubr.msk.bf16.gmra.mrb[124].mxu0 %vm705_vm1, %v8857_v41  ;;  %7160 = vmatmul.mubr.msk.bf16.gmra.mrb[124].mxu1 %vm705_vm1, %v8857_v41  ;;  %v912_v38 = vsel %vm712_vm0, %v613_v55, 0 }
 0x14e   :  { %12419 = vst [vmem:[#allocation3_spill] sm:$0xff] %v9234_v2  ;;  %12420 = vst [vmem:[#allocation28_spill] sm:$0xff] %v9237_v28  ;;  %2846 = vmatpush1.bf16.msra.mxu0 %v12421_v3  ;;  %2899 = vmatpush1.bf16.msra.mxu1 %v12423_v32 }
 0x14f   :  { %2847 = vmatprep.subr.bf16.mxu0 %v9219_v5  ;;  %2900 = vmatprep.subr.bf16.mxu1 %v9224_v11 }
 0x150   :  { %v1709_v46 = vpop.f32.mrb[40].mxu0  ;;  %2873 = vmatprep.mubr.bf16.mxu0 %v12366_v12  ;;  %v1762_v54 = vpop.f32.mrb[40].mxu1  ;;  %2926 = vmatprep.mubr.bf16.mxu1 %v12366_v12 }
 0x151   :  { %v1711_v58 = vpop.f32.mrb[41].mxu0  ;;  %v1764_v47 = vpop.f32.mrb[41].mxu1 }
 0x152   :  { %v1713_v26 = vpop.f32.mrb[42].mxu0  ;;  %2848 = vmatpush1.bf16.msra.mxu0 %v9244_v31  ;;  %v1766_v24 = vpop.f32.mrb[42].mxu1  ;;  %2901 = vmatpush1.bf16.msra.mxu1 %v9250_v50 }
 0x153   :  { %v4981_v30 = vpack.c.bf16 %v1713_v26, %v1709_v46  ;;  %v1715_v59 = vpop.f32.mrb[43].mxu0  ;;  %7161 = vmatprep.subr.msk.bf16.mxu0 %vm712_vm0, %v612_v36  ;;  %v4983_v42 = vpack.c.bf16 %v1766_v24, %v1762_v54  ;;  %v1768_v16 = vpop.f32.mrb[43].mxu1  ;;  %7164 = vmatprep.subr.msk.bf16.mxu1 %vm712_vm0, %v614_v44  ;;  %v436_v36 = vpack.c.bf16 %v8952_v57, %v8735_v37  ;;  %v12428_v26 = vld [vmem:[#allocation5_spill] sm:$0xff] }
 0x154   :  { %v4982_v45 = vpack.c.bf16 %v1715_v59, %v1711_v58  ;;  %v4984_v28 = vpack.c.bf16 %v1768_v16, %v1764_v47  ;;  %v12427_v58 = vld [vmem:[#allocation10_spill] sm:$0xff] }
 0x155   :  { %v12431_v16 = vld [vmem:[#allocation26_spill] sm:$0xff] }
 0x156   :  { %v5325_v35 = vmax.bf16 %v4982_v45, %v4981_v30  ;;  %2850 = vmatpush1.bf16.msra.mxu0 %v906_v61  ;;  %v9269_v2 = vmax.bf16 %v4984_v28, %v4983_v42  ;;  %2903 = vmatpush1.bf16.msra.mxu1 %v912_v38  ;;  %v12429_v30 = vld [vmem:[#allocation4_spill] sm:$0xff] }
 0x157   :  { %2947 = vmatprep.subr.bf16.mxu0 %v12402_v51  ;;  %3000 = vmatprep.subr.bf16.mxu1 %v12403_v14  ;;  %v12426_v14 = vld [vmem:[#allocation9_spill] sm:$0xff]  ;;  %v437_v24 = vpack.c.bf16 %v12429_v30, %v12428_v26  ;;  %v12430_v45 = vld [vmem:[#allocation8_spill] sm:$0xff]  ;;  %v9339_v26 = vpack.c.bf16 %v9231_v56, %v9214_v53 }
 0x158   :  { %12424 = vst [vmem:[#allocation19_spill] sm:$0xff] %v9269_v2  ;;  %v1719_v46 = vpop.f32.mrb[44].mxu0  ;;  %v9278_v44 = vmax.bf16 %v5325_v35, %v8984_v25  ;;  %v1772_v55 = vpop.f32.mrb[44].mxu1  ;;  %v516_v38 = vpack.c.bf16 %v12431_v16, %v12430_v45 }
 0x159   :  { %v1721_v54 = vpop.f32.mrb[45].mxu0  ;;  %7162 = vmatmul.mubr.msk.bf16.vlgmr.msra.gmra.mrb[128].mxu0 %vm705_vm1, %v8801_v34  ;;  %v1774_v28 = vpop.f32.mrb[45].mxu1  ;;  %7165 = vmatmul.mubr.msk.bf16.vlgmr.msra.gmra.mrb[128].mxu1 %vm705_vm1, %v8801_v34 }
 0x15a   :  { %12425 = vst [vmem:[#allocation29_spill] sm:$0xff] %v9278_v44  ;;  %v1723_v37 = vpop.f32.mrb[46].mxu0  ;;  %2948 = vmatpush1.bf16.msra.mxu0 %v12426_v14  ;;  %v1776_v35 = vpop.f32.mrb[46].mxu1  ;;  %3001 = vmatpush1.bf16.msra.mxu1 %v12427_v58  ;;  %v9327_v14 = vld [vmem:[%s12148_s0 + $0x3e8] sm:$0xff] }
 0x15b   :  { %v5125_v25 = vpack.c.bf16 %v1723_v37, %v1719_v46  ;;  %v1725_v47 = vpop.f32.mrb[47].mxu0  ;;  %2949 = vmatprep.subr.bf16.mxu0 %v436_v36  ;;  %v5127_v59 = vpack.c.bf16 %v1776_v35, %v1772_v55  ;;  %v1778_v42 = vpop.f32.mrb[47].mxu1  ;;  %3002 = vmatprep.subr.bf16.mxu1 %v438_v40  ;;  %v9304_v36 = vld [vmem:[%s12148_s0 + $0x3d8] sm:$0xff]  ;;  %v9309_v40 = vld [vmem:[%s12148_s0 + $0x3e0] sm:$0xff]  ;;  %12436 = vst [vmem:[#allocation8_spill] sm:$0xff] %v9327_v14 }
 0x15c   :  { %v5126_v61 = vpack.c.bf16 %v1725_v47, %v1721_v54  ;;  %2883 = vmatprep.mubr.bf16.mxu0 %v12366_v12  ;;  %v5128_v46 = vpack.c.bf16 %v1778_v42, %v1774_v28  ;;  %2936 = vmatprep.mubr.bf16.mxu1 %v12366_v12  ;;  %12432 = vst [vmem:[#allocation9_spill] sm:$0xff] %v9309_v40  ;;  %v12440_v47 = vld [vmem:[#allocation24_spill] sm:$0xff] }
 0x15d   :  { %v9316_v28 = vpack.c.bf16 %v9298_v39, %v9231_v56  ;;  %v9320_v37 = vpack.c.bf16 %v9309_v40, %v9304_v36  ;;  %v615_v42 = vpack.c.bf16 %v9298_v39, %v9298_v39 }
 0x15e   :  { %v5361_v55 = vmax.bf16 %v5126_v61, %v5125_v25  ;;  %2950 = vmatpush1.bf16.msra.mxu0 %v435_v60  ;;  %v9311_v54 = vmax.bf16 %v5128_v46, %v5127_v59  ;;  %3003 = vmatpush1.bf16.msra.mxu1 %v437_v24  ;;  %v12437_v60 = vld [vmem:[#allocation22_spill] sm:$0xff]  ;;  %v12442_v24 = vld [vmem:[#allocation25_spill] sm:$0xff]  ;;  %v9345_v59 = vpack.c.bf16 %v9304_v36, %v9298_v39 }
 0x15f   :  { %2951 = vmatprep.subr.bf16.mxu0 %v9054_v43  ;;  %12434 = vst [vmem:[#allocation5_spill] sm:$0xff] %v9316_v28  ;;  %3004 = vmatprep.subr.bf16.mxu1 %v516_v38  ;;  %12435 = vst [vmem:[#allocation4_spill] sm:$0xff] %v9320_v37  ;;  %v616_v61 = vpack.c.bf16 %v9304_v36, %v9304_v36  ;;  %v618_v46 = vpack.c.bf16 %v9327_v14, %v9327_v14  ;;  %v918_v2 = vsel %vm712_vm0, %v615_v42, 0 }
 0x160   :  { %12433 = vst [vmem:[#allocation10_spill] sm:$0xff] %v9311_v54  ;;  %v9330_v25 = vmax.bf16 %v5361_v55, %v12437_v60  ;;  %12441 = vst [vmem:[#allocation22_spill] sm:$0xff] %v9339_v26  ;;  %v617_v55 = vpack.c.bf16 %v9309_v40, %v9309_v40  ;;  %v442_v42 = vpack.c.bf16 %v9111_v20, %v8864_v23 }
 0x161   :  { %7163 = vmatmul.mubr.msk.bf16.gmra.mrb[132].mxu0 %vm705_vm1, %v8857_v41  ;;  %7166 = vmatmul.mubr.msk.bf16.gmra.mrb[132].mxu1 %vm705_vm1, %v8857_v41  ;;  %12443 = vst [vmem:[#allocation24_spill] sm:$0xff] %v9345_v59  ;;  %v441_v23 = vpack.c.bf16 %v9105_v17, %v8833_v1 }
 0x162   :  { %12438 = vst [vmem:[#allocation26_spill] sm:$0xff] %v9330_v25  ;;  %2952 = vmatpush1.bf16.msra.mxu0 %v12440_v47  ;;  %3005 = vmatpush1.bf16.msra.mxu1 %v12442_v24  ;;  %v924_v21 = vsel %vm712_vm0, %v617_v55, 0 }
 0x163   :  { %2953 = vmatprep.subr.bf16.mxu0 %v9316_v28  ;;  %3006 = vmatprep.subr.bf16.mxu1 %v9320_v37 }
 0x164   :  { %v1815_v38 = vpop.f32.mrb[48].mxu0  ;;  %2979 = vmatprep.mubr.bf16.mxu0 %v12366_v12  ;;  %v1868_v58 = vpop.f32.mrb[48].mxu1  ;;  %3032 = vmatprep.mubr.bf16.mxu1 %v12366_v12 }
 0x165   :  { %v1817_v60 = vpop.f32.mrb[49].mxu0  ;;  %v1870_v35 = vpop.f32.mrb[49].mxu1 }
 0x166   :  { %v1819_v51 = vpop.f32.mrb[50].mxu0  ;;  %2954 = vmatpush1.bf16.msra.mxu0 %v9339_v26  ;;  %3007 = vmatpush1.bf16.msra.mxu1 %v9345_v59  ;;  %v1872_v25 = vpop.f32.mrb[50].mxu1 }
 0x167   :  { %v4985_v54 = vpack.c.bf16 %v1819_v51, %v1815_v38  ;;  %v1821_v0 = vpop.f32.mrb[51].mxu0  ;;  %7167 = vmatprep.subr.msk.bf16.mxu0 %vm712_vm0, %v616_v61  ;;  %7170 = vmatprep.subr.msk.bf16.mxu1 %vm712_vm0, %v618_v46  ;;  %v4987_v37 = vpack.c.bf16 %v1872_v25, %v1868_v58  ;;  %v1874_v28 = vpop.f32.mrb[51].mxu1  ;;  %v440_v61 = vpack.c.bf16 %v9100_v7, %v8828_v22  ;;  %v9404_v25 = vld [vmem:[%s12148_s0 + $0x420] sm:$0xff] }
 0x168   :  { %v4986_v44 = vpack.c.bf16 %v1821_v0, %v1817_v60  ;;  %v4988_v14 = vpack.c.bf16 %v1874_v28, %v1870_v35  ;;  %v439_v22 = vpack.c.bf16 %v9128_v48, %v12407_v10  ;;  %v9388_v10 = vld [vmem:[%s12148_s0 + $0x408] sm:$0xff]  ;;  %v9399_v48 = vld [vmem:[%s12148_s0 + $0x418] sm:$0xff]  ;;  %v9418_v46 = vld [vmem:[%s12148_s0 + $0x400] sm:$0xff] }
 0x169   :  { %v9423_v55 = vpack.c.bf16 %v9404_v25, %v9399_v48  ;;  %v9430_v60 = vld [vmem:[%s12148_s0 + $0x428] sm:$0xff] }
 0x16a   :  { %v9364_v40 = vmax.bf16 %v4986_v44, %v4985_v54  ;;  %2956 = vmatpush1.bf16.msra.mxu0 %v918_v2  ;;  %3009 = vmatpush1.bf16.msra.mxu1 %v924_v21  ;;  %v9366_v51 = vmax.bf16 %v4988_v14, %v4987_v37  ;;  %v12444_v21 = vld [vmem:[#allocation17_spill] sm:$0xff] }
 0x16b   :  { %3053 = vmatprep.subr.bf16.mxu0 %v12413_v8  ;;  %3106 = vmatprep.subr.bf16.mxu1 %v12415_v27  ;;  %12447 = vst [vmem:[#allocation30_spill] sm:$0xff] %v9423_v55 }
 0x16c   :  { %v1825_v0 = vpop.f32.mrb[52].mxu0  ;;  %v1878_v54 = vpop.f32.mrb[52].mxu1 }
 0x16d   :  { %7168 = vmatmul.mubr.msk.bf16.vlgmr.msra.gmra.mrb[136].mxu0 %vm705_vm1, %v8801_v34  ;;  %v1827_v44 = vpop.f32.mrb[53].mxu0  ;;  %7171 = vmatmul.mubr.msk.bf16.vlgmr.msra.gmra.mrb[136].mxu1 %vm705_vm1, %v8801_v34  ;;  %v1880_v7 = vpop.f32.mrb[53].mxu1 }
 0x16e   :  { %3054 = vmatpush1.bf16.msra.mxu0 %v12444_v21  ;;  %v1829_v8 = vpop.f32.mrb[54].mxu0  ;;  %3107 = vmatpush1.bf16.msra.mxu1 %v8877_v9  ;;  %v1882_v28 = vpop.f32.mrb[54].mxu1  ;;  %v9393_v9 = vld [vmem:[%s12148_s0 + $0x410] sm:$0xff]  ;;  %v622_v21 = vpack.c.bf16 %v9430_v60, %v9430_v60 }
 0x16f   :  { %v5129_v27 = vpack.c.bf16 %v1829_v8, %v1825_v0  ;;  %v1831_v2 = vpop.f32.mrb[55].mxu0  ;;  %3055 = vmatprep.subr.bf16.mxu0 %v440_v61  ;;  %3108 = vmatprep.subr.bf16.mxu1 %v442_v42  ;;  %v5131_v34 = vpack.c.bf16 %v1882_v28, %v1878_v54  ;;  %v1884_v14 = vpop.f32.mrb[55].mxu1  ;;  %v9413_v38 = vpack.c.bf16 %v9393_v9, %v9388_v10  ;;  %v12449_v0 = vld [vmem:[#allocation12_spill] sm:$0xff] }
 0x170   :  { %v5130_v37 = vpack.c.bf16 %v1831_v2, %v1827_v44  ;;  %2989 = vmatprep.mubr.bf16.mxu0 %v12366_v12  ;;  %3042 = vmatprep.mubr.bf16.mxu1 %v12366_v12  ;;  %v5132_v1 = vpack.c.bf16 %v1884_v14, %v1880_v7  ;;  %v9437_v61 = vpack.c.bf16 %v9388_v10, %v9418_v46 }
 0x171   :  { %12446 = vst [vmem:[#allocation17_spill] sm:$0xff] %v9413_v38  ;;  %v9443_v42 = vpack.c.bf16 %v9399_v48, %v9393_v9  ;;  %v620_v44 = vpack.c.bf16 %v9399_v48, %v9399_v48  ;;  %v621_v8 = vpack.c.bf16 %v9404_v25, %v9404_v25 }
 0x172   :  { %v9406_v35 = vmax.bf16 %v5130_v37, %v5129_v27  ;;  %3056 = vmatpush1.bf16.msra.mxu0 %v439_v22  ;;  %3109 = vmatpush1.bf16.msra.mxu1 %v441_v23  ;;  %v9409_v58 = vmax.bf16 %v5132_v1, %v5131_v34  ;;  %12448 = vst [vmem:[#allocation31_spill] sm:$0xff] %v9437_v61 }
 0x173   :  { %3057 = vmatprep.subr.bf16.mxu0 %v9158_v29  ;;  %3110 = vmatprep.subr.bf16.mxu1 %v9244_v31  ;;  %v936_v1 = vsel %vm712_vm0, %v621_v8, 0 }
 0x174   :  { %12445 = vst [vmem:[#allocation25_spill] sm:$0xff] %v9409_v58 }
 0x175   :  { %7169 = vmatmul.mubr.msk.bf16.gmra.mrb[140].mxu0 %vm705_vm1, %v8857_v41  ;;  %7172 = vmatmul.mubr.msk.bf16.gmra.mrb[140].mxu1 %vm705_vm1, %v8857_v41  ;;  %v619_v41 = vpack.c.bf16 %v9393_v9, %v9393_v9 }
 0x176   :  { %3058 = vmatpush1.bf16.msra.mxu0 %v9123_v63  ;;  %3111 = vmatpush1.bf16.msra.mxu1 %v12449_v0 }
 0x177   :  { %3059 = vmatprep.subr.bf16.mxu0 %v9413_v38  ;;  %3112 = vmatprep.subr.bf16.mxu1 %v9423_v55  ;;  %v930_v37 = vsel %vm712_vm0, %v619_v41, 0 }
 0x178   :  { %v1921_v54 = vpop.f32.mrb[56].mxu0  ;;  %3085 = vmatprep.mubr.bf16.mxu0 %v12366_v12  ;;  %v1974_v7 = vpop.f32.mrb[56].mxu1  ;;  %3138 = vmatprep.mubr.bf16.mxu1 %v12366_v12 }
 0x179   :  { %v1923_v22 = vpop.f32.mrb[57].mxu0  ;;  %v1976_v2 = vpop.f32.mrb[57].mxu1 }
 0x17a   :  { %v1925_v27 = vpop.f32.mrb[58].mxu0  ;;  %3060 = vmatpush1.bf16.msra.mxu0 %v9437_v61  ;;  %3113 = vmatpush1.bf16.msra.mxu1 %v9443_v42  ;;  %v1978_v34 = vpop.f32.mrb[58].mxu1 }
 0x17b   :  { %v4989_v23 = vpack.c.bf16 %v1925_v27, %v1921_v54  ;;  %v1927_v28 = vpop.f32.mrb[59].mxu0  ;;  %7173 = vmatprep.subr.msk.bf16.mxu0 %vm712_vm0, %v620_v44  ;;  %7176 = vmatprep.subr.msk.bf16.mxu1 %vm712_vm0, %v622_v21  ;;  %v4991_v31 = vpack.c.bf16 %v1978_v34, %v1974_v7  ;;  %v1980_v55 = vpop.f32.mrb[59].mxu1  ;;  %v444_v44 = vpack.c.bf16 %v9140_v13, %v8926_v49  ;;  %v12450_v49 = vld [vmem:[#allocation20_spill] sm:$0xff] }
 0x17c   :  { %v4990_v14 = vpack.c.bf16 %v1927_v28, %v1923_v22  ;;  %v4992_v38 = vpack.c.bf16 %v1980_v55, %v1976_v2  ;;  %v446_v21 = vpack.c.bf16 %v9209_v52, %v8952_v57  ;;  %v9475_v55 = vld [vmem:[%s12149_s1] sm:$0xff]   ;;  %v445_v7 = vpack.c.bf16 %v9203_v18, %v8931_v62 }
 0x17d   :  { %v9502_v62 = vld [vmem:[%s12148_s0 + $0x440] sm:$0xff] }
 0x17e   :  { %v9462_v58 = vmax.bf16 %v4990_v14, %v4989_v23  ;;  %3062 = vmatpush1.bf16.msra.mxu0 %v930_v37  ;;  %3115 = vmatpush1.bf16.msra.mxu1 %v936_v1  ;;  %v9464_v54 = vmax.bf16 %v4992_v38, %v4991_v31 }
 0x17f   :  { %3159 = vmatprep.subr.bf16.mxu0 %v12421_v3  ;;  %3212 = vmatprep.subr.bf16.mxu1 %v12423_v32  ;;  %v443_v32 = vpack.c.bf16 %v9116_v33, %v8920_v4  ;;  %v9491_v4 = vld [vmem:[%s12148_s0 + $0x430] sm:$0xff] }
 0x180   :  { %v1931_v41 = vpop.f32.mrb[60].mxu0  ;;  %v1984_v38 = vpop.f32.mrb[60].mxu1  ;;  %12451 = vst [vmem:[#allocation12_spill] sm:$0xff] %v9491_v4  ;;  %v9511_v1 = vpack.c.bf16 %v9491_v4, %v9430_v60 }
 0x181   :  { %7174 = vmatmul.mubr.msk.bf16.vlgmr.msra.gmra.mrb[144].mxu0 %vm705_vm1, %v9475_v55  ;;  %v1933_v31 = vpop.f32.mrb[61].mxu0  ;;  %7177 = vmatmul.mubr.msk.bf16.vlgmr.msra.gmra.mrb[144].mxu1 %vm705_vm1, %v9475_v55  ;;  %v1986_v57 = vpop.f32.mrb[61].mxu1 }
 0x182   :  { %3160 = vmatpush1.bf16.msra.mxu0 %v12450_v49  ;;  %v1935_v3 = vpop.f32.mrb[62].mxu0  ;;  %3213 = vmatpush1.bf16.msra.mxu1 %v8965_v15  ;;  %v1988_v27 = vpop.f32.mrb[62].mxu1  ;;  %v9497_v15 = vld [vmem:[%s12148_s0 + $0x438] sm:$0xff]  ;;  %12454 = vst [vmem:[#allocation33_spill] sm:$0xff] %v9511_v1 }
 0x183   :  { %v5133_v8 = vpack.c.bf16 %v1935_v3, %v1931_v41  ;;  %v1937_v22 = vpop.f32.mrb[63].mxu0  ;;  %3161 = vmatprep.subr.bf16.mxu0 %v444_v44  ;;  %3214 = vmatprep.subr.bf16.mxu1 %v446_v21  ;;  %v5135_v23 = vpack.c.bf16 %v1988_v27, %v1984_v38  ;;  %v1990_v28 = vpop.f32.mrb[63].mxu1  ;;  %v9516_v44 = vpack.c.bf16 %v9502_v62, %v9497_v15  ;;  %v9521_v41 = vld [vmem:[%s12149_s1 + $0x8] sm:$0xff]  }
 0x184   :  { %v5134_v2 = vpack.c.bf16 %v1937_v22, %v1933_v31  ;;  %3095 = vmatprep.mubr.bf16.mxu0 %v12366_v12  ;;  %v5136_v37 = vpack.c.bf16 %v1990_v28, %v1986_v57  ;;  %3148 = vmatprep.mubr.bf16.mxu1 %v12366_v12  ;;  %v9528_v21 = vld [vmem:[%s12148_s0 + $0x448] sm:$0xff]  ;;  %v9535_v31 = vpack.c.bf16 %v9430_v60, %v9404_v25 }
 0x185   :  { %12455 = vst [vmem:[#allocation34_spill] sm:$0xff] %v9516_v44  ;;  %v9541_v38 = vpack.c.bf16 %v9497_v15, %v9491_v4  ;;  %v624_v49 = vpack.c.bf16 %v9497_v15, %v9497_v15  ;;  %v623_v3 = vpack.c.bf16 %v9491_v4, %v9491_v4  ;;  %v626_v57 = vpack.c.bf16 %v9528_v21, %v9528_v21 }
 0x186   :  { %v9504_v34 = vmax.bf16 %v5134_v2, %v5133_v8  ;;  %3162 = vmatpush1.bf16.msra.mxu0 %v443_v32  ;;  %3215 = vmatpush1.bf16.msra.mxu1 %v445_v7  ;;  %v9507_v14 = vmax.bf16 %v5136_v37, %v5135_v23  ;;  %v625_v8 = vpack.c.bf16 %v9502_v62, %v9502_v62 }
 0x187   :  { %3163 = vmatprep.subr.bf16.mxu0 %v9250_v50  ;;  %3216 = vmatprep.subr.bf16.mxu1 %v9339_v26  ;;  %v942_v37 = vsel %vm712_vm0, %v623_v3, 0 }
 0x188   :  { %12452 = vst [vmem:[#allocation20_spill] sm:$0xff] %v9504_v34  ;;  %12453 = vst [vmem:[#allocation32_spill] sm:$0xff] %v9507_v14 }
 0x189   :  { %7175 = vmatmul.mubr.msk.bf16.gmra.mrb[148].mxu0 %vm705_vm1, %v9521_v41  ;;  %7178 = vmatmul.mubr.msk.bf16.gmra.mrb[148].mxu1 %vm705_vm1, %v9521_v41 }
 0x18a   :  { %3164 = vmatpush1.bf16.msra.mxu0 %v9219_v5  ;;  %3217 = vmatpush1.bf16.msra.mxu1 %v9224_v11 }
 0x18b   :  { %3165 = vmatprep.subr.bf16.mxu0 %v9511_v1  ;;  %3218 = vmatprep.subr.bf16.mxu1 %v9516_v44  ;;  %v948_v44 = vsel %vm712_vm0, %v625_v8, 0  ;;  %v12456_v8 = vld [vmem:[#allocation9_spill] sm:$0xff] }
 0x18c   :  { %v2027_v32 = vpop.f32.mrb[64].mxu0  ;;  %3191 = vmatprep.mubr.bf16.mxu0 %v12366_v12  ;;  %v2080_v7 = vpop.f32.mrb[64].mxu1  ;;  %3244 = vmatprep.mubr.bf16.mxu1 %v12366_v12 }
 0x18d   :  { %v2029_v22 = vpop.f32.mrb[65].mxu0  ;;  %v2082_v2 = vpop.f32.mrb[65].mxu1 }
 0x18e   :  { %v2031_v27 = vpop.f32.mrb[66].mxu0  ;;  %3166 = vmatpush1.bf16.msra.mxu0 %v9535_v31  ;;  %3219 = vmatpush1.bf16.msra.mxu1 %v9541_v38  ;;  %v2084_v61 = vpop.f32.mrb[66].mxu1 }
 0x18f   :  { %v4993_v23 = vpack.c.bf16 %v2031_v27, %v2027_v32  ;;  %v2033_v28 = vpop.f32.mrb[67].mxu0  ;;  %7179 = vmatprep.subr.msk.bf16.mxu0 %vm712_vm0, %v624_v49  ;;  %7182 = vmatprep.subr.msk.bf16.mxu1 %vm712_vm0, %v626_v57  ;;  %v4995_v1 = vpack.c.bf16 %v2084_v61, %v2080_v7  ;;  %v2086_v14 = vpop.f32.mrb[67].mxu1  ;;  %v448_v49 = vpack.c.bf16 %v9231_v56, %v9016_v19 }
 0x190   :  { %v4994_v26 = vpack.c.bf16 %v2033_v28, %v2029_v22  ;;  %v4996_v34 = vpack.c.bf16 %v2086_v14, %v2082_v2  ;;  %v450_v57 = vpack.c.bf16 %v9304_v36, %v12431_v16  ;;  %v447_v19 = vpack.c.bf16 %v9214_v53, %v12429_v30  ;;  %v12457_v22 = vld [vmem:[#allocation8_spill] sm:$0xff]  ;;  %v9597_v2 = vld [vmem:[%s12148_s0 + $0x460] sm:$0xff] }
 0x191   :  { %v449_v16 = vpack.c.bf16 %v9298_v39, %v12430_v45  ;;  %v517_v7 = vpack.c.bf16 %v12457_v22, %v12456_v8  ;;  %v9592_v45 = vld [vmem:[%s12148_s0 + $0x458] sm:$0xff]  ;;  %12459 = vst [vmem:[#allocation35_spill] sm:$0xff] %v9597_v2 }
 0x192   :  { %v9560_v4 = vmax.bf16 %v4994_v26, %v4993_v23  ;;  %3168 = vmatpush1.bf16.msra.mxu0 %v942_v37  ;;  %3221 = vmatpush1.bf16.msra.mxu1 %v948_v44  ;;  %v9565_v32 = vmax.bf16 %v4996_v34, %v4995_v1 }
 0x193   :  { %3265 = vmatprep.subr.bf16.mxu0 %v12440_v47  ;;  %3318 = vmatprep.subr.bf16.mxu1 %v12442_v24 }
 0x194   :  { %v2037_v3 = vpop.f32.mrb[68].mxu0  ;;  %v2090_v61 = vpop.f32.mrb[68].mxu1 }
 0x195   :  { %7180 = vmatmul.mubr.msk.bf16.vlgmr.msra.gmra.mrb[152].mxu0 %vm705_vm1, %v9475_v55  ;;  %v2039_v26 = vpop.f32.mrb[69].mxu0  ;;  %7183 = vmatmul.mubr.msk.bf16.vlgmr.msra.gmra.mrb[152].mxu1 %vm705_vm1, %v9475_v55  ;;  %v2092_v34 = vpop.f32.mrb[69].mxu1 }
 0x196   :  { %3266 = vmatpush1.bf16.msra.mxu0 %v9048_v6  ;;  %v2041_v47 = vpop.f32.mrb[70].mxu0  ;;  %3319 = vmatpush1.bf16.msra.mxu1 %v9054_v43  ;;  %v2094_v1 = vpop.f32.mrb[70].mxu1  ;;  %v9586_v43 = vld [vmem:[%s12148_s0 + $0x450] sm:$0xff] }
 0x197   :  { %v5137_v24 = vpack.c.bf16 %v2041_v47, %v2037_v3  ;;  %v2043_v14 = vpop.f32.mrb[71].mxu0  ;;  %3267 = vmatprep.subr.bf16.mxu0 %v448_v49  ;;  %3320 = vmatprep.subr.bf16.mxu1 %v450_v57  ;;  %v5139_v6 = vpack.c.bf16 %v2094_v1, %v2090_v61  ;;  %v2096_v27 = vpop.f32.mrb[71].mxu1  ;;  %12458 = vst [vmem:[#allocation8_spill] sm:$0xff] %v9586_v43  ;;  %v9617_v3 = vld [vmem:[%s12148_s0 + $0x468] sm:$0xff]  ;;  %v12465_v57 = vld [vmem:[#allocation5_spill] sm:$0xff]  ;;  %v12466_v61 = vld [vmem:[#allocation4_spill] sm:$0xff] }
 0x198   :  { %v5138_v44 = vpack.c.bf16 %v2043_v14, %v2039_v26  ;;  %3201 = vmatprep.mubr.bf16.mxu0 %v12366_v12  ;;  %v5140_v30 = vpack.c.bf16 %v2096_v27, %v2092_v34  ;;  %3254 = vmatprep.mubr.bf16.mxu1 %v12366_v12  ;;  %v9604_v28 = vpack.c.bf16 %v9586_v43, %v9528_v21 }
 0x199   :  { %v9610_v49 = vpack.c.bf16 %v9597_v2, %v9592_v45  ;;  %12464 = vst [vmem:[#allocation40_spill] sm:$0xff] %v9617_v3  ;;  %v9624_v26 = vpack.c.bf16 %v9528_v21, %v9502_v62  ;;  %v9630_v47 = vpack.c.bf16 %v9592_v45, %v9586_v43  ;;  %v627_v34 = vpack.c.bf16 %v9586_v43, %v9586_v43 }
 0x19a   :  { %v9599_v23 = vmax.bf16 %v5138_v44, %v5137_v24  ;;  %3268 = vmatpush1.bf16.msra.mxu0 %v447_v19  ;;  %3321 = vmatpush1.bf16.msra.mxu1 %v449_v16  ;;  %12461 = vst [vmem:[#allocation37_spill] sm:$0xff] %v9604_v28  ;;  %v9606_v37 = vmax.bf16 %v5140_v30, %v5139_v6 }
 0x19b   :  { %3269 = vmatprep.subr.bf16.mxu0 %v9345_v59  ;;  %3322 = vmatprep.subr.bf16.mxu1 %v517_v7  ;;  %12463 = vst [vmem:[#allocation39_spill] sm:$0xff] %v9610_v49  ;;  %v628_v19 = vpack.c.bf16 %v9592_v45, %v9592_v45  ;;  %v630_v14 = vpack.c.bf16 %v9617_v3, %v9617_v3 }
 0x19c   :  { %12460 = vst [vmem:[#allocation36_spill] sm:$0xff] %v9599_v23  ;;  %12462 = vst [vmem:[#allocation38_spill] sm:$0xff] %v9606_v37  ;;  %v629_v16 = vpack.c.bf16 %v9597_v2, %v9597_v2 }
 0x19d   :  { %7181 = vmatmul.mubr.msk.bf16.gmra.mrb[156].mxu0 %vm705_vm1, %v9521_v41  ;;  %7184 = vmatmul.mubr.msk.bf16.gmra.mrb[156].mxu1 %vm705_vm1, %v9521_v41 }
 0x19e   :  { %3270 = vmatpush1.bf16.msra.mxu0 %v12465_v57  ;;  %3323 = vmatpush1.bf16.msra.mxu1 %v12466_v61  ;;  %v960_v2 = vsel %vm712_vm0, %v629_v16, 0 }
 0x19f   :  { %3271 = vmatprep.subr.bf16.mxu0 %v9604_v28  ;;  %3324 = vmatprep.subr.bf16.mxu1 %v9610_v49  ;;  %v954_v28 = vsel %vm712_vm0, %v627_v34, 0 }
 0x1a0   :  { %v2133_v24 = vpop.f32.mrb[72].mxu0  ;;  %3297 = vmatprep.mubr.bf16.mxu0 %v12366_v12  ;;  %v2186_v1 = vpop.f32.mrb[72].mxu1  ;;  %3350 = vmatprep.mubr.bf16.mxu1 %v12366_v12 }
 0x1a1   :  { %v2135_v44 = vpop.f32.mrb[73].mxu0  ;;  %v2188_v7 = vpop.f32.mrb[73].mxu1 }
 0x1a2   :  { %v2137_v6 = vpop.f32.mrb[74].mxu0  ;;  %3272 = vmatpush1.bf16.msra.mxu0 %v9624_v26  ;;  %v2190_v30 = vpop.f32.mrb[74].mxu1  ;;  %3325 = vmatpush1.bf16.msra.mxu1 %v9630_v47 }
 0x1a3   :  { %v4997_v27 = vpack.c.bf16 %v2137_v6, %v2133_v24  ;;  %v2139_v49 = vpop.f32.mrb[75].mxu0  ;;  %7185 = vmatprep.subr.msk.bf16.mxu0 %vm712_vm0, %v628_v19  ;;  %v4999_v37 = vpack.c.bf16 %v2190_v30, %v2186_v1  ;;  %v2192_v3 = vpop.f32.mrb[75].mxu1  ;;  %7188 = vmatprep.subr.msk.bf16.mxu1 %vm712_vm0, %v630_v14  ;;  %v452_v24 = vpack.c.bf16 %v9388_v10, %v9111_v20  ;;  %v12469_v20 = vld [vmem:[#allocation15_spill] sm:$0xff]  ;;  %v12471_v30 = vld [vmem:[#allocation25_spill] sm:$0xff] }
 0x1a4   :  { %v4998_v23 = vpack.c.bf16 %v2139_v49, %v2135_v44  ;;  %v5000_v43 = vpack.c.bf16 %v2192_v3, %v2188_v7  ;;  %v454_v49 = vpack.c.bf16 %v9399_v48, %v9140_v13  ;;  %v451_v13 = vpack.c.bf16 %v9418_v46, %v9105_v17  ;;  %v9680_v17 = vld [vmem:[%s12148_s0 + $0x490] sm:$0xff]  ;;  %v9691_v46 = vld [vmem:[%s12148_s0 + $0x4a0] sm:$0xff]  ;;  %v9713_v6 = vld [vmem:[%s12148_s0 + $0x4a8] sm:$0xff] }
 0x1a5   :  { %v9701_v44 = vld [vmem:[%s12148_s0 + $0x480] sm:$0xff] }
 0x1a6   :  { %v5327_v8 = vmax.bf16 %v4998_v23, %v4997_v27  ;;  %3274 = vmatpush1.bf16.msra.mxu0 %v954_v28  ;;  %v5328_v59 = vmax.bf16 %v5000_v43, %v4999_v37  ;;  %3327 = vmatpush1.bf16.msra.mxu1 %v960_v2  ;;  %v9675_v28 = vld [vmem:[%s12148_s0 + $0x488] sm:$0xff] }
 0x1a7   :  { %3371 = vmatprep.subr.bf16.mxu0 %v9123_v63  ;;  %3424 = vmatprep.subr.bf16.mxu1 %v12449_v0  ;;  %v9696_v1 = vpack.c.bf16 %v9680_v17, %v9675_v28 }
 0x1a8   :  { %v2143_v19 = vpop.f32.mrb[76].mxu0  ;;  %v9656_v34 = vmax.bf16 %v5327_v8, %v9364_v40  ;;  %v2196_v14 = vpop.f32.mrb[76].mxu1  ;;  %v9661_v43 = vmax.bf16 %v5328_v59, %v9366_v51  ;;  %v453_v59 = vpack.c.bf16 %v9393_v9, %v9116_v33  ;;  %v9686_v33 = vld [vmem:[%s12148_s0 + $0x498] sm:$0xff] }
 0x1a9   :  { %v2145_v3 = vpop.f32.mrb[77].mxu0  ;;  %7186 = vmatmul.mubr.msk.bf16.vlgmr.msra.gmra.mrb[160].mxu0 %vm705_vm1, %v9475_v55  ;;  %v2198_v63 = vpop.f32.mrb[77].mxu1  ;;  %7189 = vmatmul.mubr.msk.bf16.vlgmr.msra.gmra.mrb[160].mxu1 %vm705_vm1, %v9475_v55  ;;  %v9706_v7 = vpack.c.bf16 %v9691_v46, %v9686_v33 }
 0x1aa   :  { %12467 = vst [vmem:[#allocation5_spill] sm:$0xff] %v9656_v34  ;;  %12468 = vst [vmem:[#allocation4_spill] sm:$0xff] %v9661_v43  ;;  %v2147_v2 = vpop.f32.mrb[78].mxu0  ;;  %3372 = vmatpush1.bf16.msra.mxu0 %v12469_v20  ;;  %v2200_v10 = vpop.f32.mrb[78].mxu1  ;;  %3425 = vmatpush1.bf16.msra.mxu1 %v9158_v29  ;;  %v634_v20 = vpack.c.bf16 %v9713_v6, %v9713_v6 }
 0x1ab   :  { %v5141_v40 = vpack.c.bf16 %v2147_v2, %v2143_v19  ;;  %v2149_v0 = vpop.f32.mrb[79].mxu0  ;;  %3373 = vmatprep.subr.bf16.mxu0 %v452_v24  ;;  %v5143_v51 = vpack.c.bf16 %v2200_v10, %v2196_v14  ;;  %v2202_v23 = vpop.f32.mrb[79].mxu1  ;;  %3426 = vmatprep.subr.bf16.mxu1 %v454_v49  ;;  %v12473_v19 = vld [vmem:[#allocation17_spill] sm:$0xff]  ;;  %v9726_v49 = vpack.c.bf16 %v9675_v28, %v9701_v44  ;;  %v12475_v14 = vld [vmem:[#allocation30_spill] sm:$0xff] }
 0x1ac   :  { %v5142_v8 = vpack.c.bf16 %v2149_v0, %v2145_v3  ;;  %3307 = vmatprep.mubr.bf16.mxu0 %v12366_v12  ;;  %v5144_v29 = vpack.c.bf16 %v2202_v23, %v2198_v63  ;;  %3360 = vmatprep.mubr.bf16.mxu1 %v12366_v12  ;;  %v632_v3 = vpack.c.bf16 %v9686_v33, %v9686_v33 }
 0x1ad   :  { %12474 = vst [vmem:[#allocation17_spill] sm:$0xff] %v9726_v49  ;;  %v631_v63 = vpack.c.bf16 %v9680_v17, %v9680_v17 }
 0x1ae   :  { %v5363_v37 = vmax.bf16 %v5142_v8, %v5141_v40  ;;  %3374 = vmatpush1.bf16.msra.mxu0 %v451_v13  ;;  %v5364_v16 = vmax.bf16 %v5144_v29, %v5143_v51  ;;  %3427 = vmatpush1.bf16.msra.mxu1 %v453_v59  ;;  %v633_v13 = vpack.c.bf16 %v9691_v46, %v9691_v46 }
 0x1af   :  { %3375 = vmatprep.subr.bf16.mxu0 %v9443_v42  ;;  %3428 = vmatprep.subr.bf16.mxu1 %v9535_v31  ;;  %v966_v29 = vsel %vm712_vm0, %v631_v63, 0 }
 0x1b0   :  { %v9716_v27 = vmax.bf16 %v5363_v37, %v9406_v35  ;;  %v9719_v24 = vmax.bf16 %v5364_v16, %v12471_v30  ;;  %v9732_v35 = vpack.c.bf16 %v9686_v33, %v9680_v17 }
 0x1b1   :  { %7187 = vmatmul.mubr.msk.bf16.gmra.mrb[164].mxu0 %vm705_vm1, %v9521_v41  ;;  %7190 = vmatmul.mubr.msk.bf16.gmra.mrb[164].mxu1 %vm705_vm1, %v9521_v41 }
 0x1b2   :  { %12470 = vst [vmem:[#allocation15_spill] sm:$0xff] %v9716_v27  ;;  %12472 = vst [vmem:[#allocation25_spill] sm:$0xff] %v9719_v24  ;;  %3376 = vmatpush1.bf16.msra.mxu0 %v12473_v19  ;;  %3429 = vmatpush1.bf16.msra.mxu1 %v12475_v14  ;;  %v972_v24 = vsel %vm712_vm0, %v633_v13, 0 }
 0x1b3   :  { %3377 = vmatprep.subr.bf16.mxu0 %v9696_v1  ;;  %3430 = vmatprep.subr.bf16.mxu1 %v9706_v7 }
 0x1b4   :  { %v2239_v2 = vpop.f32.mrb[80].mxu0  ;;  %3403 = vmatprep.mubr.bf16.mxu0 %v12366_v12  ;;  %v2292_v40 = vpop.f32.mrb[80].mxu1  ;;  %3456 = vmatprep.mubr.bf16.mxu1 %v12366_v12 }
 0x1b5   :  { %v2241_v10 = vpop.f32.mrb[81].mxu0  ;;  %v2294_v0 = vpop.f32.mrb[81].mxu1 }
 0x1b6   :  { %v2243_v59 = vpop.f32.mrb[82].mxu0  ;;  %3378 = vmatpush1.bf16.msra.mxu0 %v9726_v49  ;;  %v2296_v8 = vpop.f32.mrb[82].mxu1  ;;  %3431 = vmatpush1.bf16.msra.mxu1 %v9732_v35 }
 0x1b7   :  { %v5001_v51 = vpack.c.bf16 %v2243_v59, %v2239_v2  ;;  %v2245_v23 = vpop.f32.mrb[83].mxu0  ;;  %7191 = vmatprep.subr.msk.bf16.mxu0 %vm712_vm0, %v632_v3  ;;  %v5003_v37 = vpack.c.bf16 %v2296_v8, %v2292_v40  ;;  %v2298_v30 = vpop.f32.mrb[83].mxu1  ;;  %7194 = vmatprep.subr.msk.bf16.mxu1 %vm712_vm0, %v634_v20  ;;  %v456_v2 = vpack.c.bf16 %v9430_v60, %v9209_v52 }
 0x1b8   :  { %v5002_v16 = vpack.c.bf16 %v2245_v23, %v2241_v10  ;;  %v5004_v43 = vpack.c.bf16 %v2298_v30, %v2294_v0  ;;  %v458_v20 = vpack.c.bf16 %v9497_v15, %v9231_v56 }
 0x1ba   :  { %v5329_v27 = vmax.bf16 %v5002_v16, %v5001_v51  ;;  %3380 = vmatpush1.bf16.msra.mxu0 %v966_v29  ;;  %v5330_v34 = vmax.bf16 %v5004_v43, %v5003_v37  ;;  %3433 = vmatpush1.bf16.msra.mxu1 %v972_v24  ;;  %v9777_v51 = vld [vmem:[%s12148_s0 + $0x4b0] sm:$0xff] }
 0x1bb   :  { %3477 = vmatprep.subr.bf16.mxu0 %v9219_v5  ;;  %3530 = vmatprep.subr.bf16.mxu1 %v9224_v11  ;;  %v455_v11 = vpack.c.bf16 %v9404_v25, %v9203_v18  ;;  %v9793_v29 = vpack.c.bf16 %v9777_v51, %v9713_v6  ;;  %v12480_v37 = vld [vmem:[#allocation20_spill] sm:$0xff] }
 0x1bc   :  { %v9755_v3 = vmax.bf16 %v5329_v27, %v9462_v58  ;;  %v2249_v63 = vpop.f32.mrb[84].mxu0  ;;  %v9761_v13 = vmax.bf16 %v5330_v34, %v9464_v54  ;;  %v2302_v40 = vpop.f32.mrb[84].mxu1  ;;  %v12478_v58 = vld [vmem:[#allocation18_spill] sm:$0xff]  ;;  %v12479_v34 = vld [vmem:[#allocation12_spill] sm:$0xff] }
 0x1bd   :  { %v2251_v43 = vpop.f32.mrb[85].mxu0  ;;  %7192 = vmatmul.mubr.msk.bf16.vlgmr.msra.gmra.mrb[168].mxu0 %vm705_vm1, %v9475_v55  ;;  %v2304_v5 = vpop.f32.mrb[85].mxu1  ;;  %7195 = vmatmul.mubr.msk.bf16.vlgmr.msra.gmra.mrb[168].mxu1 %vm705_vm1, %v9475_v55  ;;  %v457_v24 = vpack.c.bf16 %v12479_v34, %v9214_v53  ;;  %v9788_v53 = vld [vmem:[%s12148_s0 + $0x4c0] sm:$0xff] }
 0x1be   :  { %12476 = vst [vmem:[#allocation30_spill] sm:$0xff] %v9755_v3  ;;  %12477 = vst [vmem:[#allocation41_spill] sm:$0xff] %v9761_v13  ;;  %v2253_v52 = vpop.f32.mrb[86].mxu0  ;;  %3478 = vmatpush1.bf16.msra.mxu0 %v12478_v58  ;;  %v2306_v56 = vpop.f32.mrb[86].mxu1  ;;  %3531 = vmatpush1.bf16.msra.mxu1 %v9250_v50  ;;  %v9783_v50 = vld [vmem:[%s12148_s0 + $0x4b8] sm:$0xff] }
 0x1bf   :  { %v5145_v27 = vpack.c.bf16 %v2253_v52, %v2249_v63  ;;  %v2255_v54 = vpop.f32.mrb[87].mxu0  ;;  %3479 = vmatprep.subr.bf16.mxu0 %v456_v2  ;;  %v5147_v10 = vpack.c.bf16 %v2306_v56, %v2302_v40  ;;  %v2308_v59 = vpop.f32.mrb[87].mxu1  ;;  %3532 = vmatprep.subr.bf16.mxu1 %v458_v20  ;;  %v9801_v30 = vpack.c.bf16 %v9788_v53, %v9783_v50  ;;  %v12482_v2 = vld [vmem:[#allocation32_spill] sm:$0xff]  ;;  %v9811_v20 = vld [vmem:[%s12148_s0 + $0x4c8] sm:$0xff]  ;;  %v12484_v40 = vld [vmem:[#allocation33_spill] sm:$0xff] }
 0x1c0   :  { %v5146_v0 = vpack.c.bf16 %v2255_v54, %v2251_v43  ;;  %3413 = vmatprep.mubr.bf16.mxu0 %v12366_v12  ;;  %v5148_v18 = vpack.c.bf16 %v2308_v59, %v2304_v5  ;;  %3466 = vmatprep.mubr.bf16.mxu1 %v12366_v12  ;;  %v9818_v43 = vpack.c.bf16 %v9713_v6, %v9691_v46  ;;  %v12486_v5 = vld [vmem:[#allocation34_spill] sm:$0xff] }
 0x1c1   :  { %v9824_v52 = vpack.c.bf16 %v9783_v50, %v9777_v51  ;;  %v636_v58 = vpack.c.bf16 %v9783_v50, %v9783_v50  ;;  %v638_v56 = vpack.c.bf16 %v9811_v20, %v9811_v20  ;;  %v637_v54 = vpack.c.bf16 %v9788_v53, %v9788_v53 }
 0x1c2   :  { %v5365_v8 = vmax.bf16 %v5146_v0, %v5145_v27  ;;  %3480 = vmatpush1.bf16.msra.mxu0 %v455_v11  ;;  %v5366_v23 = vmax.bf16 %v5148_v18, %v5147_v10  ;;  %3533 = vmatpush1.bf16.msra.mxu1 %v457_v24  ;;  %12485 = vst [vmem:[#allocation20_spill] sm:$0xff] %v9818_v43 }
 0x1c3   :  { %3481 = vmatprep.subr.bf16.mxu0 %v9541_v38  ;;  %3534 = vmatprep.subr.bf16.mxu1 %v9624_v26  ;;  %v635_v11 = vpack.c.bf16 %v9777_v51, %v9777_v51 }
 0x1c4   :  { %v9796_v16 = vmax.bf16 %v5365_v8, %v12480_v37  ;;  %v9804_v63 = vmax.bf16 %v5366_v23, %v12482_v2 }
 0x1c5   :  { %7193 = vmatmul.mubr.msk.bf16.gmra.mrb[172].mxu0 %vm705_vm1, %v9521_v41  ;;  %7196 = vmatmul.mubr.msk.bf16.gmra.mrb[172].mxu1 %vm705_vm1, %v9521_v41  ;;  %v978_v37 = vsel %vm712_vm0, %v635_v11, 0  ;;  %v462_v11 = vpack.c.bf16 %v9592_v45, %v12457_v22  ;;  %v459_v22 = vpack.c.bf16 %v9502_v62, %v9298_v39  ;;  %v9871_v39 = vld [vmem:[%s12148_s0 + $0x4d0] sm:$0xff] }
 0x1c6   :  { %12481 = vst [vmem:[#allocation18_spill] sm:$0xff] %v9796_v16  ;;  %12483 = vst [vmem:[#allocation12_spill] sm:$0xff] %v9804_v63  ;;  %3482 = vmatpush1.bf16.msra.mxu0 %v12484_v40  ;;  %3535 = vmatpush1.bf16.msra.mxu1 %v12486_v5  ;;  %v984_v16 = vsel %vm712_vm0, %v637_v54, 0 }
 0x1c7   :  { %3483 = vmatprep.subr.bf16.mxu0 %v9793_v29  ;;  %3536 = vmatprep.subr.bf16.mxu1 %v9801_v30  ;;  %12495 = vst [vmem:[#allocation34_spill] sm:$0xff] %v9871_v39 }
 0x1c8   :  { %v2345_v27 = vpop.f32.mrb[88].mxu0  ;;  %3509 = vmatprep.mubr.bf16.mxu0 %v12366_v12  ;;  %v2398_v24 = vpop.f32.mrb[88].mxu1  ;;  %3562 = vmatprep.mubr.bf16.mxu1 %v12366_v12 }
 0x1c9   :  { %v2347_v10 = vpop.f32.mrb[89].mxu0  ;;  %v2400_v0 = vpop.f32.mrb[89].mxu1 }
 0x1ca   :  { %v2349_v59 = vpop.f32.mrb[90].mxu0  ;;  %3484 = vmatpush1.bf16.msra.mxu0 %v9818_v43  ;;  %v2402_v8 = vpop.f32.mrb[90].mxu1  ;;  %3537 = vmatpush1.bf16.msra.mxu1 %v9824_v52 }
 0x1cb   :  { %v5005_v18 = vpack.c.bf16 %v2349_v59, %v2345_v27  ;;  %v2351_v23 = vpop.f32.mrb[91].mxu0  ;;  %7197 = vmatprep.subr.msk.bf16.mxu0 %vm712_vm0, %v636_v58  ;;  %v5007_v2 = vpack.c.bf16 %v2402_v8, %v2398_v24  ;;  %v2404_v13 = vpop.f32.mrb[91].mxu1  ;;  %7200 = vmatprep.subr.msk.bf16.mxu1 %vm712_vm0, %v638_v56  ;;  %v460_v27 = vpack.c.bf16 %v9528_v21, %v9304_v36  ;;  %v12491_v24 = vld [vmem:[#allocation9_spill] sm:$0xff] }
 0x1cc   :  { %v5006_v63 = vpack.c.bf16 %v2351_v23, %v2347_v10  ;;  %v5008_v3 = vpack.c.bf16 %v2404_v13, %v2400_v0  ;;  %v12492_v10 = vld [vmem:[#allocation8_spill] sm:$0xff]  ;;  %v12493_v23 = vld [vmem:[#allocation35_spill] sm:$0xff] }
 0x1ce   :  { %v5331_v49 = vmax.bf16 %v5006_v63, %v5005_v18  ;;  %3486 = vmatpush1.bf16.msra.mxu0 %v978_v37  ;;  %3539 = vmatpush1.bf16.msra.mxu1 %v984_v16  ;;  %v5332_v59 = vmax.bf16 %v5008_v3, %v5007_v2  ;;  %v12490_v3 = vld [vmem:[#allocation24_spill] sm:$0xff] }
 0x1cf   :  { %3583 = vmatprep.subr.bf16.mxu0 %v12465_v57  ;;  %3636 = vmatprep.subr.bf16.mxu1 %v12466_v61  ;;  %v12489_v61 = vld [vmem:[#allocation22_spill] sm:$0xff]  ;;  %v12494_v37 = vld [vmem:[#allocation40_spill] sm:$0xff] }
 0x1d0   :  { %v2355_v58 = vpop.f32.mrb[92].mxu0  ;;  %v9850_v56 = vmax.bf16 %v5331_v49, %v9560_v4  ;;  %v2408_v54 = vpop.f32.mrb[92].mxu1  ;;  %v9855_v57 = vmax.bf16 %v5332_v59, %v9565_v32  ;;  %v461_v32 = vpack.c.bf16 %v12492_v10, %v12491_v24  ;;  %v518_v2 = vpack.c.bf16 %v12494_v37, %v12493_v23  ;;  %v12506_v24 = vld [vmem:[#allocation39_spill] sm:$0xff] }
 0x1d1   :  { %v2357_v13 = vpop.f32.mrb[93].mxu0  ;;  %7198 = vmatmul.mubr.msk.bf16.vlgmr.msra.gmra.mrb[176].mxu0 %vm705_vm1, %v9475_v55  ;;  %v2410_v16 = vpop.f32.mrb[93].mxu1  ;;  %7201 = vmatmul.mubr.msk.bf16.vlgmr.msra.gmra.mrb[176].mxu1 %vm705_vm1, %v9475_v55 }
 0x1d2   :  { %12487 = vst [vmem:[#allocation32_spill] sm:$0xff] %v9850_v56  ;;  %12488 = vst [vmem:[#allocation33_spill] sm:$0xff] %v9855_v57  ;;  %v2359_v36 = vpop.f32.mrb[94].mxu0  ;;  %3584 = vmatpush1.bf16.msra.mxu0 %v12489_v61  ;;  %v2412_v49 = vpop.f32.mrb[94].mxu1  ;;  %3637 = vmatpush1.bf16.msra.mxu1 %v12490_v3  ;;  %v12500_v61 = vld [vmem:[#allocation36_spill] sm:$0xff]  ;;  %v12504_v3 = vld [vmem:[#allocation37_spill] sm:$0xff] }
 0x1d3   :  { %v5149_v4 = vpack.c.bf16 %v2359_v36, %v2355_v58  ;;  %v2361_v63 = vpop.f32.mrb[95].mxu0  ;;  %3585 = vmatprep.subr.bf16.mxu0 %v460_v27  ;;  %v5151_v0 = vpack.c.bf16 %v2412_v49, %v2408_v54  ;;  %v2414_v8 = vpop.f32.mrb[95].mxu1  ;;  %3638 = vmatprep.subr.bf16.mxu1 %v462_v11  ;;  %v9877_v27 = vld [vmem:[%s12148_s0 + $0x4d8] sm:$0xff]  ;;  %v9882_v58 = vld [vmem:[%s12148_s0 + $0x4e0] sm:$0xff]  ;;  %v9887_v54 = vpack.c.bf16 %v9871_v39, %v9811_v20  ;;  %v9898_v36 = vld [vmem:[%s12148_s0 + $0x4e8] sm:$0xff] }
 0x1d4   :  { %v5150_v18 = vpack.c.bf16 %v2361_v63, %v2357_v13  ;;  %3519 = vmatprep.mubr.bf16.mxu0 %v12366_v12  ;;  %v5152_v59 = vpack.c.bf16 %v2414_v8, %v2410_v16  ;;  %3572 = vmatprep.mubr.bf16.mxu1 %v12366_v12  ;;  %12496 = vst [vmem:[#allocation22_spill] sm:$0xff] %v9882_v58  ;;  %12499 = vst [vmem:[#allocation8_spill] sm:$0xff] %v9898_v36 }
 0x1d5   :  { %12497 = vst [vmem:[#allocation24_spill] sm:$0xff] %v9887_v54  ;;  %v9891_v16 = vpack.c.bf16 %v9882_v58, %v9877_v27  ;;  %v9911_v63 = vpack.c.bf16 %v9811_v20, %v9788_v53 }
 0x1d6   :  { %v5367_v11 = vmax.bf16 %v5150_v18, %v5149_v4  ;;  %3586 = vmatpush1.bf16.msra.mxu0 %v459_v22  ;;  %3639 = vmatpush1.bf16.msra.mxu1 %v461_v32  ;;  %v5368_v13 = vmax.bf16 %v5152_v59, %v5151_v0  ;;  %v12502_v4 = vld [vmem:[#allocation38_spill] sm:$0xff]  ;;  %v9917_v32 = vpack.c.bf16 %v9877_v27, %v9871_v39 }
 0x1d7   :  { %3587 = vmatprep.subr.bf16.mxu0 %v9630_v47  ;;  %3640 = vmatprep.subr.bf16.mxu1 %v518_v2  ;;  %12498 = vst [vmem:[#allocation9_spill] sm:$0xff] %v9891_v16  ;;  %12505 = vst [vmem:[#allocation38_spill] sm:$0xff] %v9911_v63  ;;  %v640_v0 = vpack.c.bf16 %v9877_v27, %v9877_v27  ;;  %v639_v18 = vpack.c.bf16 %v9871_v39, %v9871_v39 }
 0x1d8   :  { %v9901_v22 = vmax.bf16 %v5367_v11, %v12500_v61  ;;  %v9904_v49 = vmax.bf16 %v5368_v13, %v12502_v4  ;;  %12507 = vst [vmem:[#allocation37_spill] sm:$0xff] %v9917_v32  ;;  %v642_v2 = vpack.c.bf16 %v9898_v36, %v9898_v36  ;;  %v641_v59 = vpack.c.bf16 %v9882_v58, %v9882_v58 }
 0x1d9   :  { %7199 = vmatmul.mubr.msk.bf16.gmra.mrb[180].mxu0 %vm705_vm1, %v9521_v41  ;;  %7202 = vmatmul.mubr.msk.bf16.gmra.mrb[180].mxu1 %vm705_vm1, %v9521_v41 }
 0x1da   :  { %12501 = vst [vmem:[#allocation40_spill] sm:$0xff] %v9901_v22  ;;  %12503 = vst [vmem:[#allocation36_spill] sm:$0xff] %v9904_v49  ;;  %3588 = vmatpush1.bf16.msra.mxu0 %v12504_v3  ;;  %3641 = vmatpush1.bf16.msra.mxu1 %v12506_v24  ;;  %v990_v22 = vsel %vm712_vm0, %v639_v18, 0  ;;  %v466_v18 = vpack.c.bf16 %v9686_v33, %v9430_v60  ;;  %v465_v60 = vpack.c.bf16 %v9680_v17, %v9404_v25 }
 0x1db   :  { %3589 = vmatprep.subr.bf16.mxu0 %v9887_v54  ;;  %3642 = vmatprep.subr.bf16.mxu1 %v9891_v16  ;;  %v996_v54 = vsel %vm712_vm0, %v641_v59, 0 }
 0x1dc   :  { %v2451_v8 = vpop.f32.mrb[96].mxu0  ;;  %3615 = vmatprep.mubr.bf16.mxu0 %v12366_v12  ;;  %v2504_v13 = vpop.f32.mrb[96].mxu1  ;;  %3668 = vmatprep.mubr.bf16.mxu1 %v12366_v12 }
 0x1dd   :  { %v2453_v11 = vpop.f32.mrb[97].mxu0  ;;  %v2506_v4 = vpop.f32.mrb[97].mxu1 }
 0x1de   :  { %v2455_v61 = vpop.f32.mrb[98].mxu0  ;;  %3590 = vmatpush1.bf16.msra.mxu0 %v9911_v63  ;;  %3643 = vmatpush1.bf16.msra.mxu1 %v9917_v32  ;;  %v2508_v56 = vpop.f32.mrb[98].mxu1 }
 0x1df   :  { %v5009_v49 = vpack.c.bf16 %v2455_v61, %v2451_v8  ;;  %v2457_v57 = vpop.f32.mrb[99].mxu0  ;;  %7203 = vmatprep.subr.msk.bf16.mxu0 %vm712_vm0, %v640_v0  ;;  %7206 = vmatprep.subr.msk.bf16.mxu1 %vm712_vm0, %v642_v2  ;;  %v5011_v36 = vpack.c.bf16 %v2508_v56, %v2504_v13  ;;  %v2510_v58 = vpop.f32.mrb[99].mxu1  ;;  %v464_v0 = vpack.c.bf16 %v9675_v28, %v9399_v48  ;;  %v9976_v2 = vld [vmem:[%s12148_s0 + $0x520] sm:$0xff] }
 0x1e0   :  { %v5010_v16 = vpack.c.bf16 %v2457_v57, %v2453_v11  ;;  %v5012_v39 = vpack.c.bf16 %v2510_v58, %v2506_v4  ;;  %v463_v48 = vpack.c.bf16 %v9701_v44, %v9393_v9  ;;  %v9960_v9 = vld [vmem:[%s12148_s0 + $0x508] sm:$0xff]  ;;  %v9971_v44 = vld [vmem:[%s12148_s0 + $0x518] sm:$0xff]  ;;  %v9988_v13 = vld [vmem:[%s12148_s0 + $0x500] sm:$0xff] }
 0x1e1   :  { %v9995_v4 = vpack.c.bf16 %v9976_v2, %v9971_v44 }
 0x1e2   :  { %v9936_v23 = vmax.bf16 %v5010_v16, %v5009_v49  ;;  %3592 = vmatpush1.bf16.msra.mxu0 %v990_v22  ;;  %3645 = vmatpush1.bf16.msra.mxu1 %v996_v54  ;;  %v9941_v8 = vmax.bf16 %v5012_v39, %v5011_v36 }
 0x1e3   :  { %3689 = vmatprep.subr.bf16.mxu0 %v12473_v19  ;;  %3742 = vmatprep.subr.bf16.mxu1 %v12475_v14  ;;  %v12508_v19 = vld [vmem:[#allocation31_spill] sm:$0xff]  ;;  %12512 = vst [vmem:[#allocation43_spill] sm:$0xff] %v9995_v4 }
 0x1e4   :  { %v2461_v57 = vpop.f32.mrb[100].mxu0  ;;  %v2514_v58 = vpop.f32.mrb[100].mxu1 }
 0x1e5   :  { %7204 = vmatmul.mubr.msk.bf16.vlgmr.msra.gmra.mrb[184].mxu0 %vm705_vm1, %v9475_v55  ;;  %v2463_v56 = vpop.f32.mrb[101].mxu0  ;;  %7207 = vmatmul.mubr.msk.bf16.vlgmr.msra.gmra.mrb[184].mxu1 %vm705_vm1, %v9475_v55  ;;  %v2516_v28 = vpop.f32.mrb[101].mxu1 }
 0x1e6   :  { %3690 = vmatpush1.bf16.msra.mxu0 %v12508_v19  ;;  %v2465_v54 = vpop.f32.mrb[102].mxu0  ;;  %3743 = vmatpush1.bf16.msra.mxu1 %v9443_v42  ;;  %v2518_v16 = vpop.f32.mrb[102].mxu1  ;;  %v9965_v42 = vld [vmem:[%s12148_s0 + $0x510] sm:$0xff] }
 0x1e7   :  { %v5153_v14 = vpack.c.bf16 %v2465_v54, %v2461_v57  ;;  %v2467_v39 = vpop.f32.mrb[103].mxu0  ;;  %3691 = vmatprep.subr.bf16.mxu0 %v464_v0  ;;  %3744 = vmatprep.subr.bf16.mxu1 %v466_v18  ;;  %v5155_v22 = vpack.c.bf16 %v2518_v16, %v2514_v58  ;;  %v2520_v49 = vpop.f32.mrb[103].mxu1  ;;  %v9983_v11 = vpack.c.bf16 %v9965_v42, %v9960_v9  ;;  %v10002_v0 = vld [vmem:[%s12148_s0 + $0x528] sm:$0xff] }
 0x1e8   :  { %v5154_v36 = vpack.c.bf16 %v2467_v39, %v2463_v56  ;;  %3625 = vmatprep.mubr.bf16.mxu0 %v12366_v12  ;;  %3678 = vmatprep.mubr.bf16.mxu1 %v12366_v12  ;;  %v5156_v25 = vpack.c.bf16 %v2520_v49, %v2516_v28  ;;  %v10009_v57 = vpack.c.bf16 %v9960_v9, %v9988_v13 }
 0x1e9   :  { %12510 = vst [vmem:[#allocation31_spill] sm:$0xff] %v9983_v11  ;;  %v10015_v18 = vpack.c.bf16 %v9971_v44, %v9965_v42  ;;  %v644_v56 = vpack.c.bf16 %v9971_v44, %v9971_v44  ;;  %v643_v58 = vpack.c.bf16 %v9965_v42, %v9965_v42  ;;  %v646_v54 = vpack.c.bf16 %v10002_v0, %v10002_v0 }
 0x1ea   :  { %v9978_v59 = vmax.bf16 %v5154_v36, %v5153_v14  ;;  %3692 = vmatpush1.bf16.msra.mxu0 %v463_v48  ;;  %3745 = vmatpush1.bf16.msra.mxu1 %v465_v60  ;;  %v9990_v61 = vmax.bf16 %v5156_v25, %v5155_v22  ;;  %12513 = vst [vmem:[#allocation44_spill] sm:$0xff] %v10009_v57 }
 0x1eb   :  { %3693 = vmatprep.subr.bf16.mxu0 %v9732_v35  ;;  %3746 = vmatprep.subr.bf16.mxu1 %v9818_v43  ;;  %v645_v48 = vpack.c.bf16 %v9976_v2, %v9976_v2  ;;  %v1002_v22 = vsel %vm712_vm0, %v643_v58, 0 }
 0x1ec   :  { %12509 = vst [vmem:[#allocation39_spill] sm:$0xff] %v9978_v59  ;;  %12511 = vst [vmem:[#allocation42_spill] sm:$0xff] %v9990_v61 }
 0x1ed   :  { %7205 = vmatmul.mubr.msk.bf16.gmra.mrb[188].mxu0 %vm705_vm1, %v9521_v41  ;;  %7208 = vmatmul.mubr.msk.bf16.gmra.mrb[188].mxu1 %vm705_vm1, %v9521_v41  ;;  %v1008_v43 = vsel %vm712_vm0, %v645_v48, 0 }
 0x1ee   :  { %3694 = vmatpush1.bf16.msra.mxu0 %v9696_v1  ;;  %3747 = vmatpush1.bf16.msra.mxu1 %v9706_v7 }
 0x1ef   :  { %3695 = vmatprep.subr.bf16.mxu0 %v9983_v11  ;;  %3748 = vmatprep.subr.bf16.mxu1 %v9995_v4 }
 0x1f0   :  { %v2557_v19 = vpop.f32.mrb[104].mxu0  ;;  %3721 = vmatprep.mubr.bf16.mxu0 %v12366_v12  ;;  %v2610_v14 = vpop.f32.mrb[104].mxu1  ;;  %3774 = vmatprep.mubr.bf16.mxu1 %v12366_v12 }
 0x1f1   :  { %v2559_v28 = vpop.f32.mrb[105].mxu0  ;;  %v2612_v60 = vpop.f32.mrb[105].mxu1 }
 0x1f2   :  { %v2561_v39 = vpop.f32.mrb[106].mxu0  ;;  %3696 = vmatpush1.bf16.msra.mxu0 %v10009_v57  ;;  %3749 = vmatpush1.bf16.msra.mxu1 %v10015_v18  ;;  %v2614_v49 = vpop.f32.mrb[106].mxu1 }
 0x1f3   :  { %v5013_v16 = vpack.c.bf16 %v2561_v39, %v2557_v19  ;;  %v2563_v36 = vpop.f32.mrb[107].mxu0  ;;  %7209 = vmatprep.subr.msk.bf16.mxu0 %vm712_vm0, %v644_v56  ;;  %7212 = vmatprep.subr.msk.bf16.mxu1 %vm712_vm0, %v646_v54  ;;  %v5015_v4 = vpack.c.bf16 %v2614_v49, %v2610_v14  ;;  %v2616_v11 = vpop.f32.mrb[107].mxu1  ;;  %v468_v56 = vpack.c.bf16 %v9713_v6, %v9497_v15 }
 0x1f4   :  { %v5014_v25 = vpack.c.bf16 %v2563_v36, %v2559_v28  ;;  %v5016_v61 = vpack.c.bf16 %v2616_v11, %v2612_v60  ;;  %v470_v54 = vpack.c.bf16 %v9783_v50, %v9528_v21  ;;  %v467_v15 = vpack.c.bf16 %v9691_v46, %v12479_v34  ;;  %v10058_v34 = vld [vmem:[%s12148_s0 + $0x530] sm:$0xff] }
 0x1f5   :  { %v469_v21 = vpack.c.bf16 %v9777_v51, %v9502_v62  ;;  %v10069_v62 = vld [vmem:[%s12148_s0 + $0x540] sm:$0xff]  ;;  %v10076_v60 = vpack.c.bf16 %v10058_v34, %v10002_v0  ;;  %v10097_v49 = vpack.c.bf16 %v10002_v0, %v9976_v2 }
 0x1f6   :  { %v10034_v59 = vmax.bf16 %v5014_v25, %v5013_v16  ;;  %3698 = vmatpush1.bf16.msra.mxu0 %v1002_v22  ;;  %3751 = vmatpush1.bf16.msra.mxu1 %v1008_v43  ;;  %v10039_v19 = vmax.bf16 %v5016_v61, %v5015_v4  ;;  %12514 = vst [vmem:[#allocation45_spill] sm:$0xff] %v10069_v62  ;;  %v10090_v22 = vld [vmem:[%s12148_s0 + $0x548] sm:$0xff] }
 0x1f7   :  { %3795 = vmatprep.subr.bf16.mxu0 %v12484_v40  ;;  %3848 = vmatprep.subr.bf16.mxu1 %v12486_v5 }
 0x1f8   :  { %v2567_v58 = vpop.f32.mrb[108].mxu0  ;;  %v2620_v48 = vpop.f32.mrb[108].mxu1 }
 0x1f9   :  { %7210 = vmatmul.mubr.msk.bf16.vlgmr.msra.gmra.mrb[192].mxu0 %vm705_vm1, %v9475_v55  ;;  %v2569_v11 = vpop.f32.mrb[109].mxu0  ;;  %7213 = vmatmul.mubr.msk.bf16.vlgmr.msra.gmra.mrb[192].mxu1 %vm705_vm1, %v9475_v55  ;;  %v2622_v43 = vpop.f32.mrb[109].mxu1 }
 0x1fa   :  { %3796 = vmatpush1.bf16.msra.mxu0 %v9535_v31  ;;  %v2571_v40 = vpop.f32.mrb[110].mxu0  ;;  %3849 = vmatpush1.bf16.msra.mxu1 %v9541_v38  ;;  %v2624_v4 = vpop.f32.mrb[110].mxu1  ;;  %v10064_v38 = vld [vmem:[%s12148_s0 + $0x538] sm:$0xff] }
 0x1fb   :  { %v5157_v5 = vpack.c.bf16 %v2571_v40, %v2567_v58  ;;  %v2573_v61 = vpop.f32.mrb[111].mxu0  ;;  %3797 = vmatprep.subr.bf16.mxu0 %v468_v56  ;;  %3850 = vmatprep.subr.bf16.mxu1 %v470_v54  ;;  %v5159_v55 = vpack.c.bf16 %v2624_v4, %v2620_v48  ;;  %v2626_v31 = vpop.f32.mrb[111].mxu1  ;;  %v10083_v36 = vpack.c.bf16 %v10069_v62, %v10064_v38 }
 0x1fc   :  { %v5158_v28 = vpack.c.bf16 %v2573_v61, %v2569_v11  ;;  %3731 = vmatprep.mubr.bf16.mxu0 %v12366_v12  ;;  %v5160_v14 = vpack.c.bf16 %v2626_v31, %v2622_v43  ;;  %3784 = vmatprep.mubr.bf16.mxu1 %v12366_v12  ;;  %v10103_v25 = vpack.c.bf16 %v10064_v38, %v10058_v34 }
 0x1fd   :  { %v648_v56 = vpack.c.bf16 %v10064_v38, %v10064_v38  ;;  %v647_v58 = vpack.c.bf16 %v10058_v34, %v10058_v34  ;;  %v649_v11 = vpack.c.bf16 %v10069_v62, %v10069_v62 }
 0x1fe   :  { %v10071_v39 = vmax.bf16 %v5158_v28, %v5157_v5  ;;  %3798 = vmatpush1.bf16.msra.mxu0 %v467_v15  ;;  %3851 = vmatpush1.bf16.msra.mxu1 %v469_v21  ;;  %v10078_v16 = vmax.bf16 %v5160_v14, %v5159_v55 }
 0x1ff   :  { %3799 = vmatprep.subr.bf16.mxu0 %v9824_v52  ;;  %3852 = vmatprep.subr.bf16.mxu1 %v9911_v63  ;;  %v1014_v21 = vsel %vm712_vm0, %v647_v58, 0  ;;  %v1020_v55 = vsel %vm712_vm0, %v649_v11, 0  ;;  %v10135_v11 = vld [vmem:[%s12149_s1] sm:$0xff]  }
 0x201   :  { %7211 = vmatmul.mubr.msk.bf16.gmra.mrb[196].mxu0 %vm705_vm1, %v9521_v41  ;;  %7214 = vmatmul.mubr.msk.bf16.gmra.mrb[196].mxu1 %vm705_vm1, %v9521_v41  ;;  %v650_v41 = vpack.c.bf16 %v10090_v22, %v10090_v22 }
 0x202   :  { %3800 = vmatpush1.bf16.msra.mxu0 %v9793_v29  ;;  %3853 = vmatpush1.bf16.msra.mxu1 %v9801_v30 }
 0x203   :  { %3801 = vmatprep.subr.bf16.mxu0 %v10076_v60  ;;  %3854 = vmatprep.subr.bf16.mxu1 %v10083_v36 }
 0x204   :  { %v2663_v54 = vpop.f32.mrb[112].mxu0  ;;  %3827 = vmatprep.mubr.bf16.mxu0 %v12366_v12  ;;  %v2716_v40 = vpop.f32.mrb[112].mxu1  ;;  %3880 = vmatprep.mubr.bf16.mxu1 %v12366_v12 }
 0x205   :  { %v2665_v48 = vpop.f32.mrb[113].mxu0  ;;  %v2718_v43 = vpop.f32.mrb[113].mxu1 }
 0x206   :  { %v2667_v15 = vpop.f32.mrb[114].mxu0  ;;  %3802 = vmatpush1.bf16.msra.mxu0 %v10097_v49  ;;  %3855 = vmatpush1.bf16.msra.mxu1 %v10103_v25  ;;  %v2720_v4 = vpop.f32.mrb[114].mxu1 }
 0x207   :  { %v5017_v5 = vpack.c.bf16 %v2667_v15, %v2663_v54  ;;  %v2669_v61 = vpop.f32.mrb[115].mxu0  ;;  %7215 = vmatprep.subr.msk.bf16.mxu0 %vm712_vm0, %v648_v56  ;;  %7218 = vmatprep.subr.msk.bf16.mxu1 %vm712_vm0, %v650_v41  ;;  %v5019_v31 = vpack.c.bf16 %v2720_v4, %v2716_v40  ;;  %v2722_v14 = vpop.f32.mrb[115].mxu1  ;;  %v472_v56 = vpack.c.bf16 %v9811_v20, %v9592_v45  ;;  %v12516_v15 = vld [vmem:[#allocation35_spill] sm:$0xff]  ;;  %v12518_v4 = vld [vmem:[#allocation22_spill] sm:$0xff] }
 0x208   :  { %v5018_v28 = vpack.c.bf16 %v2669_v61, %v2665_v48  ;;  %v5020_v57 = vpack.c.bf16 %v2722_v14, %v2718_v43  ;;  %v474_v41 = vpack.c.bf16 %v9877_v27, %v12494_v37  ;;  %v12517_v43 = vld [vmem:[#allocation34_spill] sm:$0xff]  ;;  %v10159_v14 = vld [vmem:[%s12148_s0 + $0x558] sm:$0xff] }
 0x20a   :  { %v10122_v63 = vmax.bf16 %v5018_v28, %v5017_v5  ;;  %3804 = vmatpush1.bf16.msra.mxu0 %v1014_v21  ;;  %3857 = vmatpush1.bf16.msra.mxu1 %v1020_v55  ;;  %v10124_v54 = vmax.bf16 %v5020_v57, %v5019_v31  ;;  %v473_v5 = vpack.c.bf16 %v12517_v43, %v12516_v15  ;;  %v12519_v28 = vld [vmem:[#allocation8_spill] sm:$0xff] }
 0x20b   :  { %3901 = vmatprep.subr.bf16.mxu0 %v12504_v3  ;;  %3954 = vmatprep.subr.bf16.mxu1 %v12506_v24  ;;  %v471_v3 = vpack.c.bf16 %v9788_v53, %v12492_v10  ;;  %v519_v55 = vpack.c.bf16 %v12519_v28, %v12518_v4  ;;  %12521 = vst [vmem:[#allocation8_spill] sm:$0xff] %v10159_v14 }
 0x20c   :  { %12515 = vst [vmem:[#allocation46_spill] sm:$0xff] %v10124_v54  ;;  %v2673_v58 = vpop.f32.mrb[116].mxu0  ;;  %v2726_v48 = vpop.f32.mrb[116].mxu1 }
 0x20d   :  { %7216 = vmatmul.mubr.msk.bf16.vlgmr.msra.gmra.mrb[200].mxu0 %vm705_vm1, %v10135_v11  ;;  %v2675_v57 = vpop.f32.mrb[117].mxu0  ;;  %7219 = vmatmul.mubr.msk.bf16.vlgmr.msra.gmra.mrb[200].mxu1 %vm705_vm1, %v10135_v11  ;;  %v2728_v37 = vpop.f32.mrb[117].mxu1 }
 0x20e   :  { %3902 = vmatpush1.bf16.msra.mxu0 %v9624_v26  ;;  %v2677_v45 = vpop.f32.mrb[118].mxu0  ;;  %3955 = vmatpush1.bf16.msra.mxu1 %v9630_v47  ;;  %v2730_v61 = vpop.f32.mrb[118].mxu1  ;;  %v10153_v47 = vld [vmem:[%s12148_s0 + $0x550] sm:$0xff] }
 0x20f   :  { %v5161_v24 = vpack.c.bf16 %v2677_v45, %v2673_v58  ;;  %v2679_v40 = vpop.f32.mrb[119].mxu0  ;;  %3903 = vmatprep.subr.bf16.mxu0 %v472_v56  ;;  %3956 = vmatprep.subr.bf16.mxu1 %v474_v41  ;;  %v5163_v26 = vpack.c.bf16 %v2730_v61, %v2726_v48  ;;  %v2732_v31 = vpop.f32.mrb[119].mxu1  ;;  %12520 = vst [vmem:[#allocation35_spill] sm:$0xff] %v10153_v47  ;;  %v10164_v56 = vld [vmem:[%s12148_s0 + $0x560] sm:$0xff]  ;;  %v10182_v45 = vld [vmem:[%s12149_s1 + $0x8] sm:$0xff]  }
 0x210   :  { %v5162_v21 = vpack.c.bf16 %v2679_v40, %v2675_v57  ;;  %3837 = vmatprep.mubr.bf16.mxu0 %v12366_v12  ;;  %v5164_v10 = vpack.c.bf16 %v2732_v31, %v2728_v37  ;;  %3890 = vmatprep.mubr.bf16.mxu1 %v12366_v12  ;;  %12522 = vst [vmem:[#allocation47_spill] sm:$0xff] %v10164_v56  ;;  %v12528_v37 = vld [vmem:[#allocation24_spill] sm:$0xff]  ;;  %v12529_v40 = vld [vmem:[#allocation9_spill] sm:$0xff] }
 0x211   :  { %v10173_v57 = vpack.c.bf16 %v10153_v47, %v10090_v22  ;;  %v10177_v48 = vpack.c.bf16 %v10164_v56, %v10159_v14  ;;  %v10202_v15 = vpack.c.bf16 %v10159_v14, %v10153_v47  ;;  %v651_v61 = vpack.c.bf16 %v10153_v47, %v10153_v47 }
 0x212   :  { %v10166_v58 = vmax.bf16 %v5162_v21, %v5161_v24  ;;  %3904 = vmatpush1.bf16.msra.mxu0 %v471_v3  ;;  %3957 = vmatpush1.bf16.msra.mxu1 %v473_v5  ;;  %v10169_v41 = vmax.bf16 %v5164_v10, %v5163_v26  ;;  %v10189_v3 = vld [vmem:[%s12148_s0 + $0x568] sm:$0xff]  ;;  %v10196_v24 = vpack.c.bf16 %v10090_v22, %v10069_v62 }
 0x213   :  { %3905 = vmatprep.subr.bf16.mxu0 %v9917_v32  ;;  %12525 = vst [vmem:[#allocation50_spill] sm:$0xff] %v10173_v57  ;;  %3958 = vmatprep.subr.bf16.mxu1 %v519_v55  ;;  %12526 = vst [vmem:[#allocation51_spill] sm:$0xff] %v10177_v48  ;;  %v652_v5 = vpack.c.bf16 %v10159_v14, %v10159_v14  ;;  %v654_v55 = vpack.c.bf16 %v10189_v3, %v10189_v3 }
 0x214   :  { %12523 = vst [vmem:[#allocation48_spill] sm:$0xff] %v10166_v58  ;;  %12524 = vst [vmem:[#allocation49_spill] sm:$0xff] %v10169_v41  ;;  %v653_v26 = vpack.c.bf16 %v10164_v56, %v10164_v56 }
 0x215   :  { %7217 = vmatmul.mubr.msk.bf16.gmra.mrb[204].mxu0 %vm705_vm1, %v10182_v45  ;;  %12527 = vst [vmem:[#allocation52_spill] sm:$0xff] %v10189_v3  ;;  %7220 = vmatmul.mubr.msk.bf16.gmra.mrb[204].mxu1 %vm705_vm1, %v10182_v45  ;;  %v1026_v3 = vsel %vm712_vm0, %v651_v61, 0 }
 0x216   :  { %3906 = vmatpush1.bf16.msra.mxu0 %v12528_v37  ;;  %3959 = vmatpush1.bf16.msra.mxu1 %v12529_v40  ;;  %v1032_v62 = vsel %vm712_vm0, %v653_v26, 0 }
 0x217   :  { %3907 = vmatprep.subr.bf16.mxu0 %v10173_v57  ;;  %3960 = vmatprep.subr.bf16.mxu1 %v10177_v48 }
 0x218   :  { %v2769_v21 = vpop.f32.mrb[120].mxu0  ;;  %3933 = vmatprep.mubr.bf16.mxu0 %v12366_v12  ;;  %v2822_v31 = vpop.f32.mrb[120].mxu1  ;;  %3986 = vmatprep.mubr.bf16.mxu1 %v12366_v12 }
 0x219   :  { %v2771_v10 = vpop.f32.mrb[121].mxu0  ;;  %v2824_v57 = vpop.f32.mrb[121].mxu1 }
 0x21a   :  { %v2773_v41 = vpop.f32.mrb[122].mxu0  ;;  %3908 = vmatpush1.bf16.msra.mxu0 %v10196_v24  ;;  %v2826_v47 = vpop.f32.mrb[122].mxu1  ;;  %3961 = vmatpush1.bf16.msra.mxu1 %v10202_v15 }
 0x21b   :  { %v5021_v58 = vpack.c.bf16 %v2773_v41, %v2769_v21  ;;  %v2775_v48 = vpop.f32.mrb[123].mxu0  ;;  %7221 = vmatprep.subr.msk.bf16.mxu0 %vm712_vm0, %v652_v5  ;;  %v5023_v56 = vpack.c.bf16 %v2826_v47, %v2822_v31  ;;  %v2828_v32 = vpop.f32.mrb[123].mxu1  ;;  %7224 = vmatprep.subr.msk.bf16.mxu1 %vm712_vm0, %v654_v55  ;;  %v476_v41 = vpack.c.bf16 %v9960_v9, %v9686_v33  ;;  %v12532_v33 = vld [vmem:[#allocation17_spill] sm:$0xff]  ;;  %v10273_v21 = vld [vmem:[%s12148_s0 + $0x580] sm:$0xff]  ;;  %v12533_v55 = vld [vmem:[#allocation39_spill] sm:$0xff] }
 0x21c   :  { %v5022_v4 = vpack.c.bf16 %v2775_v48, %v2771_v10  ;;  %v5024_v43 = vpack.c.bf16 %v2828_v32, %v2824_v57  ;;  %v478_v48 = vpack.c.bf16 %v9971_v44, %v9713_v6  ;;  %v477_v9 = vpack.c.bf16 %v9965_v42, %v9691_v46  ;;  %v10258_v46 = vld [vmem:[%s12148_s0 + $0x598] sm:$0xff]  ;;  %v12535_v10 = vld [vmem:[#allocation42_spill] sm:$0xff] }
 0x21e   :  { %v5333_v54 = vmax.bf16 %v5022_v4, %v5021_v58  ;;  %3910 = vmatpush1.bf16.msra.mxu0 %v1026_v3  ;;  %v5334_v14 = vmax.bf16 %v5024_v43, %v5023_v56  ;;  %3963 = vmatpush1.bf16.msra.mxu1 %v1032_v62  ;;  %v10247_v58 = vld [vmem:[%s12148_s0 + $0x588] sm:$0xff] }
 0x21f   :  { %4007 = vmatprep.subr.bf16.mxu0 %v9696_v1  ;;  %4060 = vmatprep.subr.bf16.mxu1 %v9706_v7  ;;  %v475_v7 = vpack.c.bf16 %v9988_v13, %v9680_v17  ;;  %v10252_v17 = vld [vmem:[%s12148_s0 + $0x590] sm:$0xff]  ;;  %v10263_v13 = vld [vmem:[%s12148_s0 + $0x5a0] sm:$0xff] }
 0x220   :  { %v10225_v5 = vmax.bf16 %v5333_v54, %v9936_v23  ;;  %v2779_v47 = vpop.f32.mrb[124].mxu0  ;;  %v10231_v32 = vmax.bf16 %v5334_v14, %v9941_v8  ;;  %v2832_v4 = vpop.f32.mrb[124].mxu1  ;;  %v10268_v61 = vpack.c.bf16 %v10252_v17, %v10247_v58  ;;  %v10281_v31 = vpack.c.bf16 %v10263_v13, %v10258_v46 }
 0x221   :  { %v2781_v43 = vpop.f32.mrb[125].mxu0  ;;  %7222 = vmatmul.mubr.msk.bf16.vlgmr.msra.gmra.mrb[208].mxu0 %vm705_vm1, %v10135_v11  ;;  %v2834_v1 = vpop.f32.mrb[125].mxu1  ;;  %7225 = vmatmul.mubr.msk.bf16.vlgmr.msra.gmra.mrb[208].mxu1 %vm705_vm1, %v10135_v11 }
 0x222   :  { %12530 = vst [vmem:[#allocation24_spill] sm:$0xff] %v10225_v5  ;;  %12531 = vst [vmem:[#allocation9_spill] sm:$0xff] %v10231_v32  ;;  %v2783_v62 = vpop.f32.mrb[126].mxu0  ;;  %4008 = vmatpush1.bf16.msra.mxu0 %v12532_v33  ;;  %v2836_v6 = vpop.f32.mrb[126].mxu1  ;;  %4061 = vmatpush1.bf16.msra.mxu1 %v9732_v35  ;;  %v655_v33 = vpack.c.bf16 %v10252_v17, %v10252_v17 }
 0x223   :  { %v5165_v23 = vpack.c.bf16 %v2783_v62, %v2779_v47  ;;  %v2785_v8 = vpop.f32.mrb[127].mxu0  ;;  %4009 = vmatprep.subr.bf16.mxu0 %v476_v41  ;;  %v5167_v54 = vpack.c.bf16 %v2836_v6, %v2832_v4  ;;  %v2838_v56 = vpop.f32.mrb[127].mxu1  ;;  %4062 = vmatprep.subr.bf16.mxu1 %v478_v48  ;;  %v10291_v47 = vld [vmem:[%s12148_s0 + $0x5a8] sm:$0xff]  ;;  %v10298_v4 = vpack.c.bf16 %v10247_v58, %v10273_v21 }
 0x224   :  { %v5166_v14 = vpack.c.bf16 %v2785_v8, %v2781_v43  ;;  %3943 = vmatprep.mubr.bf16.mxu0 %v12366_v12  ;;  %v5168_v35 = vpack.c.bf16 %v2838_v56, %v2834_v1  ;;  %3996 = vmatprep.mubr.bf16.mxu1 %v12366_v12  ;;  %v12537_v48 = vld [vmem:[#allocation31_spill] sm:$0xff]  ;;  %v10304_v1 = vpack.c.bf16 %v10258_v46, %v10252_v17 }
 0x225   :  { %12538 = vst [vmem:[#allocation42_spill] sm:$0xff] %v10298_v4  ;;  %v12539_v43 = vld [vmem:[#allocation43_spill] sm:$0xff]  ;;  %v656_v62 = vpack.c.bf16 %v10258_v46, %v10258_v46  ;;  %v657_v6 = vpack.c.bf16 %v10263_v13, %v10263_v13 }
 0x226   :  { %v5369_v57 = vmax.bf16 %v5166_v14, %v5165_v23  ;;  %4010 = vmatpush1.bf16.msra.mxu0 %v475_v7  ;;  %v5370_v3 = vmax.bf16 %v5168_v35, %v5167_v54  ;;  %4063 = vmatpush1.bf16.msra.mxu1 %v477_v9  ;;  %v658_v23 = vpack.c.bf16 %v10291_v47, %v10291_v47 }
 0x227   :  { %4011 = vmatprep.subr.bf16.mxu0 %v10015_v18  ;;  %4064 = vmatprep.subr.bf16.mxu1 %v10097_v49  ;;  %v1044_v32 = vsel %vm712_vm0, %v657_v6, 0 }
 0x228   :  { %v10276_v26 = vmax.bf16 %v5369_v57, %v12533_v55  ;;  %v10284_v41 = vmax.bf16 %v5370_v3, %v12535_v10  ;;  %v1038_v3 = vsel %vm712_vm0, %v655_v33, 0 }
 0x229   :  { %7223 = vmatmul.mubr.msk.bf16.gmra.mrb[212].mxu0 %vm705_vm1, %v10182_v45  ;;  %7226 = vmatmul.mubr.msk.bf16.gmra.mrb[212].mxu1 %vm705_vm1, %v10182_v45 }
 0x22a   :  { %12534 = vst [vmem:[#allocation17_spill] sm:$0xff] %v10276_v26  ;;  %12536 = vst [vmem:[#allocation39_spill] sm:$0xff] %v10284_v41  ;;  %4012 = vmatpush1.bf16.msra.mxu0 %v12537_v48  ;;  %4065 = vmatpush1.bf16.msra.mxu1 %v12539_v43 }
 0x22b   :  { %4013 = vmatprep.subr.bf16.mxu0 %v10268_v61  ;;  %4066 = vmatprep.subr.bf16.mxu1 %v10281_v31 }
 0x22c   :  { %v2875_v7 = vpop.f32.mrb[128].mxu0  ;;  %4039 = vmatprep.mubr.bf16.mxu0 %v12366_v12  ;;  %v2928_v8 = vpop.f32.mrb[128].mxu1  ;;  %4092 = vmatprep.mubr.bf16.mxu1 %v12366_v12 }
 0x22d   :  { %v2877_v9 = vpop.f32.mrb[129].mxu0  ;;  %v2930_v54 = vpop.f32.mrb[129].mxu1 }
 0x22e   :  { %v2879_v14 = vpop.f32.mrb[130].mxu0  ;;  %4014 = vmatpush1.bf16.msra.mxu0 %v10298_v4  ;;  %v2932_v35 = vpop.f32.mrb[130].mxu1  ;;  %4067 = vmatpush1.bf16.msra.mxu1 %v10304_v1 }
 0x22f   :  { %v5025_v56 = vpack.c.bf16 %v2879_v14, %v2875_v7  ;;  %v2881_v57 = vpop.f32.mrb[131].mxu0  ;;  %7227 = vmatprep.subr.msk.bf16.mxu0 %vm712_vm0, %v656_v62  ;;  %v5027_v55 = vpack.c.bf16 %v2932_v35, %v2928_v8  ;;  %v2934_v41 = vpop.f32.mrb[131].mxu1  ;;  %7230 = vmatprep.subr.msk.bf16.mxu1 %vm712_vm0, %v658_v23  ;;  %v480_v7 = vpack.c.bf16 %v10002_v0, %v9783_v50 }
 0x230   :  { %v5026_v10 = vpack.c.bf16 %v2881_v57, %v2877_v9  ;;  %v5028_v26 = vpack.c.bf16 %v2934_v41, %v2930_v54  ;;  %v482_v23 = vpack.c.bf16 %v10064_v38, %v9811_v20  ;;  %v10349_v54 = vld [vmem:[%s12148_s0 + $0x5b0] sm:$0xff] }
 0x231   :  { %v10365_v35 = vpack.c.bf16 %v10349_v54, %v10291_v47 }
 0x232   :  { %v5335_v5 = vmax.bf16 %v5026_v10, %v5025_v56  ;;  %4016 = vmatpush1.bf16.msra.mxu0 %v1038_v3  ;;  %v5336_v4 = vmax.bf16 %v5028_v26, %v5027_v55  ;;  %4069 = vmatpush1.bf16.msra.mxu1 %v1044_v32  ;;  %v481_v32 = vpack.c.bf16 %v10058_v34, %v9788_v53  ;;  %v10360_v53 = vld [vmem:[%s12148_s0 + $0x5c0] sm:$0xff]  ;;  %v10383_v10 = vld [vmem:[%s12148_s0 + $0x5c8] sm:$0xff] }
 0x233   :  { %4113 = vmatprep.subr.bf16.mxu0 %v9793_v29  ;;  %4166 = vmatprep.subr.bf16.mxu1 %v9801_v30  ;;  %v479_v30 = vpack.c.bf16 %v9976_v2, %v9777_v51 }
 0x234   :  { %v10327_v62 = vmax.bf16 %v5335_v5, %v10034_v59  ;;  %v2885_v33 = vpop.f32.mrb[132].mxu0  ;;  %v10333_v41 = vmax.bf16 %v5336_v4, %v10039_v19  ;;  %v2938_v6 = vpop.f32.mrb[132].mxu1  ;;  %v12542_v59 = vld [vmem:[#allocation20_spill] sm:$0xff] }
 0x235   :  { %v2887_v26 = vpop.f32.mrb[133].mxu0  ;;  %7228 = vmatmul.mubr.msk.bf16.vlgmr.msra.gmra.mrb[216].mxu0 %vm705_vm1, %v10135_v11  ;;  %v2940_v29 = vpop.f32.mrb[133].mxu1  ;;  %7231 = vmatmul.mubr.msk.bf16.vlgmr.msra.gmra.mrb[216].mxu1 %vm705_vm1, %v10135_v11 }
 0x236   :  { %12540 = vst [vmem:[#allocation31_spill] sm:$0xff] %v10327_v62  ;;  %12541 = vst [vmem:[#allocation43_spill] sm:$0xff] %v10333_v41  ;;  %v2889_v50 = vpop.f32.mrb[134].mxu0  ;;  %4114 = vmatpush1.bf16.msra.mxu0 %v12542_v59  ;;  %v2942_v20 = vpop.f32.mrb[134].mxu1  ;;  %4167 = vmatpush1.bf16.msra.mxu1 %v9824_v52  ;;  %v10355_v52 = vld [vmem:[%s12148_s0 + $0x5b8] sm:$0xff] }
 0x237   :  { %v5169_v5 = vpack.c.bf16 %v2889_v50, %v2885_v33  ;;  %v2891_v19 = vpop.f32.mrb[135].mxu0  ;;  %4115 = vmatprep.subr.bf16.mxu0 %v480_v7  ;;  %v5171_v4 = vpack.c.bf16 %v2942_v20, %v2938_v6  ;;  %v2944_v9 = vpop.f32.mrb[135].mxu1  ;;  %4168 = vmatprep.subr.bf16.mxu1 %v482_v23  ;;  %v10373_v3 = vpack.c.bf16 %v10360_v53, %v10355_v52 }
 0x238   :  { %v5170_v8 = vpack.c.bf16 %v2891_v19, %v2887_v26  ;;  %4049 = vmatprep.mubr.bf16.mxu0 %v12366_v12  ;;  %v5172_v51 = vpack.c.bf16 %v2944_v9, %v2940_v29  ;;  %4102 = vmatprep.mubr.bf16.mxu1 %v12366_v12  ;;  %v660_v7 = vpack.c.bf16 %v10355_v52, %v10355_v52 }
 0x239   :  { %v659_v33 = vpack.c.bf16 %v10349_v54, %v10349_v54  ;;  %v662_v6 = vpack.c.bf16 %v10383_v10, %v10383_v10  ;;  %v661_v26 = vpack.c.bf16 %v10360_v53, %v10360_v53 }
 0x23a   :  { %v5371_v14 = vmax.bf16 %v5170_v8, %v5169_v5  ;;  %4116 = vmatpush1.bf16.msra.mxu0 %v479_v30  ;;  %v5372_v56 = vmax.bf16 %v5172_v51, %v5171_v4  ;;  %4169 = vmatpush1.bf16.msra.mxu1 %v481_v32 }
 0x23b   :  { %4117 = vmatprep.subr.bf16.mxu0 %v10103_v25  ;;  %4170 = vmatprep.subr.bf16.mxu1 %v10196_v24  ;;  %v1050_v32 = vsel %vm712_vm0, %v659_v33, 0  ;;  %v1056_v51 = vsel %vm712_vm0, %v661_v26, 0 }
 0x23c   :  { %v10368_v57 = vmax.bf16 %v5371_v14, %v10071_v39  ;;  %v10376_v55 = vmax.bf16 %v5372_v56, %v10078_v16  ;;  %v10390_v39 = vpack.c.bf16 %v10291_v47, %v10263_v13  ;;  %v10396_v16 = vpack.c.bf16 %v10355_v52, %v10349_v54 }
 0x23d   :  { %7229 = vmatmul.mubr.msk.bf16.gmra.mrb[220].mxu0 %vm705_vm1, %v10182_v45  ;;  %7232 = vmatmul.mubr.msk.bf16.gmra.mrb[220].mxu1 %vm705_vm1, %v10182_v45 }
 0x23e   :  { %12543 = vst [vmem:[#allocation20_spill] sm:$0xff] %v10368_v57  ;;  %12544 = vst [vmem:[#allocation53_spill] sm:$0xff] %v10376_v55  ;;  %4118 = vmatpush1.bf16.msra.mxu0 %v10076_v60  ;;  %4171 = vmatpush1.bf16.msra.mxu1 %v10083_v36 }
 0x23f   :  { %12545 = vst [vmem:[#allocation54_spill] sm:$0xff] %v10390_v39  ;;  %4119 = vmatprep.subr.bf16.mxu0 %v10365_v35  ;;  %4172 = vmatprep.subr.bf16.mxu1 %v10373_v3 }
 0x240   :  { %v2981_v23 = vpop.f32.mrb[136].mxu0  ;;  %4145 = vmatprep.mubr.bf16.mxu0 %v12366_v12  ;;  %v3034_v29 = vpop.f32.mrb[136].mxu1  ;;  %4198 = vmatprep.mubr.bf16.mxu1 %v12366_v12 }
 0x241   :  { %v2983_v50 = vpop.f32.mrb[137].mxu0  ;;  %v3036_v59 = vpop.f32.mrb[137].mxu1 }
 0x242   :  { %v2985_v30 = vpop.f32.mrb[138].mxu0  ;;  %4120 = vmatpush1.bf16.msra.mxu0 %v10390_v39  ;;  %v3038_v20 = vpop.f32.mrb[138].mxu1  ;;  %4173 = vmatpush1.bf16.msra.mxu1 %v10396_v16 }
 0x243   :  { %v5029_v5 = vpack.c.bf16 %v2985_v30, %v2981_v23  ;;  %v2987_v19 = vpop.f32.mrb[139].mxu0  ;;  %7233 = vmatprep.subr.msk.bf16.mxu0 %vm712_vm0, %v660_v7  ;;  %v5031_v4 = vpack.c.bf16 %v3038_v20, %v3034_v29  ;;  %v3040_v9 = vpop.f32.mrb[139].mxu1  ;;  %7236 = vmatprep.subr.msk.bf16.mxu1 %vm712_vm0, %v662_v6  ;;  %v484_v23 = vpack.c.bf16 %v10090_v22, %v9877_v27  ;;  %v12547_v6 = vld [vmem:[#allocation8_spill] sm:$0xff] }
 0x244   :  { %v5030_v8 = vpack.c.bf16 %v2987_v19, %v2983_v50  ;;  %v5032_v14 = vpack.c.bf16 %v3040_v9, %v3036_v59  ;;  %v486_v29 = vpack.c.bf16 %v12547_v6, %v12519_v28  ;;  %v12548_v59 = vld [vmem:[#allocation46_spill] sm:$0xff]  ;;  %v12555_v9 = vld [vmem:[#allocation35_spill] sm:$0xff] }
 0x246   :  { %v5337_v56 = vmax.bf16 %v5030_v8, %v5029_v5  ;;  %4122 = vmatpush1.bf16.msra.mxu0 %v1050_v32  ;;  %v5338_v55 = vmax.bf16 %v5032_v14, %v5031_v4  ;;  %4175 = vmatpush1.bf16.msra.mxu1 %v1056_v51  ;;  %v12551_v5 = vld [vmem:[#allocation34_spill] sm:$0xff]  ;;  %v12553_v32 = vld [vmem:[#allocation37_spill] sm:$0xff] }
 0x247   :  { %4219 = vmatprep.subr.bf16.mxu0 %v12528_v37  ;;  %4272 = vmatprep.subr.bf16.mxu1 %v12529_v40  ;;  %v12552_v40 = vld [vmem:[#allocation45_spill] sm:$0xff]  ;;  %v12554_v8 = vld [vmem:[#allocation22_spill] sm:$0xff] }
 0x248   :  { %v10419_v7 = vmax.bf16 %v5337_v56, %v10122_v63  ;;  %v2991_v33 = vpop.f32.mrb[140].mxu0  ;;  %v3044_v26 = vpop.f32.mrb[140].mxu1  ;;  %v10427_v30 = vmax.bf16 %v5338_v55, %v12548_v59  ;;  %v12550_v63 = vld [vmem:[#allocation38_spill] sm:$0xff]  ;;  %v483_v20 = vpack.c.bf16 %v12552_v40, %v12551_v5  ;;  %v485_v55 = vpack.c.bf16 %v12555_v9, %v12554_v8  ;;  %v12556_v59 = vld [vmem:[#allocation47_spill] sm:$0xff]  ;;  %v12561_v5 = vld [vmem:[#allocation48_spill] sm:$0xff] }
 0x249   :  { %v2993_v50 = vpop.f32.mrb[141].mxu0  ;;  %7234 = vmatmul.mubr.msk.bf16.vlgmr.msra.gmra.mrb[224].mxu0 %vm705_vm1, %v10135_v11  ;;  %v3046_v37 = vpop.f32.mrb[141].mxu1  ;;  %7237 = vmatmul.mubr.msk.bf16.vlgmr.msra.gmra.mrb[224].mxu1 %vm705_vm1, %v10135_v11  ;;  %v12567_v8 = vld [vmem:[#allocation50_spill] sm:$0xff] }
 0x24a   :  { %12546 = vst [vmem:[#allocation55_spill] sm:$0xff] %v10419_v7  ;;  %12549 = vst [vmem:[#allocation8_spill] sm:$0xff] %v10427_v30  ;;  %v2995_v27 = vpop.f32.mrb[142].mxu0  ;;  %4220 = vmatpush1.bf16.msra.mxu0 %v12550_v63  ;;  %v3048_v28 = vpop.f32.mrb[142].mxu1  ;;  %4273 = vmatpush1.bf16.msra.mxu1 %v12553_v32  ;;  %v12557_v63 = vld [vmem:[#allocation52_spill] sm:$0xff] }
 0x24b   :  { %v5173_v19 = vpack.c.bf16 %v2995_v27, %v2991_v33  ;;  %v2997_v4 = vpop.f32.mrb[143].mxu0  ;;  %4221 = vmatprep.subr.bf16.mxu0 %v484_v23  ;;  %v5175_v51 = vpack.c.bf16 %v3048_v28, %v3044_v26  ;;  %v3050_v56 = vpop.f32.mrb[143].mxu1  ;;  %4274 = vmatprep.subr.bf16.mxu1 %v486_v29  ;;  %v520_v30 = vpack.c.bf16 %v12557_v63, %v12556_v59  ;;  %v10443_v33 = vld [vmem:[%s12148_s0 + $0x5d0] sm:$0xff]  ;;  %v10449_v23 = vld [vmem:[%s12148_s0 + $0x5d8] sm:$0xff]  ;;  %v10454_v29 = vld [vmem:[%s12148_s0 + $0x5e0] sm:$0xff] }
 0x24c   :  { %v5174_v14 = vpack.c.bf16 %v2997_v4, %v2993_v50  ;;  %4155 = vmatprep.mubr.bf16.mxu0 %v12366_v12  ;;  %12558 = vst [vmem:[#allocation46_spill] sm:$0xff] %v10443_v33  ;;  %v5176_v27 = vpack.c.bf16 %v3050_v56, %v3046_v37  ;;  %4208 = vmatprep.mubr.bf16.mxu1 %v12366_v12  ;;  %12559 = vst [vmem:[#allocation38_spill] sm:$0xff] %v10454_v29 }
 0x24d   :  { %v10459_v37 = vpack.c.bf16 %v10443_v33, %v10383_v10  ;;  %v10466_v32 = vpack.c.bf16 %v10454_v29, %v10449_v23  ;;  %v663_v56 = vpack.c.bf16 %v10443_v33, %v10443_v33 }
 0x24e   :  { %v5373_v26 = vmax.bf16 %v5174_v14, %v5173_v19  ;;  %4222 = vmatpush1.bf16.msra.mxu0 %v483_v20  ;;  %v5374_v50 = vmax.bf16 %v5176_v27, %v5175_v51  ;;  %4275 = vmatpush1.bf16.msra.mxu1 %v485_v55  ;;  %v10473_v20 = vld [vmem:[%s12148_s0 + $0x5e8] sm:$0xff]  ;;  %v12565_v19 = vld [vmem:[#allocation49_spill] sm:$0xff]  ;;  %v10489_v51 = vpack.c.bf16 %v10449_v23, %v10443_v33 }
 0x24f   :  { %4223 = vmatprep.subr.bf16.mxu0 %v10202_v15  ;;  %12560 = vst [vmem:[#allocation34_spill] sm:$0xff] %v10459_v37  ;;  %4276 = vmatprep.subr.bf16.mxu1 %v520_v30  ;;  %12563 = vst [vmem:[#allocation37_spill] sm:$0xff] %v10466_v32  ;;  %v10483_v30 = vpack.c.bf16 %v10383_v10, %v10360_v53  ;;  %v12569_v55 = vld [vmem:[#allocation51_spill] sm:$0xff]  ;;  %v664_v14 = vpack.c.bf16 %v10449_v23, %v10449_v23  ;;  %v1062_v62 = vsel %vm712_vm0, %v663_v56, 0 }
 0x250   :  { %v10462_v28 = vmax.bf16 %v5373_v26, %v12561_v5  ;;  %12564 = vst [vmem:[#allocation22_spill] sm:$0xff] %v10473_v20  ;;  %v10476_v4 = vmax.bf16 %v5374_v50, %v12565_v19  ;;  %12570 = vst [vmem:[#allocation48_spill] sm:$0xff] %v10489_v51  ;;  %v666_v26 = vpack.c.bf16 %v10473_v20, %v10473_v20 }
 0x251   :  { %7235 = vmatmul.mubr.msk.bf16.gmra.mrb[228].mxu0 %vm705_vm1, %v10182_v45  ;;  %7238 = vmatmul.mubr.msk.bf16.gmra.mrb[228].mxu1 %vm705_vm1, %v10182_v45  ;;  %12568 = vst [vmem:[#allocation52_spill] sm:$0xff] %v10483_v30  ;;  %v665_v50 = vpack.c.bf16 %v10454_v29, %v10454_v29  ;;  %v490_v56 = vpack.c.bf16 %v10258_v46, %v10002_v0 }
 0x252   :  { %12562 = vst [vmem:[#allocation45_spill] sm:$0xff] %v10462_v28  ;;  %12566 = vst [vmem:[#allocation35_spill] sm:$0xff] %v10476_v4  ;;  %4224 = vmatpush1.bf16.msra.mxu0 %v12567_v8  ;;  %4277 = vmatpush1.bf16.msra.mxu1 %v12569_v55  ;;  %v489_v0 = vpack.c.bf16 %v10252_v17, %v9976_v2 }
 0x253   :  { %4225 = vmatprep.subr.bf16.mxu0 %v10459_v37  ;;  %4278 = vmatprep.subr.bf16.mxu1 %v10466_v32  ;;  %v1068_v37 = vsel %vm712_vm0, %v665_v50, 0 }
 0x254   :  { %v3087_v27 = vpop.f32.mrb[144].mxu0  ;;  %4251 = vmatprep.mubr.bf16.mxu0 %v12366_v12  ;;  %v3140_v19 = vpop.f32.mrb[144].mxu1  ;;  %4304 = vmatprep.mubr.bf16.mxu1 %v12366_v12 }
 0x255   :  { %v3089_v5 = vpop.f32.mrb[145].mxu0  ;;  %v3142_v41 = vpop.f32.mrb[145].mxu1 }
 0x256   :  { %v3091_v4 = vpop.f32.mrb[146].mxu0  ;;  %4226 = vmatpush1.bf16.msra.mxu0 %v10483_v30  ;;  %4279 = vmatpush1.bf16.msra.mxu1 %v10489_v51  ;;  %v3144_v7 = vpop.f32.mrb[146].mxu1 }
 0x257   :  { %v5033_v57 = vpack.c.bf16 %v3091_v4, %v3087_v27  ;;  %v3093_v28 = vpop.f32.mrb[147].mxu0  ;;  %7239 = vmatprep.subr.msk.bf16.mxu0 %vm712_vm0, %v664_v14  ;;  %7242 = vmatprep.subr.msk.bf16.mxu1 %vm712_vm0, %v666_v26  ;;  %v5035_v20 = vpack.c.bf16 %v3144_v7, %v3140_v19  ;;  %v3146_v29 = vpop.f32.mrb[147].mxu1  ;;  %v488_v14 = vpack.c.bf16 %v10247_v58, %v9971_v44 }
 0x258   :  { %v5034_v32 = vpack.c.bf16 %v3093_v28, %v3089_v5  ;;  %v5036_v33 = vpack.c.bf16 %v3146_v29, %v3142_v41  ;;  %v487_v44 = vpack.c.bf16 %v10273_v21, %v9965_v42  ;;  %v10532_v42 = vld [vmem:[%s12148_s0 + $0x608] sm:$0xff]  ;;  %v10543_v21 = vld [vmem:[%s12148_s0 + $0x618] sm:$0xff]  ;;  %v10562_v5 = vld [vmem:[%s12148_s0 + $0x600] sm:$0xff] }
 0x25a   :  { %v10508_v59 = vmax.bf16 %v5034_v32, %v5033_v57  ;;  %4228 = vmatpush1.bf16.msra.mxu0 %v1062_v62  ;;  %4281 = vmatpush1.bf16.msra.mxu1 %v1068_v37  ;;  %v10510_v4 = vmax.bf16 %v5036_v33, %v5035_v20  ;;  %v12571_v62 = vld [vmem:[#allocation44_spill] sm:$0xff]  ;;  %v10548_v20 = vld [vmem:[%s12148_s0 + $0x620] sm:$0xff] }
 0x25b   :  { %4325 = vmatprep.subr.bf16.mxu0 %v12537_v48  ;;  %4378 = vmatprep.subr.bf16.mxu1 %v12539_v43  ;;  %v10567_v19 = vpack.c.bf16 %v10548_v20, %v10543_v21 }
 0x25c   :  { %v3097_v28 = vpop.f32.mrb[148].mxu0  ;;  %v3150_v57 = vpop.f32.mrb[148].mxu1 }
 0x25d   :  { %7240 = vmatmul.mubr.msk.bf16.vlgmr.msra.gmra.mrb[232].mxu0 %vm705_vm1, %v10135_v11  ;;  %v3099_v41 = vpop.f32.mrb[149].mxu0  ;;  %7243 = vmatmul.mubr.msk.bf16.vlgmr.msra.gmra.mrb[232].mxu1 %vm705_vm1, %v10135_v11  ;;  %v3152_v58 = vpop.f32.mrb[149].mxu1  ;;  %12575 = vst [vmem:[#allocation44_spill] sm:$0xff] %v10567_v19 }
 0x25e   :  { %4326 = vmatpush1.bf16.msra.mxu0 %v12571_v62  ;;  %v3101_v48 = vpop.f32.mrb[150].mxu0  ;;  %4379 = vmatpush1.bf16.msra.mxu1 %v10015_v18  ;;  %v3154_v33 = vpop.f32.mrb[150].mxu1  ;;  %v10537_v18 = vld [vmem:[%s12148_s0 + $0x610] sm:$0xff] }
 0x25f   :  { %v5177_v43 = vpack.c.bf16 %v3101_v48, %v3097_v28  ;;  %v3103_v7 = vpop.f32.mrb[151].mxu0  ;;  %4327 = vmatprep.subr.bf16.mxu0 %v488_v14  ;;  %4380 = vmatprep.subr.bf16.mxu1 %v490_v56  ;;  %v5179_v37 = vpack.c.bf16 %v3154_v33, %v3150_v57  ;;  %v3156_v32 = vpop.f32.mrb[151].mxu1  ;;  %v10557_v50 = vpack.c.bf16 %v10537_v18, %v10532_v42  ;;  %v10572_v14 = vld [vmem:[%s12148_s0 + $0x628] sm:$0xff] }
 0x260   :  { %v5178_v29 = vpack.c.bf16 %v3103_v7, %v3099_v41  ;;  %4261 = vmatprep.mubr.bf16.mxu0 %v12366_v12  ;;  %4314 = vmatprep.mubr.bf16.mxu1 %v12366_v12  ;;  %v5180_v2 = vpack.c.bf16 %v3156_v32, %v3152_v58  ;;  %v534_v28 = vpack.c.bf16 %v10532_v42, %v10562_v5 }
 0x261   :  { %12574 = vst [vmem:[#allocation51_spill] sm:$0xff] %v10557_v50  ;;  %v10585_v56 = vpack.c.bf16 %v10543_v21, %v10537_v18  ;;  %v668_v41 = vpack.c.bf16 %v10543_v21, %v10543_v21  ;;  %v667_v57 = vpack.c.bf16 %v10537_v18, %v10537_v18  ;;  %v670_v48 = vpack.c.bf16 %v10572_v14, %v10572_v14 }
 0x262   :  { %v10550_v27 = vmax.bf16 %v5178_v29, %v5177_v43  ;;  %4328 = vmatpush1.bf16.msra.mxu0 %v487_v44  ;;  %4381 = vmatpush1.bf16.msra.mxu1 %v489_v0  ;;  %v10553_v26 = vmax.bf16 %v5180_v2, %v5179_v37  ;;  %v669_v44 = vpack.c.bf16 %v10548_v20, %v10548_v20 }
 0x263   :  { %4329 = vmatprep.subr.bf16.mxu0 %v10304_v1  ;;  %4382 = vmatprep.subr.bf16.mxu1 %v10390_v39  ;;  %v1074_v37 = vsel %vm712_vm0, %v667_v57, 0 }
 0x264   :  { %12572 = vst [vmem:[#allocation49_spill] sm:$0xff] %v10550_v27  ;;  %12573 = vst [vmem:[#allocation50_spill] sm:$0xff] %v10553_v26  ;;  %v1080_v39 = vsel %vm712_vm0, %v669_v44, 0 }
 0x265   :  { %7241 = vmatmul.mubr.msk.bf16.gmra.mrb[236].mxu0 %vm705_vm1, %v10182_v45  ;;  %7244 = vmatmul.mubr.msk.bf16.gmra.mrb[236].mxu1 %vm705_vm1, %v10182_v45 }
 0x266   :  { %4330 = vmatpush1.bf16.msra.mxu0 %v10268_v61  ;;  %4383 = vmatpush1.bf16.msra.mxu1 %v10281_v31 }
 0x267   :  { %4331 = vmatprep.subr.bf16.mxu0 %v10557_v50  ;;  %4384 = vmatprep.subr.bf16.mxu1 %v10567_v19 }
 0x268   :  { %v3193_v62 = vpop.f32.mrb[152].mxu0  ;;  %4357 = vmatprep.mubr.bf16.mxu0 %v12366_v12  ;;  %v3246_v43 = vpop.f32.mrb[152].mxu1  ;;  %4410 = vmatprep.mubr.bf16.mxu1 %v12366_v12 }
 0x269   :  { %v3195_v58 = vpop.f32.mrb[153].mxu0  ;;  %v3248_v0 = vpop.f32.mrb[153].mxu1 }
 0x26a   :  { %v3197_v7 = vpop.f32.mrb[154].mxu0  ;;  %4332 = vmatpush1.bf16.msra.mxu0 %v534_v28  ;;  %4385 = vmatpush1.bf16.msra.mxu1 %v10585_v56  ;;  %v3250_v32 = vpop.f32.mrb[154].mxu1 }
 0x26b   :  { %v5037_v33 = vpack.c.bf16 %v3197_v7, %v3193_v62  ;;  %v3199_v29 = vpop.f32.mrb[155].mxu0  ;;  %7245 = vmatprep.subr.msk.bf16.mxu0 %vm712_vm0, %v668_v41  ;;  %7248 = vmatprep.subr.msk.bf16.mxu1 %vm712_vm0, %v670_v48  ;;  %v5039_v19 = vpack.c.bf16 %v3250_v32, %v3246_v43  ;;  %v3252_v50 = vpop.f32.mrb[155].mxu1  ;;  %v492_v41 = vpack.c.bf16 %v10291_v47, %v10064_v38 }
 0x26c   :  { %v5038_v2 = vpack.c.bf16 %v3199_v29, %v3195_v58  ;;  %v5040_v26 = vpack.c.bf16 %v3252_v50, %v3248_v0  ;;  %v494_v62 = vpack.c.bf16 %v10355_v52, %v10090_v22  ;;  %v491_v38 = vpack.c.bf16 %v10263_v13, %v10058_v34  ;;  %v10627_v34 = vld [vmem:[%s12148_s0 + $0x630] sm:$0xff] }
 0x26d   :  { %v493_v22 = vpack.c.bf16 %v10349_v54, %v12552_v40  ;;  %v10638_v40 = vld [vmem:[%s12148_s0 + $0x640] sm:$0xff]  ;;  %v10666_v32 = vpack.c.bf16 %v10572_v14, %v10548_v20 }
 0x26e   :  { %v10603_v27 = vmax.bf16 %v5038_v2, %v5037_v33  ;;  %4334 = vmatpush1.bf16.msra.mxu0 %v1074_v37  ;;  %4387 = vmatpush1.bf16.msra.mxu1 %v1080_v39  ;;  %v10605_v28 = vmax.bf16 %v5040_v26, %v5039_v19  ;;  %v10647_v33 = vpack.c.bf16 %v10627_v34, %v10572_v14  ;;  %v10659_v37 = vld [vmem:[%s12148_s0 + $0x648] sm:$0xff] }
 0x26f   :  { %4431 = vmatprep.subr.bf16.mxu0 %v10076_v60  ;;  %4484 = vmatprep.subr.bf16.mxu1 %v10083_v36 }
 0x270   :  { %v3203_v57 = vpop.f32.mrb[156].mxu0  ;;  %v3256_v48 = vpop.f32.mrb[156].mxu1  ;;  %12576 = vst [vmem:[#allocation56_spill] sm:$0xff] %v10647_v33 }
 0x271   :  { %7246 = vmatmul.mubr.msk.bf16.vlgmr.msra.gmra.mrb[240].mxu0 %vm705_vm1, %v10135_v11  ;;  %v3205_v50 = vpop.f32.mrb[157].mxu0  ;;  %7249 = vmatmul.mubr.msk.bf16.vlgmr.msra.gmra.mrb[240].mxu1 %vm705_vm1, %v10135_v11  ;;  %v3258_v39 = vpop.f32.mrb[157].mxu1 }
 0x272   :  { %4432 = vmatpush1.bf16.msra.mxu0 %v10097_v49  ;;  %v3207_v60 = vpop.f32.mrb[158].mxu0  ;;  %4485 = vmatpush1.bf16.msra.mxu1 %v10103_v25  ;;  %v3260_v19 = vpop.f32.mrb[158].mxu1  ;;  %v10633_v25 = vld [vmem:[%s12148_s0 + $0x638] sm:$0xff] }
 0x273   :  { %v5181_v36 = vpack.c.bf16 %v3207_v60, %v3203_v57  ;;  %v3209_v26 = vpop.f32.mrb[159].mxu0  ;;  %4433 = vmatprep.subr.bf16.mxu0 %v492_v41  ;;  %4486 = vmatprep.subr.bf16.mxu1 %v494_v62  ;;  %v5183_v58 = vpack.c.bf16 %v3260_v19, %v3256_v48  ;;  %v3262_v43 = vpop.f32.mrb[159].mxu1  ;;  %v10652_v29 = vpack.c.bf16 %v10638_v40, %v10633_v25 }
 0x274   :  { %v5182_v44 = vpack.c.bf16 %v3209_v26, %v3205_v50  ;;  %4367 = vmatprep.mubr.bf16.mxu0 %v12366_v12  ;;  %v5184_v49 = vpack.c.bf16 %v3262_v43, %v3258_v39  ;;  %4420 = vmatprep.mubr.bf16.mxu1 %v12366_v12  ;;  %v10672_v2 = vpack.c.bf16 %v10633_v25, %v10627_v34 }
 0x275   :  { %12577 = vst [vmem:[#allocation57_spill] sm:$0xff] %v10652_v29  ;;  %v672_v41 = vpack.c.bf16 %v10633_v25, %v10633_v25  ;;  %v671_v57 = vpack.c.bf16 %v10627_v34, %v10627_v34  ;;  %v674_v50 = vpack.c.bf16 %v10659_v37, %v10659_v37  ;;  %v673_v48 = vpack.c.bf16 %v10638_v40, %v10638_v40 }
 0x276   :  { %v10640_v7 = vmax.bf16 %v5182_v44, %v5181_v36  ;;  %4434 = vmatpush1.bf16.msra.mxu0 %v491_v38  ;;  %4487 = vmatpush1.bf16.msra.mxu1 %v493_v22  ;;  %v10643_v0 = vmax.bf16 %v5184_v49, %v5183_v58 }
 0x277   :  { %4435 = vmatprep.subr.bf16.mxu0 %v10396_v16  ;;  %4488 = vmatprep.subr.bf16.mxu1 %v10483_v30  ;;  %v1086_v19 = vsel %vm712_vm0, %v671_v57, 0  ;;  %v1092_v43 = vsel %vm712_vm0, %v673_v48, 0 }
 0x279   :  { %7247 = vmatmul.mubr.msk.bf16.gmra.mrb[244].mxu0 %vm705_vm1, %v10182_v45  ;;  %7250 = vmatmul.mubr.msk.bf16.gmra.mrb[244].mxu1 %vm705_vm1, %v10182_v45 }
 0x27a   :  { %4436 = vmatpush1.bf16.msra.mxu0 %v10365_v35  ;;  %4489 = vmatpush1.bf16.msra.mxu1 %v10373_v3 }
 0x27b   :  { %4437 = vmatprep.subr.bf16.mxu0 %v10647_v33  ;;  %4490 = vmatprep.subr.bf16.mxu1 %v10652_v29 }
 0x27c   :  { %v3299_v62 = vpop.f32.mrb[160].mxu0  ;;  %4463 = vmatprep.mubr.bf16.mxu0 %v12366_v12  ;;  %v3352_v38 = vpop.f32.mrb[160].mxu1  ;;  %4516 = vmatprep.mubr.bf16.mxu1 %v12366_v12 }
 0x27d   :  { %v3301_v60 = vpop.f32.mrb[161].mxu0  ;;  %v3354_v36 = vpop.f32.mrb[161].mxu1 }
 0x27e   :  { %v3303_v39 = vpop.f32.mrb[162].mxu0  ;;  %4438 = vmatpush1.bf16.msra.mxu0 %v10666_v32  ;;  %4491 = vmatpush1.bf16.msra.mxu1 %v10672_v2  ;;  %v3356_v44 = vpop.f32.mrb[162].mxu1 }
 0x27f   :  { %v5041_v26 = vpack.c.bf16 %v3303_v39, %v3299_v62  ;;  %v3305_v22 = vpop.f32.mrb[163].mxu0  ;;  %7251 = vmatprep.subr.msk.bf16.mxu0 %vm712_vm0, %v672_v41  ;;  %7254 = vmatprep.subr.msk.bf16.mxu1 %vm712_vm0, %v674_v50  ;;  %v5043_v49 = vpack.c.bf16 %v3356_v44, %v3352_v38  ;;  %v3358_v30 = vpop.f32.mrb[163].mxu1  ;;  %v496_v41 = vpack.c.bf16 %v10383_v10, %v12547_v6  ;;  %v12579_v38 = vld [vmem:[#allocation46_spill] sm:$0xff] }
 0x280   :  { %v5042_v58 = vpack.c.bf16 %v3305_v22, %v3301_v60  ;;  %v5044_v29 = vpack.c.bf16 %v3358_v30, %v3354_v36  ;;  %v498_v50 = vpack.c.bf16 %v10449_v23, %v12557_v63  ;;  %v495_v6 = vpack.c.bf16 %v10360_v53, %v12555_v9  ;;  %v12578_v63 = vld [vmem:[#allocation47_spill] sm:$0xff]  ;;  %v12580_v22 = vld [vmem:[#allocation38_spill] sm:$0xff] }
 0x281   :  { %v497_v39 = vpack.c.bf16 %v12579_v38, %v12578_v63 }
 0x282   :  { %v10691_v33 = vmax.bf16 %v5042_v58, %v5041_v26  ;;  %4440 = vmatpush1.bf16.msra.mxu0 %v1086_v19  ;;  %4493 = vmatpush1.bf16.msra.mxu1 %v1092_v43  ;;  %v10693_v62 = vmax.bf16 %v5044_v29, %v5043_v49  ;;  %v10723_v58 = vld [vmem:[%s12148_s0 + $0x658] sm:$0xff]  ;;  %v10728_v43 = vld [vmem:[%s12148_s0 + $0x660] sm:$0xff] }
 0x283   :  { %4537 = vmatprep.subr.bf16.mxu0 %v12567_v8  ;;  %4590 = vmatprep.subr.bf16.mxu1 %v12569_v55  ;;  %12583 = vst [vmem:[#allocation46_spill] sm:$0xff] %v10728_v43 }
 0x284   :  { %v3309_v57 = vpop.f32.mrb[164].mxu0  ;;  %v3362_v48 = vpop.f32.mrb[164].mxu1 }
 0x285   :  { %7252 = vmatmul.mubr.msk.bf16.vlgmr.msra.gmra.mrb[248].mxu0 %vm705_vm1, %v10135_v11  ;;  %v3311_v30 = vpop.f32.mrb[165].mxu0  ;;  %7255 = vmatmul.mubr.msk.bf16.vlgmr.msra.gmra.mrb[248].mxu1 %vm705_vm1, %v10135_v11  ;;  %v3364_v29 = vpop.f32.mrb[165].mxu1  ;;  %v12581_v11 = vld [vmem:[#allocation22_spill] sm:$0xff] }
 0x286   :  { %4538 = vmatpush1.bf16.msra.mxu0 %v10196_v24  ;;  %v3313_v8 = vpop.f32.mrb[166].mxu0  ;;  %4591 = vmatpush1.bf16.msra.mxu1 %v10202_v15  ;;  %v3366_v36 = vpop.f32.mrb[166].mxu1  ;;  %v521_v19 = vpack.c.bf16 %v12581_v11, %v12580_v22  ;;  %v10717_v15 = vld [vmem:[%s12148_s0 + $0x650] sm:$0xff] }
 0x287   :  { %v5185_v55 = vpack.c.bf16 %v3313_v8, %v3309_v57  ;;  %v3315_v60 = vpop.f32.mrb[167].mxu0  ;;  %4539 = vmatprep.subr.bf16.mxu0 %v496_v41  ;;  %4592 = vmatprep.subr.bf16.mxu1 %v498_v50  ;;  %v5187_v24 = vpack.c.bf16 %v3366_v36, %v3362_v48  ;;  %v3368_v44 = vpop.f32.mrb[167].mxu1  ;;  %12582 = vst [vmem:[#allocation47_spill] sm:$0xff] %v10717_v15  ;;  %v12589_v48 = vld [vmem:[#allocation34_spill] sm:$0xff] }
 0x288   :  { %v5186_v26 = vpack.c.bf16 %v3315_v60, %v3311_v30  ;;  %4473 = vmatprep.mubr.bf16.mxu0 %v12366_v12  ;;  %v5188_v9 = vpack.c.bf16 %v3368_v44, %v3364_v29  ;;  %4526 = vmatprep.mubr.bf16.mxu1 %v12366_v12  ;;  %v10737_v57 = vpack.c.bf16 %v10717_v15, %v10659_v37  ;;  %v10748_v30 = vld [vmem:[%s12148_s0 + $0x668] sm:$0xff] }
 0x289   :  { %v10741_v50 = vpack.c.bf16 %v10728_v43, %v10723_v58  ;;  %12588 = vst [vmem:[#allocation61_spill] sm:$0xff] %v10748_v30  ;;  %v10755_v8 = vpack.c.bf16 %v10659_v37, %v10638_v40  ;;  %v10761_v29 = vpack.c.bf16 %v10723_v58, %v10717_v15  ;;  %v675_v60 = vpack.c.bf16 %v10717_v15, %v10717_v15 }
 0x28a   :  { %v10730_v49 = vmax.bf16 %v5186_v26, %v5185_v55  ;;  %4540 = vmatpush1.bf16.msra.mxu0 %v495_v6  ;;  %4593 = vmatpush1.bf16.msra.mxu1 %v497_v39  ;;  %v10733_v41 = vmax.bf16 %v5188_v9, %v5187_v24  ;;  %12586 = vst [vmem:[#allocation59_spill] sm:$0xff] %v10737_v57  ;;  %v12590_v6 = vld [vmem:[#allocation37_spill] sm:$0xff] }
 0x28b   :  { %4541 = vmatprep.subr.bf16.mxu0 %v10489_v51  ;;  %4594 = vmatprep.subr.bf16.mxu1 %v521_v19  ;;  %12587 = vst [vmem:[#allocation60_spill] sm:$0xff] %v10741_v50  ;;  %v676_v55 = vpack.c.bf16 %v10723_v58, %v10723_v58  ;;  %v677_v39 = vpack.c.bf16 %v10728_v43, %v10728_v43 }
 0x28c   :  { %12584 = vst [vmem:[#allocation22_spill] sm:$0xff] %v10730_v49  ;;  %12585 = vst [vmem:[#allocation58_spill] sm:$0xff] %v10733_v41 }
 0x28d   :  { %7253 = vmatmul.mubr.msk.bf16.gmra.mrb[252].mxu0 %vm705_vm1, %v10182_v45  ;;  %7256 = vmatmul.mubr.msk.bf16.gmra.mrb[252].mxu1 %vm705_vm1, %v10182_v45  ;;  %v678_v45 = vpack.c.bf16 %v10748_v30, %v10748_v30  ;;  %v1104_v43 = vsel %vm712_vm0, %v677_v39, 0  ;;  %v209_v39 = vld [vmem:[%s12148_s0 + $0x680] sm:$0xff] }
 0x28e   :  { %4542 = vmatpush1.bf16.msra.mxu0 %v12589_v48  ;;  %4595 = vmatpush1.bf16.msra.mxu1 %v12590_v6 }
 0x28f   :  { %4543 = vmatprep.subr.bf16.mxu0 %v10737_v57  ;;  %4596 = vmatprep.subr.bf16.mxu1 %v10741_v50  ;;  %v1098_v57 = vsel %vm712_vm0, %v675_v60, 0 }
 0x290   :  { %v3405_v63 = vpop.f32.mrb[168].mxu0  ;;  %4569 = vmatprep.mubr.bf16.mxu0 %v12366_v12  ;;  %v3458_v36 = vpop.f32.mrb[168].mxu1  ;;  %4622 = vmatprep.mubr.bf16.mxu1 %v12366_v12 }
 0x291   :  { %v3407_v26 = vpop.f32.mrb[169].mxu0  ;;  %v3460_v19 = vpop.f32.mrb[169].mxu1 }
 0x292   :  { %v3409_v24 = vpop.f32.mrb[170].mxu0  ;;  %4544 = vmatpush1.bf16.msra.mxu0 %v10755_v8  ;;  %v3462_v9 = vpop.f32.mrb[170].mxu1  ;;  %4597 = vmatpush1.bf16.msra.mxu1 %v10761_v29 }
 0x293   :  { %v5045_v44 = vpack.c.bf16 %v3409_v24, %v3405_v63  ;;  %v3411_v50 = vpop.f32.mrb[171].mxu0  ;;  %7257 = vmatprep.subr.msk.bf16.mxu0 %vm712_vm0, %v676_v55  ;;  %v5047_v41 = vpack.c.bf16 %v3462_v9, %v3458_v36  ;;  %v3464_v30 = vpop.f32.mrb[171].mxu1  ;;  %7260 = vmatprep.subr.msk.bf16.mxu1 %vm712_vm0, %v678_v45  ;;  %v500_v63 = vpack.c.bf16 %v10532_v42, %v10258_v46 }
 0x294   :  { %v5046_v49 = vpack.c.bf16 %v3411_v50, %v3407_v26  ;;  %v5048_v15 = vpack.c.bf16 %v3464_v30, %v3460_v19  ;;  %v502_v50 = vpack.c.bf16 %v10543_v21, %v10291_v47  ;;  %v499_v47 = vpack.c.bf16 %v10562_v5, %v10252_v17  ;;  %v211_v17 = vld [vmem:[%s12148_s0 + $0x690] sm:$0xff]  ;;  %v12593_v26 = vld [vmem:[#allocation49_spill] sm:$0xff] }
 0x295   :  { %v501_v21 = vpack.c.bf16 %v10537_v18, %v10263_v13  ;;  %v212_v13 = vld [vmem:[%s12148_s0 + $0x698] sm:$0xff]  ;;  %v10821_v18 = vld [vmem:[%s12148_s0 + $0x6a0] sm:$0xff] }
 0x296   :  { %v5339_v22 = vmax.bf16 %v5046_v49, %v5045_v44  ;;  %4546 = vmatpush1.bf16.msra.mxu0 %v1098_v57  ;;  %v5340_v51 = vmax.bf16 %v5048_v15, %v5047_v41  ;;  %4599 = vmatpush1.bf16.msra.mxu1 %v1104_v43  ;;  %v210_v57 = vld [vmem:[%s12148_s0 + $0x688] sm:$0xff]  ;;  %v538_v24 = vpack.c.bf16 %v10821_v18, %v212_v13  ;;  %v12595_v44 = vld [vmem:[#allocation50_spill] sm:$0xff] }
 0x297   :  { %4643 = vmatprep.subr.bf16.mxu0 %v10268_v61  ;;  %4696 = vmatprep.subr.bf16.mxu1 %v10281_v31  ;;  %v10795_v61 = vld [vmem:[%s12149_s1] sm:$0xff]   ;;  %v536_v36 = vpack.c.bf16 %v211_v17, %v210_v57 }
 0x298   :  { %v10784_v55 = vmax.bf16 %v5339_v22, %v10508_v59  ;;  %v3415_v60 = vpop.f32.mrb[172].mxu0  ;;  %v10790_v30 = vmax.bf16 %v5340_v51, %v10510_v4  ;;  %v3468_v49 = vpop.f32.mrb[172].mxu1  ;;  %v12592_v31 = vld [vmem:[#allocation42_spill] sm:$0xff] }
 0x299   :  { %v3417_v15 = vpop.f32.mrb[173].mxu0  ;;  %7258 = vmatmul.mubr.msk.bf16.vlgmr.msra.gmra.mrb[0].mxu0 %vm705_vm1, %v10795_v61  ;;  %v3470_v46 = vpop.f32.mrb[173].mxu1  ;;  %7261 = vmatmul.mubr.msk.bf16.vlgmr.msra.gmra.mrb[0].mxu1 %vm705_vm1, %v10795_v61 }
 0x29a   :  { %12591 = vst [vmem:[#allocation34_spill] sm:$0xff] %v10784_v55  ;;  %v3419_v59 = vpop.f32.mrb[174].mxu0  ;;  %4644 = vmatpush1.bf16.msra.mxu0 %v12592_v31  ;;  %v3472_v4 = vpop.f32.mrb[174].mxu1  ;;  %4697 = vmatpush1.bf16.msra.mxu1 %v10304_v1 }
 0x29b   :  { %v5189_v51 = vpack.c.bf16 %v3419_v59, %v3415_v60  ;;  %v3421_v42 = vpop.f32.mrb[175].mxu0  ;;  %4645 = vmatprep.subr.bf16.mxu0 %v500_v63  ;;  %v5191_v22 = vpack.c.bf16 %v3472_v4, %v3468_v49  ;;  %v3474_v41 = vpop.f32.mrb[175].mxu1  ;;  %4698 = vmatprep.subr.bf16.mxu1 %v502_v50  ;;  %v10838_v63 = vld [vmem:[%s12149_s1 + $0x8] sm:$0xff]   ;;  %v12597_v50 = vld [vmem:[#allocation44_spill] sm:$0xff]  ;;  %v537_v49 = vpack.c.bf16 %v212_v13, %v211_v17 }
 0x29c   :  { %v5190_v43 = vpack.c.bf16 %v3421_v42, %v3417_v15  ;;  %4632 = vmatprep.mubr.bf16.mxu1 %v12366_v12  ;;  %v5192_v1 = vpack.c.bf16 %v3474_v41, %v3470_v46  ;;  %4579 = vmatprep.mubr.bf16.mxu0 %v12366_v12  ;;  %v12596_v60 = vld [vmem:[#allocation51_spill] sm:$0xff]  ;;  %v680_v15 = vpack.c.bf16 %v212_v13, %v212_v13 }
 0x29d   :  { %v679_v46 = vpack.c.bf16 %v211_v17, %v211_v17 }
 0x29e   :  { %v5375_v5 = vmax.bf16 %v5190_v43, %v5189_v51  ;;  %4646 = vmatpush1.bf16.msra.mxu0 %v499_v47  ;;  %v5376_v45 = vmax.bf16 %v5192_v1, %v5191_v22  ;;  %4699 = vmatpush1.bf16.msra.mxu1 %v501_v21  ;;  %v681_v47 = vpack.c.bf16 %v10821_v18, %v10821_v18 }
 0x29f   :  { %4647 = vmatprep.subr.bf16.mxu0 %v10585_v56  ;;  %4700 = vmatprep.subr.bf16.mxu1 %v10666_v32  ;;  %v10845_v56 = vld [vmem:[%s12148_s0 + $0x6a8] sm:$0xff]  ;;  %v535_v32 = vpack.c.bf16 %v210_v57, %v209_v39  ;;  %v1110_v57 = vsel %vm712_vm0, %v679_v46, 0 }
 0x2a0   :  { %v10828_v19 = vmax.bf16 %v5375_v5, %v12593_v26  ;;  %v10833_v9 = vmax.bf16 %v5376_v45, %v12595_v44  ;;  %v682_v31 = vpack.c.bf16 %v10845_v56, %v10845_v56  ;;  %v1116_v5 = vsel %vm712_vm0, %v681_v47, 0 }
 0x2a1   :  { %7259 = vmatmul.mubr.msk.bf16.gmra.mrb[4].mxu0 %vm705_vm1, %v10838_v63  ;;  %7262 = vmatmul.mubr.msk.bf16.gmra.mrb[4].mxu1 %vm705_vm1, %v10838_v63  ;;  %v504_v26 = vpack.c.bf16 %v10572_v14, %v10355_v52 }
 0x2a2   :  { %12594 = vst [vmem:[#allocation37_spill] sm:$0xff] %v10828_v19  ;;  %4648 = vmatpush1.bf16.msra.mxu0 %v12596_v60  ;;  %4701 = vmatpush1.bf16.msra.mxu1 %v12597_v50  ;;  %v506_v60 = vpack.c.bf16 %v10633_v25, %v10383_v10  ;;  %v505_v25 = vpack.c.bf16 %v10627_v34, %v10360_v53  ;;  %v10894_v53 = vld [vmem:[%s12148_s0 + $0x6c0] sm:$0xff] }
 0x2a3   :  { %4649 = vmatprep.subr.bf16.mxu0 %v536_v36  ;;  %4702 = vmatprep.subr.bf16.mxu1 %v538_v24 }
 0x2a4   :  { %v3511_v59 = vpop.f32.mrb[176].mxu0  ;;  %4728 = vmatprep.mubr.bf16.mxu1 %v12366_v12  ;;  %v3564_v51 = vpop.f32.mrb[176].mxu1  ;;  %4675 = vmatprep.mubr.bf16.mxu0 %v12366_v12 }
 0x2a5   :  { %v3513_v4 = vpop.f32.mrb[177].mxu0  ;;  %v3566_v42 = vpop.f32.mrb[177].mxu1 }
 0x2a6   :  { %v3515_v21 = vpop.f32.mrb[178].mxu0  ;;  %4650 = vmatpush1.bf16.msra.mxu0 %v535_v32  ;;  %v3568_v43 = vpop.f32.mrb[178].mxu1  ;;  %4703 = vmatpush1.bf16.msra.mxu1 %v537_v49 }
 0x2a7   :  { %v5049_v22 = vpack.c.bf16 %v3515_v21, %v3511_v59  ;;  %v3517_v41 = vpop.f32.mrb[179].mxu0  ;;  %7263 = vmatprep.subr.msk.bf16.mxu0 %vm712_vm0, %v680_v15  ;;  %v5051_v17 = vpack.c.bf16 %v3568_v43, %v3564_v51  ;;  %v3570_v13 = vpop.f32.mrb[179].mxu1  ;;  %7266 = vmatprep.subr.msk.bf16.mxu1 %vm712_vm0, %v682_v31  ;;  %v215_v31 = vld [vmem:[%s12148_s0 + $0x6b0] sm:$0xff]  ;;  %v10911_v21 = vld [vmem:[%s12148_s0 + $0x6c8] sm:$0xff] }
 0x2a8   :  { %v5050_v1 = vpack.c.bf16 %v3517_v41, %v3513_v4  ;;  %v5052_v45 = vpack.c.bf16 %v3570_v13, %v3566_v42  ;;  %v540_v47 = vpack.c.bf16 %v215_v31, %v10845_v56  ;;  %v683_v43 = vpack.c.bf16 %v215_v31, %v215_v31 }
 0x2aa   :  { %v5341_v39 = vmax.bf16 %v5050_v1, %v5049_v22  ;;  %4652 = vmatpush1.bf16.msra.mxu0 %v1110_v57  ;;  %v5342_v36 = vmax.bf16 %v5052_v45, %v5051_v17  ;;  %4705 = vmatpush1.bf16.msra.mxu1 %v1116_v5  ;;  %v686_v57 = vpack.c.bf16 %v10911_v21, %v10911_v21 }
 0x2ab   :  { %4749 = vmatprep.subr.bf16.mxu0 %v10365_v35  ;;  %4802 = vmatprep.subr.bf16.mxu1 %v10373_v3  ;;  %v503_v3 = vpack.c.bf16 %v10548_v20, %v10349_v54  ;;  %v685_v17 = vpack.c.bf16 %v10894_v53, %v10894_v53 }
 0x2ac   :  { %v10865_v24 = vmax.bf16 %v5341_v39, %v10603_v27  ;;  %v3521_v44 = vpop.f32.mrb[180].mxu0  ;;  %v10871_v32 = vmax.bf16 %v5342_v36, %v10605_v28  ;;  %v3574_v50 = vpop.f32.mrb[180].mxu1  ;;  %v12598_v27 = vld [vmem:[#allocation54_spill] sm:$0xff]  ;;  %v1122_v36 = vsel %vm712_vm0, %v683_v43, 0 }
 0x2ad   :  { %v3523_v49 = vpop.f32.mrb[181].mxu0  ;;  %7264 = vmatmul.mubr.msk.bf16.vlgmr.msra.gmra.mrb[8].mxu0 %vm705_vm1, %v10795_v61  ;;  %v3576_v35 = vpop.f32.mrb[181].mxu1  ;;  %7267 = vmatmul.mubr.msk.bf16.vlgmr.msra.gmra.mrb[8].mxu1 %vm705_vm1, %v10795_v61  ;;  %v12609_v43 = vld [vmem:[#allocation22_spill] sm:$0xff] }
 0x2ae   :  { %v3525_v52 = vpop.f32.mrb[182].mxu0  ;;  %4750 = vmatpush1.bf16.msra.mxu0 %v12598_v27  ;;  %v3578_v10 = vpop.f32.mrb[182].mxu1  ;;  %4803 = vmatpush1.bf16.msra.mxu1 %v10396_v16  ;;  %v216_v16 = vld [vmem:[%s12148_s0 + $0x6b8] sm:$0xff]  ;;  %v508_v27 = vpack.c.bf16 %v10659_v37, %v10449_v23  ;;  %v507_v37 = vpack.c.bf16 %v10638_v40, %v12579_v38  ;;  %v219_v40 = vld [vmem:[%s12148_s0 + $0x6d0] sm:$0xff] }
 0x2af   :  { %v5193_v14 = vpack.c.bf16 %v3525_v52, %v3521_v44  ;;  %v3527_v28 = vpop.f32.mrb[183].mxu0  ;;  %4751 = vmatprep.subr.bf16.mxu0 %v504_v26  ;;  %v5195_v15 = vpack.c.bf16 %v3578_v10, %v3574_v50  ;;  %v3580_v59 = vpop.f32.mrb[183].mxu1  ;;  %4804 = vmatprep.subr.bf16.mxu1 %v506_v60  ;;  %v542_v4 = vpack.c.bf16 %v10894_v53, %v216_v16  ;;  %v1128_v50 = vsel %vm712_vm0, %v685_v17, 0  ;;  %v222_v17 = vld [vmem:[%s12148_s0 + $0x6e8] sm:$0xff] }
 0x2b0   :  { %v5194_v46 = vpack.c.bf16 %v3527_v28, %v3523_v49  ;;  %4738 = vmatprep.mubr.bf16.mxu1 %v12366_v12  ;;  %v5196_v54 = vpack.c.bf16 %v3580_v59, %v3576_v35  ;;  %4685 = vmatprep.mubr.bf16.mxu0 %v12366_v12  ;;  %v684_v22 = vpack.c.bf16 %v216_v16, %v216_v16  ;;  %v12605_v59 = vld [vmem:[#allocation38_spill] sm:$0xff] }
 0x2b1   :  { %v510_v10 = vpack.c.bf16 %v10723_v58, %v12581_v11  ;;  %v12604_v58 = vld [vmem:[#allocation48_spill] sm:$0xff] }
 0x2b2   :  { %v5377_v20 = vmax.bf16 %v5194_v46, %v5193_v14  ;;  %4752 = vmatpush1.bf16.msra.mxu0 %v503_v3  ;;  %v5378_v34 = vmax.bf16 %v5196_v54, %v5195_v15  ;;  %4805 = vmatpush1.bf16.msra.mxu1 %v505_v25 }
 0x2b3   :  { %4753 = vmatprep.subr.bf16.mxu0 %v10672_v2  ;;  %4806 = vmatprep.subr.bf16.mxu1 %v10755_v8  ;;  %v539_v2 = vpack.c.bf16 %v10845_v56, %v10821_v18  ;;  %v12601_v8 = vld [vmem:[#allocation57_spill] sm:$0xff] }
 0x2b4   :  { %v10899_v51 = vmax.bf16 %v5377_v20, %v10640_v7  ;;  %v10904_v42 = vmax.bf16 %v5378_v34, %v10643_v0  ;;  %v12600_v7 = vld [vmem:[#allocation56_spill] sm:$0xff]  ;;  %v541_v0 = vpack.c.bf16 %v216_v16, %v215_v31  ;;  %v12606_v31 = vld [vmem:[#allocation47_spill] sm:$0xff]  ;;  %v12607_v34 = vld [vmem:[#allocation46_spill] sm:$0xff] }
 0x2b5   :  { %7265 = vmatmul.mubr.msk.bf16.gmra.mrb[12].mxu0 %vm705_vm1, %v10838_v63  ;;  %7268 = vmatmul.mubr.msk.bf16.gmra.mrb[12].mxu1 %vm705_vm1, %v10838_v63 }
 0x2b6   :  { %12599 = vst [vmem:[#allocation42_spill] sm:$0xff] %v10899_v51  ;;  %4754 = vmatpush1.bf16.msra.mxu0 %v12600_v7  ;;  %4807 = vmatpush1.bf16.msra.mxu1 %v12601_v8  ;;  %v220_v7 = vld [vmem:[%s12148_s0 + $0x6d8] sm:$0xff] }
 0x2b7   :  { %4755 = vmatprep.subr.bf16.mxu0 %v540_v47  ;;  %4808 = vmatprep.subr.bf16.mxu1 %v542_v4  ;;  %v12608_v47 = vld [vmem:[#allocation61_spill] sm:$0xff] }
 0x2b8   :  { %v3617_v41 = vpop.f32.mrb[184].mxu0  ;;  %4834 = vmatprep.mubr.bf16.mxu1 %v12366_v12  ;;  %v3670_v1 = vpop.f32.mrb[184].mxu1  ;;  %4781 = vmatprep.mubr.bf16.mxu0 %v12366_v12  ;;  %v533_v4 = vpack.c.bf16 %v12608_v47, %v12607_v34  ;;  %v12621_v34 = vld [vmem:[#allocation3_spill] sm:$0xff] }
 0x2b9   :  { %v3619_v13 = vpop.f32.mrb[185].mxu0  ;;  %v3672_v18 = vpop.f32.mrb[185].mxu1 }
 0x2ba   :  { %v3621_v56 = vpop.f32.mrb[186].mxu0  ;;  %4756 = vmatpush1.bf16.msra.mxu0 %v539_v2  ;;  %v3674_v45 = vpop.f32.mrb[186].mxu1  ;;  %4809 = vmatpush1.bf16.msra.mxu1 %v541_v0  ;;  %v221_v2 = vld [vmem:[%s12148_s0 + $0x6e0] sm:$0xff] }
 0x2bb   :  { %v5053_v5 = vpack.c.bf16 %v3621_v56, %v3617_v41  ;;  %v3623_v39 = vpop.f32.mrb[187].mxu0  ;;  %7269 = vmatprep.subr.msk.bf16.mxu0 %vm712_vm0, %v684_v22  ;;  %v5055_v26 = vpack.c.bf16 %v3674_v45, %v3670_v1  ;;  %v3676_v60 = vpop.f32.mrb[187].mxu1  ;;  %7272 = vmatprep.subr.msk.bf16.mxu1 %vm712_vm0, %v686_v57  ;;  %v544_v22 = vpack.c.bf16 %v219_v40, %v10911_v21  ;;  %v12611_v1 = vld [vmem:[#allocation58_spill] sm:$0xff]  ;;  %v12614_v56 = vld [vmem:[#allocation60_spill] sm:$0xff] }
 0x2bc   :  { %v5054_v44 = vpack.c.bf16 %v3623_v39, %v3619_v13  ;;  %v5056_v49 = vpack.c.bf16 %v3676_v60, %v3672_v18  ;;  %v546_v57 = vpack.c.bf16 %v221_v2, %v220_v7  ;;  %v543_v18 = vpack.c.bf16 %v10911_v21, %v10894_v53 }
 0x2bd   :  { %v688_v45 = vpack.c.bf16 %v220_v7, %v220_v7  ;;  %v687_v39 = vpack.c.bf16 %v219_v40, %v219_v40 }
 0x2be   :  { %v5343_v35 = vmax.bf16 %v5054_v44, %v5053_v5  ;;  %4758 = vmatpush1.bf16.msra.mxu0 %v1122_v36  ;;  %v5344_v52 = vmax.bf16 %v5056_v49, %v5055_v26  ;;  %4811 = vmatpush1.bf16.msra.mxu1 %v1128_v50  ;;  %v545_v5 = vpack.c.bf16 %v220_v7, %v219_v40 }
 0x2bf   :  { %4855 = vmatprep.subr.bf16.mxu0 %v12589_v48  ;;  %4908 = vmatprep.subr.bf16.mxu1 %v12590_v6  ;;  %v690_v26 = vpack.c.bf16 %v222_v17, %v222_v17  ;;  %v689_v44 = vpack.c.bf16 %v221_v2, %v221_v2  ;;  %v12626_v17 = vld [vmem:[#allocation20_spill] sm:$0xff] }
 0x2c0   :  { %v10933_v3 = vmax.bf16 %v5343_v35, %v10691_v33  ;;  %v3627_v14 = vpop.f32.mrb[188].mxu0  ;;  %v3680_v28 = vpop.f32.mrb[188].mxu1  ;;  %v10941_v15 = vmax.bf16 %v5344_v52, %v10693_v62  ;;  %v12603_v33 = vld [vmem:[#allocation52_spill] sm:$0xff]  ;;  %v509_v62 = vpack.c.bf16 %v12606_v31, %v12605_v59  ;;  %v1134_v52 = vsel %vm712_vm0, %v687_v39, 0  ;;  %v12617_v59 = vld [vmem:[#allocation6_spill] sm:$0xff]  ;;  %v12618_v31 = vld [vmem:[#allocation11_spill] sm:$0xff] }
 0x2c1   :  { %v3629_v25 = vpop.f32.mrb[189].mxu0  ;;  %7270 = vmatmul.mubr.msk.bf16.vlgmr.msra.gmra.mrb[16].mxu0 %vm705_vm1, %v10795_v61  ;;  %v3682_v48 = vpop.f32.mrb[189].mxu1  ;;  %7273 = vmatmul.mubr.msk.bf16.vlgmr.msra.gmra.mrb[16].mxu1 %vm705_vm1, %v10795_v61 }
 0x2c2   :  { %12602 = vst [vmem:[#allocation49_spill] sm:$0xff] %v10941_v15  ;;  %v3631_v23 = vpop.f32.mrb[190].mxu0  ;;  %4856 = vmatpush1.bf16.msra.mxu0 %v12603_v33  ;;  %v3684_v11 = vpop.f32.mrb[190].mxu1  ;;  %4909 = vmatpush1.bf16.msra.mxu1 %v12604_v58  ;;  %v12615_v33 = vld [vmem:[#allocation16_spill] sm:$0xff] }
 0x2c3   :  { %v5197_v6 = vpack.c.bf16 %v3631_v23, %v3627_v14  ;;  %v3633_v46 = vpop.f32.mrb[191].mxu0  ;;  %4857 = vmatprep.subr.bf16.mxu0 %v508_v27  ;;  %v5199_v54 = vpack.c.bf16 %v3684_v11, %v3680_v28  ;;  %v3686_v20 = vpop.f32.mrb[191].mxu1  ;;  %4910 = vmatprep.subr.bf16.mxu1 %v510_v10  ;;  %v1140_v10 = vsel %vm712_vm0, %v689_v44, 0  ;;  %v12630_v44 = vld [vmem:[#allocation14_spill] sm:$0xff] }
 0x2c4   :  { %v5198_v16 = vpack.c.bf16 %v3633_v46, %v3629_v25  ;;  %4844 = vmatprep.mubr.bf16.mxu1 %v12366_v12  ;;  %v5200_v38 = vpack.c.bf16 %v3686_v20, %v3682_v48  ;;  %4791 = vmatprep.mubr.bf16.mxu0 %v12366_v12  ;;  %v12620_v20 = vld [vmem:[#allocation31_spill] sm:$0xff] }
 0x2c6   :  { %v5379_v8 = vmax.bf16 %v5198_v16, %v5197_v6  ;;  %4858 = vmatpush1.bf16.msra.mxu0 %v507_v37  ;;  %v5380_v0 = vmax.bf16 %v5200_v38, %v5199_v54  ;;  %4911 = vmatpush1.bf16.msra.mxu1 %v509_v62  ;;  %v12616_v6 = vld [vmem:[#allocation55_spill] sm:$0xff]  ;;  %v12619_v62 = vmax.bf16 %v12617_v59, %v12618_v31  ;;  %v12622_v38 = vld [vmem:[#allocation45_spill] sm:$0xff] }
 0x2c7   :  { %4859 = vmatprep.subr.bf16.mxu0 %v10761_v29  ;;  %4912 = vmatprep.subr.bf16.mxu1 %v533_v4  ;;  %v12613_v29 = vld [vmem:[#allocation59_spill] sm:$0xff] }
 0x2c8   :  { %v10967_v41 = vmax.bf16 %v5379_v8, %v12609_v43  ;;  %v10975_v13 = vmax.bf16 %v5380_v0, %v12611_v1  ;;  %v12624_v43 = vld [vmem:[#allocation13_spill] sm:$0xff]  ;;  %v12627_v1 = vld [vmem:[#allocation27_spill] sm:$0xff] }
 0x2c9   :  { %7271 = vmatmul.mubr.msk.bf16.gmra.mrb[20].mxu0 %vm705_vm1, %v10838_v63  ;;  %7274 = vmatmul.mubr.msk.bf16.gmra.mrb[20].mxu1 %vm705_vm1, %v10838_v63 }
 0x2ca   :  { %12610 = vst [vmem:[#allocation50_spill] sm:$0xff] %v10967_v41  ;;  %12612 = vst [vmem:[#allocation51_spill] sm:$0xff] %v10975_v13  ;;  %4860 = vmatpush1.bf16.msra.mxu0 %v12613_v29  ;;  %4913 = vmatpush1.bf16.msra.mxu1 %v12614_v56  ;;  %v12628_v56 = vld [vmem:[#allocation7_spill] sm:$0xff] }
 0x2cb   :  { %4861 = vmatprep.subr.bf16.mxu0 %v544_v22  ;;  %4914 = vmatprep.subr.bf16.mxu1 %v546_v57  ;;  %v12623_v22 = vld [vmem:[#allocation2_spill] sm:$0xff] }
 0x2cc   :  { %v3723_v36 = vpop.f32.mrb[192].mxu0  ;;  %4940 = vmatprep.mubr.bf16.mxu1 %v12366_v12  ;;  %v3776_v50 = vpop.f32.mrb[192].mxu1  ;;  %4887 = vmatprep.mubr.bf16.mxu0 %v12366_v12  ;;  %v12625_v57 = vmax.bf16 %v12623_v22, %v12624_v43 }
 0x2cd   :  { %v3725_v60 = vpop.f32.mrb[193].mxu0  ;;  %v3778_v35 = vpop.f32.mrb[193].mxu1 }
 0x2ce   :  { %v3727_v49 = vpop.f32.mrb[194].mxu0  ;;  %4862 = vmatpush1.bf16.msra.mxu0 %v543_v18  ;;  %4915 = vmatpush1.bf16.msra.mxu1 %v545_v5  ;;  %v3780_v27 = vpop.f32.mrb[194].mxu1  ;;  %v11020_v18 = vld [vmem:[%s12150_s2 + $0x4] ss:$12 sps:$4 sm:$0xff]  }
 0x2cf   :  { %v5057_v53 = vpack.c.bf16 %v3727_v49, %v3723_v36  ;;  %v3729_v21 = vpop.f32.mrb[195].mxu0  ;;  %7275 = vmatprep.subr.msk.bf16.mxu0 %vm712_vm0, %v688_v45  ;;  %7278 = vmatprep.subr.msk.bf16.mxu1 %vm712_vm0, %v690_v26  ;;  %v5059_v28 = vpack.c.bf16 %v3780_v27, %v3776_v50  ;;  %v3782_v25 = vpop.f32.mrb[195].mxu1  ;;  %v12629_v5 = vld [vmem:[#allocation28_spill] sm:$0xff] }
 0x2d0   :  { %v5058_v14 = vpack.c.bf16 %v3729_v21, %v3725_v60  ;;  %v5060_v48 = vpack.c.bf16 %v3782_v25, %v3778_v35  ;;  %v11034_v60 = vld [vmem:[%s12150_s2 + $0x8] ss:$12 sps:$4 sm:$0xff]   ;;  %v12631_v35 = vld [vmem:[#allocation29_spill] sm:$0xff]  ;;  %v12633_v25 = vld [vmem:[#allocation26_spill] sm:$0xff] }
 0x2d2   :  { %v10989_v23 = vmax.bf16 %v5058_v14, %v5057_v53  ;;  %4864 = vmatpush1.bf16.msra.mxu0 %v1134_v52  ;;  %4917 = vmatpush1.bf16.msra.mxu1 %v1140_v10  ;;  %v10992_v37 = vmax.bf16 %v5060_v48, %v5059_v28  ;;  %v12632_v28 = vld [vmem:[#allocation24_spill] sm:$0xff] }
 0x2d3   :  { %5554 = vmatprep.subr.bf16.mxu0 %v12615_v33  ;;  %5627 = vmatprep.subr.bf16.mxu1 %v12616_v6 }
 0x2d4   :  { %v3733_v11 = vpop.f32.mrb[196].mxu0  ;;  %v3786_v46 = vpop.f32.mrb[196].mxu1 }
 0x2d5   :  { %7276 = vmatmul.mubr.msk.bf16.vlgmr.msra.gmra.mrb[24].mxu0 %vm705_vm1, %v10795_v61  ;;  %v3735_v58 = vpop.f32.mrb[197].mxu0  ;;  %7279 = vmatmul.mubr.msk.bf16.vlgmr.msra.gmra.mrb[24].mxu1 %vm705_vm1, %v10795_v61  ;;  %v3788_v16 = vpop.f32.mrb[197].mxu1 }
 0x2d6   :  { %5555 = vmatpush1.bf16.msra.mxu0 %v12619_v62  ;;  %v3737_v54 = vpop.f32.mrb[198].mxu0  ;;  %5628 = vmatpush1.bf16.msra.mxu1 %v12620_v20  ;;  %v3790_v40 = vpop.f32.mrb[198].mxu1  ;;  %v11052_v62 = vld [vmem:[%s12150_s2 + $0x20] ss:$12 sps:$4 sm:$0xff]  }
 0x2d7   :  { %5556 = vmatprep.subr.bf16.mxu0 %v12621_v34  ;;  %v5201_v47 = vpack.c.bf16 %v3737_v54, %v3733_v11  ;;  %v3739_v4 = vpop.f32.mrb[199].mxu0  ;;  %5629 = vmatprep.subr.bf16.mxu1 %v12622_v38  ;;  %v5203_v2 = vpack.c.bf16 %v3790_v40, %v3786_v46  ;;  %v3792_v61 = vpop.f32.mrb[199].mxu1  ;;  %v12634_v54 = vld [vmem:[#allocation17_spill] sm:$0xff] }
 0x2d8   :  { %v5202_v7 = vpack.c.bf16 %v3739_v4, %v3735_v58  ;;  %4950 = vmatprep.mubr.bf16.mxu1 %v12366_v12  ;;  %v5204_v8 = vpack.c.bf16 %v3792_v61, %v3788_v16  ;;  %4897 = vmatprep.mubr.bf16.mxu0 %v12366_v12  ;;  %v12635_v16 = vld [vmem:[#allocation30_spill] sm:$0xff] }
 0x2da   :  { %v11007_v0 = vmax.bf16 %v5202_v7, %v5201_v47  ;;  %5557 = vmatpush1.bf16.msra.mxu0 %v12625_v57  ;;  %5630 = vmatpush1.bf16.msra.mxu1 %v12626_v17  ;;  %v11014_v29 = vmax.bf16 %v5204_v8, %v5203_v2  ;;  %v12636_v7 = vld [vmem:[#allocation43_spill] sm:$0xff]  ;;  %v12637_v57 = vld [vmem:[#allocation5_spill] sm:$0xff] }
 0x2db   :  { %5558 = vmatprep.subr.bf16.mxu0 %v12627_v1  ;;  %5700 = vmatprep.subr.bf16.mxu1 %v12620_v20 }
 0x2dd   :  { %7277 = vmatmul.mubr.msk.bf16.gmra.mrb[28].mxu0 %vm705_vm1, %v10838_v63  ;;  %7280 = vmatmul.mubr.msk.bf16.gmra.mrb[28].mxu1 %vm705_vm1, %v10838_v63 }
 0x2de   :  { %5559 = vmatpush1.bf16.msra.mxu0 %v12628_v56  ;;  %5659 = vmatprep.mubr.bf16.mxu1 %v12366_v12 }
 0x2df   :  { %5560 = vmatprep.subr.bf16.mxu0 %v12629_v5  ;;  %5586 = vmatprep.mubr.bf16.mxu0 %v11020_v18 }
 0x2e0   :  { %v3829_v45 = vpop.f32.mrb[200].mxu0  ;;  %v3882_v36 = vpop.f32.mrb[200].mxu1 }
 0x2e1   :  { %v3831_v39 = vpop.f32.mrb[201].mxu0  ;;  %v3884_v63 = vpop.f32.mrb[201].mxu1 }
 0x2e2   :  { %v3833_v26 = vpop.f32.mrb[202].mxu0  ;;  %5561 = vmatpush1.bf16.msra.mxu0 %v12630_v44  ;;  %v3886_v53 = vpop.f32.mrb[202].mxu1 }
 0x2e3   :  { %v5061_v50 = vpack.c.bf16 %v3833_v26, %v3829_v45  ;;  %v3835_v49 = vpop.f32.mrb[203].mxu0  ;;  %5562 = vmatprep.subr.bf16.mxu0 %v12631_v35  ;;  %v5063_v52 = vpack.c.bf16 %v3886_v53, %v3882_v36  ;;  %v3888_v27 = vpop.f32.mrb[203].mxu1  ;;  %v12638_v45 = vld [vmem:[#allocation9_spill] sm:$0xff] }
 0x2e4   :  { %v5062_v21 = vpack.c.bf16 %v3835_v49, %v3831_v39  ;;  %v5064_v14 = vpack.c.bf16 %v3888_v27, %v3884_v63  ;;  %v12639_v39 = vld [vmem:[#allocation18_spill] sm:$0xff]  ;;  %v12640_v26 = vld [vmem:[#allocation53_spill] sm:$0xff]  ;;  %v12641_v63 = vld [vmem:[#allocation15_spill] sm:$0xff] }
 0x2e5   :  { %7293 = vmatmul.mubr.msk.bf16.vlgmr.msra.gmra.mrb[32].mxu1 %vm5541_vm2, %v11034_v60  ;;  %v12643_v49 = vld [vmem:[#allocation39_spill] sm:$0xff]  ;;  %v12644_v53 = vld [vmem:[#allocation41_spill] sm:$0xff] }
 0x2e6   :  { %v11037_v10 = vmax.bf16 %v5062_v21, %v5061_v50  ;;  %5563 = vmatpush1.bf16.msra.mxu0 %v12615_v33  ;;  %5701 = vmatpush1.bf16.msra.mxu1 %v12632_v28  ;;  %v11044_v48 = vmax.bf16 %v5064_v14, %v5063_v52  ;;  %v11072_v50 = vld [vmem:[%s12150_s2 + $0x38] ss:$12 sps:$4 sm:$0xff]  }
 0x2e7   :  { %5564 = vmatprep.subr.bf16.mxu0 %v12633_v25  ;;  %5702 = vmatprep.subr.bf16.mxu1 %v12626_v17  ;;  %12642 = vst [vmem:[#allocation44_spill] sm:$0xff] %v11072_v50 }
 0x2e8   :  { %v3839_v11 = vpop.f32.mrb[204].mxu0  ;;  %5669 = vmatprep.mubr.bf16.mxu1 %v12366_v12  ;;  %v3892_v46 = vpop.f32.mrb[204].mxu1 }
 0x2e9   :  { %v3841_v58 = vpop.f32.mrb[205].mxu0  ;;  %v3894_v31 = vpop.f32.mrb[205].mxu1 }
 0x2ea   :  { %5565 = vmatpush1.bf16.msra.mxu0 %v12621_v34  ;;  %v3843_v59 = vpop.f32.mrb[206].mxu0  ;;  %5703 = vmatpush1.bf16.msra.mxu1 %v12634_v54  ;;  %v3896_v40 = vpop.f32.mrb[206].mxu1 }
 0x2eb   :  { %5566 = vmatprep.subr.bf16.mxu0 %v12635_v16  ;;  %v5205_v47 = vpack.c.bf16 %v3843_v59, %v3839_v11  ;;  %v3845_v4 = vpop.f32.mrb[207].mxu0  ;;  %5704 = vmatprep.subr.bf16.mxu1 %v12636_v7  ;;  %v5207_v61 = vpack.c.bf16 %v3896_v40, %v3892_v46  ;;  %v3898_v8 = vpop.f32.mrb[207].mxu1  ;;  %v12645_v11 = vld [vmem:[#allocation4_spill] sm:$0xff] }
 0x2ec   :  { %v5206_v2 = vpack.c.bf16 %v3845_v4, %v3841_v58  ;;  %v5208_v22 = vpack.c.bf16 %v3898_v8, %v3894_v31  ;;  %v12646_v31 = vld [vmem:[#allocation12_spill] sm:$0xff] }
 0x2ed   :  { %7294 = vmatmul.mubr.msk.bf16.gmra.mrb[36].mxu1 %vm5541_vm2, %v11052_v62 }
 0x2ee   :  { %v11057_v43 = vmax.bf16 %v5206_v2, %v5205_v47  ;;  %5567 = vmatpush1.bf16.msra.mxu0 %v12637_v57  ;;  %5705 = vmatpush1.bf16.msra.mxu1 %v12638_v45  ;;  %v11064_v36 = vmax.bf16 %v5208_v22, %v5207_v61  ;;  %v12647_v22 = vld [vmem:[#allocation25_spill] sm:$0xff] }
 0x2ef   :  { %5568 = vmatprep.subr.bf16.mxu0 %v12639_v39  ;;  %5706 = vmatprep.subr.bf16.mxu1 %v12640_v26 }
 0x2f0   :  { %5679 = vmatprep.mubr.bf16.mxu1 %v12366_v12 }
 0x2f2   :  { %5569 = vmatpush1.bf16.msra.mxu0 %v12641_v63  ;;  %5707 = vmatpush1.bf16.msra.mxu1 %v12643_v49 }
 0x2f3   :  { %5570 = vmatprep.subr.bf16.mxu0 %v12644_v53  ;;  %5708 = vmatprep.subr.bf16.mxu1 %v12616_v6 }
 0x2f4   :  { %v3935_v21 = vpop.f32.mrb[208].mxu0  ;;  %v3988_v27 = vpop.f32.mrb[208].mxu1 }
 0x2f5   :  { %v3937_v52 = vpop.f32.mrb[209].mxu0  ;;  %v3990_v58 = vpop.f32.mrb[209].mxu1  ;;  %7295 = vmatmul.mubr.msk.bf16.gmra.mrb[40].mxu1 %vm5541_vm2, %v11072_v50 }
 0x2f6   :  { %v3939_v14 = vpop.f32.mrb[210].mxu0  ;;  %5571 = vmatpush1.bf16.msra.mxu0 %v12645_v11  ;;  %5709 = vmatpush1.bf16.msra.mxu1 %v12620_v20  ;;  %v3992_v47 = vpop.f32.mrb[210].mxu1 }
 0x2f7   :  { %v5065_v46 = vpack.c.bf16 %v3939_v14, %v3935_v21  ;;  %v3941_v59 = vpop.f32.mrb[211].mxu0  ;;  %5572 = vmatprep.subr.bf16.mxu0 %v12646_v31  ;;  %5710 = vmatprep.subr.bf16.mxu1 %v12622_v38  ;;  %v5067_v40 = vpack.c.bf16 %v3992_v47, %v3988_v27  ;;  %v3994_v2 = vpop.f32.mrb[211].mxu1  ;;  %v11090_v21 = vld [vmem:[%s12150_s2 + $0x50] ss:$12 sps:$4 sm:$0xff]  }
 0x2f8   :  { %v5066_v4 = vpack.c.bf16 %v3941_v59, %v3937_v52  ;;  %5689 = vmatprep.mubr.bf16.mxu1 %v12366_v12  ;;  %v5068_v61 = vpack.c.bf16 %v3994_v2, %v3990_v58  ;;  %v12648_v14 = vld [vmem:[#allocation32_spill] sm:$0xff] }
 0x2f9   :  { %v12649_v47 = vld [vmem:[#allocation40_spill] sm:$0xff] }
 0x2fa   :  { %v11084_v8 = vmax.bf16 %v5066_v4, %v5065_v46  ;;  %5573 = vmatpush1.bf16.msra.mxu0 %v12647_v22  ;;  %5711 = vmatpush1.bf16.msra.mxu1 %v12626_v17  ;;  %v11094_v13 = vmax.bf16 %v5068_v61, %v5067_v40 }
 0x2fb   :  { %5574 = vmatprep.subr.bf16.mxu0 %v12648_v14  ;;  %5712 = vmatprep.subr.bf16.mxu1 %v10865_v24 }
 0x2fc   :  { %v3945_v52 = vpop.f32.mrb[212].mxu0  ;;  %v3998_v58 = vpop.f32.mrb[212].mxu1 }
 0x2fd   :  { %v3947_v27 = vpop.f32.mrb[213].mxu0  ;;  %v4000_v59 = vpop.f32.mrb[213].mxu1  ;;  %7296 = vmatmul.mubr.msk.bf16.gmra.mrb[44].mxu1 %vm5541_vm2, %v11090_v21 }
 0x2fe   :  { %5575 = vmatpush1.bf16.msra.mxu0 %v12635_v16  ;;  %v3949_v46 = vpop.f32.mrb[214].mxu0  ;;  %5713 = vmatpush1.bf16.msra.mxu1 %v10784_v55  ;;  %v4002_v40 = vpop.f32.mrb[214].mxu1 }
 0x2ff   :  { %5576 = vmatprep.subr.bf16.mxu0 %v12649_v47  ;;  %v5209_v4 = vpack.c.bf16 %v3949_v46, %v3945_v52  ;;  %v3951_v2 = vpop.f32.mrb[215].mxu0  ;;  %5714 = vmatprep.subr.bf16.mxu1 %v10899_v51  ;;  %v5211_v15 = vpack.c.bf16 %v4002_v40, %v3998_v58  ;;  %v4004_v63 = vpop.f32.mrb[215].mxu1 }
 0x300   :  { %v5210_v61 = vpack.c.bf16 %v3951_v2, %v3947_v27  ;;  %5732 = vmatprep.mubr.bf16.mxu1 %v11020_v18  ;;  %v5212_v57 = vpack.c.bf16 %v4004_v63, %v4000_v59 }
 0x302   :  { %v11104_v50 = vmax.bf16 %v5210_v61, %v5209_v4  ;;  %5577 = vmatpush1.bf16.msra.mxu0 %v12639_v39  ;;  %5715 = vmatpush1.bf16.msra.mxu1 %v10828_v19  ;;  %v11109_v55 = vmax.bf16 %v5212_v57, %v5211_v15 }
 0x303   :  { %5578 = vmatprep.subr.bf16.mxu0 %v12620_v20  ;;  %5716 = vmatprep.subr.bf16.mxu1 %v10871_v32 }
 0x306   :  { %5579 = vmatpush1.bf16.msra.mxu0 %v12632_v28  ;;  %5717 = vmatpush1.bf16.msra.mxu1 %v10790_v30 }
 0x307   :  { %5580 = vmatprep.subr.bf16.mxu0 %v12626_v17  ;;  %5718 = vmatprep.subr.bf16.mxu1 %v10904_v42 }
 0x308   :  { %v4041_v63 = vpop.f32.mrb[216].mxu0  ;;  %v4094_v52 = vpop.f32.mrb[216].mxu1 }
 0x309   :  { %v4043_v27 = vpop.f32.mrb[217].mxu0  ;;  %v4096_v58 = vpop.f32.mrb[217].mxu1 }
 0x30a   :  { %v4045_v46 = vpop.f32.mrb[218].mxu0  ;;  %5581 = vmatpush1.bf16.msra.mxu0 %v12634_v54  ;;  %5719 = vmatpush1.bf16.msra.mxu1 %v10833_v9  ;;  %v4098_v57 = vpop.f32.mrb[218].mxu1 }
 0x30b   :  { %v5069_v15 = vpack.c.bf16 %v4045_v46, %v4041_v63  ;;  %v4047_v59 = vpop.f32.mrb[219].mxu0  ;;  %5582 = vmatprep.subr.bf16.mxu0 %v12636_v7  ;;  %v5071_v4 = vpack.c.bf16 %v4098_v57, %v4094_v52  ;;  %5720 = vmatprep.subr.bf16.mxu1 %v10933_v3  ;;  %v4100_v40 = vpop.f32.mrb[219].mxu1 }
 0x30c   :  { %v5070_v2 = vpack.c.bf16 %v4047_v59, %v4043_v27  ;;  %v5072_v61 = vpack.c.bf16 %v4100_v40, %v4096_v58  ;;  %v11133_v58 = vld [vmem:[%s12150_s2] ss:$12 sps:$4 sm:$0xff]  }
 0x30e   :  { %v5345_v19 = vmax.bf16 %v5070_v2, %v5069_v15  ;;  %5583 = vmatpush1.bf16.msra.mxu0 %v12638_v45  ;;  %v5346_v28 = vmax.bf16 %v5072_v61, %v5071_v4  ;;  %5721 = vmatpush1.bf16.msra.mxu1 %v10865_v24 }
 0x30f   :  { %5584 = vmatprep.subr.bf16.mxu0 %v12640_v26  ;;  %5722 = vmatprep.subr.bf16.mxu1 %v10967_v41 }
 0x310   :  { %v11124_v63 = vmax.bf16 %v5345_v19, %v10989_v23  ;;  %v4051_v46 = vpop.f32.mrb[220].mxu0  ;;  %v11128_v52 = vmax.bf16 %v5346_v28, %v10992_v37  ;;  %v4104_v27 = vpop.f32.mrb[220].mxu1  ;;  %v11139_v19 = vld [vmem:[%s12150_s2 + $0x1c] ss:$12 sps:$4 sm:$0xff]  }
 0x311   :  { %v4053_v57 = vpop.f32.mrb[221].mxu0  ;;  %v4106_v15 = vpop.f32.mrb[221].mxu1 }
 0x312   :  { %12650 = vst [vmem:[#allocation54_spill] sm:$0xff] %v11124_v63  ;;  %v4055_v59 = vpop.f32.mrb[222].mxu0  ;;  %5585 = vmatpush1.bf16.msra.mxu0 %v12643_v49  ;;  %5723 = vmatpush1.bf16.msra.mxu1 %v10899_v51  ;;  %v4108_v37 = vpop.f32.mrb[222].mxu1  ;;  %v12655_v51 = vld [vmem:[#allocation21_spill] sm:$0xff] }
 0x313   :  { %v5213_v23 = vpack.c.bf16 %v4055_v59, %v4051_v46  ;;  %v4057_v28 = vpop.f32.mrb[223].mxu0  ;;  %5846 = vmatprep.subr.bf16.mxu0 %v12627_v1  ;;  %v5215_v4 = vpack.c.bf16 %v4108_v37, %v4104_v27  ;;  %v4110_v40 = vpop.f32.mrb[223].mxu1  ;;  %v11156_v27 = vld [vmem:[%s12150_s2 + $0x18] ss:$12 sps:$4 sm:$0xff]  }
 0x314   :  { %v5214_v2 = vpack.c.bf16 %v4057_v28, %v4053_v57  ;;  %v5216_v61 = vpack.c.bf16 %v4110_v40, %v4106_v15  ;;  %12652 = vst [vmem:[#allocation57_spill] sm:$0xff] %v11156_v27 }
 0x315   :  { %5587 = vmatmul.mubr.bf16.vlgmr.msra.gmra.mrb[32].mxu0 %v11133_v58 }
 0x316   :  { %v5381_v54 = vmax.bf16 %v5214_v2, %v5213_v23  ;;  %5847 = vmatpush1.bf16.msra.mxu0 %v12628_v56  ;;  %5596 = vmatprep.mubr.bf16.mxu0 %v11139_v19  ;;  %v5382_v41 = vmax.bf16 %v5216_v61, %v5215_v4  ;;  %v11162_v56 = vld [vmem:[%s12150_s2 + $0x34] ss:$12 sps:$4 sm:$0xff]   ;;  %v11172_v2 = vld [vmem:[%s12150_s2 + $0x30] ss:$12 sps:$4 sm:$0xff]   ;;  %v12654_v61 = vld [vmem:[#allocation19_spill] sm:$0xff] }
 0x317   :  { %5848 = vmatprep.subr.bf16.mxu0 %v12629_v5  ;;  %12653 = vst [vmem:[#allocation52_spill] sm:$0xff] %v11162_v56 }
 0x318   :  { %v11148_v46 = vmax.bf16 %v5381_v54, %v11007_v0  ;;  %v11151_v59 = vmax.bf16 %v5382_v41, %v11014_v29 }
 0x31a   :  { %12651 = vst [vmem:[#allocation56_spill] sm:$0xff] %v11148_v46  ;;  %5849 = vmatpush1.bf16.msra.mxu0 %v12630_v44 }
 0x31b   :  { %5850 = vmatprep.subr.bf16.mxu0 %v12631_v35 }
 0x31c   :  { %v4147_v57 = vpop.f32.mrb[224].mxu0  ;;  %v4200_v0 = vpop.f32.mrb[224].mxu1 }
 0x31d   :  { %v4149_v54 = vpop.f32.mrb[225].mxu0  ;;  %5597 = vmatmul.mubr.bf16.gmra.mrb[36].mxu0 %v11156_v27  ;;  %v4202_v41 = vpop.f32.mrb[225].mxu1 }
 0x31e   :  { %v4151_v29 = vpop.f32.mrb[226].mxu0  ;;  %5851 = vmatpush1.bf16.msra.mxu0 %v12615_v33  ;;  %5606 = vmatprep.mubr.bf16.mxu0 %v11162_v56  ;;  %v4204_v44 = vpop.f32.mrb[226].mxu1 }
 0x31f   :  { %v5073_v15 = vpack.c.bf16 %v4151_v29, %v4147_v57  ;;  %v4153_v23 = vpop.f32.mrb[227].mxu0  ;;  %5852 = vmatprep.subr.bf16.mxu0 %v12633_v25  ;;  %v5075_v37 = vpack.c.bf16 %v4204_v44, %v4200_v0  ;;  %v4206_v4 = vpop.f32.mrb[227].mxu1  ;;  %v12656_v57 = vmax.bf16 %v12654_v61, %v12655_v51  ;;  %v11184_v0 = vld [vmem:[%s12150_s2 + $0x4c] ss:$12 sps:$4 sm:$0xff]   ;;  %v11200_v61 = vld [vmem:[%s12150_s2 + $0x48] ss:$12 sps:$4 sm:$0xff]  }
 0x320   :  { %v5074_v28 = vpack.c.bf16 %v4153_v23, %v4149_v54  ;;  %v5076_v35 = vpack.c.bf16 %v4206_v4, %v4202_v41  ;;  %12657 = vst [vmem:[#allocation48_spill] sm:$0xff] %v11184_v0  ;;  %12661 = vst [vmem:[#allocation38_spill] sm:$0xff] %v11200_v61 }
 0x322   :  { %v5347_v40 = vmax.bf16 %v5074_v28, %v5073_v15  ;;  %5853 = vmatpush1.bf16.msra.mxu0 %v12621_v34  ;;  %v5348_v33 = vmax.bf16 %v5076_v35, %v5075_v37  ;;  %v12658_v37 = vld [vmem:[#allocation10_spill] sm:$0xff]  ;;  %v12659_v28 = vld [vmem:[#allocation23_spill] sm:$0xff] }
 0x323   :  { %5854 = vmatprep.subr.bf16.mxu0 %v12656_v57  ;;  %v12660_v4 = vmax.bf16 %v12658_v37, %v12659_v28 }
 0x324   :  { %v11179_v29 = vmax.bf16 %v5347_v40, %v11037_v10  ;;  %v4157_v25 = vpop.f32.mrb[228].mxu0  ;;  %v11187_v54 = vmax.bf16 %v5348_v33, %v11044_v48  ;;  %v4210_v41 = vpop.f32.mrb[228].mxu1 }
 0x325   :  { %v4159_v15 = vpop.f32.mrb[229].mxu0  ;;  %5607 = vmatmul.mubr.bf16.gmra.mrb[40].mxu0 %v11172_v2  ;;  %v4212_v34 = vpop.f32.mrb[229].mxu1 }
 0x326   :  { %v4161_v44 = vpop.f32.mrb[230].mxu0  ;;  %5724 = vmatprep.subr.bf16.mxu1 %v11179_v29  ;;  %5855 = vmatpush1.bf16.msra.mxu0 %v12627_v1  ;;  %v4214_v10 = vpop.f32.mrb[230].mxu1 }
 0x327   :  { %v5217_v51 = vpack.c.bf16 %v4161_v44, %v4157_v25  ;;  %v4163_v23 = vpop.f32.mrb[231].mxu0  ;;  %5725 = vmatpush1.bf16.msra.mxu1 %v11124_v63  ;;  %5856 = vmatprep.subr.bf16.mxu0 %v12660_v4  ;;  %v5219_v48 = vpack.c.bf16 %v4214_v10, %v4210_v41  ;;  %v4216_v40 = vpop.f32.mrb[231].mxu1 }
 0x328   :  { %v5218_v35 = vpack.c.bf16 %v4163_v23, %v4159_v15  ;;  %5616 = vmatprep.mubr.bf16.mxu0 %v11184_v0  ;;  %v5220_v33 = vpack.c.bf16 %v4216_v40, %v4212_v34 }
 0x32a   :  { %v5383_v1 = vmax.bf16 %v5218_v35, %v5217_v51  ;;  %5857 = vmatpush1.bf16.msra.mxu0 %v12629_v5  ;;  %v5384_v57 = vmax.bf16 %v5220_v33, %v5219_v48 }
 0x32b   :  { %5858 = vmatprep.subr.bf16.mxu0 %v12644_v53 }
 0x32c   :  { %v11205_v25 = vmax.bf16 %v5383_v1, %v11057_v43  ;;  %v11208_v41 = vmax.bf16 %v5384_v57, %v11064_v36 }
 0x32d   :  { %5617 = vmatmul.mubr.bf16.gmra.mrb[44].mxu0 %v11200_v61 }
 0x32e   :  { %5726 = vmatprep.subr.bf16.mxu1 %v11205_v25  ;;  %5859 = vmatpush1.bf16.msra.mxu0 %v12645_v11 }
 0x32f   :  { %5727 = vmatpush1.bf16.msra.mxu1 %v11148_v46  ;;  %5860 = vmatprep.subr.bf16.mxu0 %v12646_v31 }
 0x330   :  { %v4253_v5 = vpop.f32.mrb[232].mxu0  ;;  %5728 = vmatprep.subr.bf16.mxu1 %v11187_v54  ;;  %5878 = vmatprep.mubr.bf16.mxu0 %v11020_v18  ;;  %v4306_v43 = vpop.f32.mrb[232].mxu1 }
 0x331   :  { %v4255_v15 = vpop.f32.mrb[233].mxu0  ;;  %v4308_v34 = vpop.f32.mrb[233].mxu1 }
 0x332   :  { %v4257_v36 = vpop.f32.mrb[234].mxu0  ;;  %5861 = vmatpush1.bf16.msra.mxu0 %v12647_v22  ;;  %v4310_v51 = vpop.f32.mrb[234].mxu1 }
 0x333   :  { %v5077_v44 = vpack.c.bf16 %v4257_v36, %v4253_v5  ;;  %v4259_v10 = vpop.f32.mrb[235].mxu0  ;;  %5729 = vmatpush1.bf16.msra.mxu1 %v11128_v52  ;;  %5862 = vmatprep.subr.bf16.mxu0 %v12648_v14  ;;  %v5079_v23 = vpack.c.bf16 %v4310_v51, %v4306_v43  ;;  %v4312_v28 = vpop.f32.mrb[235].mxu1 }
 0x334   :  { %v5078_v37 = vpack.c.bf16 %v4259_v10, %v4255_v15  ;;  %5730 = vmatprep.subr.bf16.mxu1 %v11208_v41  ;;  %v5080_v4 = vpack.c.bf16 %v4312_v28, %v4308_v34 }
 0x336   :  { %v5349_v48 = vmax.bf16 %v5078_v37, %v5077_v44  ;;  %5863 = vmatpush1.bf16.msra.mxu0 %v12635_v16  ;;  %v5350_v35 = vmax.bf16 %v5080_v4, %v5079_v23  ;;  %v12663_v23 = vld [vmem:[#allocation33_spill] sm:$0xff] }
 0x337   :  { %5731 = vmatpush1.bf16.msra.mxu1 %v11151_v59  ;;  %5864 = vmatprep.subr.bf16.mxu0 %v12649_v47 }
 0x338   :  { %v11225_v40 = vmax.bf16 %v5349_v48, %v11084_v8  ;;  %v4263_v33 = vpop.f32.mrb[236].mxu0  ;;  %v4316_v1 = vpop.f32.mrb[236].mxu1  ;;  %v11228_v5 = vmax.bf16 %v5350_v35, %v11094_v13  ;;  %v12664_v48 = vld [vmem:[#allocation36_spill] sm:$0xff] }
 0x339   :  { %v4265_v57 = vpop.f32.mrb[237].mxu0  ;;  %v4318_v43 = vpop.f32.mrb[237].mxu1 }
 0x33a   :  { %12662 = vst [vmem:[#allocation47_spill] sm:$0xff] %v11228_v5  ;;  %v4267_v15 = vpop.f32.mrb[238].mxu0  ;;  %5733 = vmatmul.mubr.bf16.vlgmr.msra.gmra.mrb[48].mxu1 %v11133_v58  ;;  %5773 = vmatprep.subr.bf16.mxu1 %v11225_v40  ;;  %v4320_v36 = vpop.f32.mrb[238].mxu1 }
 0x33b   :  { %v5221_v34 = vpack.c.bf16 %v4267_v15, %v4263_v33  ;;  %5865 = vmatpush1.bf16.msra.mxu0 %v12639_v39  ;;  %v4269_v44 = vpop.f32.mrb[239].mxu0  ;;  %5774 = vmatpush1.bf16.msra.mxu1 %v11179_v29  ;;  %v5223_v8 = vpack.c.bf16 %v4320_v36, %v4316_v1  ;;  %v4322_v10 = vpop.f32.mrb[239].mxu1 }
 0x33c   :  { %v5222_v51 = vpack.c.bf16 %v4269_v44, %v4265_v57  ;;  %5866 = vmatprep.subr.bf16.mxu0 %v12663_v23  ;;  %5742 = vmatprep.mubr.bf16.mxu1 %v11139_v19  ;;  %v5224_v13 = vpack.c.bf16 %v4322_v10, %v4318_v43 }
 0x33e   :  { %v5385_v37 = vmax.bf16 %v5222_v51, %v5221_v34  ;;  %v5386_v28 = vmax.bf16 %v5224_v13, %v5223_v8 }
 0x33f   :  { %5867 = vmatpush1.bf16.msra.mxu0 %v12644_v53 }
 0x340   :  { %v11238_v4 = vmax.bf16 %v5385_v37, %v11104_v50  ;;  %5868 = vmatprep.subr.bf16.mxu0 %v12664_v48  ;;  %v11242_v35 = vmax.bf16 %v5386_v28, %v11109_v55  ;;  %v12666_v48 = vld [vmem:[#allocation8_spill] sm:$0xff] }
 0x342   :  { %12665 = vst [vmem:[#allocation46_spill] sm:$0xff] %v11242_v35  ;;  %5743 = vmatmul.mubr.bf16.gmra.mrb[52].mxu1 %v11156_v27  ;;  %5775 = vmatprep.subr.bf16.mxu1 %v11238_v4 }
 0x343   :  { %5869 = vmatpush1.bf16.msra.mxu0 %v12646_v31  ;;  %5776 = vmatpush1.bf16.msra.mxu1 %v11205_v25 }
 0x344   :  { %5870 = vmatprep.subr.bf16.mxu0 %v12636_v7  ;;  %5992 = vmatprep.subr.bf16.mxu1 %v12636_v7  ;;  %v4359_v33 = vpop.f32.mrb[240].mxu0  ;;  %v4412_v50 = vpop.f32.mrb[240].mxu1 }
 0x345   :  { %5752 = vmatprep.mubr.bf16.mxu1 %v11162_v56  ;;  %v4361_v1 = vpop.f32.mrb[241].mxu0  ;;  %v4414_v57 = vpop.f32.mrb[241].mxu1 }
 0x346   :  { %v4363_v55 = vpop.f32.mrb[242].mxu0  ;;  %v4416_v43 = vpop.f32.mrb[242].mxu1 }
 0x347   :  { %5871 = vmatpush1.bf16.msra.mxu0 %v12638_v45  ;;  %v5081_v15 = vpack.c.bf16 %v4363_v55, %v4359_v33  ;;  %v4365_v34 = vpop.f32.mrb[243].mxu0  ;;  %v5083_v36 = vpack.c.bf16 %v4416_v43, %v4412_v50  ;;  %v4418_v44 = vpop.f32.mrb[243].mxu1 }
 0x348   :  { %5872 = vmatprep.subr.bf16.mxu0 %v12640_v26  ;;  %v5082_v8 = vpack.c.bf16 %v4365_v34, %v4361_v1  ;;  %v5084_v51 = vpack.c.bf16 %v4418_v44, %v4414_v57 }
 0x34a   :  { %5753 = vmatmul.mubr.bf16.gmra.mrb[56].mxu1 %v11172_v2  ;;  %v11254_v10 = vmax.bf16 %v5082_v8, %v5081_v15  ;;  %v11258_v13 = vmax.bf16 %v5084_v51, %v5083_v36 }
 0x34b   :  { %5873 = vmatpush1.bf16.msra.mxu0 %v12643_v49  ;;  %5762 = vmatprep.mubr.bf16.mxu1 %v11184_v0 }
 0x34c   :  { %5874 = vmatprep.subr.bf16.mxu0 %v12616_v6  ;;  %v4369_v37 = vpop.f32.mrb[244].mxu0  ;;  %v4422_v28 = vpop.f32.mrb[244].mxu1 }
 0x34d   :  { %v4371_v33 = vpop.f32.mrb[245].mxu0  ;;  %v4424_v55 = vpop.f32.mrb[245].mxu1 }
 0x34e   :  { %v4373_v50 = vpop.f32.mrb[246].mxu0  ;;  %v4426_v1 = vpop.f32.mrb[246].mxu1 }
 0x34f   :  { %5875 = vmatpush1.bf16.msra.mxu0 %v12620_v20  ;;  %v5225_v57 = vpack.c.bf16 %v4373_v50, %v4369_v37  ;;  %v4375_v43 = vpop.f32.mrb[247].mxu0  ;;  %v5227_v15 = vpack.c.bf16 %v4426_v1, %v4422_v28  ;;  %v4428_v34 = vpop.f32.mrb[247].mxu1  ;;  %v12667_v37 = vld [vmem:[#allocation35_spill] sm:$0xff] }
 0x350   :  { %5876 = vmatprep.subr.bf16.mxu0 %v12622_v38  ;;  %v5226_v44 = vpack.c.bf16 %v4375_v43, %v4371_v33  ;;  %v5228_v8 = vpack.c.bf16 %v4428_v34, %v4424_v55 }
 0x352   :  { %5763 = vmatmul.mubr.bf16.gmra.mrb[60].mxu1 %v11200_v61  ;;  %v11264_v36 = vmax.bf16 %v5226_v44, %v5225_v57  ;;  %v11268_v51 = vmax.bf16 %v5228_v8, %v5227_v15 }
 0x353   :  { %5877 = vmatpush1.bf16.msra.mxu0 %v12626_v17  ;;  %5805 = vmatprep.mubr.bf16.mxu1 %v12366_v12 }
 0x354   :  { %5919 = vmatprep.subr.bf16.mxu0 %v12666_v48 }
 0x356   :  { %5879 = vmatmul.mubr.bf16.vlgmr.msra.gmra.mrb[48].mxu0 %v11133_v58 }
 0x357   :  { %5920 = vmatpush1.bf16.msra.mxu0 %v12636_v7  ;;  %5888 = vmatprep.mubr.bf16.mxu0 %v11139_v19 }
 0x358   :  { %5921 = vmatprep.subr.bf16.mxu0 %v12667_v37  ;;  %v4465_v28 = vpop.f32.mrb[248].mxu0  ;;  %v4518_v33 = vpop.f32.mrb[248].mxu1 }
 0x359   :  { %v4467_v55 = vpop.f32.mrb[249].mxu0  ;;  %v4520_v50 = vpop.f32.mrb[249].mxu1 }
 0x35a   :  { %7297 = vmatmul.mubr.msk.bf16.vlgmr.msra.gmra.mrb[48].mxu1 %vm5541_vm2, %v11034_v60  ;;  %v4469_v1 = vpop.f32.mrb[250].mxu0  ;;  %v4522_v57 = vpop.f32.mrb[250].mxu1 }
 0x35b   :  { %5922 = vmatpush1.bf16.msra.mxu0 %v12640_v26  ;;  %5993 = vmatpush1.bf16.msra.mxu1 %v12638_v45  ;;  %v5085_v43 = vpack.c.bf16 %v4469_v1, %v4465_v28  ;;  %v4471_v15 = vpop.f32.mrb[251].mxu0  ;;  %v5087_v34 = vpack.c.bf16 %v4522_v57, %v4518_v33  ;;  %v4524_v44 = vpop.f32.mrb[251].mxu1 }
 0x35c   :  { %5994 = vmatprep.subr.bf16.mxu1 %v12640_v26  ;;  %6138 = vmatprep.subr.bf16.mxu0 %v12635_v16  ;;  %v5086_v8 = vpack.c.bf16 %v4471_v15, %v4467_v55  ;;  %v5088_v23 = vpack.c.bf16 %v4524_v44, %v4520_v50 }
 0x35d   :  { %5815 = vmatprep.mubr.bf16.mxu1 %v12366_v12 }
 0x35e   :  { %5889 = vmatmul.mubr.bf16.gmra.mrb[52].mxu0 %v11156_v27  ;;  %v11283_v46 = vmax.bf16 %v5086_v8, %v5085_v43  ;;  %v11287_v28 = vmax.bf16 %v5088_v23, %v5087_v34 }
 0x35f   :  { %5995 = vmatpush1.bf16.msra.mxu1 %v12643_v49  ;;  %5898 = vmatprep.mubr.bf16.mxu0 %v11162_v56 }
 0x360   :  { %5996 = vmatprep.subr.bf16.mxu1 %v12616_v6  ;;  %v4475_v1 = vpop.f32.mrb[252].mxu0  ;;  %v4528_v63 = vpop.f32.mrb[252].mxu1 }
 0x361   :  { %v4477_v33 = vpop.f32.mrb[253].mxu0  ;;  %v4530_v55 = vpop.f32.mrb[253].mxu1 }
 0x362   :  { %7298 = vmatmul.mubr.msk.bf16.gmra.mrb[52].mxu1 %vm5541_vm2, %v11052_v62  ;;  %v4479_v50 = vpop.f32.mrb[254].mxu0  ;;  %v4532_v57 = vpop.f32.mrb[254].mxu1 }
 0x363   :  { %5997 = vmatpush1.bf16.msra.mxu1 %v12620_v20  ;;  %5825 = vmatprep.mubr.bf16.mxu1 %v12366_v12  ;;  %v5229_v43 = vpack.c.bf16 %v4479_v50, %v4475_v1  ;;  %v4481_v15 = vpop.f32.mrb[255].mxu0  ;;  %v5231_v23 = vpack.c.bf16 %v4532_v57, %v4528_v63  ;;  %v4534_v34 = vpop.f32.mrb[255].mxu1  ;;  %v12668_v1 = vld [vmem:[#allocation44_spill] sm:$0xff] }
 0x364   :  { %5998 = vmatprep.subr.bf16.mxu1 %v12622_v38  ;;  %v5230_v44 = vpack.c.bf16 %v4481_v15, %v4477_v33  ;;  %v5232_v8 = vpack.c.bf16 %v4534_v34, %v4530_v55 }
 0x366   :  { %5899 = vmatmul.mubr.bf16.gmra.mrb[56].mxu0 %v11172_v2  ;;  %v11296_v56 = vmax.bf16 %v5230_v44, %v5229_v43  ;;  %v11300_v27 = vmax.bf16 %v5232_v8, %v5231_v23 }
 0x367   :  { %5999 = vmatpush1.bf16.msra.mxu1 %v12626_v17  ;;  %5908 = vmatprep.mubr.bf16.mxu0 %v11184_v0 }
 0x368   :  { %6000 = vmatprep.subr.bf16.mxu1 %v12666_v48 }
 0x36a   :  { %7299 = vmatmul.mubr.msk.bf16.gmra.mrb[56].mxu1 %vm5541_vm2, %v12668_v1 }
 0x36b   :  { %6001 = vmatpush1.bf16.msra.mxu1 %v12636_v7  ;;  %5835 = vmatprep.mubr.bf16.mxu1 %v12366_v12 }
 0x36c   :  { %6002 = vmatprep.subr.bf16.mxu1 %v12667_v37  ;;  %v4571_v63 = vpop.f32.mrb[0].mxu0  ;;  %v4624_v33 = vpop.f32.mrb[0].mxu1 }
 0x36d   :  { %v4573_v55 = vpop.f32.mrb[1].mxu0  ;;  %v4626_v50 = vpop.f32.mrb[1].mxu1 }
 0x36e   :  { %5909 = vmatmul.mubr.bf16.gmra.mrb[60].mxu0 %v11200_v61  ;;  %v4575_v57 = vpop.f32.mrb[2].mxu0  ;;  %v4628_v43 = vpop.f32.mrb[2].mxu1 }
 0x36f   :  { %6003 = vmatpush1.bf16.msra.mxu1 %v12640_v26  ;;  %5951 = vmatprep.mubr.bf16.mxu0 %v12366_v12  ;;  %v5089_v15 = vpack.c.bf16 %v4575_v57, %v4571_v63  ;;  %v4577_v23 = vpop.f32.mrb[3].mxu0  ;;  %v5091_v34 = vpack.c.bf16 %v4628_v43, %v4624_v33  ;;  %v4630_v44 = vpop.f32.mrb[3].mxu1 }
 0x370   :  { %6004 = vmatprep.subr.bf16.mxu1 %v10871_v32  ;;  %v5090_v8 = vpack.c.bf16 %v4577_v23, %v4573_v55  ;;  %v5092_v37 = vpack.c.bf16 %v4630_v44, %v4626_v50  ;;  %v12670_v50 = vld [vmem:[#allocation5_spill] sm:$0xff] }
 0x372   :  { %7300 = vmatmul.mubr.msk.bf16.gmra.mrb[60].mxu1 %vm5541_vm2, %v11090_v21  ;;  %v11314_v48 = vmax.bf16 %v5090_v8, %v5089_v15  ;;  %v11317_v61 = vmax.bf16 %v5092_v37, %v5091_v34 }
 0x373   :  { %6005 = vmatpush1.bf16.msra.mxu1 %v10790_v30  ;;  %6024 = vmatprep.mubr.bf16.mxu1 %v11020_v18 }
 0x374   :  { %12669 = vst [vmem:[#allocation61_spill] sm:$0xff] %v11317_v61  ;;  %6006 = vmatprep.subr.bf16.mxu1 %v10904_v42  ;;  %v4581_v63 = vpop.f32.mrb[4].mxu0  ;;  %v4634_v57 = vpop.f32.mrb[4].mxu1  ;;  %v12671_v61 = vld [vmem:[#allocation15_spill] sm:$0xff] }
 0x375   :  { %v4583_v0 = vpop.f32.mrb[5].mxu0  ;;  %v4636_v33 = vpop.f32.mrb[5].mxu1 }
 0x376   :  { %7301 = vmatmul.mubr.msk.bf16.vlgmr.msra.gmra.mrb[48].mxu0 %vm5541_vm2, %v11034_v60  ;;  %v4585_v55 = vpop.f32.mrb[6].mxu0  ;;  %v4638_v43 = vpop.f32.mrb[6].mxu1 }
 0x377   :  { %6139 = vmatpush1.bf16.msra.mxu0 %v12670_v50  ;;  %6007 = vmatpush1.bf16.msra.mxu1 %v10833_v9  ;;  %v5233_v15 = vpack.c.bf16 %v4585_v55, %v4581_v63  ;;  %v4587_v37 = vpop.f32.mrb[7].mxu0  ;;  %v5235_v23 = vpack.c.bf16 %v4638_v43, %v4634_v57  ;;  %v4640_v34 = vpop.f32.mrb[7].mxu1  ;;  %v12673_v63 = vld [vmem:[#allocation50_spill] sm:$0xff]  ;;  %v12675_v57 = vld [vmem:[#allocation49_spill] sm:$0xff] }
 0x378   :  { %6140 = vmatprep.subr.bf16.mxu0 %v12639_v39  ;;  %6008 = vmatprep.subr.bf16.mxu1 %v10933_v3  ;;  %v5234_v44 = vpack.c.bf16 %v4587_v37, %v4583_v0  ;;  %v5236_v8 = vpack.c.bf16 %v4640_v34, %v4636_v33  ;;  %v12674_v0 = vld [vmem:[#allocation42_spill] sm:$0xff] }
 0x379   :  { %5961 = vmatprep.mubr.bf16.mxu0 %v12366_v12 }
 0x37a   :  { %v11328_v60 = vmax.bf16 %v5234_v44, %v5233_v15  ;;  %v11332_v50 = vmax.bf16 %v5236_v8, %v5235_v23  ;;  %v12676_v8 = vld [vmem:[#allocation51_spill] sm:$0xff] }
 0x37b   :  { %6141 = vmatpush1.bf16.msra.mxu0 %v12671_v61  ;;  %6009 = vmatpush1.bf16.msra.mxu1 %v10865_v24 }
 0x37c   :  { %12672 = vst [vmem:[#allocation22_spill] sm:$0xff] %v11332_v50  ;;  %6142 = vmatprep.subr.bf16.mxu0 %v12644_v53  ;;  %6010 = vmatprep.subr.bf16.mxu1 %v12673_v63  ;;  %v12691_v50 = vld [vmem:[#allocation4_spill] sm:$0xff] }
 0x37e   :  { %7302 = vmatmul.mubr.msk.bf16.gmra.mrb[52].mxu0 %vm5541_vm2, %v11052_v62 }
 0x37f   :  { %6143 = vmatpush1.bf16.msra.mxu0 %v12645_v11  ;;  %6011 = vmatpush1.bf16.msra.mxu1 %v12674_v0 }
 0x380   :  { %6144 = vmatprep.subr.bf16.mxu0 %v12646_v31  ;;  %6012 = vmatprep.subr.bf16.mxu1 %v12675_v57  ;;  %v4677_v61 = vpop.f32.mrb[8].mxu0  ;;  %v4730_v33 = vpop.f32.mrb[8].mxu1 }
 0x381   :  { %5971 = vmatprep.mubr.bf16.mxu0 %v12366_v12  ;;  %v4679_v55 = vpop.f32.mrb[9].mxu0  ;;  %v4732_v43 = vpop.f32.mrb[9].mxu1 }
 0x382   :  { %v4681_v15 = vpop.f32.mrb[10].mxu0  ;;  %v4734_v37 = vpop.f32.mrb[10].mxu1 }
 0x383   :  { %6145 = vmatpush1.bf16.msra.mxu0 %v12647_v22  ;;  %6013 = vmatpush1.bf16.msra.mxu1 %v10871_v32  ;;  %v5093_v62 = vpack.c.bf16 %v4681_v15, %v4677_v61  ;;  %v4683_v23 = vpop.f32.mrb[11].mxu0  ;;  %v5095_v34 = vpack.c.bf16 %v4734_v37, %v4730_v33  ;;  %v4736_v44 = vpop.f32.mrb[11].mxu1 }
 0x384   :  { %6146 = vmatprep.subr.bf16.mxu0 %v12648_v14  ;;  %6014 = vmatprep.subr.bf16.mxu1 %v12676_v8  ;;  %v5094_v57 = vpack.c.bf16 %v4683_v23, %v4679_v55  ;;  %v5096_v31 = vpack.c.bf16 %v4736_v44, %v4732_v43  ;;  %v12677_v8 = vld [vmem:[#allocation24_spill] sm:$0xff] }
 0x386   :  { %7303 = vmatmul.mubr.msk.bf16.gmra.mrb[56].mxu0 %vm5541_vm2, %v12668_v1  ;;  %v11349_v11 = vmax.bf16 %v5094_v57, %v5093_v62  ;;  %v5352_v53 = vmax.bf16 %v5096_v31, %v5095_v34 }
 0x387   :  { %6147 = vmatpush1.bf16.msra.mxu0 %v12635_v16  ;;  %6015 = vmatpush1.bf16.msra.mxu1 %v10904_v42 }
 0x388   :  { %6148 = vmatprep.subr.bf16.mxu0 %v12649_v47  ;;  %6016 = vmatprep.subr.bf16.mxu1 %v11187_v54  ;;  %v4687_v33 = vpop.f32.mrb[12].mxu0  ;;  %v11358_v55 = vmax.bf16 %v5352_v53, %v11258_v13  ;;  %v4740_v43 = vpop.f32.mrb[12].mxu1 }
 0x389   :  { %5981 = vmatprep.mubr.bf16.mxu0 %v12366_v12  ;;  %v4689_v1 = vpop.f32.mrb[13].mxu0  ;;  %v4742_v31 = vpop.f32.mrb[13].mxu1 }
 0x38a   :  { %v4691_v57 = vpop.f32.mrb[14].mxu0  ;;  %v4744_v15 = vpop.f32.mrb[14].mxu1 }
 0x38b   :  { %6149 = vmatpush1.bf16.msra.mxu0 %v12639_v39  ;;  %6017 = vmatpush1.bf16.msra.mxu1 %v11128_v52  ;;  %v5237_v37 = vpack.c.bf16 %v4691_v57, %v4687_v33  ;;  %v4693_v62 = vpop.f32.mrb[15].mxu0  ;;  %v5239_v23 = vpack.c.bf16 %v4744_v15, %v4740_v43  ;;  %v4746_v34 = vpop.f32.mrb[15].mxu1  ;;  %v12681_v33 = vld [vmem:[#allocation52_spill] sm:$0xff] }
 0x38c   :  { %6150 = vmatprep.subr.bf16.mxu0 %v12620_v20  ;;  %6018 = vmatprep.subr.bf16.mxu1 %v11208_v41  ;;  %v5238_v53 = vpack.c.bf16 %v4693_v62, %v4689_v1  ;;  %v5240_v13 = vpack.c.bf16 %v4746_v34, %v4742_v31 }
 0x38e   :  { %7304 = vmatmul.mubr.msk.bf16.gmra.mrb[60].mxu0 %vm5541_vm2, %v11090_v21  ;;  %v11367_v44 = vmax.bf16 %v5238_v53, %v5237_v37  ;;  %v5388_v61 = vmax.bf16 %v5240_v13, %v5239_v23  ;;  %v12679_v21 = vld [vmem:[#allocation17_spill] sm:$0xff] }
 0x38f   :  { %6151 = vmatpush1.bf16.msra.mxu0 %v12677_v8  ;;  %6019 = vmatpush1.bf16.msra.mxu1 %v11151_v59 }
 0x390   :  { %6152 = vmatprep.subr.bf16.mxu0 %v12626_v17  ;;  %6020 = vmatprep.subr.bf16.mxu1 %v11225_v40  ;;  %v11376_v43 = vmax.bf16 %v5388_v61, %v11268_v51 }
 0x391   :  { %6170 = vmatprep.mubr.bf16.mxu0 %v11020_v18 }
 0x392   :  { %12678 = vst [vmem:[#allocation58_spill] sm:$0xff] %v11376_v43 }
 0x393   :  { %6153 = vmatpush1.bf16.msra.mxu0 %v12679_v21  ;;  %6021 = vmatpush1.bf16.msra.mxu1 %v11179_v29 }
 0x394   :  { %6154 = vmatprep.subr.bf16.mxu0 %v12636_v7  ;;  %6022 = vmatprep.subr.bf16.mxu1 %v11238_v4  ;;  %v4783_v8 = vpop.f32.mrb[16].mxu0  ;;  %v4836_v1 = vpop.f32.mrb[16].mxu1 }
 0x395   :  { %v4785_v31 = vpop.f32.mrb[17].mxu0  ;;  %v4838_v57 = vpop.f32.mrb[17].mxu1 }
 0x396   :  { %v4787_v15 = vpop.f32.mrb[18].mxu0  ;;  %v4840_v37 = vpop.f32.mrb[18].mxu1 }
 0x397   :  { %6155 = vmatpush1.bf16.msra.mxu0 %v12638_v45  ;;  %6023 = vmatpush1.bf16.msra.mxu1 %v11205_v25  ;;  %v5097_v51 = vpack.c.bf16 %v4787_v15, %v4783_v8  ;;  %v4789_v18 = vpop.f32.mrb[19].mxu0  ;;  %v5099_v61 = vpack.c.bf16 %v4840_v37, %v4836_v1  ;;  %v4842_v62 = vpop.f32.mrb[19].mxu1 }
 0x398   :  { %6156 = vmatprep.subr.bf16.mxu0 %v12640_v26  ;;  %6065 = vmatprep.subr.bf16.mxu1 %v11228_v5  ;;  %v5098_v23 = vpack.c.bf16 %v4789_v18, %v4785_v31  ;;  %v5100_v34 = vpack.c.bf16 %v4842_v62, %v4838_v57 }
 0x39a   :  { %6025 = vmatmul.mubr.bf16.vlgmr.msra.gmra.mrb[64].mxu1 %v11133_v58  ;;  %v5353_v53 = vmax.bf16 %v5098_v23, %v5097_v51  ;;  %v5354_v13 = vmax.bf16 %v5100_v34, %v5099_v61 }
 0x39b   :  { %6157 = vmatpush1.bf16.msra.mxu0 %v12643_v49  ;;  %6066 = vmatpush1.bf16.msra.mxu1 %v11187_v54 }
 0x39c   :  { %6158 = vmatprep.subr.bf16.mxu0 %v12616_v6  ;;  %6067 = vmatprep.subr.bf16.mxu1 %v11242_v35  ;;  %v4793_v21 = vpop.f32.mrb[20].mxu0  ;;  %v11393_v8 = vmax.bf16 %v5353_v53, %v11283_v46  ;;  %v4846_v1 = vpop.f32.mrb[20].mxu1  ;;  %v11397_v57 = vmax.bf16 %v5354_v13, %v11287_v28  ;;  %v12680_v53 = vld [vmem:[#allocation57_spill] sm:$0xff] }
 0x39d   :  { %6034 = vmatprep.mubr.bf16.mxu1 %v11139_v19  ;;  %v4795_v31 = vpop.f32.mrb[21].mxu0  ;;  %v4848_v15 = vpop.f32.mrb[21].mxu1 }
 0x39e   :  { %v4797_v37 = vpop.f32.mrb[22].mxu0  ;;  %v4850_v51 = vpop.f32.mrb[22].mxu1 }
 0x39f   :  { %6159 = vmatpush1.bf16.msra.mxu0 %v12620_v20  ;;  %6068 = vmatpush1.bf16.msra.mxu1 %v11208_v41  ;;  %v5241_v18 = vpack.c.bf16 %v4797_v37, %v4793_v21  ;;  %v4799_v61 = vpop.f32.mrb[23].mxu0  ;;  %v5243_v62 = vpack.c.bf16 %v4850_v51, %v4846_v1  ;;  %v4852_v46 = vpop.f32.mrb[23].mxu1  ;;  %v12683_v37 = vld [vmem:[#allocation34_spill] sm:$0xff] }
 0x3a0   :  { %6160 = vmatprep.subr.bf16.mxu0 %v12622_v38  ;;  %6284 = vmatprep.subr.bf16.mxu1 %v10865_v24  ;;  %v5242_v23 = vpack.c.bf16 %v4799_v61, %v4795_v31  ;;  %v5244_v34 = vpack.c.bf16 %v4852_v46, %v4848_v15 }
 0x3a2   :  { %6035 = vmatmul.mubr.bf16.gmra.mrb[68].mxu1 %v12680_v53  ;;  %v5389_v28 = vmax.bf16 %v5242_v23, %v5241_v18  ;;  %v5390_v13 = vmax.bf16 %v5244_v34, %v5243_v62  ;;  %v12684_v62 = vld [vmem:[#allocation37_spill] sm:$0xff]  ;;  %v12685_v23 = vld [vmem:[#allocation48_spill] sm:$0xff] }
 0x3a3   :  { %6161 = vmatpush1.bf16.msra.mxu0 %v12626_v17  ;;  %6044 = vmatprep.mubr.bf16.mxu1 %v12681_v33 }
 0x3a4   :  { %6162 = vmatprep.subr.bf16.mxu0 %v10865_v24  ;;  %v11408_v21 = vmax.bf16 %v5389_v28, %v11296_v56  ;;  %v11411_v1 = vmax.bf16 %v5390_v13, %v11300_v27 }
 0x3a6   :  { %12682 = vst [vmem:[#allocation59_spill] sm:$0xff] %v11411_v1  ;;  %v12687_v1 = vld [vmem:[#allocation38_spill] sm:$0xff] }
 0x3a7   :  { %6163 = vmatpush1.bf16.msra.mxu0 %v12683_v37 }
 0x3a8   :  { %6164 = vmatprep.subr.bf16.mxu0 %v12674_v0  ;;  %v4889_v31 = vpop.f32.mrb[24].mxu0  ;;  %v4942_v15 = vpop.f32.mrb[24].mxu1 }
 0x3a9   :  { %v4891_v51 = vpop.f32.mrb[25].mxu0  ;;  %v4944_v18 = vpop.f32.mrb[25].mxu1 }
 0x3aa   :  { %6045 = vmatmul.mubr.bf16.gmra.mrb[72].mxu1 %v11172_v2  ;;  %v4893_v61 = vpop.f32.mrb[26].mxu0  ;;  %v4946_v46 = vpop.f32.mrb[26].mxu1 }
 0x3ab   :  { %6165 = vmatpush1.bf16.msra.mxu0 %v12684_v62  ;;  %6054 = vmatprep.mubr.bf16.mxu1 %v12685_v23  ;;  %v5101_v56 = vpack.c.bf16 %v4893_v61, %v4889_v31  ;;  %v4895_v34 = vpop.f32.mrb[27].mxu0  ;;  %v5103_v27 = vpack.c.bf16 %v4946_v46, %v4942_v15  ;;  %v4948_v28 = vpop.f32.mrb[27].mxu1  ;;  %v12686_v61 = vld [vmem:[#allocation61_spill] sm:$0xff] }
 0x3ac   :  { %6166 = vmatprep.subr.bf16.mxu0 %v10871_v32  ;;  %v5102_v13 = vpack.c.bf16 %v4895_v34, %v4891_v51  ;;  %v5104_v35 = vpack.c.bf16 %v4948_v28, %v4944_v18 }
 0x3ae   :  { %v5355_v5 = vmax.bf16 %v5102_v13, %v5101_v56  ;;  %v11419_v17 = vmax.bf16 %v5104_v35, %v5103_v27 }
 0x3af   :  { %6167 = vmatpush1.bf16.msra.mxu0 %v10790_v30 }
 0x3b0   :  { %6168 = vmatprep.subr.bf16.mxu0 %v10904_v42  ;;  %v4899_v38 = vpop.f32.mrb[28].mxu0  ;;  %v11424_v43 = vmax.bf16 %v5355_v5, %v11314_v48  ;;  %v4952_v20 = vpop.f32.mrb[28].mxu1 }
 0x3b1   :  { %v4901_v31 = vpop.f32.mrb[29].mxu0  ;;  %v4954_v46 = vpop.f32.mrb[29].mxu1 }
 0x3b2   :  { %6055 = vmatmul.mubr.bf16.gmra.mrb[76].mxu1 %v12687_v1  ;;  %v4903_v51 = vpop.f32.mrb[30].mxu0  ;;  %v4956_v35 = vpop.f32.mrb[30].mxu1 }
 0x3b3   :  { %6169 = vmatpush1.bf16.msra.mxu0 %v10833_v9  ;;  %6097 = vmatprep.mubr.bf16.mxu1 %v12366_v12  ;;  %v5245_v18 = vpack.c.bf16 %v4903_v51, %v4899_v38  ;;  %v4905_v56 = vpop.f32.mrb[31].mxu0  ;;  %v5247_v34 = vpack.c.bf16 %v4956_v35, %v4952_v20  ;;  %v4958_v5 = vpop.f32.mrb[31].mxu1 }
 0x3b4   :  { %6211 = vmatprep.subr.bf16.mxu0 %v10933_v3  ;;  %v5246_v48 = vpack.c.bf16 %v4905_v56, %v4901_v31  ;;  %v5248_v27 = vpack.c.bf16 %v4958_v5, %v4954_v46  ;;  %v11494_v56 = vld [vmem:[%s12150_s2 + $0x38] ss:$12 sps:$4 sm:$0xff]  }
 0x3b6   :  { %6171 = vmatmul.mubr.bf16.vlgmr.msra.gmra.mrb[64].mxu0 %v11133_v58  ;;  %v5391_v28 = vmax.bf16 %v5246_v48, %v5245_v18  ;;  %v11433_v13 = vmax.bf16 %v5248_v27, %v5247_v34  ;;  %v11448_v58 = vld [vmem:[%s12150_s2 + $0x8] ss:$12 sps:$4 sm:$0xff]   ;;  %v11516_v48 = vld [vmem:[%s12150_s2 + $0x50] ss:$12 sps:$4 sm:$0xff]  }
 0x3b7   :  { %6212 = vmatpush1.bf16.msra.mxu0 %v10865_v24  ;;  %6180 = vmatprep.mubr.bf16.mxu0 %v11139_v19 }
 0x3b8   :  { %12688 = vst [vmem:[#allocation60_spill] sm:$0xff] %v11433_v13  ;;  %6213 = vmatprep.subr.bf16.mxu0 %v12673_v63  ;;  %v11439_v38 = vmax.bf16 %v5391_v28, %v11328_v60  ;;  %v11441_v20 = vpop.f32.mrb[32].mxu1  ;;  %v12689_v60 = vld [vmem:[#allocation41_spill] sm:$0xff]  ;;  %v12690_v28 = vld [vmem:[#allocation54_spill] sm:$0xff]  ;;  %v12692_v13 = vld [vmem:[#allocation56_spill] sm:$0xff] }
 0x3b9   :  { %v11452_v46 = vpop.f32.mrb[33].mxu1 }
 0x3ba   :  { %7305 = vmatmul.mubr.msk.bf16.vlgmr.msra.gmra.mrb[64].mxu1 %vm5541_vm2, %v11448_v58  ;;  %v11456_v19 = vpop.f32.mrb[34].mxu1 }
 0x3bb   :  { %6214 = vmatpush1.bf16.msra.mxu0 %v12674_v0  ;;  %6285 = vmatpush1.bf16.msra.mxu1 %v12683_v37  ;;  %v11460_v51 = vpop.f32.mrb[35].mxu1  ;;  %v11472_v37 = vld [vmem:[%s12150_s2 + $0x20] ss:$12 sps:$4 sm:$0xff]  }
 0x3bc   :  { %6286 = vmatprep.subr.bf16.mxu1 %v12674_v0  ;;  %6430 = vmatprep.subr.bf16.mxu0 %v12689_v60 }
 0x3bd   :  { %6107 = vmatprep.mubr.bf16.mxu1 %v12366_v12 }
 0x3be   :  { %6181 = vmatmul.mubr.bf16.gmra.mrb[68].mxu0 %v12680_v53 }
 0x3bf   :  { %6287 = vmatpush1.bf16.msra.mxu1 %v12684_v62  ;;  %6190 = vmatprep.mubr.bf16.mxu0 %v12681_v33 }
 0x3c0   :  { %6288 = vmatprep.subr.bf16.mxu1 %v10871_v32  ;;  %v11467_v35 = vpop.f32.mrb[36].mxu1 }
 0x3c1   :  { %v11476_v18 = vpop.f32.mrb[37].mxu1 }
 0x3c2   :  { %7306 = vmatmul.mubr.msk.bf16.gmra.mrb[68].mxu1 %vm5541_vm2, %v11472_v37  ;;  %v11480_v53 = vpop.f32.mrb[38].mxu1 }
 0x3c3   :  { %6289 = vmatpush1.bf16.msra.mxu1 %v10790_v30  ;;  %6117 = vmatprep.mubr.bf16.mxu1 %v12366_v12  ;;  %v11483_v33 = vpop.f32.mrb[39].mxu1 }
 0x3c4   :  { %6290 = vmatprep.subr.bf16.mxu1 %v10904_v42 }
 0x3c6   :  { %6191 = vmatmul.mubr.bf16.gmra.mrb[72].mxu0 %v11172_v2 }
 0x3c7   :  { %6291 = vmatpush1.bf16.msra.mxu1 %v10833_v9  ;;  %6200 = vmatprep.mubr.bf16.mxu0 %v12685_v23 }
 0x3c8   :  { %6292 = vmatprep.subr.bf16.mxu1 %v10933_v3  ;;  %v11489_v62 = vpop.f32.mrb[40].mxu1 }
 0x3c9   :  { %v11498_v34 = vpop.f32.mrb[41].mxu1 }
 0x3ca   :  { %7307 = vmatmul.mubr.msk.bf16.gmra.mrb[72].mxu1 %vm5541_vm2, %v11494_v56  ;;  %v11502_v2 = vpop.f32.mrb[42].mxu1 }
 0x3cb   :  { %6293 = vmatpush1.bf16.msra.mxu1 %v10865_v24  ;;  %6127 = vmatprep.mubr.bf16.mxu1 %v12366_v12  ;;  %v11505_v23 = vpop.f32.mrb[43].mxu1 }
 0x3cc   :  { %6294 = vmatprep.subr.bf16.mxu1 %v12673_v63 }
 0x3ce   :  { %6201 = vmatmul.mubr.bf16.gmra.mrb[76].mxu0 %v12687_v1  ;;  %v11526_v1 = vld [vmem:[%s12150_s2 + $0x4] ss:$12 sps:$4 sm:$0xff]  }
 0x3cf   :  { %6295 = vmatpush1.bf16.msra.mxu1 %v12674_v0  ;;  %6243 = vmatprep.mubr.bf16.mxu0 %v12366_v12 }
 0x3d0   :  { %6296 = vmatprep.subr.bf16.mxu1 %v11179_v29  ;;  %v11511_v5 = vpop.f32.mrb[44].mxu1 }
 0x3d1   :  { %v11520_v27 = vpop.f32.mrb[45].mxu1 }
 0x3d2   :  { %7308 = vmatmul.mubr.msk.bf16.gmra.mrb[76].mxu1 %vm5541_vm2, %v11516_v48  ;;  %v11529_v31 = vpop.f32.mrb[46].mxu1 }
 0x3d3   :  { %6297 = vmatpush1.bf16.msra.mxu1 %v12690_v28  ;;  %6316 = vmatprep.mubr.bf16.mxu1 %v11526_v1  ;;  %v11532_v15 = vpop.f32.mrb[47].mxu1  ;;  %v12693_v28 = vld [vmem:[#allocation12_spill] sm:$0xff] }
 0x3d4   :  { %6298 = vmatprep.subr.bf16.mxu1 %v11205_v25 }
 0x3d6   :  { %7309 = vmatmul.mubr.msk.bf16.vlgmr.msra.gmra.mrb[64].mxu0 %vm5541_vm2, %v11448_v58 }
 0x3d7   :  { %6431 = vmatpush1.bf16.msra.mxu0 %v12691_v50  ;;  %6299 = vmatpush1.bf16.msra.mxu1 %v12692_v13 }
 0x3d8   :  { %6432 = vmatprep.subr.bf16.mxu0 %v12693_v28  ;;  %6300 = vmatprep.subr.bf16.mxu1 %v11187_v54 }
 0x3d9   :  { %6253 = vmatprep.mubr.bf16.mxu0 %v12366_v12 }
 0x3db   :  { %6433 = vmatpush1.bf16.msra.mxu0 %v12647_v22  ;;  %6301 = vmatpush1.bf16.msra.mxu1 %v11128_v52  ;;  %v12694_v22 = vld [vmem:[#allocation33_spill] sm:$0xff] }
 0x3dc   :  { %6434 = vmatprep.subr.bf16.mxu0 %v12648_v14  ;;  %6302 = vmatprep.subr.bf16.mxu1 %v11208_v41 }
 0x3de   :  { %7310 = vmatmul.mubr.msk.bf16.gmra.mrb[68].mxu0 %vm5541_vm2, %v11472_v37 }
 0x3df   :  { %6435 = vmatpush1.bf16.msra.mxu0 %v12635_v16  ;;  %6303 = vmatpush1.bf16.msra.mxu1 %v11151_v59  ;;  %v12695_v16 = vld [vmem:[#allocation36_spill] sm:$0xff] }
 0x3e0   :  { %6436 = vmatprep.subr.bf16.mxu0 %v12649_v47  ;;  %6304 = vmatprep.subr.bf16.mxu1 %v11225_v40 }
 0x3e1   :  { %6263 = vmatprep.mubr.bf16.mxu0 %v12366_v12 }
 0x3e3   :  { %6437 = vmatpush1.bf16.msra.mxu0 %v12639_v39  ;;  %6305 = vmatpush1.bf16.msra.mxu1 %v11179_v29 }
 0x3e4   :  { %6438 = vmatprep.subr.bf16.mxu0 %v12694_v22  ;;  %6306 = vmatprep.subr.bf16.mxu1 %v11238_v4 }
 0x3e6   :  { %7311 = vmatmul.mubr.msk.bf16.gmra.mrb[72].mxu0 %vm5541_vm2, %v11494_v56 }
 0x3e7   :  { %6439 = vmatpush1.bf16.msra.mxu0 %v12689_v60  ;;  %6307 = vmatpush1.bf16.msra.mxu1 %v11205_v25  ;;  %v12696_v60 = vmax.bf16 %v11349_v11, %v11254_v10  ;;  %v12697_v11 = vmax.bf16 %v11367_v44, %v11264_v36  ;;  %v12698_v44 = vld [vmem:[#allocation59_spill] sm:$0xff] }
 0x3e8   :  { %6440 = vmatprep.subr.bf16.mxu0 %v12695_v16  ;;  %6308 = vmatprep.subr.bf16.mxu1 %v11393_v8  ;;  %v5588_v14 = vpop.f32.mrb[32].mxu0 }
 0x3e9   :  { %v11563_v39 = vadd.f32 %v11441_v20, %v5588_v14  ;;  %v5590_v47 = vpop.f32.mrb[33].mxu0  ;;  %6273 = vmatprep.mubr.bf16.mxu0 %v12366_v12 }
 0x3ea   :  { %v11567_v50 = vadd.f32 %v11452_v46, %v5590_v47  ;;  %v5592_v13 = vpop.f32.mrb[34].mxu0 }
 0x3eb   :  { %6441 = vmatpush1.bf16.msra.mxu0 %v12693_v28  ;;  %6309 = vmatpush1.bf16.msra.mxu1 %v12696_v60  ;;  %v11574_v22 = vadd.f32 %v11456_v19, %v5592_v13  ;;  %v5594_v16 = vpop.f32.mrb[35].mxu0  ;;  %v12700_v60 = vld [vmem:[#allocation58_spill] sm:$0xff] }
 0x3ec   :  { %6442 = vmatprep.subr.bf16.mxu0 %v12636_v7  ;;  %6310 = vmatprep.subr.bf16.mxu1 %v11408_v21  ;;  %v11579_v20 = vadd.f32 %v11460_v51, %v5594_v16 }
 0x3ed   :  { %v6722_v46 = vpack.c.bf16 %v11574_v22, %v11563_v39 }
 0x3ee   :  { %7312 = vmatmul.mubr.msk.bf16.gmra.mrb[76].mxu0 %vm5541_vm2, %v11516_v48 }
 0x3ef   :  { %6443 = vmatpush1.bf16.msra.mxu0 %v12638_v45  ;;  %6311 = vmatpush1.bf16.msra.mxu1 %v12697_v11  ;;  %v11624_v11 = vld [vmem:[%s12150_s2] ss:$12 sps:$4 sm:$0xff]  }
 0x3f0   :  { %6444 = vmatprep.subr.bf16.mxu0 %v12640_v26  ;;  %6312 = vmatprep.subr.bf16.mxu1 %v11397_v57  ;;  %v5598_v10 = vpop.f32.mrb[36].mxu0 }
 0x3f1   :  { %v11594_v19 = vadd.f32 %v11467_v35, %v5598_v10  ;;  %v5600_v51 = vpop.f32.mrb[37].mxu0  ;;  %6462 = vmatprep.mubr.bf16.mxu0 %v11526_v1 }
 0x3f2   :  { %v11598_v14 = vadd.f32 %v11476_v18, %v5600_v51  ;;  %v5602_v47 = vpop.f32.mrb[38].mxu0 }
 0x3f3   :  { %6445 = vmatpush1.bf16.msra.mxu0 %v12643_v49  ;;  %6313 = vmatpush1.bf16.msra.mxu1 %v11358_v55  ;;  %v11603_v45 = vadd.f32 %v11480_v53, %v5602_v47  ;;  %v5604_v36 = vpop.f32.mrb[39].mxu0  ;;  %v12699_v49 = vld [vmem:[#allocation31_spill] sm:$0xff]  ;;  %v12701_v53 = vld [vmem:[#allocation45_spill] sm:$0xff]  ;;  %v12702_v47 = vld [vmem:[#allocation20_spill] sm:$0xff] }
 0x3f4   :  { %6446 = vmatprep.subr.bf16.mxu0 %v12616_v6  ;;  %6314 = vmatprep.subr.bf16.mxu1 %v12698_v44  ;;  %v11608_v35 = vadd.f32 %v11483_v33, %v5604_v36 }
 0x3f7   :  { %6447 = vmatpush1.bf16.msra.mxu0 %v12699_v49  ;;  %6315 = vmatpush1.bf16.msra.mxu1 %v12700_v60  ;;  %v12703_v49 = vld [vmem:[#allocation8_spill] sm:$0xff] }
 0x3f8   :  { %6448 = vmatprep.subr.bf16.mxu0 %v12701_v53  ;;  %6357 = vmatprep.subr.bf16.mxu1 %v11424_v43  ;;  %v5608_v6 = vpop.f32.mrb[40].mxu0 }
 0x3f9   :  { %v11619_v16 = vadd.f32 %v11489_v62, %v5608_v6  ;;  %v5610_v33 = vpop.f32.mrb[41].mxu0  ;;  %v11645_v6 = vld [vmem:[%s12150_s2 + $0x1c] ss:$12 sps:$4 sm:$0xff]  }
 0x3fa   :  { %6317 = vmatmul.mubr.bf16.vlgmr.msra.gmra.mrb[80].mxu1 %v11624_v11  ;;  %v11628_v10 = vadd.f32 %v11498_v34, %v5610_v33  ;;  %v5612_v51 = vpop.f32.mrb[42].mxu0  ;;  %v12704_v33 = vld [vmem:[#allocation35_spill] sm:$0xff] }
 0x3fb   :  { %6449 = vmatpush1.bf16.msra.mxu0 %v12702_v47  ;;  %6358 = vmatpush1.bf16.msra.mxu1 %v11393_v8  ;;  %v11633_v36 = vadd.f32 %v11502_v2, %v5612_v51  ;;  %v5614_v62 = vpop.f32.mrb[43].mxu0 }
 0x3fc   :  { %6450 = vmatprep.subr.bf16.mxu0 %v12703_v49  ;;  %6359 = vmatprep.subr.bf16.mxu1 %v11439_v38  ;;  %v11638_v53 = vadd.f32 %v11505_v23, %v5614_v62  ;;  %v11660_v62 = vld [vmem:[%s12150_s2 + $0x18] ss:$12 sps:$4 sm:$0xff]  }
 0x3fd   :  { %6326 = vmatprep.mubr.bf16.mxu1 %v11645_v6 }
 0x3ff   :  { %6451 = vmatpush1.bf16.msra.mxu0 %v12636_v7  ;;  %6360 = vmatpush1.bf16.msra.mxu1 %v11408_v21 }
 0x400   :  { %6452 = vmatprep.subr.bf16.mxu0 %v12704_v33  ;;  %6576 = vmatprep.subr.bf16.mxu1 %v10871_v32  ;;  %v5618_v23 = vpop.f32.mrb[44].mxu0 }
 0x401   :  { %v11655_v51 = vadd.f32 %v11511_v5, %v5618_v23  ;;  %v5620_v47 = vpop.f32.mrb[45].mxu0  ;;  %v11673_v5 = vld [vmem:[%s12150_s2 + $0x34] ss:$12 sps:$4 sm:$0xff]  }
 0x402   :  { %6327 = vmatmul.mubr.bf16.gmra.mrb[84].mxu1 %v11660_v62  ;;  %v11664_v7 = vadd.f32 %v11520_v27, %v5620_v47  ;;  %v5622_v49 = vpop.f32.mrb[46].mxu0  ;;  %v12705_v47 = vld [vmem:[#allocation49_spill] sm:$0xff] }
 0x403   :  { %6453 = vmatpush1.bf16.msra.mxu0 %v12640_v26  ;;  %v11668_v33 = vadd.f32 %v11529_v31, %v5622_v49  ;;  %v5624_v2 = vpop.f32.mrb[47].mxu0  ;;  %6336 = vmatprep.mubr.bf16.mxu1 %v11673_v5  ;;  %v11689_v31 = vld [vmem:[%s12150_s2 + $0x30] ss:$12 sps:$4 sm:$0xff]   ;;  %v12706_v49 = vld [vmem:[#allocation51_spill] sm:$0xff] }
 0x404   :  { %6454 = vmatprep.subr.bf16.mxu0 %v10871_v32  ;;  %v11678_v23 = vadd.f32 %v11532_v15, %v5624_v2  ;;  %v11696_v15 = vld [vmem:[%s12150_s2 + $0x4c] ss:$12 sps:$4 sm:$0xff]   ;;  %v11705_v2 = vld [vmem:[%s12150_s2 + $0x48] ss:$12 sps:$4 sm:$0xff]  }
 0x407   :  { %6455 = vmatpush1.bf16.msra.mxu0 %v10790_v30 }
 0x408   :  { %6456 = vmatprep.subr.bf16.mxu0 %v10904_v42 }
 0x40a   :  { %6337 = vmatmul.mubr.bf16.gmra.mrb[88].mxu1 %v11689_v31 }
 0x40b   :  { %6457 = vmatpush1.bf16.msra.mxu0 %v10833_v9  ;;  %6346 = vmatprep.mubr.bf16.mxu1 %v11696_v15 }
 0x40c   :  { %6458 = vmatprep.subr.bf16.mxu0 %v10933_v3 }
 0x40f   :  { %6459 = vmatpush1.bf16.msra.mxu0 %v10865_v24 }
 0x410   :  { %6460 = vmatprep.subr.bf16.mxu0 %v12673_v63 }
 0x412   :  { %6347 = vmatmul.mubr.bf16.gmra.mrb[92].mxu1 %v11705_v2 }
 0x413   :  { %6461 = vmatpush1.bf16.msra.mxu0 %v12674_v0  ;;  %6389 = vmatprep.mubr.bf16.mxu1 %v12366_v12 }
 0x414   :  { %6503 = vmatprep.subr.bf16.mxu0 %v12705_v47 }
 0x416   :  { %6463 = vmatmul.mubr.bf16.vlgmr.msra.gmra.mrb[80].mxu0 %v11624_v11 }
 0x417   :  { %6504 = vmatpush1.bf16.msra.mxu0 %v10871_v32  ;;  %6472 = vmatprep.mubr.bf16.mxu0 %v11645_v6 }
 0x418   :  { %6505 = vmatprep.subr.bf16.mxu0 %v12706_v49 }
 0x41a   :  { %7313 = vmatmul.mubr.msk.bf16.vlgmr.msra.gmra.mrb[80].mxu1 %vm5541_vm2, %v11448_v58 }
 0x41b   :  { %6506 = vmatpush1.bf16.msra.mxu0 %v10904_v42  ;;  %6577 = vmatpush1.bf16.msra.mxu1 %v10790_v30 }
 0x41c   :  { %6578 = vmatprep.subr.bf16.mxu1 %v10904_v42  ;;  %6399 = vmatprep.mubr.bf16.mxu1 %v12366_v12 }
 0x41e   :  { %6473 = vmatmul.mubr.bf16.gmra.mrb[84].mxu0 %v11660_v62 }
 0x41f   :  { %6579 = vmatpush1.bf16.msra.mxu1 %v10833_v9  ;;  %6482 = vmatprep.mubr.bf16.mxu0 %v11673_v5 }
 0x420   :  { %6580 = vmatprep.subr.bf16.mxu1 %v10933_v3 }
 0x422   :  { %7314 = vmatmul.mubr.msk.bf16.gmra.mrb[84].mxu1 %vm5541_vm2, %v11472_v37 }
 0x423   :  { %6581 = vmatpush1.bf16.msra.mxu1 %v10865_v24  ;;  %6409 = vmatprep.mubr.bf16.mxu1 %v12366_v12 }
 0x424   :  { %6582 = vmatprep.subr.bf16.mxu1 %v12673_v63 }
 0x426   :  { %6483 = vmatmul.mubr.bf16.gmra.mrb[88].mxu0 %v11689_v31 }
 0x427   :  { %6583 = vmatpush1.bf16.msra.mxu1 %v12674_v0  ;;  %6492 = vmatprep.mubr.bf16.mxu0 %v11696_v15 }
 0x428   :  { %6584 = vmatprep.subr.bf16.mxu1 %v12705_v47 }
 0x42a   :  { %7315 = vmatmul.mubr.msk.bf16.gmra.mrb[88].mxu1 %vm5541_vm2, %v11494_v56 }
 0x42b   :  { %6585 = vmatpush1.bf16.msra.mxu1 %v10871_v32  ;;  %6419 = vmatprep.mubr.bf16.mxu1 %v12366_v12  ;;  %v12708_v32 = vld [vmem:[#allocation46_spill] sm:$0xff] }
 0x42c   :  { %6586 = vmatprep.subr.bf16.mxu1 %v12706_v49 }
 0x42d   :  { %v11739_v30 = vpop.f32.mrb[48].mxu1 }
 0x42e   :  { %6493 = vmatmul.mubr.bf16.gmra.mrb[92].mxu0 %v11705_v2  ;;  %v11742_v9 = vpop.f32.mrb[49].mxu1 }
 0x42f   :  { %6587 = vmatpush1.bf16.msra.mxu1 %v10904_v42  ;;  %v11745_v24 = vpop.f32.mrb[50].mxu1  ;;  %6535 = vmatprep.mubr.bf16.mxu0 %v12366_v12 }
 0x430   :  { %6588 = vmatprep.subr.bf16.mxu1 %v11187_v54  ;;  %v11751_v3 = vpop.f32.mrb[51].mxu1 }
 0x432   :  { %7316 = vmatmul.mubr.msk.bf16.gmra.mrb[92].mxu1 %vm5541_vm2, %v11516_v48 }
 0x433   :  { %6589 = vmatpush1.bf16.msra.mxu1 %v11128_v52  ;;  %6608 = vmatprep.mubr.bf16.mxu1 %v11526_v1  ;;  %v12707_v52 = vld [vmem:[#allocation47_spill] sm:$0xff] }
 0x434   :  { %6590 = vmatprep.subr.bf16.mxu1 %v11208_v41 }
 0x435   :  { %v11760_v42 = vpop.f32.mrb[52].mxu1 }
 0x436   :  { %7317 = vmatmul.mubr.msk.bf16.vlgmr.msra.gmra.mrb[80].mxu0 %vm5541_vm2, %v11448_v58  ;;  %v11764_v0 = vpop.f32.mrb[53].mxu1 }
 0x437   :  { %6591 = vmatpush1.bf16.msra.mxu1 %v11151_v59  ;;  %v11767_v47 = vpop.f32.mrb[54].mxu1  ;;  %6545 = vmatprep.mubr.bf16.mxu0 %v12366_v12 }
 0x438   :  { %6592 = vmatprep.subr.bf16.mxu1 %v11225_v40  ;;  %v11773_v1 = vpop.f32.mrb[55].mxu1 }
 0x43b   :  { %6593 = vmatpush1.bf16.msra.mxu1 %v11179_v29 }
 0x43c   :  { %6594 = vmatprep.subr.bf16.mxu1 %v11238_v4 }
 0x43d   :  { %v11779_v63 = vpop.f32.mrb[56].mxu1 }
 0x43e   :  { %7318 = vmatmul.mubr.msk.bf16.gmra.mrb[84].mxu0 %vm5541_vm2, %v11472_v37  ;;  %v11783_v59 = vpop.f32.mrb[57].mxu1 }
 0x43f   :  { %6595 = vmatpush1.bf16.msra.mxu1 %v11205_v25  ;;  %v11786_v40 = vpop.f32.mrb[58].mxu1  ;;  %6555 = vmatprep.mubr.bf16.mxu0 %v12366_v12 }
 0x440   :  { %6596 = vmatprep.subr.bf16.mxu1 %v12707_v52  ;;  %v11792_v49 = vpop.f32.mrb[59].mxu1 }
 0x443   :  { %6597 = vmatpush1.bf16.msra.mxu1 %v11187_v54 }
 0x444   :  { %6598 = vmatprep.subr.bf16.mxu1 %v12708_v32  ;;  %v12709_v32 = vpack.c.bf16 %v11579_v20, %v11567_v50  ;;  %v12711_v20 = vpack.c.bf16 %v11608_v35, %v11598_v14 }
 0x445   :  { %v11798_v26 = vpop.f32.mrb[60].mxu1 }
 0x446   :  { %7319 = vmatmul.mubr.msk.bf16.gmra.mrb[88].mxu0 %vm5541_vm2, %v11494_v56  ;;  %v11802_v25 = vpop.f32.mrb[61].mxu1 }
 0x447   :  { %6599 = vmatpush1.bf16.msra.mxu1 %v11208_v41  ;;  %v11805_v52 = vpop.f32.mrb[62].mxu1  ;;  %6565 = vmatprep.mubr.bf16.mxu0 %v12366_v12 }
 0x448   :  { %6600 = vmatprep.subr.bf16.mxu1 %v11397_v57  ;;  %v11811_v4 = vpop.f32.mrb[63].mxu1 }
 0x449   :  { %v5953_v29 = vpop.f32.mrb[48].mxu0 }
 0x44a   :  { %v5955_v27 = vpop.f32.mrb[49].mxu0 }
 0x44b   :  { %6601 = vmatpush1.bf16.msra.mxu1 %v11358_v55  ;;  %v5957_v34 = vpop.f32.mrb[50].mxu0 }
 0x44c   :  { %6602 = vmatprep.subr.bf16.mxu1 %v12698_v44  ;;  %v6726_v41 = vpack.c.bf16 %v5957_v34, %v5953_v29  ;;  %v5959_v13 = vpop.f32.mrb[51].mxu0 }
 0x44d   :  { %v6727_v18 = vpack.c.bf16 %v5959_v13, %v5955_v27  ;;  %v12710_v27 = vpack.c.bf16 %v11603_v45, %v11594_v19  ;;  %v12713_v45 = vld [vmem:[#allocation60_spill] sm:$0xff] }
 0x44e   :  { %v11820_v28 = vmax.bf16 %v6726_v41, %v6722_v46  ;;  %7320 = vmatmul.mubr.msk.bf16.gmra.mrb[92].mxu0 %vm5541_vm2, %v11516_v48 }
 0x44f   :  { %v11827_v54 = vmax.bf16 %v6727_v18, %v12709_v32  ;;  %6603 = vmatpush1.bf16.msra.mxu1 %v12700_v60  ;;  %v12714_v60 = vld [vmem:[#allocation22_spill] sm:$0xff] }
 0x450   :  { %6604 = vmatprep.subr.bf16.mxu1 %v11424_v43  ;;  %v12712_v43 = vmax.bf16 %v11419_v17, %v12686_v61  ;;  %v12715_v14 = vmax.bf16 %v12713_v45, %v12714_v60  ;;  %v12716_v17 = vpack.c.bf16 %v11633_v36, %v11619_v16  ;;  %v12718_v16 = vpack.c.bf16 %v11668_v33, %v11655_v51 }
 0x451   :  { %v5963_v55 = vpop.f32.mrb[52].mxu0 }
 0x452   :  { %v5965_v34 = vpop.f32.mrb[53].mxu0 }
 0x453   :  { %6605 = vmatpush1.bf16.msra.mxu1 %v11393_v8  ;;  %v5967_v13 = vpop.f32.mrb[54].mxu0 }
 0x454   :  { %6606 = vmatprep.subr.bf16.mxu1 %v11439_v38  ;;  %v6742_v39 = vpack.c.bf16 %v5967_v13, %v5963_v55  ;;  %v5969_v22 = vpop.f32.mrb[55].mxu0 }
 0x455   :  { %v6743_v46 = vpack.c.bf16 %v5969_v22, %v5965_v34 }
 0x456   :  { %v11836_v50 = vmax.bf16 %v6742_v39, %v12710_v27 }
 0x457   :  { %v11841_v18 = vmax.bf16 %v6743_v46, %v12711_v20  ;;  %6607 = vmatpush1.bf16.msra.mxu1 %v11408_v21  ;;  %v12722_v46 = vpack.c.bf16 %v11767_v47, %v11760_v42  ;;  %v12725_v42 = vpack.c.bf16 %v11792_v49, %v11783_v59 }
 0x458   :  { %6649 = vmatprep.subr.bf16.mxu1 %v12712_v43 }
 0x459   :  { %v5973_v8 = vpop.f32.mrb[56].mxu0 }
 0x45a   :  { %6609 = vmatmul.mubr.bf16.vlgmr.msra.gmra.mrb[96].mxu1 %v11624_v11  ;;  %v5975_v38 = vpop.f32.mrb[57].mxu0  ;;  %v12717_v11 = vpack.c.bf16 %v11638_v53, %v11628_v10  ;;  %v12719_v10 = vpack.c.bf16 %v11678_v23, %v11664_v7 }
 0x45b   :  { %6650 = vmatpush1.bf16.msra.mxu1 %v11397_v57  ;;  %v5977_v19 = vpop.f32.mrb[58].mxu0  ;;  %6618 = vmatprep.mubr.bf16.mxu1 %v11645_v6 }
 0x45c   :  { %6651 = vmatprep.subr.bf16.mxu1 %v12715_v14  ;;  %v6758_v35 = vpack.c.bf16 %v5977_v19, %v5973_v8  ;;  %v5979_v29 = vpop.f32.mrb[59].mxu0 }
 0x45d   :  { %v6759_v21 = vpack.c.bf16 %v5979_v29, %v5975_v38  ;;  %v12724_v38 = vpack.c.bf16 %v11786_v40, %v11779_v63  ;;  %v12727_v40 = vpack.c.bf16 %v11811_v4, %v11802_v25 }
 0x45e   :  { %v11856_v61 = vmax.bf16 %v6758_v35, %v12716_v17 }
 0x45f   :  { %v11861_v32 = vmax.bf16 %v6759_v21, %v12717_v11  ;;  %6652 = vmatpush1.bf16.msra.mxu1 %v12698_v44  ;;  %v12726_v21 = vpack.c.bf16 %v11805_v52, %v11798_v26 }
 0x461   :  { %v5983_v57 = vpop.f32.mrb[60].mxu0 }
 0x462   :  { %6619 = vmatmul.mubr.bf16.gmra.mrb[100].mxu1 %v11660_v62  ;;  %v5985_v6 = vpop.f32.mrb[61].mxu0 }
 0x463   :  { %v5987_v41 = vpop.f32.mrb[62].mxu0  ;;  %6628 = vmatprep.mubr.bf16.mxu1 %v11673_v5 }
 0x464   :  { %v6774_v55 = vpack.c.bf16 %v5987_v41, %v5983_v57  ;;  %v5989_v34 = vpop.f32.mrb[63].mxu0 }
 0x465   :  { %v6775_v13 = vpack.c.bf16 %v5989_v34, %v5985_v6 }
 0x466   :  { %v11869_v36 = vmax.bf16 %v6774_v55, %v12718_v16 }
 0x467   :  { %v11874_v53 = vmax.bf16 %v6775_v13, %v12719_v10 }
 0x46a   :  { %6629 = vmatmul.mubr.bf16.gmra.mrb[104].mxu1 %v11689_v31 }
 0x46b   :  { %6638 = vmatprep.mubr.bf16.mxu1 %v11696_v15 }
 0x472   :  { %6639 = vmatmul.mubr.bf16.gmra.mrb[108].mxu1 %v11705_v2 }
 0x473   :  { %6681 = vmatprep.mubr.bf16.mxu1 %v12366_v12 }
 0x47a   :  { %7321 = vmatmul.mubr.msk.bf16.vlgmr.msra.gmra.mrb[96].mxu1 %vm5541_vm2, %v11448_v58  ;;  %v12720_v58 = vpack.c.bf16 %v11745_v24, %v11739_v30  ;;  %v12723_v24 = vpack.c.bf16 %v11773_v1, %v11764_v0 }
 0x47b   :  { %6691 = vmatprep.mubr.bf16.mxu1 %v12366_v12 }
 0x482   :  { %7322 = vmatmul.mubr.msk.bf16.gmra.mrb[100].mxu1 %vm5541_vm2, %v11472_v37  ;;  %v12721_v37 = vpack.c.bf16 %v11751_v3, %v11742_v9 }
 0x483   :  { %6701 = vmatprep.mubr.bf16.mxu1 %v12366_v12 }
 0x48a   :  { %7323 = vmatmul.mubr.msk.bf16.gmra.mrb[104].mxu1 %vm5541_vm2, %v11494_v56 }
 0x48b   :  { %6711 = vmatprep.mubr.bf16.mxu1 %v12366_v12 }
 0x48d   :  { %v6099_v44 = vpop.f32.mrb[64].mxu1 }
 0x48e   :  { %v6101_v51 = vpop.f32.mrb[65].mxu1 }
 0x48f   :  { %v6103_v62 = vpop.f32.mrb[66].mxu1 }
 0x490   :  { %v6728_v7 = vpack.c.bf16 %v6103_v62, %v6099_v44  ;;  %v6105_v33 = vpop.f32.mrb[67].mxu1 }
 0x491   :  { %v6729_v5 = vpack.c.bf16 %v6105_v33, %v6101_v51 }
 0x492   :  { %v11892_v23 = vmax.bf16 %v6728_v7, %v12720_v58  ;;  %7324 = vmatmul.mubr.msk.bf16.gmra.mrb[108].mxu1 %vm5541_vm2, %v11516_v48 }
 0x493   :  { %v11899_v56 = vmax.bf16 %v6729_v5, %v12721_v37 }
 0x495   :  { %v6109_v12 = vpop.f32.mrb[68].mxu1 }
 0x496   :  { %v6111_v31 = vpop.f32.mrb[69].mxu1 }
 0x497   :  { %v6113_v15 = vpop.f32.mrb[70].mxu1 }
 0x498   :  { %v6744_v2 = vpack.c.bf16 %v6113_v15, %v6109_v12  ;;  %v6115_v39 = vpop.f32.mrb[71].mxu1 }
 0x499   :  { %v6745_v22 = vpack.c.bf16 %v6115_v39, %v6111_v31 }
 0x49a   :  { %v11904_v30 = vmax.bf16 %v6744_v2, %v12722_v46 }
 0x49b   :  { %v11909_v48 = vmax.bf16 %v6745_v22, %v12723_v24 }
 0x49d   :  { %v6119_v27 = vpop.f32.mrb[72].mxu1 }
 0x49e   :  { %v6121_v9 = vpop.f32.mrb[73].mxu1 }
 0x49f   :  { %v6123_v3 = vpop.f32.mrb[74].mxu1 }
 0x4a0   :  { %v6760_v20 = vpack.c.bf16 %v6123_v3, %v6119_v27  ;;  %v6125_v43 = vpop.f32.mrb[75].mxu1 }
 0x4a1   :  { %v6761_v8 = vpack.c.bf16 %v6125_v43, %v6121_v9 }
 0x4a2   :  { %v11914_v19 = vmax.bf16 %v6760_v20, %v12724_v38 }
 0x4a3   :  { %v11919_v47 = vmax.bf16 %v6761_v8, %v12725_v42 }
 0x4a5   :  { %v6129_v45 = vpop.f32.mrb[76].mxu1 }
 0x4a6   :  { %v6131_v0 = vpop.f32.mrb[77].mxu1 }
 0x4a7   :  { %v6133_v1 = vpop.f32.mrb[78].mxu1 }
 0x4a8   :  { %v6776_v60 = vpack.c.bf16 %v6133_v1, %v6129_v45  ;;  %v6135_v14 = vpop.f32.mrb[79].mxu1 }
 0x4a9   :  { %v6777_v35 = vpack.c.bf16 %v6135_v14, %v6131_v0  ;;  %v6245_v29 = vpop.f32.mrb[64].mxu0  ;;  %v7544_v0 = vld [vmem:[%s12151_s3 + $0x4] ss:$8 sps:$4 sm:$0xff]  }
 0x4aa   :  { %v11924_v17 = vmax.bf16 %v6776_v60, %v12726_v21  ;;  %v6247_v63 = vpop.f32.mrb[65].mxu0  ;;  %6962 = vmatprep.mubr.bf16.mxu0 %v7544_v0 }
 0x4ab   :  { %v11929_v11 = vmax.bf16 %v6777_v35, %v12727_v40  ;;  %v6249_v49 = vpop.f32.mrb[66].mxu0 }
 0x4ac   :  { %v6730_v59 = vpack.c.bf16 %v6249_v49, %v6245_v29  ;;  %v6251_v57 = vpop.f32.mrb[67].mxu0 }
 0x4ad   :  { %v6731_v6 = vpack.c.bf16 %v6251_v57, %v6247_v63 }
 0x4b1   :  { %v6255_v41 = vpop.f32.mrb[68].mxu0 }
 0x4b2   :  { %v6257_v55 = vpop.f32.mrb[69].mxu0 }
 0x4b3   :  { %v6259_v34 = vpop.f32.mrb[70].mxu0 }
 0x4b4   :  { %v6746_v13 = vpack.c.bf16 %v6259_v34, %v6255_v41  ;;  %v6261_v16 = vpop.f32.mrb[71].mxu0 }
 0x4b5   :  { %v6747_v10 = vpack.c.bf16 %v6261_v16, %v6257_v55 }
 0x4b9   :  { %v11931_v44 = vpop.f32.mrb[72].mxu0 }
 0x4ba   :  { %v11933_v26 = vpop.f32.mrb[73].mxu0 }
 0x4bb   :  { %v11935_v52 = vpop.f32.mrb[74].mxu0 }
 0x4bc   :  { %v6762_v4 = vpack.c.bf16 %v11935_v52, %v11931_v44  ;;  %v11939_v25 = vpop.f32.mrb[75].mxu0  ;;  %v6846_v44 = vld [vmem:[%s12152_s4 + $0x20] sm:$0xff] }
 0x4bd   :  { %v6763_v51 = vpack.c.bf16 %v11939_v25, %v11933_v26  ;;  %v6847_v26 = vld [vmem:[%s12152_s4 + $0x28] sm:$0xff] }
 0x4c1   :  { %v11943_v62 = vpop.f32.mrb[76].mxu0 }
 0x4c2   :  { %v11945_v7 = vpop.f32.mrb[77].mxu0 }
 0x4c3   :  { %v11947_v33 = vpop.f32.mrb[78].mxu0 }
 0x4c4   :  { %v6778_v5 = vpack.c.bf16 %v11947_v33, %v11943_v62  ;;  %v11951_v58 = vpop.f32.mrb[79].mxu0  ;;  %v7008_v62 = vld [vmem:[%s12153_s6] sm:$0x7] }
 0x4ed   :  { %v11955_v12 = vpop.f32.mrb[80].mxu1 }
 0x4ee   :  { %v11957_v31 = vpop.f32.mrb[81].mxu1 }
 0x4ef   :  { %v11959_v15 = vpop.f32.mrb[82].mxu1 }
 0x4f0   :  { %v11963_v39 = vpop.f32.mrb[83].mxu1 }
 0x4f5   :  { %v11967_v46 = vpop.f32.mrb[84].mxu1 }
 0x4f6   :  { %v11969_v24 = vpop.f32.mrb[85].mxu1 }
 0x4f7   :  { %v11971_v27 = vpop.f32.mrb[86].mxu1 }
 0x4f8   :  { %v11975_v3 = vpop.f32.mrb[87].mxu1 }
 0x4fd   :  { %v11979_v43 = vpop.f32.mrb[88].mxu1 }
 0x4fe   :  { %v11981_v8 = vpop.f32.mrb[89].mxu1 }
 0x4ff   :  { %v11983_v38 = vpop.f32.mrb[90].mxu1 }
 0x500   :  { %v11987_v45 = vpop.f32.mrb[91].mxu1 }
 0x505   :  { %v11994_v60 = vpop.f32.mrb[92].mxu1 }
 0x506   :  { %v11996_v14 = vpop.f32.mrb[93].mxu1 }
 0x507   :  { %v11998_v35 = vpop.f32.mrb[94].mxu1 }
 0x508   :  { %v12002_v21 = vpop.f32.mrb[95].mxu1 }
 0x509   :  { %v6537_v40 = vpop.f32.mrb[80].mxu0 }
 0x50a   :  { %v6539_v49 = vpop.f32.mrb[81].mxu0 }
 0x50b   :  { %v6541_v57 = vpop.f32.mrb[82].mxu0 }
 0x50c   :  { %v6734_v41 = vpack.c.bf16 %v6541_v57, %v6537_v40  ;;  %v6543_v55 = vpop.f32.mrb[83].mxu0 }
 0x50d   :  { %v6735_v34 = vpack.c.bf16 %v6543_v55, %v6539_v49  ;;  %v6842_v55 = vld [vmem:[%s12152_s4] sm:$0xff] }
 0x50e   :  { %v12006_v16 = vmax.bf16 %v6734_v41, %v6730_v59  ;;  %6852 = vperm.xlu0 %7522, %v6842_v55  }
 0x50f   :  { %v12008_v0 = vmax.bf16 %v6735_v34, %v6731_v6 }
 0x510   :  { %v6818_v1 = vmax.bf16 %v12006_v16, %v11820_v28 }
 0x511   :  { %v6819_v29 = vmax.bf16 %v12008_v0, %v11827_v54  ;;  %v6547_v42 = vpop.f32.mrb[84].mxu0  ;;  %v7547_v54 = vld [vmem:[%s12151_s3 + $0x14] ss:$8 sps:$4 sm:$0xff]  }
 0x512   :  { %v6549_v20 = vpop.f32.mrb[85].mxu0 }
 0x513   :  { %v6551_v9 = vpop.f32.mrb[86].mxu0 }
 0x514   :  { %v6750_v63 = vpack.c.bf16 %v6551_v9, %v6547_v42  ;;  %v6553_v22 = vpop.f32.mrb[87].mxu0 }
 0x515   :  { %v6751_v2 = vpack.c.bf16 %v6553_v22, %v6549_v20  ;;  %v6845_v20 = vld [vmem:[%s12152_s4 + $0x18] sm:$0xff] }
 0x516   :  { %v12014_v37 = vmax.bf16 %v6750_v63, %v6746_v13  ;;  %v6844_v13 = vld [vmem:[%s12152_s4 + $0x10] sm:$0xff] }
 0x517   :  { %v12016_v40 = vmax.bf16 %v6751_v2, %v6747_v10  ;;  %v6843_v2 = vld [vmem:[%s12152_s4 + $0x8] sm:$0xff]  ;;  %6862 = vperm.xlu1 %7523, %v6844_v13  }
 0x518   :  { %v6822_v59 = vmax.bf16 %v12014_v37, %v11836_v50  ;;  %6857 = vperm.xlu0 %7522, %v6843_v2  }
 0x519   :  { %v6823_v6 = vmax.bf16 %v12016_v40, %v11841_v18  ;;  %v6557_v49 = vpop.f32.mrb[88].mxu0  ;;  %v7545_v18 = vld [vmem:[%s12151_s3 + $0x10] ss:$8 sps:$4 sm:$0xff]  }
 0x51a   :  { %v6559_v57 = vpop.f32.mrb[89].mxu0 }
 0x51b   :  { %v6561_v41 = vpop.f32.mrb[90].mxu0  ;;  %6867 = vperm.xlu1 %7523, %v6845_v20  }
 0x51c   :  { %v6766_v9 = vpack.c.bf16 %v6561_v41, %v6557_v49  ;;  %v6563_v42 = vpop.f32.mrb[91].mxu0  ;;  %6872 = vperm.xlu0 %7522, %v6846_v44   ;;  %v6848_v41 = vld [vmem:[%s12152_s4 + $0x30] sm:$0xff]  ;;  %v12730_v44 = vpack.c.bf16 %v11963_v39, %v11957_v31 }
 0x51d   :  { %v6767_v10 = vpack.c.bf16 %v6563_v42, %v6559_v57  ;;  %v12728_v42 = vpack.c.bf16 %v11951_v58, %v11945_v7  ;;  %v12729_v58 = vpack.c.bf16 %v11959_v15, %v11955_v12  ;;  %v12731_v15 = vpack.c.bf16 %v11971_v27, %v11967_v46 }
 0x51e   :  { %v12034_v22 = vmax.bf16 %v6766_v9, %v6762_v4  ;;  %v6849_v9 = vld [vmem:[%s12152_s4 + $0x38] sm:$0xff]  ;;  %v12733_v27 = vpack.c.bf16 %v11983_v38, %v11979_v43  ;;  %v12735_v43 = vpack.c.bf16 %v11998_v35, %v11994_v60 }
 0x51f   :  { %v12042_v63 = vmax.bf16 %v6767_v10, %v6763_v51  ;;  %6877 = vperm.xlu1 %7523, %v6847_v26   ;;  %v7551_v60 = vld [vmem:[%s12151_s3 + $0x30] ss:$8 sps:$4 sm:$0xff]  }
 0x520   :  { %v6826_v34 = vmax.bf16 %v12034_v22, %v11856_v61  ;;  %6882 = vperm.xlu0 %7522, %v6848_v41  }
 0x521   :  { %v6827_v49 = vmax.bf16 %v12042_v63, %v11861_v32  ;;  %v6567_v57 = vpop.f32.mrb[92].mxu0  ;;  %v7550_v32 = vld [vmem:[%s12151_s3 + $0x24] ss:$8 sps:$4 sm:$0xff]  }
 0x522   :  { %v6569_v52 = vpop.f32.mrb[93].mxu0 }
 0x523   :  { %v6571_v4 = vpop.f32.mrb[94].mxu0  ;;  %6887 = vperm.xlu1 %7523, %v6849_v9  }
 0x524   :  { %v6782_v25 = vpack.c.bf16 %v6571_v4, %v6567_v57  ;;  %v6573_v51 = vpop.f32.mrb[95].mxu0  ;;  %7011 = vperm.xlu0 %7522, %v7008_v62  }
 0x525   :  { %v6783_v61 = vpack.c.bf16 %v6573_v51, %v6569_v52 }
 0x526   :  { %v6814_v55 = vmax.bf16 %v6782_v25, %v6778_v5 }
 0x527   :  { %v12066_v13 = vmax.bf16 %v6783_v61, %v12728_v42 }
 0x528   :  { %v6830_v10 = vmax.bf16 %v6814_v55, %v11869_v36 }
 0x529   :  { %v6831_v2 = vmax.bf16 %v12066_v13, %v11874_v53 }
 0x54d   :  { %v6683_v33 = vpop.f32.mrb[96].mxu1 }
 0x54e   :  { %v6685_v5 = vpop.f32.mrb[97].mxu1 }
 0x54f   :  { %v6687_v22 = vpop.f32.mrb[98].mxu1 }
 0x550   :  { %v6736_v20 = vpack.c.bf16 %v6687_v22, %v6683_v33  ;;  %v6689_v57 = vpop.f32.mrb[99].mxu1 }
 0x551   :  { %v6737_v7 = vpack.c.bf16 %v6689_v57, %v6685_v5 }
 0x552   :  { %v6804_v36 = vmax.bf16 %v6736_v20, %v12729_v58 }
 0x553   :  { %v6805_v53 = vmax.bf16 %v6737_v7, %v12730_v44 }
 0x554   :  { %v6820_v52 = vmax.bf16 %v6804_v36, %v11892_v23  ;;  %v12732_v23 = vpack.c.bf16 %v11975_v3, %v11969_v24 }
 0x555   :  { %v6693_v26 = vpop.f32.mrb[100].mxu1  ;;  %v6821_v4 = vmax.bf16 %v6805_v53, %v11899_v56 }
 0x556   :  { %v6695_v25 = vpop.f32.mrb[101].mxu1  ;;  %7334 = vmatprep.subr.bf16.mxu0 %v6820_v52 }
 0x557   :  { %v6697_v51 = vpop.f32.mrb[102].mxu1  ;;  %7335 = vmatpush3.bf16.msra.mxu0 %v6818_v1 }
 0x558   :  { %v6752_v61 = vpack.c.bf16 %v6697_v51, %v6693_v26  ;;  %v6699_v41 = vpop.f32.mrb[103].mxu1 }
 0x559   :  { %v6753_v12 = vpack.c.bf16 %v6699_v41, %v6695_v25 }
 0x55a   :  { %v6808_v31 = vmax.bf16 %v6752_v61, %v12731_v15 }
 0x55b   :  { %v6809_v39 = vmax.bf16 %v6753_v12, %v12732_v23 }
 0x55c   :  { %v6824_v56 = vmax.bf16 %v6808_v31, %v11904_v30  ;;  %v12734_v30 = vpack.c.bf16 %v11987_v45, %v11981_v8  ;;  %v12736_v8 = vpack.c.bf16 %v12002_v21, %v11996_v14  ;;  %v7575_v14 = vmov 0.0  }
 0x55d   :  { %v6703_v55 = vpop.f32.mrb[104].mxu1  ;;  %v6825_v9 = vmax.bf16 %v6809_v39, %v11909_v48 }
 0x55e   :  { %v6705_v42 = vpop.f32.mrb[105].mxu1  ;;  %7336 = vmatprep.subr.bf16.mxu0 %v6824_v56 }
 0x55f   :  { %v6707_v28 = vpop.f32.mrb[106].mxu1  ;;  %7337 = vmatpush3.bf16.msra.mxu0 %v6822_v59 }
 0x560   :  { %v6768_v1 = vpack.c.bf16 %v6707_v28, %v6703_v55  ;;  %v6709_v16 = vpop.f32.mrb[107].mxu1 }
 0x561   :  { %v6769_v46 = vpack.c.bf16 %v6709_v16, %v6705_v42 }
 0x562   :  { %v6812_v24 = vmax.bf16 %v6768_v1, %v12733_v27 }
 0x563   :  { %v6813_v3 = vmax.bf16 %v6769_v46, %v12734_v30 }
 0x564   :  { %v6828_v48 = vmax.bf16 %v6812_v24, %v11914_v19 }
 0x565   :  { %v6713_v13 = vpop.f32.mrb[108].mxu1  ;;  %v6829_v62 = vmax.bf16 %v6813_v3, %v11919_v47  ;;  %v7542_v47 = vld [vmem:[%s12151_s3] ss:$8 sps:$4 sm:$0xff]  }
 0x566   :  { %v6715_v33 = vpop.f32.mrb[109].mxu1  ;;  %7338 = vmatprep.subr.bf16.mxu0 %v6828_v48 }
 0x567   :  { %v6717_v50 = vpop.f32.mrb[110].mxu1  ;;  %7339 = vmatpush3.bf16.msra.mxu0 %v6826_v34 }
 0x568   :  { %v6784_v37 = vpack.c.bf16 %v6717_v50, %v6713_v13  ;;  %v6719_v59 = vpop.f32.mrb[111].mxu1 }
 0x569   :  { %v6785_v5 = vpack.c.bf16 %v6719_v59, %v6715_v33 }
 0x56a   :  { %v6816_v38 = vmax.bf16 %v6784_v37, %v12735_v43 }
 0x56b   :  { %v6817_v45 = vmax.bf16 %v6785_v5, %v12736_v8  ;;  %v7007_v8 = vld [vmem:[%s12154_s5] sm:$0x3] }
 0x56c   :  { %v6832_v19 = vmax.bf16 %v6816_v38, %v11924_v17  ;;  %v7548_v17 = vld [vmem:[%s12151_s3 + $0x20] ss:$8 sps:$4 sm:$0xff]  }
 0x56d   :  { %v6833_v22 = vmax.bf16 %v6817_v45, %v11929_v11  ;;  %v7553_v11 = vld [vmem:[%s12151_s3 + $0x34] ss:$8 sps:$4 sm:$0xff]  }
 0x56e   :  { %7340 = vmatprep.subr.bf16.mxu0 %v6832_v19 }
 0x56f   :  { %7341 = vmatpush3.bf16.msra.mxu0 %v6830_v10 }
 0x570   :  { %7342 = vmatprep.subr.bf16.mxu0 %v6821_v4 }
 0x573   :  { %7343 = vmatpush3.bf16.msra.mxu0 %v6819_v29 }
 0x574   :  { %7344 = vmatprep.subr.bf16.mxu0 %v6825_v9 }
 0x577   :  { %7345 = vmatpush3.bf16.msra.mxu0 %v6823_v6 }
 0x578   :  { %7346 = vmatprep.subr.bf16.mxu0 %v6829_v62 }
 0x57b   :  { %7347 = vmatpush3.bf16.msra.mxu0 %v6827_v49 }
 0x57c   :  { %7348 = vmatprep.subr.bf16.mxu0 %v6833_v22 }
 0x57f   :  { %7349 = vmatpush3.bf16.msra.mxu0 %v6831_v2 }
 0x580   :  { %7379 = vmatprep.subr.bf16.mxu0 %v7575_v14 }
 0x582   :  { %6963 = vmatmul.mubr.bf16.vlgmr.msra.gmra.mrb[96].mxu0 %v7542_v47 }
 0x583   :  { %6970 = vmatprep.mubr.bf16.mxu0 %v7547_v54 }
 0x58a   :  { %6971 = vmatmul.mubr.bf16.gmra.mrb[100].mxu0 %v7545_v18 }
 0x58b   :  { %6978 = vmatprep.mubr.bf16.mxu0 %v7550_v32 }
 0x58d   :  { %v6853_v35 = vpop.permute.xlu0 %6852 }
 0x592   :  { %6979 = vmatmul.mubr.bf16.gmra.mrb[104].mxu0 %v7548_v17 }
 0x593   :  { %6986 = vmatprep.mubr.bf16.mxu0 %v7553_v11 }
 0x596   :  { %v6863_v2 = vpop.permute.xlu1 %6862 }
 0x597   :  { %v6858_v49 = vpop.permute.xlu0 %6857 }
 0x59a   :  { %6987 = vmatmul.mubr.bf16.gmra.mrb[108].mxu0 %v7551_v60  ;;  %v6868_v25 = vpop.permute.xlu1 %6867 }
 0x59b   :  { %7387 = vmatprep.mubr.msk.bf16.mxu0 %vm7576_vm3, %v7575_v14  ;;  %v6873_v56 = vpop.permute.xlu0 %6872 }
 0x59e   :  { %v6878_v28 = vpop.permute.xlu1 %6877 }
 0x59f   :  { %v6883_v13 = vpop.permute.xlu0 %6882 }
 0x5a2   :  { %v6888_v37 = vpop.permute.xlu1 %6887 }
 0x5a3   :  { %v7012_v45 = vpop.permute.xlu0 %7011 }
 0x655   :  { %v7350_v29 = vpop.f32.mrb[96].mxu0 }
 0x656   :  { %v7351_v21 = vpop.f32.mrb[97].mxu0 }
 0x657   :  { %v7352_v0 = vadd.f32 %v7351_v21, %v7350_v29  ;;  %v7353_v40 = vpop.f32.mrb[98].mxu0 }
 0x658   :  { %v7354_v6 = vpop.f32.mrb[99].mxu0 }
 0x659   :  { %v6965_v63 = vadd.f32 %v7352_v0, %v6853_v35  ;;  %v7355_v34 = vadd.f32 %v7354_v6, %v7353_v40 }
 0x65b   :  { %v6968_v10 = vadd.f32 %v7355_v34, %v6858_v49  ;;  %v6995_v20 = vmax.f32 %v6965_v63, 0.0 }
 0x65d   :  { %v6996_v57 = vmax.f32 %v6968_v10, 0.0  ;;  %v7356_v7 = vpop.f32.mrb[100].mxu0 }
 0x65e   :  { %v7357_v58 = vpop.f32.mrb[101].mxu0 }
 0x65f   :  { %v7003_v36 = vpack.c.bf16 %v6996_v57, %v6995_v20  ;;  %v7358_v44 = vadd.f32 %v7357_v58, %v7356_v7  ;;  %v7359_v53 = vpop.f32.mrb[102].mxu0 }
 0x660   :  { %v7360_v52 = vpop.f32.mrb[103].mxu0 }
 0x661   :  { %v6973_v26 = vadd.f32 %v7358_v44, %v6863_v2  ;;  %v7361_v4 = vadd.f32 %v7360_v52, %v7359_v53  ;;  %7380 = vmatpush3.bf16.msra.mxu0 %v7003_v36 }
 0x662   :  { %7381 = vmatprep.subr.bf16.mxu0 %v7575_v14 }
 0x663   :  { %v6976_v51 = vadd.f32 %v7361_v4, %v6868_v25  ;;  %v6997_v61 = vmax.f32 %v6973_v26, 0.0 }
 0x665   :  { %v6998_v41 = vmax.f32 %v6976_v51, 0.0  ;;  %v7362_v12 = vpop.f32.mrb[104].mxu0 }
 0x666   :  { %v7363_v15 = vpop.f32.mrb[105].mxu0 }
 0x667   :  { %v7004_v31 = vpack.c.bf16 %v6998_v41, %v6997_v61  ;;  %v7364_v23 = vadd.f32 %v7363_v15, %v7362_v12  ;;  %v7365_v39 = vpop.f32.mrb[106].mxu0 }
 0x668   :  { %v7366_v55 = vpop.f32.mrb[107].mxu0 }
 0x669   :  { %v6981_v9 = vadd.f32 %v7364_v23, %v6873_v56  ;;  %v7367_v42 = vadd.f32 %v7366_v55, %v7365_v39  ;;  %7382 = vmatpush3.bf16.msra.mxu0 %v7004_v31 }
 0x66a   :  { %7383 = vmatprep.subr.bf16.mxu0 %v7575_v14 }
 0x66b   :  { %v6984_v1 = vadd.f32 %v7367_v42, %v6878_v28  ;;  %v6999_v16 = vmax.f32 %v6981_v9, 0.0 }
 0x66d   :  { %v7000_v46 = vmax.f32 %v6984_v1, 0.0  ;;  %v7368_v27 = vpop.f32.mrb[108].mxu0 }
 0x66e   :  { %v7369_v24 = vpop.f32.mrb[109].mxu0 }
 0x66f   :  { %v7005_v30 = vpack.c.bf16 %v7000_v46, %v6999_v16  ;;  %v7370_v3 = vadd.f32 %v7369_v24, %v7368_v27  ;;  %v7371_v48 = vpop.f32.mrb[110].mxu0 }
 0x670   :  { %v7372_v62 = vpop.f32.mrb[111].mxu0 }
 0x671   :  { %v6989_v33 = vadd.f32 %v7370_v3, %v6883_v13  ;;  %v7373_v50 = vadd.f32 %v7372_v62, %v7371_v48  ;;  %7384 = vmatpush3.bf16.msra.mxu0 %v7005_v30 }
 0x672   :  { %7385 = vmatprep.subr.bf16.mxu0 %v7575_v14 }
 0x673   :  { %v6992_v59 = vadd.f32 %v7373_v50, %v6888_v37  ;;  %v7001_v5 = vmax.f32 %v6989_v33, 0.0 }
 0x675   :  { %v7002_v43 = vmax.f32 %v6992_v59, 0.0 }
 0x677   :  { %v7006_v38 = vpack.c.bf16 %v7002_v43, %v7001_v5 }
 0x679   :  { %7386 = vmatpush3.bf16.msra.mxu0 %v7006_v38 }
 0x67c   :  { %7388 = vmatmul.mubr.msk.bf16.vlgmr.msra.gmra.mrb[112].mxu0 %vm7014_vm4, %v7007_v8 }
 0x74f   :  { %v7052_v19 = vpop.f32.mrb[112].mxu0 }
 0x750   :  { %v7053_v22 = vadd.f32 %v7052_v19, %v7012_v45  ;;  %v7389_v47 = vpop.f32.mrb[113].mxu0 }
 0x751   :  { %v7055_v54 = vpop.f32.mrb[114].mxu0 }
 0x752   :  { %7058 = vst [vmem:[%s12155_s7] sm:$0x7] %v7053_v22  ;;  %v7390_v18 = vpop.f32.mrb[115].mxu0 }

</bundles_post_ra>
